<compile_context>
chip_gen: v7x
topology: tpu7x:2x2x1
jax: 0.10.0
libtpu: 0.0.40
codegen_flags: <defaults>
</compile_context>

<pallas_src>
import functools
import math

import jax
import jax.numpy as jnp
from jax.experimental import pallas as pl
from jax.experimental.pallas import tpu as pltpu

NUM_STACK_FRAME = 4
_LANE = 128
_SUBLANE = 16   # bf16 packing granularity for second-minor dims


def _round_up(x, m):
    return (x + m - 1) // m * m


# ---------------------------------------------------------------------------
# Kernel 1: fused conv1 + conv2 + conv3  (one sample per grid step)
# ---------------------------------------------------------------------------
def _conv_stack_kernel(p1_ref, w1_ref, b1_ref, w2_ref, b2_ref, w3_ref, b3_ref,
                       out_ref, c1_ref, c2_ref):
    # --- conv1: one matmul.  p1 rows are width-pairs (oy*10 + p); the block-diagonal
    #     w1 emits channels (r*32 + c), i.e. the (20, 10, 64) layout conv2 reads.
    c1 = jnp.dot(p1_ref[...], w1_ref[...], preferred_element_type=jnp.float32)
    c1 = jnp.maximum(c1 + b1_ref[...], 0.0)
    c1_ref[...] = c1.astype(jnp.bfloat16)                       # (200, 64)

    # --- conv2: 4x4 stride 2, 32 -> 64, out 9x9.  Per output row: 8 tap slices
    #     (contiguous VMEM loads), lane-concat to (9, 512), one matmul.
    for oy in range(9):
        pieces = []
        for i in range(4):
            base = (2 * oy + i) * 10
            for j in range(2):
                pieces.append(c1_ref[pl.ds(base + j, 9), :])    # (9, 64)
        patches = jnp.concatenate(pieces, axis=-1)              # (9, 512)
        r = jnp.dot(patches, w2_ref[...], preferred_element_type=jnp.float32)
        r = jnp.maximum(r + b2_ref[...], 0.0)
        c2_ref[pl.ds(9 * oy, 9), :] = r.astype(jnp.bfloat16)    # rows oy*9 .. +9

    # --- conv3: 3x3 stride 1, 64 -> 64, out 7x7.  Same scheme (9 taps per row).
    for oy in range(7):
        pieces = []
        for i in range(3):
            base = (oy + i) * 9
            for j in range(3):
                pieces.append(c2_ref[pl.ds(base + j, 7), :])    # (7, 64)
        patches = jnp.concatenate(pieces, axis=-1)              # (7, 576)
        r = jnp.dot(patches, w3_ref[...], preferred_element_type=jnp.float32)
        r = jnp.maximum(r + b3_ref[...], 0.0)
        out_ref[pl.ds(7 * oy, 7), :] = r.astype(jnp.bfloat16)   # rows oy*7 .. +7


def conv_stack(p1, kp):
    """p1: (B, 200, 512) bf16 conv1 patches -> (B, 49, 64) bf16 conv-stack output."""
    B = p1.shape[0]
    return pl.pallas_call(
        _conv_stack_kernel,
        out_shape=jax.ShapeDtypeStruct((B, 49, 64), jnp.bfloat16),
        grid=(B,),
        in_specs=[
            pl.BlockSpec((None, 200, 512), lambda b: (b, 0, 0)),
            pl.BlockSpec((512, 64), lambda b: (0, 0)),   # weights: constant index_map
            pl.BlockSpec((1, 64), lambda b: (0, 0)),     #  -> VMEM-resident across B
            pl.BlockSpec((512, 64), lambda b: (0, 0)),
            pl.BlockSpec((1, 64), lambda b: (0, 0)),
            pl.BlockSpec((576, 64), lambda b: (0, 0)),
            pl.BlockSpec((1, 64), lambda b: (0, 0)),
        ],
        out_specs=pl.BlockSpec((None, 49, 64), lambda b: (b, 0, 0)),
        scratch_shapes=[pltpu.VMEM((200, 64), jnp.bfloat16),   # conv1 out (paired W)
                        pltpu.VMEM((81, 64), jnp.bfloat16)],   # conv2 out (9x9 rows)
        compiler_params=pltpu.CompilerParams(
            dimension_semantics=("parallel",),
            vmem_limit_bytes=32 * 1024 * 1024),
    )(p1, kp["w1"], kp["b1"], kp["w2"], kp["b2"], kp["w3"], kp["b3"])


# ---------------------------------------------------------------------------
# Kernel 2: fused fc(3136->512)+ReLU and critic/actor heads (one 128-wide slab)
# ---------------------------------------------------------------------------
def _fc_heads_kernel(x_ref, w1_ref, b1_ref, w2_ref, b2_ref, o_ref):
    h = jnp.dot(x_ref[...], w1_ref[...], preferred_element_type=jnp.float32)
    h = jnp.maximum(h + b1_ref[...], 0.0)
    o = jnp.dot(h.astype(jnp.bfloat16), w2_ref[...],
                preferred_element_type=jnp.float32)
    o_ref[...] = o + b2_ref[...]


def fc_heads(x, fc_w, fc_b, head_w, head_b, *, tile_m=128):
    M, K = x.shape
    H = fc_w.shape[1]
    N = head_w.shape[1]
    # Modest tile (VMEM / v5e friendly) that still yields >= 2 grid steps when M >= 32.
    tm = min(tile_m, max(_SUBLANE, _round_up(pl.cdiv(M, 2), _SUBLANE)))
    grid = (pl.cdiv(M, tm),)
    return pl.pallas_call(
        _fc_heads_kernel,
        out_shape=jax.ShapeDtypeStruct((M, N), jnp.float32),
        grid=grid,
        in_specs=[
            pl.BlockSpec((tm, K), lambda i: (i, 0)),
            pl.BlockSpec((K, H), lambda i: (0, 0)),   # fc weight VMEM-resident
            pl.BlockSpec((1, H), lambda i: (0, 0)),
            pl.BlockSpec((H, N), lambda i: (0, 0)),
            pl.BlockSpec((1, N), lambda i: (0, 0)),
        ],
        out_specs=pl.BlockSpec((tm, N), lambda i: (i, 0)),
        compiler_params=pltpu.CompilerParams(
            dimension_semantics=("parallel",),
            vmem_limit_bytes=32 * 1024 * 1024),
    )(x, fc_w, fc_b, head_w, head_b)


# ---------------------------------------------------------------------------
# Parameter preparation (PyTorch layout -> kernel-ready operands, done once)
# ---------------------------------------------------------------------------
def prepare_params(params, n_out):
    f32, bf16 = jnp.float32, jnp.bfloat16

    def conv_wmat(w):
        cout, cin, kh, kw = w.shape
        # (Cout,Cin,kh,kw) -> (kh,kw,Cin,Cout) -> (kh*kw*Cin, Cout): NHWC im2col order.
        return jnp.transpose(w, (2, 3, 1, 0)).reshape(kh * kw * cin, cout)

    # conv1: fold 1/255, then block-diagonal expand (512, 64) so the matmul output is
    # already in the width-paired (p, r*32+c) layout used by the in-kernel conv2 taps.
    w1s = conv_wmat(params["conv1_w"]) * (1.0 / 255.0)           # (256, 32)
    w1p = jnp.zeros((512, 64), f32)
    w1p = w1p.at[:256, :32].set(w1s).at[256:, 32:].set(w1s)
    b1p = jnp.tile(params["conv1_b"], 2)                         # (64,)

    w2 = conv_wmat(params["conv2_w"])                            # (512, 64)
    w3 = conv_wmat(params["conv3_w"])                            # (576, 64)

    # fc weight: torch flattens NCHW (c*49 + y*7 + x); permute once to the NHWC
    # flatten order ((y*7+x)*64 + c) produced by the fused conv kernel.
    fc_w = params["fc_w"].reshape(512, 64, 7, 7)
    fc_w = jnp.transpose(fc_w, (2, 3, 1, 0)).reshape(7 * 7 * 64, 512)

    # critic + actor fused into one lane-dense 128-wide head slab.
    n_heads = 1 + n_out
    n_slab = _round_up(n_heads, _LANE)
    head_w = jnp.concatenate([params["critic_w"], params["actor_w"]], axis=0).T
    head_b = jnp.concatenate([params["critic_b"], params["actor_b"]], axis=0)
    head_w = jnp.pad(head_w, ((0, 0), (0, n_slab - n_heads)))
    head_b = jnp.pad(head_b, ((0, n_slab - n_heads),))

    return {
        "w1": w1p.astype(bf16), "b1": b1p.reshape(1, -1).astype(f32),
        "w2": w2.astype(bf16), "b2": params["conv2_b"].reshape(1, -1).astype(f32),
        "w3": w3.astype(bf16), "b3": params["conv3_b"].reshape(1, -1).astype(f32),
        "fc_w": fc_w.astype(bf16), "fc_b": params["fc_b"].reshape(1, -1).astype(f32),
        "head_w": head_w.astype(bf16), "head_b": head_b.reshape(1, -1).astype(f32),
    }


# ---------------------------------------------------------------------------
# Net forward pass (matches PyTorch module semantics)
# ---------------------------------------------------------------------------
def net_forward(kp, x, *, n_out):
    """x: (B, 4, 84, 84) NCHW float32 in [0, 255] -> (critic (B,1), actor (B,n_out))."""
    B = x.shape[0]
    # conv1 patch slab, built once in XLA (16 slices + concat + free reshape + cast):
    # rows = width-pairs (oy*10 + p), 512 features = [pair-even | pair-odd] x 256.
    # TODO(synk): conv1 patch extraction stays as XLA glue; the channel-minor-4 raw
    # input has no efficient in-kernel gather on the (16,128) bf16 layout.
    xt = jnp.transpose(x, (0, 2, 3, 1))                  # (B, 84, 84, 4)
    xr = xt.reshape(B, 84, 21, 16)                       # width packed into (21, 4*4)
    cols = [xr[:, i:i + 77:4, j:j + 20, :] for i in range(8) for j in range(2)]
    p1 = jnp.concatenate(cols, axis=-1)                  # (B, 20, 20, 256)
    p1 = p1.reshape(B, 200, 512).astype(jnp.bfloat16)    # contiguous (metadata) reshape

    c3 = conv_stack(p1, kp)                              # (B, 49, 64) bf16
    feats = c3.reshape(B, 49 * 64)                       # contiguous (metadata) reshape
    out = fc_heads(feats, kp["fc_w"], kp["fc_b"], kp["head_w"], kp["head_b"])
    critic = out[:, :1]
    actor = out[:, 1:1 + n_out]
    return critic, actor


# ---------------------------------------------------------------------------
# Pure-JAX f32 reference (for validation)
# ---------------------------------------------------------------------------
def net_reference(params, x):
    hp = jax.lax.Precision.HIGHEST
    h = x.astype(jnp.float32) / 255.0

    def conv(h, w, b, s):
        y = jax.lax.conv_general_dilated(
            h, w, (s, s), "VALID",
            dimension_numbers=("NCHW", "OIHW", "NCHW"), precision=hp)
        return jax.nn.relu(y + b.reshape(1, -1, 1, 1))

    h = conv(h, params["conv1_w"], params["conv1_b"], 4)
    h = conv(h, params["conv2_w"], params["conv2_b"], 2)
    h = conv(h, params["conv3_w"], params["conv3_b"], 1)
    h = h.reshape(h.shape[0], -1)                        # NCHW flatten, like torch
    h = jax.nn.relu(jnp.dot(h, params["fc_w"].T, precision=hp) + params["fc_b"])
    critic = jnp.dot(h, params["critic_w"].T, precision=hp) + params["critic_b"]
    actor = jnp.dot(h, params["actor_w"].T, precision=hp) + params["actor_b"]
    return critic, actor


# ---------------------------------------------------------------------------
# Deterministic parameter initialization (synthetic weights, PyTorch layout)
# ---------------------------------------------------------------------------
def init_params(key, n_out):
    # TODO(synk): orthogonal init approximated with fan-in-scaled Gaussian (synthetic).
    relu_gain = math.sqrt(2.0)

    def w_init(k, shape, gain):
        fan_in = int(math.prod(shape[1:]))
        std = gain / math.sqrt(fan_in)
        return std * jax.random.normal(k, shape, jnp.float32)

    ks = jax.random.split(key, 6)
    return {
        "conv1_w": w_init(ks[0], (32, NUM_STACK_FRAME, 8, 8), relu_gain),
        "conv1_b": jnp.zeros((32,), jnp.float32),
        "conv2_w": w_init(ks[1], (64, 32, 4, 4), relu_gain),
        "conv2_b": jnp.zeros((64,), jnp.float32),
        "conv3_w": w_init(ks[2], (64, 64, 3, 3), relu_gain),
        "conv3_b": jnp.zeros((64,), jnp.float32),
        "fc_w": w_init(ks[3], (512, 64 * 7 * 7), relu_gain),
        "fc_b": jnp.zeros((512,), jnp.float32),
        "critic_w": w_init(ks[4], (1, 512), 1.0),
        "critic_b": jnp.zeros((1,), jnp.float32),
        "actor_w": w_init(ks[5], (n_out, 512), 0.01),
        "actor_b": jnp.zeros((n_out,), jnp.float32),
    }


if __name__ == "__main__":
    n_out = 4   # Breakout action space
    batch = 2
    key = jax.random.PRNGKey(0)
    k_x, k_p = jax.random.split(key)

    # 84x84 spatial is required by the module (the Linear expects 64*7*7 features).
    x = jax.random.uniform(k_x, (batch, NUM_STACK_FRAME, 84, 84),
                           minval=0.0, maxval=255.0, dtype=jnp.float32)
    params = init_params(k_p, n_out)
    kparams = prepare_params(params, n_out)     # one-time weight permute/fold/cast

    forward = jax.jit(functools.partial(net_forward, n_out=n_out))
    critic_out, actor_out = forward(kparams, x)
    jax.block_until_ready((critic_out, actor_out))

    assert critic_out.shape == (batch, 1)
    assert actor_out.shape == (batch, n_out)

    # Validate against an f32 reference (loose tolerance: bf16 kernel operands).
    critic_ref, actor_ref = net_reference(params, x)

    def _max_rel(a, b):
        scale = float(jnp.max(jnp.abs(b))) + 1e-6
        return float(jnp.max(jnp.abs(a.astype(jnp.float32) - b))) / scale

    assert _max_rel(critic_out, critic_ref) < 5e-2
    assert _max_rel(actor_out, actor_ref) < 5e-2

    print("KERNEL_OK")
</pallas_src>

<mosaic_0001>
module attributes {stable_mosaic.version = 11 : i64} {
  func.func @_conv_stack_kernel(%arg0: i32, %arg1: memref<1x200x512xbf16, #tpu.memory_space<vmem>>, %arg2: memref<512x64xbf16, #tpu.memory_space<vmem>>, %arg3: memref<1x64xf32, #tpu.memory_space<vmem>>, %arg4: memref<512x64xbf16, #tpu.memory_space<vmem>>, %arg5: memref<1x64xf32, #tpu.memory_space<vmem>>, %arg6: memref<576x64xbf16, #tpu.memory_space<vmem>>, %arg7: memref<1x64xf32, #tpu.memory_space<vmem>>, %arg8: memref<1x49x64xbf16, #tpu.memory_space<vmem>>, %arg9: memref<200x64xbf16, #tpu.memory_space<vmem>>, %arg10: memref<81x64xbf16, #tpu.memory_space<vmem>>) attributes {dimension_semantics = [#tpu.dimension_semantics<parallel>], iteration_bounds = array<i64: 2>, scalar_prefetch = 0 : i64, scratch_operands = 2 : i64, tpu.core_type = #tpu.core_type<tc>, window_params = [{transform_indices = @transform_0, window_bounds = array<i64: 1, 200, 512>}, {pipeline_mode = #tpu.pipeline_mode<synchronous>, transform_indices = @transform_1, window_bounds = array<i64: 512, 64>}, {pipeline_mode = #tpu.pipeline_mode<synchronous>, transform_indices = @transform_2, window_bounds = array<i64: 1, 64>}, {pipeline_mode = #tpu.pipeline_mode<synchronous>, transform_indices = @transform_3, window_bounds = array<i64: 512, 64>}, {pipeline_mode = #tpu.pipeline_mode<synchronous>, transform_indices = @transform_4, window_bounds = array<i64: 1, 64>}, {pipeline_mode = #tpu.pipeline_mode<synchronous>, transform_indices = @transform_5, window_bounds = array<i64: 576, 64>}, {pipeline_mode = #tpu.pipeline_mode<synchronous>, transform_indices = @transform_6, window_bounds = array<i64: 1, 64>}, {transform_indices = @transform_7, window_bounds = array<i64: 1, 49, 64>}]} {
    %c0 = arith.constant 0 : index
    %c0_0 = arith.constant 0 : index
    %c0_1 = arith.constant 0 : index
    %0 = vector.load %arg1[%c0, %c0_0, %c0_1] : memref<1x200x512xbf16, #tpu.memory_space<vmem>>, vector<1x200x512xbf16>
    %1 = vector.shape_cast %0 : vector<1x200x512xbf16> to vector<200x512xbf16>
    %c0_2 = arith.constant 0 : index
    %c0_3 = arith.constant 0 : index
    %2 = vector.load %arg2[%c0_2, %c0_3] : memref<512x64xbf16, #tpu.memory_space<vmem>>, vector<512x64xbf16>
    %cst = arith.constant dense<0.000000e+00> : vector<200x64xf32>
    %3 = tpu.matmul %1, %2, %cst {dimension_numbers = #tpu.dot_dimension_numbers<[1], [0], [0], [1], [0, 0, 1, 1], [], []>} : vector<200x512xbf16>, vector<512x64xbf16>, vector<200x64xf32> -> vector<200x64xf32>
    %c0_4 = arith.constant 0 : index
    %c0_5 = arith.constant 0 : index
    %4 = vector.load %arg3[%c0_4, %c0_5] : memref<1x64xf32, #tpu.memory_space<vmem>>, vector<1x64xf32>
    %5 = vector.broadcast %4 : vector<1x64xf32> to vector<200x64xf32>
    %6 = arith.addf %3, %5 : vector<200x64xf32>
    %cst_6 = arith.constant 0.000000e+00 : f32
    %7 = vector.broadcast %cst_6 : f32 to vector<200x64xf32>
    %8 = arith.maximumf %6, %7 : vector<200x64xf32>
    %9 = arith.truncf %8 : vector<200x64xf32> to vector<200x64xbf16>
    %c0_7 = arith.constant 0 : index
    %c0_8 = arith.constant 0 : index
    %10 = vector.load %arg9[%c0_7, %c0_8] : memref<200x64xbf16, #tpu.memory_space<vmem>>, vector<200x64xbf16>
    tpu.vector_store %arg9[%c0_7, %c0_8], %9 {strides = array<i32>} : memref<200x64xbf16, #tpu.memory_space<vmem>>, vector<200x64xbf16>,
    %c0_9 = arith.constant 0 : index
    %c0_10 = arith.constant 0 : index
    %11 = vector.load %arg9[%c0_9, %c0_10] : memref<200x64xbf16, #tpu.memory_space<vmem>>, vector<9x64xbf16>
    %c1 = arith.constant 1 : index
    %c0_11 = arith.constant 0 : index
    %12 = vector.load %arg9[%c1, %c0_11] : memref<200x64xbf16, #tpu.memory_space<vmem>>, vector<9x64xbf16>
    %c10 = arith.constant 10 : index
    %c0_12 = arith.constant 0 : index
    %13 = vector.load %arg9[%c10, %c0_12] : memref<200x64xbf16, #tpu.memory_space<vmem>>, vector<9x64xbf16>
    %c11 = arith.constant 11 : index
    %c0_13 = arith.constant 0 : index
    %14 = vector.load %arg9[%c11, %c0_13] : memref<200x64xbf16, #tpu.memory_space<vmem>>, vector<9x64xbf16>
    %c20 = arith.constant 20 : index
    %c0_14 = arith.constant 0 : index
    %15 = vector.load %arg9[%c20, %c0_14] : memref<200x64xbf16, #tpu.memory_space<vmem>>, vector<9x64xbf16>
    %c21 = arith.constant 21 : index
    %c0_15 = arith.constant 0 : index
    %16 = vector.load %arg9[%c21, %c0_15] : memref<200x64xbf16, #tpu.memory_space<vmem>>, vector<9x64xbf16>
    %c30 = arith.constant 30 : index
    %c0_16 = arith.constant 0 : index
    %17 = vector.load %arg9[%c30, %c0_16] : memref<200x64xbf16, #tpu.memory_space<vmem>>, vector<9x64xbf16>
    %c31 = arith.constant 31 : index
    %c0_17 = arith.constant 0 : index
    %18 = vector.load %arg9[%c31, %c0_17] : memref<200x64xbf16, #tpu.memory_space<vmem>>, vector<9x64xbf16>
    %19 = tpu.concatenate %11, %12, %13, %14, %15, %16, %17, %18 in 1 : vector<9x64xbf16>, vector<9x64xbf16>, vector<9x64xbf16>, vector<9x64xbf16>, vector<9x64xbf16>, vector<9x64xbf16>, vector<9x64xbf16>, vector<9x64xbf16> -> vector<9x512xbf16>
    %c0_18 = arith.constant 0 : index
    %c0_19 = arith.constant 0 : index
    %20 = vector.load %arg4[%c0_18, %c0_19] : memref<512x64xbf16, #tpu.memory_space<vmem>>, vector<512x64xbf16>
    %cst_20 = arith.constant dense<0.000000e+00> : vector<9x64xf32>
    %21 = tpu.matmul %19, %20, %cst_20 {dimension_numbers = #tpu.dot_dimension_numbers<[1], [0], [0], [1], [0, 0, 1, 1], [], []>} : vector<9x512xbf16>, vector<512x64xbf16>, vector<9x64xf32> -> vector<9x64xf32>
    %c0_21 = arith.constant 0 : index
    %c0_22 = arith.constant 0 : index
    %22 = vector.load %arg5[%c0_21, %c0_22] : memref<1x64xf32, #tpu.memory_space<vmem>>, vector<1x64xf32>
    %23 = vector.broadcast %22 : vector<1x64xf32> to vector<9x64xf32>
    %24 = arith.addf %21, %23 : vector<9x64xf32>
    %cst_23 = arith.constant 0.000000e+00 : f32
    %25 = vector.broadcast %cst_23 : f32 to vector<9x64xf32>
    %26 = arith.maximumf %24, %25 : vector<9x64xf32>
    %27 = arith.truncf %26 : vector<9x64xf32> to vector<9x64xbf16>
    %c0_24 = arith.constant 0 : index
    %c0_25 = arith.constant 0 : index
    %28 = vector.load %arg10[%c0_24, %c0_25] : memref<81x64xbf16, #tpu.memory_space<vmem>>, vector<9x64xbf16>
    tpu.vector_store %arg10[%c0_24, %c0_25], %27 {strides = array<i32>} : memref<81x64xbf16, #tpu.memory_space<vmem>>, vector<9x64xbf16>,
    %c20_26 = arith.constant 20 : index
    %c0_27 = arith.constant 0 : index
    %29 = vector.load %arg9[%c20_26, %c0_27] : memref<200x64xbf16, #tpu.memory_space<vmem>>, vector<9x64xbf16>
    %c21_28 = arith.constant 21 : index
    %c0_29 = arith.constant 0 : index
    %30 = vector.load %arg9[%c21_28, %c0_29] : memref<200x64xbf16, #tpu.memory_space<vmem>>, vector<9x64xbf16>
    %c30_30 = arith.constant 30 : index
    %c0_31 = arith.constant 0 : index
    %31 = vector.load %arg9[%c30_30, %c0_31] : memref<200x64xbf16, #tpu.memory_space<vmem>>, vector<9x64xbf16>
    %c31_32 = arith.constant 31 : index
    %c0_33 = arith.constant 0 : index
    %32 = vector.load %arg9[%c31_32, %c0_33] : memref<200x64xbf16, #tpu.memory_space<vmem>>, vector<9x64xbf16>
    %c40 = arith.constant 40 : index
    %c0_34 = arith.constant 0 : index
    %33 = vector.load %arg9[%c40, %c0_34] : memref<200x64xbf16, #tpu.memory_space<vmem>>, vector<9x64xbf16>
    %c41 = arith.constant 41 : index
    %c0_35 = arith.constant 0 : index
    %34 = vector.load %arg9[%c41, %c0_35] : memref<200x64xbf16, #tpu.memory_space<vmem>>, vector<9x64xbf16>
    %c50 = arith.constant 50 : index
    %c0_36 = arith.constant 0 : index
    %35 = vector.load %arg9[%c50, %c0_36] : memref<200x64xbf16, #tpu.memory_space<vmem>>, vector<9x64xbf16>
    %c51 = arith.constant 51 : index
    %c0_37 = arith.constant 0 : index
    %36 = vector.load %arg9[%c51, %c0_37] : memref<200x64xbf16, #tpu.memory_space<vmem>>, vector<9x64xbf16>
    %37 = tpu.concatenate %29, %30, %31, %32, %33, %34, %35, %36 in 1 : vector<9x64xbf16>, vector<9x64xbf16>, vector<9x64xbf16>, vector<9x64xbf16>, vector<9x64xbf16>, vector<9x64xbf16>, vector<9x64xbf16>, vector<9x64xbf16> -> vector<9x512xbf16>
    %c0_38 = arith.constant 0 : index
    %c0_39 = arith.constant 0 : index
    %38 = vector.load %arg4[%c0_38, %c0_39] : memref<512x64xbf16, #tpu.memory_space<vmem>>, vector<512x64xbf16>
    %cst_40 = arith.constant dense<0.000000e+00> : vector<9x64xf32>
    %39 = tpu.matmul %37, %38, %cst_40 {dimension_numbers = #tpu.dot_dimension_numbers<[1], [0], [0], [1], [0, 0, 1, 1], [], []>} : vector<9x512xbf16>, vector<512x64xbf16>, vector<9x64xf32> -> vector<9x64xf32>
    %c0_41 = arith.constant 0 : index
    %c0_42 = arith.constant 0 : index
    %40 = vector.load %arg5[%c0_41, %c0_42] : memref<1x64xf32, #tpu.memory_space<vmem>>, vector<1x64xf32>
    %41 = vector.broadcast %40 : vector<1x64xf32> to vector<9x64xf32>
    %42 = arith.addf %39, %41 : vector<9x64xf32>
    %cst_43 = arith.constant 0.000000e+00 : f32
    %43 = vector.broadcast %cst_43 : f32 to vector<9x64xf32>
    %44 = arith.maximumf %42, %43 : vector<9x64xf32>
    %45 = arith.truncf %44 : vector<9x64xf32> to vector<9x64xbf16>
    %c9 = arith.constant 9 : index
    %c0_44 = arith.constant 0 : index
    %46 = vector.load %arg10[%c9, %c0_44] : memref<81x64xbf16, #tpu.memory_space<vmem>>, vector<9x64xbf16>
    tpu.vector_store %arg10[%c9, %c0_44], %45 {strides = array<i32>} : memref<81x64xbf16, #tpu.memory_space<vmem>>, vector<9x64xbf16>,
    %c40_45 = arith.constant 40 : index
    %c0_46 = arith.constant 0 : index
    %47 = vector.load %arg9[%c40_45, %c0_46] : memref<200x64xbf16, #tpu.memory_space<vmem>>, vector<9x64xbf16>
    %c41_47 = arith.constant 41 : index
    %c0_48 = arith.constant 0 : index
    %48 = vector.load %arg9[%c41_47, %c0_48] : memref<200x64xbf16, #tpu.memory_space<vmem>>, vector<9x64xbf16>
    %c50_49 = arith.constant 50 : index
    %c0_50 = arith.constant 0 : index
    %49 = vector.load %arg9[%c50_49, %c0_50] : memref<200x64xbf16, #tpu.memory_space<vmem>>, vector<9x64xbf16>
    %c51_51 = arith.constant 51 : index
    %c0_52 = arith.constant 0 : index
    %50 = vector.load %arg9[%c51_51, %c0_52] : memref<200x64xbf16, #tpu.memory_space<vmem>>, vector<9x64xbf16>
    %c60 = arith.constant 60 : index
    %c0_53 = arith.constant 0 : index
    %51 = vector.load %arg9[%c60, %c0_53] : memref<200x64xbf16, #tpu.memory_space<vmem>>, vector<9x64xbf16>
    %c61 = arith.constant 61 : index
    %c0_54 = arith.constant 0 : index
    %52 = vector.load %arg9[%c61, %c0_54] : memref<200x64xbf16, #tpu.memory_space<vmem>>, vector<9x64xbf16>
    %c70 = arith.constant 70 : index
    %c0_55 = arith.constant 0 : index
    %53 = vector.load %arg9[%c70, %c0_55] : memref<200x64xbf16, #tpu.memory_space<vmem>>, vector<9x64xbf16>
    %c71 = arith.constant 71 : index
    %c0_56 = arith.constant 0 : index
    %54 = vector.load %arg9[%c71, %c0_56] : memref<200x64xbf16, #tpu.memory_space<vmem>>, vector<9x64xbf16>
    %55 = tpu.concatenate %47, %48, %49, %50, %51, %52, %53, %54 in 1 : vector<9x64xbf16>, vector<9x64xbf16>, vector<9x64xbf16>, vector<9x64xbf16>, vector<9x64xbf16>, vector<9x64xbf16>, vector<9x64xbf16>, vector<9x64xbf16> -> vector<9x512xbf16>
    %c0_57 = arith.constant 0 : index
    %c0_58 = arith.constant 0 : index
    %56 = vector.load %arg4[%c0_57, %c0_58] : memref<512x64xbf16, #tpu.memory_space<vmem>>, vector<512x64xbf16>
    %cst_59 = arith.constant dense<0.000000e+00> : vector<9x64xf32>
    %57 = tpu.matmul %55, %56, %cst_59 {dimension_numbers = #tpu.dot_dimension_numbers<[1], [0], [0], [1], [0, 0, 1, 1], [], []>} : vector<9x512xbf16>, vector<512x64xbf16>, vector<9x64xf32> -> vector<9x64xf32>
    %c0_60 = arith.constant 0 : index
    %c0_61 = arith.constant 0 : index
    %58 = vector.load %arg5[%c0_60, %c0_61] : memref<1x64xf32, #tpu.memory_space<vmem>>, vector<1x64xf32>
    %59 = vector.broadcast %58 : vector<1x64xf32> to vector<9x64xf32>
    %60 = arith.addf %57, %59 : vector<9x64xf32>
    %cst_62 = arith.constant 0.000000e+00 : f32
    %61 = vector.broadcast %cst_62 : f32 to vector<9x64xf32>
    %62 = arith.maximumf %60, %61 : vector<9x64xf32>
    %63 = arith.truncf %62 : vector<9x64xf32> to vector<9x64xbf16>
    %c18 = arith.constant 18 : index
    %c0_63 = arith.constant 0 : index
    %64 = vector.load %arg10[%c18, %c0_63] : memref<81x64xbf16, #tpu.memory_space<vmem>>, vector<9x64xbf16>
    tpu.vector_store %arg10[%c18, %c0_63], %63 {strides = array<i32>} : memref<81x64xbf16, #tpu.memory_space<vmem>>, vector<9x64xbf16>,
    %c60_64 = arith.constant 60 : index
    %c0_65 = arith.constant 0 : index
    %65 = vector.load %arg9[%c60_64, %c0_65] : memref<200x64xbf16, #tpu.memory_space<vmem>>, vector<9x64xbf16>
    %c61_66 = arith.constant 61 : index
    %c0_67 = arith.constant 0 : index
    %66 = vector.load %arg9[%c61_66, %c0_67] : memref<200x64xbf16, #tpu.memory_space<vmem>>, vector<9x64xbf16>
    %c70_68 = arith.constant 70 : index
    %c0_69 = arith.constant 0 : index
    %67 = vector.load %arg9[%c70_68, %c0_69] : memref<200x64xbf16, #tpu.memory_space<vmem>>, vector<9x64xbf16>
    %c71_70 = arith.constant 71 : index
    %c0_71 = arith.constant 0 : index
    %68 = vector.load %arg9[%c71_70, %c0_71] : memref<200x64xbf16, #tpu.memory_space<vmem>>, vector<9x64xbf16>
    %c80 = arith.constant 80 : index
    %c0_72 = arith.constant 0 : index
    %69 = vector.load %arg9[%c80, %c0_72] : memref<200x64xbf16, #tpu.memory_space<vmem>>, vector<9x64xbf16>
    %c81 = arith.constant 81 : index
    %c0_73 = arith.constant 0 : index
    %70 = vector.load %arg9[%c81, %c0_73] : memref<200x64xbf16, #tpu.memory_space<vmem>>, vector<9x64xbf16>
    %c90 = arith.constant 90 : index
    %c0_74 = arith.constant 0 : index
    %71 = vector.load %arg9[%c90, %c0_74] : memref<200x64xbf16, #tpu.memory_space<vmem>>, vector<9x64xbf16>
    %c91 = arith.constant 91 : index
    %c0_75 = arith.constant 0 : index
    %72 = vector.load %arg9[%c91, %c0_75] : memref<200x64xbf16, #tpu.memory_space<vmem>>, vector<9x64xbf16>
    %73 = tpu.concatenate %65, %66, %67, %68, %69, %70, %71, %72 in 1 : vector<9x64xbf16>, vector<9x64xbf16>, vector<9x64xbf16>, vector<9x64xbf16>, vector<9x64xbf16>, vector<9x64xbf16>, vector<9x64xbf16>, vector<9x64xbf16> -> vector<9x512xbf16>
    %c0_76 = arith.constant 0 : index
    %c0_77 = arith.constant 0 : index
    %74 = vector.load %arg4[%c0_76, %c0_77] : memref<512x64xbf16, #tpu.memory_space<vmem>>, vector<512x64xbf16>
    %cst_78 = arith.constant dense<0.000000e+00> : vector<9x64xf32>
    %75 = tpu.matmul %73, %74, %cst_78 {dimension_numbers = #tpu.dot_dimension_numbers<[1], [0], [0], [1], [0, 0, 1, 1], [], []>} : vector<9x512xbf16>, vector<512x64xbf16>, vector<9x64xf32> -> vector<9x64xf32>
    %c0_79 = arith.constant 0 : index
    %c0_80 = arith.constant 0 : index
    %76 = vector.load %arg5[%c0_79, %c0_80] : memref<1x64xf32, #tpu.memory_space<vmem>>, vector<1x64xf32>
    %77 = vector.broadcast %76 : vector<1x64xf32> to vector<9x64xf32>
    %78 = arith.addf %75, %77 : vector<9x64xf32>
    %cst_81 = arith.constant 0.000000e+00 : f32
    %79 = vector.broadcast %cst_81 : f32 to vector<9x64xf32>
    %80 = arith.maximumf %78, %79 : vector<9x64xf32>
    %81 = arith.truncf %80 : vector<9x64xf32> to vector<9x64xbf16>
    %c27 = arith.constant 27 : index
    %c0_82 = arith.constant 0 : index
    %82 = vector.load %arg10[%c27, %c0_82] : memref<81x64xbf16, #tpu.memory_space<vmem>>, vector<9x64xbf16>
    tpu.vector_store %arg10[%c27, %c0_82], %81 {strides = array<i32>} : memref<81x64xbf16, #tpu.memory_space<vmem>>, vector<9x64xbf16>,
    %c80_83 = arith.constant 80 : index
    %c0_84 = arith.constant 0 : index
    %83 = vector.load %arg9[%c80_83, %c0_84] : memref<200x64xbf16, #tpu.memory_space<vmem>>, vector<9x64xbf16>
    %c81_85 = arith.constant 81 : index
    %c0_86 = arith.constant 0 : index
    %84 = vector.load %arg9[%c81_85, %c0_86] : memref<200x64xbf16, #tpu.memory_space<vmem>>, vector<9x64xbf16>
    %c90_87 = arith.constant 90 : index
    %c0_88 = arith.constant 0 : index
    %85 = vector.load %arg9[%c90_87, %c0_88] : memref<200x64xbf16, #tpu.memory_space<vmem>>, vector<9x64xbf16>
    %c91_89 = arith.constant 91 : index
    %c0_90 = arith.constant 0 : index
    %86 = vector.load %arg9[%c91_89, %c0_90] : memref<200x64xbf16, #tpu.memory_space<vmem>>, vector<9x64xbf16>
    %c100 = arith.constant 100 : index
    %c0_91 = arith.constant 0 : index
    %87 = vector.load %arg9[%c100, %c0_91] : memref<200x64xbf16, #tpu.memory_space<vmem>>, vector<9x64xbf16>
    %c101 = arith.constant 101 : index
    %c0_92 = arith.constant 0 : index
    %88 = vector.load %arg9[%c101, %c0_92] : memref<200x64xbf16, #tpu.memory_space<vmem>>, vector<9x64xbf16>
    %c110 = arith.constant 110 : index
    %c0_93 = arith.constant 0 : index
    %89 = vector.load %arg9[%c110, %c0_93] : memref<200x64xbf16, #tpu.memory_space<vmem>>, vector<9x64xbf16>
    %c111 = arith.constant 111 : index
    %c0_94 = arith.constant 0 : index
    %90 = vector.load %arg9[%c111, %c0_94] : memref<200x64xbf16, #tpu.memory_space<vmem>>, vector<9x64xbf16>
    %91 = tpu.concatenate %83, %84, %85, %86, %87, %88, %89, %90 in 1 : vector<9x64xbf16>, vector<9x64xbf16>, vector<9x64xbf16>, vector<9x64xbf16>, vector<9x64xbf16>, vector<9x64xbf16>, vector<9x64xbf16>, vector<9x64xbf16> -> vector<9x512xbf16>
    %c0_95 = arith.constant 0 : index
    %c0_96 = arith.constant 0 : index
    %92 = vector.load %arg4[%c0_95, %c0_96] : memref<512x64xbf16, #tpu.memory_space<vmem>>, vector<512x64xbf16>
    %cst_97 = arith.constant dense<0.000000e+00> : vector<9x64xf32>
    %93 = tpu.matmul %91, %92, %cst_97 {dimension_numbers = #tpu.dot_dimension_numbers<[1], [0], [0], [1], [0, 0, 1, 1], [], []>} : vector<9x512xbf16>, vector<512x64xbf16>, vector<9x64xf32> -> vector<9x64xf32>
    %c0_98 = arith.constant 0 : index
    %c0_99 = arith.constant 0 : index
    %94 = vector.load %arg5[%c0_98, %c0_99] : memref<1x64xf32, #tpu.memory_space<vmem>>, vector<1x64xf32>
    %95 = vector.broadcast %94 : vector<1x64xf32> to vector<9x64xf32>
    %96 = arith.addf %93, %95 : vector<9x64xf32>
    %cst_100 = arith.constant 0.000000e+00 : f32
    %97 = vector.broadcast %cst_100 : f32 to vector<9x64xf32>
    %98 = arith.maximumf %96, %97 : vector<9x64xf32>
    %99 = arith.truncf %98 : vector<9x64xf32> to vector<9x64xbf16>
    %c36 = arith.constant 36 : index
    %c0_101 = arith.constant 0 : index
    %100 = vector.load %arg10[%c36, %c0_101] : memref<81x64xbf16, #tpu.memory_space<vmem>>, vector<9x64xbf16>
    tpu.vector_store %arg10[%c36, %c0_101], %99 {strides = array<i32>} : memref<81x64xbf16, #tpu.memory_space<vmem>>, vector<9x64xbf16>,
    %c100_102 = arith.constant 100 : index
    %c0_103 = arith.constant 0 : index
    %101 = vector.load %arg9[%c100_102, %c0_103] : memref<200x64xbf16, #tpu.memory_space<vmem>>, vector<9x64xbf16>
    %c101_104 = arith.constant 101 : index
    %c0_105 = arith.constant 0 : index
    %102 = vector.load %arg9[%c101_104, %c0_105] : memref<200x64xbf16, #tpu.memory_space<vmem>>, vector<9x64xbf16>
    %c110_106 = arith.constant 110 : index
    %c0_107 = arith.constant 0 : index
    %103 = vector.load %arg9[%c110_106, %c0_107] : memref<200x64xbf16, #tpu.memory_space<vmem>>, vector<9x64xbf16>
    %c111_108 = arith.constant 111 : index
    %c0_109 = arith.constant 0 : index
    %104 = vector.load %arg9[%c111_108, %c0_109] : memref<200x64xbf16, #tpu.memory_space<vmem>>, vector<9x64xbf16>
    %c120 = arith.constant 120 : index
    %c0_110 = arith.constant 0 : index
    %105 = vector.load %arg9[%c120, %c0_110] : memref<200x64xbf16, #tpu.memory_space<vmem>>, vector<9x64xbf16>
    %c121 = arith.constant 121 : index
    %c0_111 = arith.constant 0 : index
    %106 = vector.load %arg9[%c121, %c0_111] : memref<200x64xbf16, #tpu.memory_space<vmem>>, vector<9x64xbf16>
    %c130 = arith.constant 130 : index
    %c0_112 = arith.constant 0 : index
    %107 = vector.load %arg9[%c130, %c0_112] : memref<200x64xbf16, #tpu.memory_space<vmem>>, vector<9x64xbf16>
    %c131 = arith.constant 131 : index
    %c0_113 = arith.constant 0 : index
    %108 = vector.load %arg9[%c131, %c0_113] : memref<200x64xbf16, #tpu.memory_space<vmem>>, vector<9x64xbf16>
    %109 = tpu.concatenate %101, %102, %103, %104, %105, %106, %107, %108 in 1 : vector<9x64xbf16>, vector<9x64xbf16>, vector<9x64xbf16>, vector<9x64xbf16>, vector<9x64xbf16>, vector<9x64xbf16>, vector<9x64xbf16>, vector<9x64xbf16> -> vector<9x512xbf16>
    %c0_114 = arith.constant 0 : index
    %c0_115 = arith.constant 0 : index
    %110 = vector.load %arg4[%c0_114, %c0_115] : memref<512x64xbf16, #tpu.memory_space<vmem>>, vector<512x64xbf16>
    %cst_116 = arith.constant dense<0.000000e+00> : vector<9x64xf32>
    %111 = tpu.matmul %109, %110, %cst_116 {dimension_numbers = #tpu.dot_dimension_numbers<[1], [0], [0], [1], [0, 0, 1, 1], [], []>} : vector<9x512xbf16>, vector<512x64xbf16>, vector<9x64xf32> -> vector<9x64xf32>
    %c0_117 = arith.constant 0 : index
    %c0_118 = arith.constant 0 : index
    %112 = vector.load %arg5[%c0_117, %c0_118] : memref<1x64xf32, #tpu.memory_space<vmem>>, vector<1x64xf32>
    %113 = vector.broadcast %112 : vector<1x64xf32> to vector<9x64xf32>
    %114 = arith.addf %111, %113 : vector<9x64xf32>
    %cst_119 = arith.constant 0.000000e+00 : f32
    %115 = vector.broadcast %cst_119 : f32 to vector<9x64xf32>
    %116 = arith.maximumf %114, %115 : vector<9x64xf32>
    %117 = arith.truncf %116 : vector<9x64xf32> to vector<9x64xbf16>
    %c45 = arith.constant 45 : index
    %c0_120 = arith.constant 0 : index
    %118 = vector.load %arg10[%c45, %c0_120] : memref<81x64xbf16, #tpu.memory_space<vmem>>, vector<9x64xbf16>
    tpu.vector_store %arg10[%c45, %c0_120], %117 {strides = array<i32>} : memref<81x64xbf16, #tpu.memory_space<vmem>>, vector<9x64xbf16>,
    %c120_121 = arith.constant 120 : index
    %c0_122 = arith.constant 0 : index
    %119 = vector.load %arg9[%c120_121, %c0_122] : memref<200x64xbf16, #tpu.memory_space<vmem>>, vector<9x64xbf16>
    %c121_123 = arith.constant 121 : index
    %c0_124 = arith.constant 0 : index
    %120 = vector.load %arg9[%c121_123, %c0_124] : memref<200x64xbf16, #tpu.memory_space<vmem>>, vector<9x64xbf16>
    %c130_125 = arith.constant 130 : index
    %c0_126 = arith.constant 0 : index
    %121 = vector.load %arg9[%c130_125, %c0_126] : memref<200x64xbf16, #tpu.memory_space<vmem>>, vector<9x64xbf16>
    %c131_127 = arith.constant 131 : index
    %c0_128 = arith.constant 0 : index
    %122 = vector.load %arg9[%c131_127, %c0_128] : memref<200x64xbf16, #tpu.memory_space<vmem>>, vector<9x64xbf16>
    %c140 = arith.constant 140 : index
    %c0_129 = arith.constant 0 : index
    %123 = vector.load %arg9[%c140, %c0_129] : memref<200x64xbf16, #tpu.memory_space<vmem>>, vector<9x64xbf16>
    %c141 = arith.constant 141 : index
    %c0_130 = arith.constant 0 : index
    %124 = vector.load %arg9[%c141, %c0_130] : memref<200x64xbf16, #tpu.memory_space<vmem>>, vector<9x64xbf16>
    %c150 = arith.constant 150 : index
    %c0_131 = arith.constant 0 : index
    %125 = vector.load %arg9[%c150, %c0_131] : memref<200x64xbf16, #tpu.memory_space<vmem>>, vector<9x64xbf16>
    %c151 = arith.constant 151 : index
    %c0_132 = arith.constant 0 : index
    %126 = vector.load %arg9[%c151, %c0_132] : memref<200x64xbf16, #tpu.memory_space<vmem>>, vector<9x64xbf16>
    %127 = tpu.concatenate %119, %120, %121, %122, %123, %124, %125, %126 in 1 : vector<9x64xbf16>, vector<9x64xbf16>, vector<9x64xbf16>, vector<9x64xbf16>, vector<9x64xbf16>, vector<9x64xbf16>, vector<9x64xbf16>, vector<9x64xbf16> -> vector<9x512xbf16>
    %c0_133 = arith.constant 0 : index
    %c0_134 = arith.constant 0 : index
    %128 = vector.load %arg4[%c0_133, %c0_134] : memref<512x64xbf16, #tpu.memory_space<vmem>>, vector<512x64xbf16>
    %cst_135 = arith.constant dense<0.000000e+00> : vector<9x64xf32>
    %129 = tpu.matmul %127, %128, %cst_135 {dimension_numbers = #tpu.dot_dimension_numbers<[1], [0], [0], [1], [0, 0, 1, 1], [], []>} : vector<9x512xbf16>, vector<512x64xbf16>, vector<9x64xf32> -> vector<9x64xf32>
    %c0_136 = arith.constant 0 : index
    %c0_137 = arith.constant 0 : index
    %130 = vector.load %arg5[%c0_136, %c0_137] : memref<1x64xf32, #tpu.memory_space<vmem>>, vector<1x64xf32>
    %131 = vector.broadcast %130 : vector<1x64xf32> to vector<9x64xf32>
    %132 = arith.addf %129, %131 : vector<9x64xf32>
    %cst_138 = arith.constant 0.000000e+00 : f32
    %133 = vector.broadcast %cst_138 : f32 to vector<9x64xf32>
    %134 = arith.maximumf %132, %133 : vector<9x64xf32>
    %135 = arith.truncf %134 : vector<9x64xf32> to vector<9x64xbf16>
    %c54 = arith.constant 54 : index
    %c0_139 = arith.constant 0 : index
    %136 = vector.load %arg10[%c54, %c0_139] : memref<81x64xbf16, #tpu.memory_space<vmem>>, vector<9x64xbf16>
    tpu.vector_store %arg10[%c54, %c0_139], %135 {strides = array<i32>} : memref<81x64xbf16, #tpu.memory_space<vmem>>, vector<9x64xbf16>,
    %c140_140 = arith.constant 140 : index
    %c0_141 = arith.constant 0 : index
    %137 = vector.load %arg9[%c140_140, %c0_141] : memref<200x64xbf16, #tpu.memory_space<vmem>>, vector<9x64xbf16>
    %c141_142 = arith.constant 141 : index
    %c0_143 = arith.constant 0 : index
    %138 = vector.load %arg9[%c141_142, %c0_143] : memref<200x64xbf16, #tpu.memory_space<vmem>>, vector<9x64xbf16>
    %c150_144 = arith.constant 150 : index
    %c0_145 = arith.constant 0 : index
    %139 = vector.load %arg9[%c150_144, %c0_145] : memref<200x64xbf16, #tpu.memory_space<vmem>>, vector<9x64xbf16>
    %c151_146 = arith.constant 151 : index
    %c0_147 = arith.constant 0 : index
    %140 = vector.load %arg9[%c151_146, %c0_147] : memref<200x64xbf16, #tpu.memory_space<vmem>>, vector<9x64xbf16>
    %c160 = arith.constant 160 : index
    %c0_148 = arith.constant 0 : index
    %141 = vector.load %arg9[%c160, %c0_148] : memref<200x64xbf16, #tpu.memory_space<vmem>>, vector<9x64xbf16>
    %c161 = arith.constant 161 : index
    %c0_149 = arith.constant 0 : index
    %142 = vector.load %arg9[%c161, %c0_149] : memref<200x64xbf16, #tpu.memory_space<vmem>>, vector<9x64xbf16>
    %c170 = arith.constant 170 : index
    %c0_150 = arith.constant 0 : index
    %143 = vector.load %arg9[%c170, %c0_150] : memref<200x64xbf16, #tpu.memory_space<vmem>>, vector<9x64xbf16>
    %c171 = arith.constant 171 : index
    %c0_151 = arith.constant 0 : index
    %144 = vector.load %arg9[%c171, %c0_151] : memref<200x64xbf16, #tpu.memory_space<vmem>>, vector<9x64xbf16>
    %145 = tpu.concatenate %137, %138, %139, %140, %141, %142, %143, %144 in 1 : vector<9x64xbf16>, vector<9x64xbf16>, vector<9x64xbf16>, vector<9x64xbf16>, vector<9x64xbf16>, vector<9x64xbf16>, vector<9x64xbf16>, vector<9x64xbf16> -> vector<9x512xbf16>
    %c0_152 = arith.constant 0 : index
    %c0_153 = arith.constant 0 : index
    %146 = vector.load %arg4[%c0_152, %c0_153] : memref<512x64xbf16, #tpu.memory_space<vmem>>, vector<512x64xbf16>
    %cst_154 = arith.constant dense<0.000000e+00> : vector<9x64xf32>
    %147 = tpu.matmul %145, %146, %cst_154 {dimension_numbers = #tpu.dot_dimension_numbers<[1], [0], [0], [1], [0, 0, 1, 1], [], []>} : vector<9x512xbf16>, vector<512x64xbf16>, vector<9x64xf32> -> vector<9x64xf32>
    %c0_155 = arith.constant 0 : index
    %c0_156 = arith.constant 0 : index
    %148 = vector.load %arg5[%c0_155, %c0_156] : memref<1x64xf32, #tpu.memory_space<vmem>>, vector<1x64xf32>
    %149 = vector.broadcast %148 : vector<1x64xf32> to vector<9x64xf32>
    %150 = arith.addf %147, %149 : vector<9x64xf32>
    %cst_157 = arith.constant 0.000000e+00 : f32
    %151 = vector.broadcast %cst_157 : f32 to vector<9x64xf32>
    %152 = arith.maximumf %150, %151 : vector<9x64xf32>
    %153 = arith.truncf %152 : vector<9x64xf32> to vector<9x64xbf16>
    %c63 = arith.constant 63 : index
    %c0_158 = arith.constant 0 : index
    %154 = vector.load %arg10[%c63, %c0_158] : memref<81x64xbf16, #tpu.memory_space<vmem>>, vector<9x64xbf16>
    tpu.vector_store %arg10[%c63, %c0_158], %153 {strides = array<i32>} : memref<81x64xbf16, #tpu.memory_space<vmem>>, vector<9x64xbf16>,
    %c160_159 = arith.constant 160 : index
    %c0_160 = arith.constant 0 : index
    %155 = vector.load %arg9[%c160_159, %c0_160] : memref<200x64xbf16, #tpu.memory_space<vmem>>, vector<9x64xbf16>
    %c161_161 = arith.constant 161 : index
    %c0_162 = arith.constant 0 : index
    %156 = vector.load %arg9[%c161_161, %c0_162] : memref<200x64xbf16, #tpu.memory_space<vmem>>, vector<9x64xbf16>
    %c170_163 = arith.constant 170 : index
    %c0_164 = arith.constant 0 : index
    %157 = vector.load %arg9[%c170_163, %c0_164] : memref<200x64xbf16, #tpu.memory_space<vmem>>, vector<9x64xbf16>
    %c171_165 = arith.constant 171 : index
    %c0_166 = arith.constant 0 : index
    %158 = vector.load %arg9[%c171_165, %c0_166] : memref<200x64xbf16, #tpu.memory_space<vmem>>, vector<9x64xbf16>
    %c180 = arith.constant 180 : index
    %c0_167 = arith.constant 0 : index
    %159 = vector.load %arg9[%c180, %c0_167] : memref<200x64xbf16, #tpu.memory_space<vmem>>, vector<9x64xbf16>
    %c181 = arith.constant 181 : index
    %c0_168 = arith.constant 0 : index
    %160 = vector.load %arg9[%c181, %c0_168] : memref<200x64xbf16, #tpu.memory_space<vmem>>, vector<9x64xbf16>
    %c190 = arith.constant 190 : index
    %c0_169 = arith.constant 0 : index
    %161 = vector.load %arg9[%c190, %c0_169] : memref<200x64xbf16, #tpu.memory_space<vmem>>, vector<9x64xbf16>
    %c191 = arith.constant 191 : index
    %c0_170 = arith.constant 0 : index
    %162 = vector.load %arg9[%c191, %c0_170] : memref<200x64xbf16, #tpu.memory_space<vmem>>, vector<9x64xbf16>
    %163 = tpu.concatenate %155, %156, %157, %158, %159, %160, %161, %162 in 1 : vector<9x64xbf16>, vector<9x64xbf16>, vector<9x64xbf16>, vector<9x64xbf16>, vector<9x64xbf16>, vector<9x64xbf16>, vector<9x64xbf16>, vector<9x64xbf16> -> vector<9x512xbf16>
    %c0_171 = arith.constant 0 : index
    %c0_172 = arith.constant 0 : index
    %164 = vector.load %arg4[%c0_171, %c0_172] : memref<512x64xbf16, #tpu.memory_space<vmem>>, vector<512x64xbf16>
    %cst_173 = arith.constant dense<0.000000e+00> : vector<9x64xf32>
    %165 = tpu.matmul %163, %164, %cst_173 {dimension_numbers = #tpu.dot_dimension_numbers<[1], [0], [0], [1], [0, 0, 1, 1], [], []>} : vector<9x512xbf16>, vector<512x64xbf16>, vector<9x64xf32> -> vector<9x64xf32>
    %c0_174 = arith.constant 0 : index
    %c0_175 = arith.constant 0 : index
    %166 = vector.load %arg5[%c0_174, %c0_175] : memref<1x64xf32, #tpu.memory_space<vmem>>, vector<1x64xf32>
    %167 = vector.broadcast %166 : vector<1x64xf32> to vector<9x64xf32>
    %168 = arith.addf %165, %167 : vector<9x64xf32>
    %cst_176 = arith.constant 0.000000e+00 : f32
    %169 = vector.broadcast %cst_176 : f32 to vector<9x64xf32>
    %170 = arith.maximumf %168, %169 : vector<9x64xf32>
    %171 = arith.truncf %170 : vector<9x64xf32> to vector<9x64xbf16>
    %c72 = arith.constant 72 : index
    %c0_177 = arith.constant 0 : index
    %172 = vector.load %arg10[%c72, %c0_177] : memref<81x64xbf16, #tpu.memory_space<vmem>>, vector<9x64xbf16>
    tpu.vector_store %arg10[%c72, %c0_177], %171 {strides = array<i32>} : memref<81x64xbf16, #tpu.memory_space<vmem>>, vector<9x64xbf16>,
    %c0_178 = arith.constant 0 : index
    %c0_179 = arith.constant 0 : index
    %173 = vector.load %arg10[%c0_178, %c0_179] : memref<81x64xbf16, #tpu.memory_space<vmem>>, vector<7x64xbf16>
    %c1_180 = arith.constant 1 : index
    %c0_181 = arith.constant 0 : index
    %174 = vector.load %arg10[%c1_180, %c0_181] : memref<81x64xbf16, #tpu.memory_space<vmem>>, vector<7x64xbf16>
    %c2 = arith.constant 2 : index
    %c0_182 = arith.constant 0 : index
    %175 = vector.load %arg10[%c2, %c0_182] : memref<81x64xbf16, #tpu.memory_space<vmem>>, vector<7x64xbf16>
    %c9_183 = arith.constant 9 : index
    %c0_184 = arith.constant 0 : index
    %176 = vector.load %arg10[%c9_183, %c0_184] : memref<81x64xbf16, #tpu.memory_space<vmem>>, vector<7x64xbf16>
    %c10_185 = arith.constant 10 : index
    %c0_186 = arith.constant 0 : index
    %177 = vector.load %arg10[%c10_185, %c0_186] : memref<81x64xbf16, #tpu.memory_space<vmem>>, vector<7x64xbf16>
    %c11_187 = arith.constant 11 : index
    %c0_188 = arith.constant 0 : index
    %178 = vector.load %arg10[%c11_187, %c0_188] : memref<81x64xbf16, #tpu.memory_space<vmem>>, vector<7x64xbf16>
    %c18_189 = arith.constant 18 : index
    %c0_190 = arith.constant 0 : index
    %179 = vector.load %arg10[%c18_189, %c0_190] : memref<81x64xbf16, #tpu.memory_space<vmem>>, vector<7x64xbf16>
    %c19 = arith.constant 19 : index
    %c0_191 = arith.constant 0 : index
    %180 = vector.load %arg10[%c19, %c0_191] : memref<81x64xbf16, #tpu.memory_space<vmem>>, vector<7x64xbf16>
    %c20_192 = arith.constant 20 : index
    %c0_193 = arith.constant 0 : index
    %181 = vector.load %arg10[%c20_192, %c0_193] : memref<81x64xbf16, #tpu.memory_space<vmem>>, vector<7x64xbf16>
    %182 = tpu.concatenate %173, %174, %175, %176, %177, %178, %179, %180, %181 in 1 : vector<7x64xbf16>, vector<7x64xbf16>, vector<7x64xbf16>, vector<7x64xbf16>, vector<7x64xbf16>, vector<7x64xbf16>, vector<7x64xbf16>, vector<7x64xbf16>, vector<7x64xbf16> -> vector<7x576xbf16>
    %c0_194 = arith.constant 0 : index
    %c0_195 = arith.constant 0 : index
    %183 = vector.load %arg6[%c0_194, %c0_195] : memref<576x64xbf16, #tpu.memory_space<vmem>>, vector<576x64xbf16>
    %cst_196 = arith.constant dense<0.000000e+00> : vector<7x64xf32>
    %184 = tpu.matmul %182, %183, %cst_196 {dimension_numbers = #tpu.dot_dimension_numbers<[1], [0], [0], [1], [0, 0, 1, 1], [], []>} : vector<7x576xbf16>, vector<576x64xbf16>, vector<7x64xf32> -> vector<7x64xf32>
    %c0_197 = arith.constant 0 : index
    %c0_198 = arith.constant 0 : index
    %185 = vector.load %arg7[%c0_197, %c0_198] : memref<1x64xf32, #tpu.memory_space<vmem>>, vector<1x64xf32>
    %186 = vector.broadcast %185 : vector<1x64xf32> to vector<7x64xf32>
    %187 = arith.addf %184, %186 : vector<7x64xf32>
    %cst_199 = arith.constant 0.000000e+00 : f32
    %188 = vector.broadcast %cst_199 : f32 to vector<7x64xf32>
    %189 = arith.maximumf %187, %188 : vector<7x64xf32>
    %190 = arith.truncf %189 : vector<7x64xf32> to vector<7x64xbf16>
    %c0_200 = arith.constant 0 : index
    %c0_201 = arith.constant 0 : index
    %c0_202 = arith.constant 0 : index
    %191 = vector.load %arg8[%c0_200, %c0_201, %c0_202] : memref<1x49x64xbf16, #tpu.memory_space<vmem>>, vector<1x7x64xbf16>
    %192 = vector.shape_cast %191 : vector<1x7x64xbf16> to vector<7x64xbf16>
    %193 = vector.shape_cast %190 : vector<7x64xbf16> to vector<1x7x64xbf16>
    tpu.vector_store %arg8[%c0_200, %c0_201, %c0_202], %193 {strides = array<i32>} : memref<1x49x64xbf16, #tpu.memory_space<vmem>>, vector<1x7x64xbf16>,
    %c9_203 = arith.constant 9 : index
    %c0_204 = arith.constant 0 : index
    %194 = vector.load %arg10[%c9_203, %c0_204] : memref<81x64xbf16, #tpu.memory_space<vmem>>, vector<7x64xbf16>
    %c10_205 = arith.constant 10 : index
    %c0_206 = arith.constant 0 : index
    %195 = vector.load %arg10[%c10_205, %c0_206] : memref<81x64xbf16, #tpu.memory_space<vmem>>, vector<7x64xbf16>
    %c11_207 = arith.constant 11 : index
    %c0_208 = arith.constant 0 : index
    %196 = vector.load %arg10[%c11_207, %c0_208] : memref<81x64xbf16, #tpu.memory_space<vmem>>, vector<7x64xbf16>
    %c18_209 = arith.constant 18 : index
    %c0_210 = arith.constant 0 : index
    %197 = vector.load %arg10[%c18_209, %c0_210] : memref<81x64xbf16, #tpu.memory_space<vmem>>, vector<7x64xbf16>
    %c19_211 = arith.constant 19 : index
    %c0_212 = arith.constant 0 : index
    %198 = vector.load %arg10[%c19_211, %c0_212] : memref<81x64xbf16, #tpu.memory_space<vmem>>, vector<7x64xbf16>
    %c20_213 = arith.constant 20 : index
    %c0_214 = arith.constant 0 : index
    %199 = vector.load %arg10[%c20_213, %c0_214] : memref<81x64xbf16, #tpu.memory_space<vmem>>, vector<7x64xbf16>
    %c27_215 = arith.constant 27 : index
    %c0_216 = arith.constant 0 : index
    %200 = vector.load %arg10[%c27_215, %c0_216] : memref<81x64xbf16, #tpu.memory_space<vmem>>, vector<7x64xbf16>
    %c28 = arith.constant 28 : index
    %c0_217 = arith.constant 0 : index
    %201 = vector.load %arg10[%c28, %c0_217] : memref<81x64xbf16, #tpu.memory_space<vmem>>, vector<7x64xbf16>
    %c29 = arith.constant 29 : index
    %c0_218 = arith.constant 0 : index
    %202 = vector.load %arg10[%c29, %c0_218] : memref<81x64xbf16, #tpu.memory_space<vmem>>, vector<7x64xbf16>
    %203 = tpu.concatenate %194, %195, %196, %197, %198, %199, %200, %201, %202 in 1 : vector<7x64xbf16>, vector<7x64xbf16>, vector<7x64xbf16>, vector<7x64xbf16>, vector<7x64xbf16>, vector<7x64xbf16>, vector<7x64xbf16>, vector<7x64xbf16>, vector<7x64xbf16> -> vector<7x576xbf16>
    %c0_219 = arith.constant 0 : index
    %c0_220 = arith.constant 0 : index
    %204 = vector.load %arg6[%c0_219, %c0_220] : memref<576x64xbf16, #tpu.memory_space<vmem>>, vector<576x64xbf16>
    %cst_221 = arith.constant dense<0.000000e+00> : vector<7x64xf32>
    %205 = tpu.matmul %203, %204, %cst_221 {dimension_numbers = #tpu.dot_dimension_numbers<[1], [0], [0], [1], [0, 0, 1, 1], [], []>} : vector<7x576xbf16>, vector<576x64xbf16>, vector<7x64xf32> -> vector<7x64xf32>
    %c0_222 = arith.constant 0 : index
    %c0_223 = arith.constant 0 : index
    %206 = vector.load %arg7[%c0_222, %c0_223] : memref<1x64xf32, #tpu.memory_space<vmem>>, vector<1x64xf32>
    %207 = vector.broadcast %206 : vector<1x64xf32> to vector<7x64xf32>
    %208 = arith.addf %205, %207 : vector<7x64xf32>
    %cst_224 = arith.constant 0.000000e+00 : f32
    %209 = vector.broadcast %cst_224 : f32 to vector<7x64xf32>
    %210 = arith.maximumf %208, %209 : vector<7x64xf32>
    %211 = arith.truncf %210 : vector<7x64xf32> to vector<7x64xbf16>
    %c0_225 = arith.constant 0 : index
    %c7 = arith.constant 7 : index
    %c0_226 = arith.constant 0 : index
    %212 = vector.load %arg8[%c0_225, %c7, %c0_226] : memref<1x49x64xbf16, #tpu.memory_space<vmem>>, vector<1x7x64xbf16>
    %213 = vector.shape_cast %212 : vector<1x7x64xbf16> to vector<7x64xbf16>
    %214 = vector.shape_cast %211 : vector<7x64xbf16> to vector<1x7x64xbf16>
    tpu.vector_store %arg8[%c0_225, %c7, %c0_226], %214 {strides = array<i32>} : memref<1x49x64xbf16, #tpu.memory_space<vmem>>, vector<1x7x64xbf16>,
    %c18_227 = arith.constant 18 : index
    %c0_228 = arith.constant 0 : index
    %215 = vector.load %arg10[%c18_227, %c0_228] : memref<81x64xbf16, #tpu.memory_space<vmem>>, vector<7x64xbf16>
    %c19_229 = arith.constant 19 : index
    %c0_230 = arith.constant 0 : index
    %216 = vector.load %arg10[%c19_229, %c0_230] : memref<81x64xbf16, #tpu.memory_space<vmem>>, vector<7x64xbf16>
    %c20_231 = arith.constant 20 : index
    %c0_232 = arith.constant 0 : index
    %217 = vector.load %arg10[%c20_231, %c0_232] : memref<81x64xbf16, #tpu.memory_space<vmem>>, vector<7x64xbf16>
    %c27_233 = arith.constant 27 : index
    %c0_234 = arith.constant 0 : index
    %218 = vector.load %arg10[%c27_233, %c0_234] : memref<81x64xbf16, #tpu.memory_space<vmem>>, vector<7x64xbf16>
    %c28_235 = arith.constant 28 : index
    %c0_236 = arith.constant 0 : index
    %219 = vector.load %arg10[%c28_235, %c0_236] : memref<81x64xbf16, #tpu.memory_space<vmem>>, vector<7x64xbf16>
    %c29_237 = arith.constant 29 : index
    %c0_238 = arith.constant 0 : index
    %220 = vector.load %arg10[%c29_237, %c0_238] : memref<81x64xbf16, #tpu.memory_space<vmem>>, vector<7x64xbf16>
    %c36_239 = arith.constant 36 : index
    %c0_240 = arith.constant 0 : index
    %221 = vector.load %arg10[%c36_239, %c0_240] : memref<81x64xbf16, #tpu.memory_space<vmem>>, vector<7x64xbf16>
    %c37 = arith.constant 37 : index
    %c0_241 = arith.constant 0 : index
    %222 = vector.load %arg10[%c37, %c0_241] : memref<81x64xbf16, #tpu.memory_space<vmem>>, vector<7x64xbf16>
    %c38 = arith.constant 38 : index
    %c0_242 = arith.constant 0 : index
    %223 = vector.load %arg10[%c38, %c0_242] : memref<81x64xbf16, #tpu.memory_space<vmem>>, vector<7x64xbf16>
    %224 = tpu.concatenate %215, %216, %217, %218, %219, %220, %221, %222, %223 in 1 : vector<7x64xbf16>, vector<7x64xbf16>, vector<7x64xbf16>, vector<7x64xbf16>, vector<7x64xbf16>, vector<7x64xbf16>, vector<7x64xbf16>, vector<7x64xbf16>, vector<7x64xbf16> -> vector<7x576xbf16>
    %c0_243 = arith.constant 0 : index
    %c0_244 = arith.constant 0 : index
    %225 = vector.load %arg6[%c0_243, %c0_244] : memref<576x64xbf16, #tpu.memory_space<vmem>>, vector<576x64xbf16>
    %cst_245 = arith.constant dense<0.000000e+00> : vector<7x64xf32>
    %226 = tpu.matmul %224, %225, %cst_245 {dimension_numbers = #tpu.dot_dimension_numbers<[1], [0], [0], [1], [0, 0, 1, 1], [], []>} : vector<7x576xbf16>, vector<576x64xbf16>, vector<7x64xf32> -> vector<7x64xf32>
    %c0_246 = arith.constant 0 : index
    %c0_247 = arith.constant 0 : index
    %227 = vector.load %arg7[%c0_246, %c0_247] : memref<1x64xf32, #tpu.memory_space<vmem>>, vector<1x64xf32>
    %228 = vector.broadcast %227 : vector<1x64xf32> to vector<7x64xf32>
    %229 = arith.addf %226, %228 : vector<7x64xf32>
    %cst_248 = arith.constant 0.000000e+00 : f32
    %230 = vector.broadcast %cst_248 : f32 to vector<7x64xf32>
    %231 = arith.maximumf %229, %230 : vector<7x64xf32>
    %232 = arith.truncf %231 : vector<7x64xf32> to vector<7x64xbf16>
    %c0_249 = arith.constant 0 : index
    %c14 = arith.constant 14 : index
    %c0_250 = arith.constant 0 : index
    %233 = vector.load %arg8[%c0_249, %c14, %c0_250] : memref<1x49x64xbf16, #tpu.memory_space<vmem>>, vector<1x7x64xbf16>
    %234 = vector.shape_cast %233 : vector<1x7x64xbf16> to vector<7x64xbf16>
    %235 = vector.shape_cast %232 : vector<7x64xbf16> to vector<1x7x64xbf16>
    tpu.vector_store %arg8[%c0_249, %c14, %c0_250], %235 {strides = array<i32>} : memref<1x49x64xbf16, #tpu.memory_space<vmem>>, vector<1x7x64xbf16>,
    %c27_251 = arith.constant 27 : index
    %c0_252 = arith.constant 0 : index
    %236 = vector.load %arg10[%c27_251, %c0_252] : memref<81x64xbf16, #tpu.memory_space<vmem>>, vector<7x64xbf16>
    %c28_253 = arith.constant 28 : index
    %c0_254 = arith.constant 0 : index
    %237 = vector.load %arg10[%c28_253, %c0_254] : memref<81x64xbf16, #tpu.memory_space<vmem>>, vector<7x64xbf16>
    %c29_255 = arith.constant 29 : index
    %c0_256 = arith.constant 0 : index
    %238 = vector.load %arg10[%c29_255, %c0_256] : memref<81x64xbf16, #tpu.memory_space<vmem>>, vector<7x64xbf16>
    %c36_257 = arith.constant 36 : index
    %c0_258 = arith.constant 0 : index
    %239 = vector.load %arg10[%c36_257, %c0_258] : memref<81x64xbf16, #tpu.memory_space<vmem>>, vector<7x64xbf16>
    %c37_259 = arith.constant 37 : index
    %c0_260 = arith.constant 0 : index
    %240 = vector.load %arg10[%c37_259, %c0_260] : memref<81x64xbf16, #tpu.memory_space<vmem>>, vector<7x64xbf16>
    %c38_261 = arith.constant 38 : index
    %c0_262 = arith.constant 0 : index
    %241 = vector.load %arg10[%c38_261, %c0_262] : memref<81x64xbf16, #tpu.memory_space<vmem>>, vector<7x64xbf16>
    %c45_263 = arith.constant 45 : index
    %c0_264 = arith.constant 0 : index
    %242 = vector.load %arg10[%c45_263, %c0_264] : memref<81x64xbf16, #tpu.memory_space<vmem>>, vector<7x64xbf16>
    %c46 = arith.constant 46 : index
    %c0_265 = arith.constant 0 : index
    %243 = vector.load %arg10[%c46, %c0_265] : memref<81x64xbf16, #tpu.memory_space<vmem>>, vector<7x64xbf16>
    %c47 = arith.constant 47 : index
    %c0_266 = arith.constant 0 : index
    %244 = vector.load %arg10[%c47, %c0_266] : memref<81x64xbf16, #tpu.memory_space<vmem>>, vector<7x64xbf16>
    %245 = tpu.concatenate %236, %237, %238, %239, %240, %241, %242, %243, %244 in 1 : vector<7x64xbf16>, vector<7x64xbf16>, vector<7x64xbf16>, vector<7x64xbf16>, vector<7x64xbf16>, vector<7x64xbf16>, vector<7x64xbf16>, vector<7x64xbf16>, vector<7x64xbf16> -> vector<7x576xbf16>
    %c0_267 = arith.constant 0 : index
    %c0_268 = arith.constant 0 : index
    %246 = vector.load %arg6[%c0_267, %c0_268] : memref<576x64xbf16, #tpu.memory_space<vmem>>, vector<576x64xbf16>
    %cst_269 = arith.constant dense<0.000000e+00> : vector<7x64xf32>
    %247 = tpu.matmul %245, %246, %cst_269 {dimension_numbers = #tpu.dot_dimension_numbers<[1], [0], [0], [1], [0, 0, 1, 1], [], []>} : vector<7x576xbf16>, vector<576x64xbf16>, vector<7x64xf32> -> vector<7x64xf32>
    %c0_270 = arith.constant 0 : index
    %c0_271 = arith.constant 0 : index
    %248 = vector.load %arg7[%c0_270, %c0_271] : memref<1x64xf32, #tpu.memory_space<vmem>>, vector<1x64xf32>
    %249 = vector.broadcast %248 : vector<1x64xf32> to vector<7x64xf32>
    %250 = arith.addf %247, %249 : vector<7x64xf32>
    %cst_272 = arith.constant 0.000000e+00 : f32
    %251 = vector.broadcast %cst_272 : f32 to vector<7x64xf32>
    %252 = arith.maximumf %250, %251 : vector<7x64xf32>
    %253 = arith.truncf %252 : vector<7x64xf32> to vector<7x64xbf16>
    %c0_273 = arith.constant 0 : index
    %c21_274 = arith.constant 21 : index
    %c0_275 = arith.constant 0 : index
    %254 = vector.load %arg8[%c0_273, %c21_274, %c0_275] : memref<1x49x64xbf16, #tpu.memory_space<vmem>>, vector<1x7x64xbf16>
    %255 = vector.shape_cast %254 : vector<1x7x64xbf16> to vector<7x64xbf16>
    %256 = vector.shape_cast %253 : vector<7x64xbf16> to vector<1x7x64xbf16>
    tpu.vector_store %arg8[%c0_273, %c21_274, %c0_275], %256 {strides = array<i32>} : memref<1x49x64xbf16, #tpu.memory_space<vmem>>, vector<1x7x64xbf16>,
    %c36_276 = arith.constant 36 : index
    %c0_277 = arith.constant 0 : index
    %257 = vector.load %arg10[%c36_276, %c0_277] : memref<81x64xbf16, #tpu.memory_space<vmem>>, vector<7x64xbf16>
    %c37_278 = arith.constant 37 : index
    %c0_279 = arith.constant 0 : index
    %258 = vector.load %arg10[%c37_278, %c0_279] : memref<81x64xbf16, #tpu.memory_space<vmem>>, vector<7x64xbf16>
    %c38_280 = arith.constant 38 : index
    %c0_281 = arith.constant 0 : index
    %259 = vector.load %arg10[%c38_280, %c0_281] : memref<81x64xbf16, #tpu.memory_space<vmem>>, vector<7x64xbf16>
    %c45_282 = arith.constant 45 : index
    %c0_283 = arith.constant 0 : index
    %260 = vector.load %arg10[%c45_282, %c0_283] : memref<81x64xbf16, #tpu.memory_space<vmem>>, vector<7x64xbf16>
    %c46_284 = arith.constant 46 : index
    %c0_285 = arith.constant 0 : index
    %261 = vector.load %arg10[%c46_284, %c0_285] : memref<81x64xbf16, #tpu.memory_space<vmem>>, vector<7x64xbf16>
    %c47_286 = arith.constant 47 : index
    %c0_287 = arith.constant 0 : index
    %262 = vector.load %arg10[%c47_286, %c0_287] : memref<81x64xbf16, #tpu.memory_space<vmem>>, vector<7x64xbf16>
    %c54_288 = arith.constant 54 : index
    %c0_289 = arith.constant 0 : index
    %263 = vector.load %arg10[%c54_288, %c0_289] : memref<81x64xbf16, #tpu.memory_space<vmem>>, vector<7x64xbf16>
    %c55 = arith.constant 55 : index
    %c0_290 = arith.constant 0 : index
    %264 = vector.load %arg10[%c55, %c0_290] : memref<81x64xbf16, #tpu.memory_space<vmem>>, vector<7x64xbf16>
    %c56 = arith.constant 56 : index
    %c0_291 = arith.constant 0 : index
    %265 = vector.load %arg10[%c56, %c0_291] : memref<81x64xbf16, #tpu.memory_space<vmem>>, vector<7x64xbf16>
    %266 = tpu.concatenate %257, %258, %259, %260, %261, %262, %263, %264, %265 in 1 : vector<7x64xbf16>, vector<7x64xbf16>, vector<7x64xbf16>, vector<7x64xbf16>, vector<7x64xbf16>, vector<7x64xbf16>, vector<7x64xbf16>, vector<7x64xbf16>, vector<7x64xbf16> -> vector<7x576xbf16>
    %c0_292 = arith.constant 0 : index
    %c0_293 = arith.constant 0 : index
    %267 = vector.load %arg6[%c0_292, %c0_293] : memref<576x64xbf16, #tpu.memory_space<vmem>>, vector<576x64xbf16>
    %cst_294 = arith.constant dense<0.000000e+00> : vector<7x64xf32>
    %268 = tpu.matmul %266, %267, %cst_294 {dimension_numbers = #tpu.dot_dimension_numbers<[1], [0], [0], [1], [0, 0, 1, 1], [], []>} : vector<7x576xbf16>, vector<576x64xbf16>, vector<7x64xf32> -> vector<7x64xf32>
    %c0_295 = arith.constant 0 : index
    %c0_296 = arith.constant 0 : index
    %269 = vector.load %arg7[%c0_295, %c0_296] : memref<1x64xf32, #tpu.memory_space<vmem>>, vector<1x64xf32>
    %270 = vector.broadcast %269 : vector<1x64xf32> to vector<7x64xf32>
    %271 = arith.addf %268, %270 : vector<7x64xf32>
    %cst_297 = arith.constant 0.000000e+00 : f32
    %272 = vector.broadcast %cst_297 : f32 to vector<7x64xf32>
    %273 = arith.maximumf %271, %272 : vector<7x64xf32>
    %274 = arith.truncf %273 : vector<7x64xf32> to vector<7x64xbf16>
    %c0_298 = arith.constant 0 : index
    %c28_299 = arith.constant 28 : index
    %c0_300 = arith.constant 0 : index
    %275 = vector.load %arg8[%c0_298, %c28_299, %c0_300] : memref<1x49x64xbf16, #tpu.memory_space<vmem>>, vector<1x7x64xbf16>
    %276 = vector.shape_cast %275 : vector<1x7x64xbf16> to vector<7x64xbf16>
    %277 = vector.shape_cast %274 : vector<7x64xbf16> to vector<1x7x64xbf16>
    tpu.vector_store %arg8[%c0_298, %c28_299, %c0_300], %277 {strides = array<i32>} : memref<1x49x64xbf16, #tpu.memory_space<vmem>>, vector<1x7x64xbf16>,
    %c45_301 = arith.constant 45 : index
    %c0_302 = arith.constant 0 : index
    %278 = vector.load %arg10[%c45_301, %c0_302] : memref<81x64xbf16, #tpu.memory_space<vmem>>, vector<7x64xbf16>
    %c46_303 = arith.constant 46 : index
    %c0_304 = arith.constant 0 : index
    %279 = vector.load %arg10[%c46_303, %c0_304] : memref<81x64xbf16, #tpu.memory_space<vmem>>, vector<7x64xbf16>
    %c47_305 = arith.constant 47 : index
    %c0_306 = arith.constant 0 : index
    %280 = vector.load %arg10[%c47_305, %c0_306] : memref<81x64xbf16, #tpu.memory_space<vmem>>, vector<7x64xbf16>
    %c54_307 = arith.constant 54 : index
    %c0_308 = arith.constant 0 : index
    %281 = vector.load %arg10[%c54_307, %c0_308] : memref<81x64xbf16, #tpu.memory_space<vmem>>, vector<7x64xbf16>
    %c55_309 = arith.constant 55 : index
    %c0_310 = arith.constant 0 : index
    %282 = vector.load %arg10[%c55_309, %c0_310] : memref<81x64xbf16, #tpu.memory_space<vmem>>, vector<7x64xbf16>
    %c56_311 = arith.constant 56 : index
    %c0_312 = arith.constant 0 : index
    %283 = vector.load %arg10[%c56_311, %c0_312] : memref<81x64xbf16, #tpu.memory_space<vmem>>, vector<7x64xbf16>
    %c63_313 = arith.constant 63 : index
    %c0_314 = arith.constant 0 : index
    %284 = vector.load %arg10[%c63_313, %c0_314] : memref<81x64xbf16, #tpu.memory_space<vmem>>, vector<7x64xbf16>
    %c64 = arith.constant 64 : index
    %c0_315 = arith.constant 0 : index
    %285 = vector.load %arg10[%c64, %c0_315] : memref<81x64xbf16, #tpu.memory_space<vmem>>, vector<7x64xbf16>
    %c65 = arith.constant 65 : index
    %c0_316 = arith.constant 0 : index
    %286 = vector.load %arg10[%c65, %c0_316] : memref<81x64xbf16, #tpu.memory_space<vmem>>, vector<7x64xbf16>
    %287 = tpu.concatenate %278, %279, %280, %281, %282, %283, %284, %285, %286 in 1 : vector<7x64xbf16>, vector<7x64xbf16>, vector<7x64xbf16>, vector<7x64xbf16>, vector<7x64xbf16>, vector<7x64xbf16>, vector<7x64xbf16>, vector<7x64xbf16>, vector<7x64xbf16> -> vector<7x576xbf16>
    %c0_317 = arith.constant 0 : index
    %c0_318 = arith.constant 0 : index
    %288 = vector.load %arg6[%c0_317, %c0_318] : memref<576x64xbf16, #tpu.memory_space<vmem>>, vector<576x64xbf16>
    %cst_319 = arith.constant dense<0.000000e+00> : vector<7x64xf32>
    %289 = tpu.matmul %287, %288, %cst_319 {dimension_numbers = #tpu.dot_dimension_numbers<[1], [0], [0], [1], [0, 0, 1, 1], [], []>} : vector<7x576xbf16>, vector<576x64xbf16>, vector<7x64xf32> -> vector<7x64xf32>
    %c0_320 = arith.constant 0 : index
    %c0_321 = arith.constant 0 : index
    %290 = vector.load %arg7[%c0_320, %c0_321] : memref<1x64xf32, #tpu.memory_space<vmem>>, vector<1x64xf32>
    %291 = vector.broadcast %290 : vector<1x64xf32> to vector<7x64xf32>
    %292 = arith.addf %289, %291 : vector<7x64xf32>
    %cst_322 = arith.constant 0.000000e+00 : f32
    %293 = vector.broadcast %cst_322 : f32 to vector<7x64xf32>
    %294 = arith.maximumf %292, %293 : vector<7x64xf32>
    %295 = arith.truncf %294 : vector<7x64xf32> to vector<7x64xbf16>
    %c0_323 = arith.constant 0 : index
    %c35 = arith.constant 35 : index
    %c0_324 = arith.constant 0 : index
    %296 = vector.load %arg8[%c0_323, %c35, %c0_324] : memref<1x49x64xbf16, #tpu.memory_space<vmem>>, vector<1x7x64xbf16>
    %297 = vector.shape_cast %296 : vector<1x7x64xbf16> to vector<7x64xbf16>
    %298 = vector.shape_cast %295 : vector<7x64xbf16> to vector<1x7x64xbf16>
    tpu.vector_store %arg8[%c0_323, %c35, %c0_324], %298 {strides = array<i32>} : memref<1x49x64xbf16, #tpu.memory_space<vmem>>, vector<1x7x64xbf16>,
    %c54_325 = arith.constant 54 : index
    %c0_326 = arith.constant 0 : index
    %299 = vector.load %arg10[%c54_325, %c0_326] : memref<81x64xbf16, #tpu.memory_space<vmem>>, vector<7x64xbf16>
    %c55_327 = arith.constant 55 : index
    %c0_328 = arith.constant 0 : index
    %300 = vector.load %arg10[%c55_327, %c0_328] : memref<81x64xbf16, #tpu.memory_space<vmem>>, vector<7x64xbf16>
    %c56_329 = arith.constant 56 : index
    %c0_330 = arith.constant 0 : index
    %301 = vector.load %arg10[%c56_329, %c0_330] : memref<81x64xbf16, #tpu.memory_space<vmem>>, vector<7x64xbf16>
    %c63_331 = arith.constant 63 : index
    %c0_332 = arith.constant 0 : index
    %302 = vector.load %arg10[%c63_331, %c0_332] : memref<81x64xbf16, #tpu.memory_space<vmem>>, vector<7x64xbf16>
    %c64_333 = arith.constant 64 : index
    %c0_334 = arith.constant 0 : index
    %303 = vector.load %arg10[%c64_333, %c0_334] : memref<81x64xbf16, #tpu.memory_space<vmem>>, vector<7x64xbf16>
    %c65_335 = arith.constant 65 : index
    %c0_336 = arith.constant 0 : index
    %304 = vector.load %arg10[%c65_335, %c0_336] : memref<81x64xbf16, #tpu.memory_space<vmem>>, vector<7x64xbf16>
    %c72_337 = arith.constant 72 : index
    %c0_338 = arith.constant 0 : index
    %305 = vector.load %arg10[%c72_337, %c0_338] : memref<81x64xbf16, #tpu.memory_space<vmem>>, vector<7x64xbf16>
    %c73 = arith.constant 73 : index
    %c0_339 = arith.constant 0 : index
    %306 = vector.load %arg10[%c73, %c0_339] : memref<81x64xbf16, #tpu.memory_space<vmem>>, vector<7x64xbf16>
    %c74 = arith.constant 74 : index
    %c0_340 = arith.constant 0 : index
    %307 = vector.load %arg10[%c74, %c0_340] : memref<81x64xbf16, #tpu.memory_space<vmem>>, vector<7x64xbf16>
    %308 = tpu.concatenate %299, %300, %301, %302, %303, %304, %305, %306, %307 in 1 : vector<7x64xbf16>, vector<7x64xbf16>, vector<7x64xbf16>, vector<7x64xbf16>, vector<7x64xbf16>, vector<7x64xbf16>, vector<7x64xbf16>, vector<7x64xbf16>, vector<7x64xbf16> -> vector<7x576xbf16>
    %c0_341 = arith.constant 0 : index
    %c0_342 = arith.constant 0 : index
    %309 = vector.load %arg6[%c0_341, %c0_342] : memref<576x64xbf16, #tpu.memory_space<vmem>>, vector<576x64xbf16>
    %cst_343 = arith.constant dense<0.000000e+00> : vector<7x64xf32>
    %310 = tpu.matmul %308, %309, %cst_343 {dimension_numbers = #tpu.dot_dimension_numbers<[1], [0], [0], [1], [0, 0, 1, 1], [], []>} : vector<7x576xbf16>, vector<576x64xbf16>, vector<7x64xf32> -> vector<7x64xf32>
    %c0_344 = arith.constant 0 : index
    %c0_345 = arith.constant 0 : index
    %311 = vector.load %arg7[%c0_344, %c0_345] : memref<1x64xf32, #tpu.memory_space<vmem>>, vector<1x64xf32>
    %312 = vector.broadcast %311 : vector<1x64xf32> to vector<7x64xf32>
    %313 = arith.addf %310, %312 : vector<7x64xf32>
    %cst_346 = arith.constant 0.000000e+00 : f32
    %314 = vector.broadcast %cst_346 : f32 to vector<7x64xf32>
    %315 = arith.maximumf %313, %314 : vector<7x64xf32>
    %316 = arith.truncf %315 : vector<7x64xf32> to vector<7x64xbf16>
    %c0_347 = arith.constant 0 : index
    %c42 = arith.constant 42 : index
    %c0_348 = arith.constant 0 : index
    %317 = vector.load %arg8[%c0_347, %c42, %c0_348] : memref<1x49x64xbf16, #tpu.memory_space<vmem>>, vector<1x7x64xbf16>
    %318 = vector.shape_cast %317 : vector<1x7x64xbf16> to vector<7x64xbf16>
    %319 = vector.shape_cast %316 : vector<7x64xbf16> to vector<1x7x64xbf16>
    tpu.vector_store %arg8[%c0_347, %c42, %c0_348], %319 {strides = array<i32>} : memref<1x49x64xbf16, #tpu.memory_space<vmem>>, vector<1x7x64xbf16>,
    return
  }
  func.func @transform_0(%arg0: i32) -> (i32, i32, i32) {
    %c0_i32 = arith.constant 0 : i32
    %c0_i32_0 = arith.constant 0 : i32
    %c0_i32_1 = arith.constant 0 : i32
    return %arg0, %c0_i32, %c0_i32_0 : i32, i32, i32
  }
  func.func @transform_1(%arg0: i32) -> (i32, i32) {
    %c0_i32 = arith.constant 0 : i32
    %c0_i32_0 = arith.constant 0 : i32
    %c0_i32_1 = arith.constant 0 : i32
    return %c0_i32, %c0_i32_0 : i32, i32
  }
  func.func @transform_2(%arg0: i32) -> (i32, i32) {
    %c0_i32 = arith.constant 0 : i32
    %c0_i32_0 = arith.constant 0 : i32
    %c0_i32_1 = arith.constant 0 : i32
    return %c0_i32, %c0_i32_0 : i32, i32
  }
  func.func @transform_3(%arg0: i32) -> (i32, i32) {
    %c0_i32 = arith.constant 0 : i32
    %c0_i32_0 = arith.constant 0 : i32
    %c0_i32_1 = arith.constant 0 : i32
    return %c0_i32, %c0_i32_0 : i32, i32
  }
  func.func @transform_4(%arg0: i32) -> (i32, i32) {
    %c0_i32 = arith.constant 0 : i32
    %c0_i32_0 = arith.constant 0 : i32
    %c0_i32_1 = arith.constant 0 : i32
    return %c0_i32, %c0_i32_0 : i32, i32
  }
  func.func @transform_5(%arg0: i32) -> (i32, i32) {
    %c0_i32 = arith.constant 0 : i32
    %c0_i32_0 = arith.constant 0 : i32
    %c0_i32_1 = arith.constant 0 : i32
    return %c0_i32, %c0_i32_0 : i32, i32
  }
  func.func @transform_6(%arg0: i32) -> (i32, i32) {
    %c0_i32 = arith.constant 0 : i32
    %c0_i32_0 = arith.constant 0 : i32
    %c0_i32_1 = arith.constant 0 : i32
    return %c0_i32, %c0_i32_0 : i32, i32
  }
  func.func @transform_7(%arg0: i32) -> (i32, i32, i32) {
    %c0_i32 = arith.constant 0 : i32
    %c0_i32_0 = arith.constant 0 : i32
    %c0_i32_1 = arith.constant 0 : i32
    return %arg0, %c0_i32, %c0_i32_0 : i32, i32, i32
  }
}

module attributes {stable_mosaic.version = 11 : i64} {
  func.func @_fc_heads_kernel(%arg0: i32, %arg1: memref<16x3136xbf16, #tpu.memory_space<vmem>>, %arg2: memref<3136x512xbf16, #tpu.memory_space<vmem>>, %arg3: memref<1x512xf32, #tpu.memory_space<vmem>>, %arg4: memref<512x128xbf16, #tpu.memory_space<vmem>>, %arg5: memref<1x128xf32, #tpu.memory_space<vmem>>, %arg6: memref<16x128xf32, #tpu.memory_space<vmem>>) attributes {dimension_semantics = [#tpu.dimension_semantics<parallel>], iteration_bounds = array<i64: 1>, scalar_prefetch = 0 : i64, scratch_operands = 0 : i64, tpu.core_type = #tpu.core_type<tc>, window_params = [{transform_indices = @transform_0, window_bounds = array<i64: 16, 3136>}, {pipeline_mode = #tpu.pipeline_mode<synchronous>, transform_indices = @transform_1, window_bounds = array<i64: 3136, 512>}, {pipeline_mode = #tpu.pipeline_mode<synchronous>, transform_indices = @transform_2, window_bounds = array<i64: 1, 512>}, {pipeline_mode = #tpu.pipeline_mode<synchronous>, transform_indices = @transform_3, window_bounds = array<i64: 512, 128>}, {pipeline_mode = #tpu.pipeline_mode<synchronous>, transform_indices = @transform_4, window_bounds = array<i64: 1, 128>}, {transform_indices = @transform_5, window_bounds = array<i64: 16, 128>}]} {
    %c0 = arith.constant 0 : index
    %c0_0 = arith.constant 0 : index
    %0 = vector.load %arg1[%c0, %c0_0] : memref<16x3136xbf16, #tpu.memory_space<vmem>>, vector<16x3136xbf16>
    %c0_1 = arith.constant 0 : index
    %c0_2 = arith.constant 0 : index
    %1 = vector.load %arg2[%c0_1, %c0_2] : memref<3136x512xbf16, #tpu.memory_space<vmem>>, vector<3136x512xbf16>
    %cst = arith.constant dense<0.000000e+00> : vector<16x512xf32>
    %2 = tpu.matmul %0, %1, %cst {dimension_numbers = #tpu.dot_dimension_numbers<[1], [0], [0], [1], [0, 0, 1, 1], [], []>} : vector<16x3136xbf16>, vector<3136x512xbf16>, vector<16x512xf32> -> vector<16x512xf32>
    %c0_3 = arith.constant 0 : index
    %c0_4 = arith.constant 0 : index
    %3 = vector.load %arg3[%c0_3, %c0_4] : memref<1x512xf32, #tpu.memory_space<vmem>>, vector<1x512xf32>
    %4 = vector.broadcast %3 : vector<1x512xf32> to vector<16x512xf32>
    %5 = arith.addf %2, %4 : vector<16x512xf32>
    %cst_5 = arith.constant 0.000000e+00 : f32
    %6 = vector.broadcast %cst_5 : f32 to vector<16x512xf32>
    %7 = arith.maximumf %5, %6 : vector<16x512xf32>
    %8 = arith.truncf %7 : vector<16x512xf32> to vector<16x512xbf16>
    %c0_6 = arith.constant 0 : index
    %c0_7 = arith.constant 0 : index
    %9 = vector.load %arg4[%c0_6, %c0_7] : memref<512x128xbf16, #tpu.memory_space<vmem>>, vector<512x128xbf16>
    %cst_8 = arith.constant dense<0.000000e+00> : vector<16x128xf32>
    %10 = tpu.matmul %8, %9, %cst_8 {dimension_numbers = #tpu.dot_dimension_numbers<[1], [0], [0], [1], [0, 0, 1, 1], [], []>} : vector<16x512xbf16>, vector<512x128xbf16>, vector<16x128xf32> -> vector<16x128xf32>
    %c0_9 = arith.constant 0 : index
    %c0_10 = arith.constant 0 : index
    %11 = vector.load %arg5[%c0_9, %c0_10] : memref<1x128xf32, #tpu.memory_space<vmem>>, vector<1x128xf32>
    %12 = vector.broadcast %11 : vector<1x128xf32> to vector<16x128xf32>
    %13 = arith.addf %10, %12 : vector<16x128xf32>
    %c0_11 = arith.constant 0 : index
    %c0_12 = arith.constant 0 : index
    %14 = vector.load %arg6[%c0_11, %c0_12] : memref<16x128xf32, #tpu.memory_space<vmem>>, vector<16x128xf32>
    tpu.vector_store %arg6[%c0_11, %c0_12], %13 {strides = array<i32>} : memref<16x128xf32, #tpu.memory_space<vmem>>, vector<16x128xf32>,
    return
  }
  func.func @transform_0(%arg0: i32) -> (i32, i32) {
    %c0_i32 = arith.constant 0 : i32
    %c0_i32_0 = arith.constant 0 : i32
    return %arg0, %c0_i32 : i32, i32
  }
  func.func @transform_1(%arg0: i32) -> (i32, i32) {
    %c0_i32 = arith.constant 0 : i32
    %c0_i32_0 = arith.constant 0 : i32
    %c0_i32_1 = arith.constant 0 : i32
    return %c0_i32, %c0_i32_0 : i32, i32
  }
  func.func @transform_2(%arg0: i32) -> (i32, i32) {
    %c0_i32 = arith.constant 0 : i32
    %c0_i32_0 = arith.constant 0 : i32
    %c0_i32_1 = arith.constant 0 : i32
    return %c0_i32, %c0_i32_0 : i32, i32
  }
  func.func @transform_3(%arg0: i32) -> (i32, i32) {
    %c0_i32 = arith.constant 0 : i32
    %c0_i32_0 = arith.constant 0 : i32
    %c0_i32_1 = arith.constant 0 : i32
    return %c0_i32, %c0_i32_0 : i32, i32
  }
  func.func @transform_4(%arg0: i32) -> (i32, i32) {
    %c0_i32 = arith.constant 0 : i32
    %c0_i32_0 = arith.constant 0 : i32
    %c0_i32_1 = arith.constant 0 : i32
    return %c0_i32, %c0_i32_0 : i32, i32
  }
  func.func @transform_5(%arg0: i32) -> (i32, i32) {
    %c0_i32 = arith.constant 0 : i32
    %c0_i32_0 = arith.constant 0 : i32
    return %arg0, %c0_i32 : i32, i32
  }
}

</mosaic_0001>

<bundles_post_ra>
// kernel: net_forward.3
= control target key start
LH: loop header
LB: loop body
LE: loop exit
PB: predicated region body
PF: predicated region fallthrough
CT: control target
= control target key end

     0   :  { %v839_v39 = vlaneseq  ;;  %v9029_v40 = vmov 1966171168   ;;  %vm5292_vm0 = vcmask 523264   ;;  %s11749_s0 = inlined_call_operand.vmem [shape: bf16[2,3136], index: 0, kind: input, shape index: {}]   ;;  %s11750_s1 = inlined_call_operand.vmem [shape: bf16[3136,512], index: 1, kind: input, shape index: {}]   ;;  %s11751_s2 = inlined_call_operand.vmem [shape: f32[1,512], index: 2, kind: input, shape index: {}]   ;;  %s11752_s3 = inlined_call_operand.vmem [shape: bf16[512,128], index: 3, kind: input, shape index: {}]   ;;  %s11753_s4 = inlined_call_operand.vmem [shape: f32[1,128], index: 4, kind: input, shape index: {}]   ;;  %s11754_s5 = inlined_call_operand.vmem [shape: f32[2,128], index: 5, kind: output, shape index: {}]  }
   0x1   :  { %v7781_v0 = vld [vmem:[%s11750_s1 + $0x4] ss:$16 sps:$4 sm:$0xff]   ;;  %v7783_v1 = vld [vmem:[%s11750_s1 + $0xc] ss:$16 sps:$4 sm:$0xff]   ;;  %v7785_v2 = vld [vmem:[%s11750_s1] ss:$16 sps:$4 sm:$0xff]   ;;  %v900_v41 = vunpack.c.l.s4 %v9029_v40 }
   0x2   :  { %5296 = vmatprep.subr.bf16.mxu0 %v7781_v0  ;;  %v7786_v3 = vld [vmem:[%s11750_s1 + $0x8] ss:$16 sps:$4 sm:$0xff]   ;;  %5855 = vmatprep.subr.bf16.mxu1 %v7783_v1  ;;  %v7787_v4 = vld [vmem:[%s11750_s1 + $0x24] ss:$16 sps:$4 sm:$0xff]   ;;  %v7789_v5 = vld [vmem:[%s11750_s1 + $0x2c] ss:$16 sps:$4 sm:$0xff]  }
   0x3   :  { %5297 = vmatpush1.bf16.msra.mxu0 %v7785_v2  ;;  %5856 = vmatpush1.bf16.msra.mxu1 %v7786_v3  ;;  %v7791_v6 = vld [vmem:[%s11750_s1 + $0x20] ss:$16 sps:$4 sm:$0xff]   ;;  %v7792_v7 = vld [vmem:[%s11750_s1 + $0x28] ss:$16 sps:$4 sm:$0xff]   ;;  %v7793_v8 = vld [vmem:[%s11750_s1 + $0x44] ss:$16 sps:$4 sm:$0xff]   ;;  %v901_v48 = vunpack.c.0.s8 %v900_v41 }
   0x4   :  { %5298 = vmatprep.subr.bf16.mxu0 %v7787_v4  ;;  %5857 = vmatprep.subr.bf16.mxu1 %v7789_v5  ;;  %v7795_v9 = vld [vmem:[%s11750_s1 + $0x4c] ss:$16 sps:$4 sm:$0xff]   ;;  %v7797_v10 = vld [vmem:[%s11750_s1 + $0x40] ss:$16 sps:$4 sm:$0xff]   ;;  %v7798_v11 = vld [vmem:[%s11750_s1 + $0x48] ss:$16 sps:$4 sm:$0xff]  }
   0x5   :  { %v7799_v12 = vld [vmem:[%s11750_s1 + $0x64] ss:$16 sps:$4 sm:$0xff]   ;;  %v7801_v13 = vld [vmem:[%s11750_s1 + $0x6c] ss:$16 sps:$4 sm:$0xff]   ;;  %v7803_v14 = vld [vmem:[%s11750_s1 + $0x60] ss:$16 sps:$4 sm:$0xff]  }
   0x6   :  { %v7804_v15 = vld [vmem:[%s11750_s1 + $0x68] ss:$16 sps:$4 sm:$0xff]   ;;  %v7805_v16 = vld [vmem:[%s11750_s1 + $0x84] ss:$16 sps:$4 sm:$0xff]   ;;  %v7807_v17 = vld [vmem:[%s11750_s1 + $0x8c] ss:$16 sps:$4 sm:$0xff]  }
   0x7   :  { %5299 = vmatpush1.bf16.msra.mxu0 %v7791_v6  ;;  %5858 = vmatpush1.bf16.msra.mxu1 %v7792_v7  ;;  %v7809_v18 = vld [vmem:[%s11750_s1 + $0x80] ss:$16 sps:$4 sm:$0xff]   ;;  %v7810_v19 = vld [vmem:[%s11750_s1 + $0x88] ss:$16 sps:$4 sm:$0xff]   ;;  %v7811_v20 = vld [vmem:[%s11750_s1 + $0xa4] ss:$16 sps:$4 sm:$0xff]  }
   0x8   :  { %5300 = vmatprep.subr.bf16.mxu0 %v7793_v8  ;;  %5859 = vmatprep.subr.bf16.mxu1 %v7795_v9  ;;  %v7813_v21 = vld [vmem:[%s11750_s1 + $0xac] ss:$16 sps:$4 sm:$0xff]   ;;  %v7815_v22 = vld [vmem:[%s11750_s1 + $0xa0] ss:$16 sps:$4 sm:$0xff]   ;;  %v7816_v23 = vld [vmem:[%s11750_s1 + $0xa8] ss:$16 sps:$4 sm:$0xff]  }
   0x9   :  { %v7817_v24 = vld [vmem:[%s11750_s1 + $0xc4] ss:$16 sps:$4 sm:$0xff]   ;;  %v7819_v25 = vld [vmem:[%s11750_s1 + $0xcc] ss:$16 sps:$4 sm:$0xff]   ;;  %v7821_v26 = vld [vmem:[%s11750_s1 + $0xc0] ss:$16 sps:$4 sm:$0xff]  }
   0xa   :  { %v7822_v27 = vld [vmem:[%s11750_s1 + $0xc8] ss:$16 sps:$4 sm:$0xff]   ;;  %v7823_v28 = vld [vmem:[%s11750_s1 + $0xe4] ss:$16 sps:$4 sm:$0xff]   ;;  %v7825_v29 = vld [vmem:[%s11750_s1 + $0xec] ss:$16 sps:$4 sm:$0xff]  }
   0xb   :  { %5301 = vmatpush1.bf16.msra.mxu0 %v7797_v10  ;;  %5860 = vmatpush1.bf16.msra.mxu1 %v7798_v11  ;;  %v7827_v30 = vld [vmem:[%s11750_s1 + $0xe0] ss:$16 sps:$4 sm:$0xff]   ;;  %v7828_v31 = vld [vmem:[%s11750_s1 + $0xe8] ss:$16 sps:$4 sm:$0xff]   ;;  %v7829_v32 = vld [vmem:[%s11750_s1 + $0x104] ss:$16 sps:$4 sm:$0xff]  }
   0xc   :  { %5302 = vmatprep.subr.bf16.mxu0 %v7799_v12  ;;  %5861 = vmatprep.subr.bf16.mxu1 %v7801_v13  ;;  %v7831_v33 = vld [vmem:[%s11750_s1 + $0x10c] ss:$16 sps:$4 sm:$0xff]   ;;  %v7833_v34 = vld [vmem:[%s11750_s1 + $0x100] ss:$16 sps:$4 sm:$0xff]   ;;  %v7834_v35 = vld [vmem:[%s11750_s1 + $0x108] ss:$16 sps:$4 sm:$0xff]  }
   0xd   :  { %v7835_v36 = vld [vmem:[%s11750_s1 + $0x124] ss:$16 sps:$4 sm:$0xff]   ;;  %v7837_v37 = vld [vmem:[%s11750_s1 + $0x12c] ss:$16 sps:$4 sm:$0xff]   ;;  %v7839_v38 = vld [vmem:[%s11750_s1 + $0x120] ss:$16 sps:$4 sm:$0xff]  }
   0xe   :  { %v7840_v42 = vld [vmem:[%s11750_s1 + $0x128] ss:$16 sps:$4 sm:$0xff]   ;;  %v7841_v43 = vld [vmem:[%s11750_s1 + $0x144] ss:$16 sps:$4 sm:$0xff]   ;;  %v7843_v44 = vld [vmem:[%s11750_s1 + $0x14c] ss:$16 sps:$4 sm:$0xff]  }
   0xf   :  { %5303 = vmatpush1.bf16.msra.mxu0 %v7803_v14  ;;  %5862 = vmatpush1.bf16.msra.mxu1 %v7804_v15  ;;  %v7845_v45 = vld [vmem:[%s11750_s1 + $0x140] ss:$16 sps:$4 sm:$0xff]   ;;  %v7846_v46 = vld [vmem:[%s11750_s1 + $0x148] ss:$16 sps:$4 sm:$0xff]   ;;  %v9193_v47 = vshrl.u32 %v839_v39, 7 }
  0x10   :  { %5304 = vmatprep.subr.bf16.mxu0 %v7805_v16  ;;  %5863 = vmatprep.subr.bf16.mxu1 %v7807_v17  ;;  %v7847_v49 = vld [vmem:[%s11750_s1 + $0x164] ss:$16 sps:$4 sm:$0xff]   ;;  %v7849_v50 = vld [vmem:[%s11750_s1 + $0x16c] ss:$16 sps:$4 sm:$0xff]   ;;  %v7851_v51 = vld [vmem:[%s11750_s1 + $0x160] ss:$16 sps:$4 sm:$0xff]  }
  0x11   :  { %v7852_v52 = vld [vmem:[%s11750_s1 + $0x168] ss:$16 sps:$4 sm:$0xff]   ;;  %v7853_v53 = vld [vmem:[%s11750_s1 + $0x184] ss:$16 sps:$4 sm:$0xff]   ;;  %v9211_v54 = vsub.s32 %v901_v48, %v9193_v47  ;;  %v7855_v55 = vld [vmem:[%s11750_s1 + $0x18c] ss:$16 sps:$4 sm:$0xff]  }
  0x12   :  { %v7877_v56 = vld [vmem:[%s11749_s0] ss:$25 sps:$4 sm:$0xff]   ;;  %v7880_v57 = vld [vmem:[%s11749_s0 + $0x32] ss:$25 sps:$4 sm:$0xff]  }
  0x13   :  { %5305 = vmatpush1.bf16.msra.mxu0 %v7809_v18  ;;  %5864 = vmatpush1.bf16.msra.mxu1 %v7810_v19  ;;  %v7883_v58 = vld [vmem:[%s11749_s0 + $0x64] ss:$25 sps:$4 sm:$0xff]   ;;  %v7858_v60 = vld [vmem:[%s11750_s1 + $0x188] ss:$16 sps:$4 sm:$0xff]   ;;  %v905_v62 = vrot.slane %v7877_v56, %v9211_v54  ;;  %v919_v0 = vrot.slane %v7880_v57, %v9211_v54 }
  0x14   :  { %5306 = vmatprep.subr.bf16.mxu0 %v7811_v20  ;;  %5865 = vmatprep.subr.bf16.mxu1 %v7813_v21  ;;  %v7857_v59 = vld [vmem:[%s11750_s1 + $0x180] ss:$16 sps:$4 sm:$0xff]   ;;  %v7859_v63 = vld [vmem:[%s11750_s1 + $0x1a4] ss:$16 sps:$4 sm:$0xff]   ;;  %v933_v1 = vrot.slane %v7883_v58, %v9211_v54  ;;  %v7861_v2 = vld [vmem:[%s11750_s1 + $0x1ac] ss:$16 sps:$4 sm:$0xff]  }
  0x15   :  { %v7886_v61 = vld [vmem:[%s11749_s0 + $0x96] ss:$25 sps:$4 sm:$0xff]   ;;  %v956_v4 = vcombine.high %v905_v62, %v919_v0  ;;  %v955_v5 = vcombine.low %v905_v62, %v919_v0 }
  0x16   :  { %v947_v3 = vrot.slane %v7886_v61, %v9211_v54  ;;  %v7863_v6 = vld [vmem:[%s11750_s1 + $0x1a0] ss:$16 sps:$4 sm:$0xff]   ;;  %v7864_v7 = vld [vmem:[%s11750_s1 + $0x1a8] ss:$16 sps:$4 sm:$0xff]   ;;  %v7865_v10 = vld [vmem:[%s11750_s1 + $0x1c4] ss:$16 sps:$4 sm:$0xff]  }
  0x17   :  { %5307 = vmatpush1.bf16.msra.mxu0 %v7815_v22  ;;  %5866 = vmatpush1.bf16.msra.mxu1 %v7816_v23  ;;  %v983_v11 = vrot.slane %v956_v4, %v9211_v54  ;;  %v7867_v12 = vld [vmem:[%s11750_s1 + $0x1cc] ss:$16 sps:$4 sm:$0xff]   ;;  %v969_v14 = vrot.slane %v955_v5, %v9211_v54  ;;  %v7869_v16 = vld [vmem:[%s11750_s1 + $0x1c0] ss:$16 sps:$4 sm:$0xff]   ;;  %v7870_v17 = vld [vmem:[%s11750_s1 + $0x1c8] ss:$16 sps:$4 sm:$0xff]  }
  0x18   :  { %5308 = vmatprep.subr.bf16.mxu0 %v7817_v24  ;;  %5867 = vmatprep.subr.bf16.mxu1 %v7819_v25  ;;  %v960_v8 = vcombine.high %v933_v1, %v947_v3  ;;  %v959_v9 = vcombine.low %v933_v1, %v947_v3  ;;  %v7871_v20 = vld [vmem:[%s11750_s1 + $0x1e4] ss:$16 sps:$4 sm:$0xff]   ;;  %v7873_v21 = vld [vmem:[%s11750_s1 + $0x1ec] ss:$16 sps:$4 sm:$0xff]   ;;  %v7875_v22 = vld [vmem:[%s11750_s1 + $0x1e0] ss:$16 sps:$4 sm:$0xff]  }
  0x19   :  { %v7876_v23 = vld [vmem:[%s11750_s1 + $0x1e8] ss:$16 sps:$4 sm:$0xff]   ;;  %v7891_v24 = vld [vmem:[%s11750_s1 + $0x204] ss:$16 sps:$4 sm:$0xff]   ;;  %v7894_v25 = vld [vmem:[%s11750_s1 + $0x20c] ss:$16 sps:$4 sm:$0xff]  }
  0x1a   :  { %v1011_v13 = vrot.slane %v960_v8, %v9211_v54  ;;  %v997_v15 = vrot.slane %v959_v9, %v9211_v54  ;;  %v7912_v39 = vld [vmem:[%s11750_s1 + $0x26c] ss:$16 sps:$4 sm:$0xff]   ;;  %v7907_v40 = vld [vmem:[%s11750_s1 + $0x260] ss:$16 sps:$4 sm:$0xff]   ;;  %v7910_v41 = vld [vmem:[%s11750_s1 + $0x268] ss:$16 sps:$4 sm:$0xff]  }
  0x1b   :  { %5309 = vmatpush1.bf16.msra.mxu0 %v7821_v26  ;;  %5868 = vmatpush1.bf16.msra.mxu1 %v7822_v27  ;;  %v7889_v26 = vld [vmem:[%s11750_s1 + $0x200] ss:$16 sps:$4 sm:$0xff]   ;;  %v7892_v27 = vld [vmem:[%s11750_s1 + $0x208] ss:$16 sps:$4 sm:$0xff]   ;;  %v7924_v48 = vld [vmem:[%s11750_s1 + $0x2ac] ss:$16 sps:$4 sm:$0xff]  }
  0x1c   :  { %5310 = vmatprep.subr.bf16.mxu0 %v7823_v28  ;;  %5869 = vmatprep.subr.bf16.mxu1 %v7825_v29  ;;  %v1023_v18 = vcombine.low %v983_v11, %v1011_v13  ;;  %v9266_v19 = vcombine.high %v969_v14, %v997_v15  ;;  %v1019_v28 = vcombine.low %v969_v14, %v997_v15  ;;  %v7897_v29 = vld [vmem:[%s11750_s1 + $0x224] ss:$16 sps:$4 sm:$0xff]   ;;  %v7936_v57 = vld [vmem:[%s11750_s1 + $0x2ec] ss:$16 sps:$4 sm:$0xff]   ;;  %v7931_v58 = vld [vmem:[%s11750_s1 + $0x2e0] ss:$16 sps:$4 sm:$0xff]  }
  0x1d   :  { %v7933_v56 = vld [vmem:[%s11750_s1 + $0x2e4] ss:$16 sps:$4 sm:$0xff]   ;;  %v7942_v61 = vld [vmem:[%s11750_s1 + $0x30c] ss:$16 sps:$4 sm:$0xff]   ;;  %v7937_v62 = vld [vmem:[%s11750_s1 + $0x300] ss:$16 sps:$4 sm:$0xff]  }
  0x1e   :  { %5328 = vmatprep.mubr.bf16.mxu0 %v1023_v18  ;;  %5887 = vmatprep.mubr.bf16.mxu1 %v1023_v18  ;;  %v7945_v0 = vld [vmem:[%s11750_s1 + $0x324] ss:$16 sps:$4 sm:$0xff]   ;;  %v7948_v1 = vld [vmem:[%s11750_s1 + $0x32c] ss:$16 sps:$4 sm:$0xff]   ;;  %v7946_v3 = vld [vmem:[%s11750_s1 + $0x328] ss:$16 sps:$4 sm:$0xff]  }
  0x1f   :  { %5311 = vmatpush1.bf16.msra.mxu0 %v7827_v30  ;;  %5870 = vmatpush1.bf16.msra.mxu1 %v7828_v31  ;;  %v7900_v30 = vld [vmem:[%s11750_s1 + $0x22c] ss:$16 sps:$4 sm:$0xff]   ;;  %v1024_v31 = vcombine.high %v983_v11, %v1011_v13  ;;  %v7951_v4 = vld [vmem:[%s11750_s1 + $0x344] ss:$16 sps:$4 sm:$0xff]   ;;  %v7958_v11 = vld [vmem:[%s11750_s1 + $0x368] ss:$16 sps:$4 sm:$0xff]  }
  0x20   :  { %5312 = vmatprep.subr.bf16.mxu0 %v7829_v32  ;;  %5871 = vmatprep.subr.bf16.mxu1 %v7831_v33  ;;  %v7895_v32 = vld [vmem:[%s11750_s1 + $0x220] ss:$16 sps:$4 sm:$0xff]   ;;  %v7898_v33 = vld [vmem:[%s11750_s1 + $0x228] ss:$16 sps:$4 sm:$0xff]   ;;  %v7954_v5 = vld [vmem:[%s11750_s1 + $0x34c] ss:$16 sps:$4 sm:$0xff]  }
  0x21   :  { %v7957_v8 = vld [vmem:[%s11750_s1 + $0x364] ss:$16 sps:$4 sm:$0xff]   ;;  %v7960_v9 = vld [vmem:[%s11750_s1 + $0x36c] ss:$16 sps:$4 sm:$0xff]   ;;  %v7961_v14 = vld [vmem:[%s11750_s1 + $0x380] ss:$16 sps:$4 sm:$0xff]  }
  0x22   :  { %v7966_v13 = vld [vmem:[%s11750_s1 + $0x38c] ss:$16 sps:$4 sm:$0xff]   ;;  %v7964_v15 = vld [vmem:[%s11750_s1 + $0x388] ss:$16 sps:$4 sm:$0xff]   ;;  %v7969_v18 = vld [vmem:[%s11750_s1 + $0x3a4] ss:$16 sps:$4 sm:$0xff]  }
  0x23   :  { %5313 = vmatpush1.bf16.msra.mxu0 %v7833_v34  ;;  %5872 = vmatpush1.bf16.msra.mxu1 %v7834_v35  ;;  %v7903_v34 = vld [vmem:[%s11750_s1 + $0x244] ss:$16 sps:$4 sm:$0xff]   ;;  %v7906_v35 = vld [vmem:[%s11750_s1 + $0x24c] ss:$16 sps:$4 sm:$0xff]  }
  0x24   :  { %5314 = vmatprep.subr.bf16.mxu0 %v7835_v36  ;;  %5873 = vmatprep.subr.bf16.mxu1 %v7837_v37  ;;  %v7901_v36 = vld [vmem:[%s11750_s1 + $0x240] ss:$16 sps:$4 sm:$0xff]   ;;  %v7904_v37 = vld [vmem:[%s11750_s1 + $0x248] ss:$16 sps:$4 sm:$0xff]  }
  0x27   :  { %5315 = vmatpush1.bf16.msra.mxu0 %v7839_v38  ;;  %5874 = vmatpush1.bf16.msra.mxu1 %v7840_v42  ;;  %v7909_v38 = vld [vmem:[%s11750_s1 + $0x264] ss:$16 sps:$4 sm:$0xff]  }
  0x28   :  { %5316 = vmatprep.subr.bf16.mxu0 %v7841_v43  ;;  %5875 = vmatprep.subr.bf16.mxu1 %v7843_v44  ;;  %v7915_v42 = vld [vmem:[%s11750_s1 + $0x284] ss:$16 sps:$4 sm:$0xff]   ;;  %v7918_v43 = vld [vmem:[%s11750_s1 + $0x28c] ss:$16 sps:$4 sm:$0xff]   ;;  %v7913_v44 = vld [vmem:[%s11750_s1 + $0x280] ss:$16 sps:$4 sm:$0xff]  }
  0x2b   :  { %5317 = vmatpush1.bf16.msra.mxu0 %v7845_v45  ;;  %5876 = vmatpush1.bf16.msra.mxu1 %v7846_v46  ;;  %v7916_v45 = vld [vmem:[%s11750_s1 + $0x288] ss:$16 sps:$4 sm:$0xff]   ;;  %v7921_v46 = vld [vmem:[%s11750_s1 + $0x2a4] ss:$16 sps:$4 sm:$0xff]  }
  0x2c   :  { %5318 = vmatprep.subr.bf16.mxu0 %v7847_v49  ;;  %5877 = vmatprep.subr.bf16.mxu1 %v7849_v50  ;;  %v7919_v49 = vld [vmem:[%s11750_s1 + $0x2a0] ss:$16 sps:$4 sm:$0xff]   ;;  %v7922_v50 = vld [vmem:[%s11750_s1 + $0x2a8] ss:$16 sps:$4 sm:$0xff]  }
  0x2f   :  { %5319 = vmatpush1.bf16.msra.mxu0 %v7851_v51  ;;  %5878 = vmatpush1.bf16.msra.mxu1 %v7852_v52  ;;  %v7927_v51 = vld [vmem:[%s11750_s1 + $0x2c4] ss:$16 sps:$4 sm:$0xff]   ;;  %v7930_v52 = vld [vmem:[%s11750_s1 + $0x2cc] ss:$16 sps:$4 sm:$0xff]  }
  0x30   :  { %5320 = vmatprep.subr.bf16.mxu0 %v7853_v53  ;;  %5879 = vmatprep.subr.bf16.mxu1 %v7855_v55  ;;  %v7925_v53 = vld [vmem:[%s11750_s1 + $0x2c0] ss:$16 sps:$4 sm:$0xff]   ;;  %v7928_v55 = vld [vmem:[%s11750_s1 + $0x2c8] ss:$16 sps:$4 sm:$0xff]  }
  0x33   :  { %5321 = vmatpush1.bf16.msra.mxu0 %v7857_v59  ;;  %5880 = vmatpush1.bf16.msra.mxu1 %v7858_v60  ;;  %v7934_v59 = vld [vmem:[%s11750_s1 + $0x2e8] ss:$16 sps:$4 sm:$0xff]   ;;  %v7939_v60 = vld [vmem:[%s11750_s1 + $0x304] ss:$16 sps:$4 sm:$0xff]  }
  0x34   :  { %5322 = vmatprep.subr.bf16.mxu0 %v7859_v63  ;;  %5881 = vmatprep.subr.bf16.mxu1 %v7861_v2  ;;  %v7940_v63 = vld [vmem:[%s11750_s1 + $0x308] ss:$16 sps:$4 sm:$0xff]   ;;  %v7943_v2 = vld [vmem:[%s11750_s1 + $0x320] ss:$16 sps:$4 sm:$0xff]  }
  0x37   :  { %5323 = vmatpush1.bf16.msra.mxu0 %v7863_v6  ;;  %5882 = vmatpush1.bf16.msra.mxu1 %v7864_v7  ;;  %v7949_v6 = vld [vmem:[%s11750_s1 + $0x340] ss:$16 sps:$4 sm:$0xff]   ;;  %v7952_v7 = vld [vmem:[%s11750_s1 + $0x348] ss:$16 sps:$4 sm:$0xff]  }
  0x38   :  { %5324 = vmatprep.subr.bf16.mxu0 %v7865_v10  ;;  %5883 = vmatprep.subr.bf16.mxu1 %v7867_v12  ;;  %v7955_v10 = vld [vmem:[%s11750_s1 + $0x360] ss:$16 sps:$4 sm:$0xff]   ;;  %v7963_v12 = vld [vmem:[%s11750_s1 + $0x384] ss:$16 sps:$4 sm:$0xff]  }
  0x3b   :  { %5325 = vmatpush1.bf16.msra.mxu0 %v7869_v16  ;;  %5884 = vmatpush1.bf16.msra.mxu1 %v7870_v17  ;;  %v7879_v16 = vld [vmem:[%s11749_s0 + $0x4] ss:$25 sps:$4 sm:$0xff]   ;;  %v7882_v17 = vld [vmem:[%s11749_s0 + $0x36] ss:$25 sps:$4 sm:$0xff]  }
  0x3c   :  { %5326 = vmatprep.subr.bf16.mxu0 %v7871_v20  ;;  %5885 = vmatprep.subr.bf16.mxu1 %v7873_v21  ;;  %v7972_v20 = vld [vmem:[%s11750_s1 + $0x3ac] ss:$16 sps:$4 sm:$0xff]   ;;  %v7885_v21 = vld [vmem:[%s11749_s0 + $0x68] ss:$25 sps:$4 sm:$0xff]  }
  0x3f   :  { %5327 = vmatpush1.bf16.msra.mxu0 %v7875_v22  ;;  %5886 = vmatpush1.bf16.msra.mxu1 %v7876_v23  ;;  %v7888_v22 = vld [vmem:[%s11749_s0 + $0x9a] ss:$25 sps:$4 sm:$0xff]  }
  0x40   :  { %5339 = vmatprep.subr.bf16.mxu0 %v7891_v24  ;;  %5898 = vmatprep.subr.bf16.mxu1 %v7894_v25  ;;  %v7967_v23 = vld [vmem:[%s11750_s1 + $0x3a0] ss:$16 sps:$4 sm:$0xff]   ;;  %v7970_v24 = vld [vmem:[%s11750_s1 + $0x3a8] ss:$16 sps:$4 sm:$0xff]   ;;  %v7975_v25 = vld [vmem:[%s11750_s1 + $0x3c4] ss:$16 sps:$4 sm:$0xff]  }
  0x42   :  { %5329 = vmatmul.mubr.bf16.vlgmr.msra.gmra.mrb[0].mxu0 %v1019_v28  ;;  %5888 = vmatmul.mubr.bf16.vlgmr.msra.gmra.mrb[0].mxu1 %v1019_v28  ;;  %v926_v28 = vrot.slane %v7882_v17, %v9211_v54  ;;  %v8035_v17 = vld [vmem:[%s11750_s1 + $0x504] ss:$16 sps:$4 sm:$0xff]  }
  0x43   :  { %5340 = vmatpush1.bf16.msra.mxu0 %v7889_v26  ;;  %5899 = vmatpush1.bf16.msra.mxu1 %v7892_v27  ;;  %v7978_v26 = vld [vmem:[%s11750_s1 + $0x3cc] ss:$16 sps:$4 sm:$0xff]   ;;  %v912_v27 = vrot.slane %v7879_v16, %v9211_v54  ;;  %v8030_v16 = vld [vmem:[%s11750_s1 + $0x4e8] ss:$16 sps:$4 sm:$0xff]  }
  0x44   :  { %5341 = vmatprep.subr.bf16.mxu0 %v7897_v29  ;;  %5900 = vmatprep.subr.bf16.mxu1 %v7900_v30  ;;  %v940_v29 = vrot.slane %v7885_v21, %v9211_v54  ;;  %v954_v30 = vrot.slane %v7888_v22, %v9211_v54  ;;  %v8036_v21 = vld [vmem:[%s11750_s1 + $0x508] ss:$16 sps:$4 sm:$0xff]   ;;  %v8041_v22 = vld [vmem:[%s11750_s1 + $0x524] ss:$16 sps:$4 sm:$0xff]  }
  0x45   :  { %5371 = vmatprep.mubr.bf16.mxu0 %v1024_v31  ;;  %5930 = vmatprep.mubr.bf16.mxu1 %v1024_v31  ;;  %v7973_v31 = vld [vmem:[%s11750_s1 + $0x3c0] ss:$16 sps:$4 sm:$0xff]  }
  0x47   :  { %5342 = vmatpush1.bf16.msra.mxu0 %v7895_v32  ;;  %5901 = vmatpush1.bf16.msra.mxu1 %v7898_v33  ;;  %v7976_v32 = vld [vmem:[%s11750_s1 + $0x3c8] ss:$16 sps:$4 sm:$0xff]   ;;  %v7981_v33 = vld [vmem:[%s11750_s1 + $0x3e4] ss:$16 sps:$4 sm:$0xff]  }
  0x48   :  { %5343 = vmatprep.subr.bf16.mxu0 %v7903_v34  ;;  %5902 = vmatprep.subr.bf16.mxu1 %v7906_v35  ;;  %v7984_v34 = vld [vmem:[%s11750_s1 + $0x3ec] ss:$16 sps:$4 sm:$0xff]   ;;  %v958_v35 = vcombine.high %v912_v27, %v926_v28 }
  0x4b   :  { %5344 = vmatpush1.bf16.msra.mxu0 %v7901_v36  ;;  %5903 = vmatpush1.bf16.msra.mxu1 %v7904_v37  ;;  %v962_v36 = vcombine.high %v940_v29, %v954_v30  ;;  %v7979_v37 = vld [vmem:[%s11750_s1 + $0x3e0] ss:$16 sps:$4 sm:$0xff]  }
  0x4c   :  { %5345 = vmatprep.subr.bf16.mxu0 %v7909_v38  ;;  %5904 = vmatprep.subr.bf16.mxu1 %v7912_v39  ;;  %v7982_v38 = vld [vmem:[%s11750_s1 + $0x3e8] ss:$16 sps:$4 sm:$0xff]   ;;  %v957_v39 = vcombine.low %v912_v27, %v926_v28  ;;  %v8050_v27 = vld [vmem:[%s11750_s1 + $0x54c] ss:$16 sps:$4 sm:$0xff]   ;;  %v8045_v28 = vld [vmem:[%s11750_s1 + $0x540] ss:$16 sps:$4 sm:$0xff]  }
  0x4f   :  { %5346 = vmatpush1.bf16.msra.mxu0 %v7907_v40  ;;  %5905 = vmatpush1.bf16.msra.mxu1 %v7910_v41  ;;  %v961_v40 = vcombine.low %v940_v29, %v954_v30  ;;  %v7987_v41 = vld [vmem:[%s11750_s1 + $0x404] ss:$16 sps:$4 sm:$0xff]   ;;  %v8048_v29 = vld [vmem:[%s11750_s1 + $0x548] ss:$16 sps:$4 sm:$0xff]  }
  0x50   :  { %5347 = vmatprep.subr.bf16.mxu0 %v7915_v42  ;;  %5906 = vmatprep.subr.bf16.mxu1 %v7918_v43  ;;  %v7990_v42 = vld [vmem:[%s11750_s1 + $0x40c] ss:$16 sps:$4 sm:$0xff]   ;;  %v990_v43 = vrot.slane %v958_v35, %v9211_v54  ;;  %v8053_v30 = vld [vmem:[%s11750_s1 + $0x564] ss:$16 sps:$4 sm:$0xff]  }
  0x51   :  { %v8062_v35 = vld [vmem:[%s11750_s1 + $0x58c] ss:$16 sps:$4 sm:$0xff]  }
  0x53   :  { %5348 = vmatpush1.bf16.msra.mxu0 %v7913_v44  ;;  %5907 = vmatpush1.bf16.msra.mxu1 %v7916_v45  ;;  %v1018_v44 = vrot.slane %v962_v36, %v9211_v54  ;;  %v7985_v45 = vld [vmem:[%s11750_s1 + $0x400] ss:$16 sps:$4 sm:$0xff]  }
  0x54   :  { %5349 = vmatprep.subr.bf16.mxu0 %v7921_v46  ;;  %5908 = vmatprep.subr.bf16.mxu1 %v7924_v48  ;;  %v7988_v46 = vld [vmem:[%s11750_s1 + $0x408] ss:$16 sps:$4 sm:$0xff]   ;;  %v9503_v48 = vrot.slane %v957_v39, %v9211_v54  ;;  %v8057_v36 = vld [vmem:[%s11750_s1 + $0x580] ss:$16 sps:$4 sm:$0xff]   ;;  %v8068_v39 = vld [vmem:[%s11750_s1 + $0x5ac] ss:$16 sps:$4 sm:$0xff]  }
  0x57   :  { %5350 = vmatpush1.bf16.msra.mxu0 %v7919_v49  ;;  %5909 = vmatpush1.bf16.msra.mxu1 %v7922_v50  ;;  %v9506_v49 = vrot.slane %v961_v40, %v9211_v54  ;;  %v7993_v50 = vld [vmem:[%s11750_s1 + $0x424] ss:$16 sps:$4 sm:$0xff]   ;;  %v8063_v40 = vld [vmem:[%s11750_s1 + $0x5a0] ss:$16 sps:$4 sm:$0xff]  }
  0x58   :  { %5351 = vmatprep.subr.bf16.mxu0 %v7927_v51  ;;  %5910 = vmatprep.subr.bf16.mxu1 %v7930_v52  ;;  %v9511_v51 = vcombine.high %v990_v43, %v1018_v44  ;;  %v7996_v52 = vld [vmem:[%s11750_s1 + $0x42c] ss:$16 sps:$4 sm:$0xff]  }
  0x5b   :  { %5352 = vmatpush1.bf16.msra.mxu0 %v7925_v53  ;;  %5911 = vmatpush1.bf16.msra.mxu1 %v7928_v55  ;;  %v9518_v53 = vcombine.high %v9503_v48, %v9506_v49  ;;  %v1025_v55 = vcombine.low %v990_v43, %v1018_v44  ;;  %v8074_v43 = vld [vmem:[%s11750_s1 + $0x5cc] ss:$16 sps:$4 sm:$0xff]   ;;  %v8069_v44 = vld [vmem:[%s11750_s1 + $0x5c0] ss:$16 sps:$4 sm:$0xff]  }
  0x5c   :  { %5353 = vmatprep.subr.bf16.mxu0 %v7933_v56  ;;  %5912 = vmatprep.subr.bf16.mxu1 %v7936_v57  ;;  %v7991_v56 = vld [vmem:[%s11750_s1 + $0x420] ss:$16 sps:$4 sm:$0xff]   ;;  %v7994_v57 = vld [vmem:[%s11750_s1 + $0x428] ss:$16 sps:$4 sm:$0xff]  }
  0x5f   :  { %5354 = vmatpush1.bf16.msra.mxu0 %v7931_v58  ;;  %5913 = vmatpush1.bf16.msra.mxu1 %v7934_v59  ;;  %v7999_v58 = vld [vmem:[%s11750_s1 + $0x444] ss:$16 sps:$4 sm:$0xff]   ;;  %v7997_v59 = vld [vmem:[%s11750_s1 + $0x440] ss:$16 sps:$4 sm:$0xff]  }
  0x60   :  { %5355 = vmatprep.subr.bf16.mxu0 %v7939_v60  ;;  %5914 = vmatprep.subr.bf16.mxu1 %v7942_v61  ;;  %v8000_v60 = vld [vmem:[%s11750_s1 + $0x448] ss:$16 sps:$4 sm:$0xff]   ;;  %v8005_v61 = vld [vmem:[%s11750_s1 + $0x464] ss:$16 sps:$4 sm:$0xff]  }
  0x63   :  { %5356 = vmatpush1.bf16.msra.mxu0 %v7937_v62  ;;  %5915 = vmatpush1.bf16.msra.mxu1 %v7940_v63  ;;  %v8008_v62 = vld [vmem:[%s11750_s1 + $0x46c] ss:$16 sps:$4 sm:$0xff]   ;;  %v8003_v63 = vld [vmem:[%s11750_s1 + $0x460] ss:$16 sps:$4 sm:$0xff]  }
  0x64   :  { %5357 = vmatprep.subr.bf16.mxu0 %v7945_v0  ;;  %5916 = vmatprep.subr.bf16.mxu1 %v7948_v1  ;;  %v8006_v0 = vld [vmem:[%s11750_s1 + $0x468] ss:$16 sps:$4 sm:$0xff]   ;;  %v8011_v1 = vld [vmem:[%s11750_s1 + $0x484] ss:$16 sps:$4 sm:$0xff]  }
  0x67   :  { %5358 = vmatpush1.bf16.msra.mxu0 %v7943_v2  ;;  %5917 = vmatpush1.bf16.msra.mxu1 %v7946_v3  ;;  %v8014_v2 = vld [vmem:[%s11750_s1 + $0x48c] ss:$16 sps:$4 sm:$0xff]   ;;  %v8009_v3 = vld [vmem:[%s11750_s1 + $0x480] ss:$16 sps:$4 sm:$0xff]  }
  0x68   :  { %5359 = vmatprep.subr.bf16.mxu0 %v7951_v4  ;;  %5918 = vmatprep.subr.bf16.mxu1 %v7954_v5  ;;  %v8012_v4 = vld [vmem:[%s11750_s1 + $0x488] ss:$16 sps:$4 sm:$0xff]   ;;  %v8017_v5 = vld [vmem:[%s11750_s1 + $0x4a4] ss:$16 sps:$4 sm:$0xff]  }
  0x6b   :  { %5360 = vmatpush1.bf16.msra.mxu0 %v7949_v6  ;;  %5919 = vmatpush1.bf16.msra.mxu1 %v7952_v7  ;;  %v8020_v6 = vld [vmem:[%s11750_s1 + $0x4ac] ss:$16 sps:$4 sm:$0xff]   ;;  %v8015_v7 = vld [vmem:[%s11750_s1 + $0x4a0] ss:$16 sps:$4 sm:$0xff]  }
  0x6c   :  { %5361 = vmatprep.subr.bf16.mxu0 %v7957_v8  ;;  %5920 = vmatprep.subr.bf16.mxu1 %v7960_v9  ;;  %v8018_v8 = vld [vmem:[%s11750_s1 + $0x4a8] ss:$16 sps:$4 sm:$0xff]   ;;  %v8023_v9 = vld [vmem:[%s11750_s1 + $0x4c4] ss:$16 sps:$4 sm:$0xff]  }
  0x6f   :  { %5362 = vmatpush1.bf16.msra.mxu0 %v7955_v10  ;;  %5921 = vmatpush1.bf16.msra.mxu1 %v7958_v11  ;;  %v8026_v10 = vld [vmem:[%s11750_s1 + $0x4cc] ss:$16 sps:$4 sm:$0xff]   ;;  %v8021_v11 = vld [vmem:[%s11750_s1 + $0x4c0] ss:$16 sps:$4 sm:$0xff]  }
  0x70   :  { %5363 = vmatprep.subr.bf16.mxu0 %v7963_v12  ;;  %5922 = vmatprep.subr.bf16.mxu1 %v7966_v13  ;;  %v8024_v12 = vld [vmem:[%s11750_s1 + $0x4c8] ss:$16 sps:$4 sm:$0xff]   ;;  %v8029_v13 = vld [vmem:[%s11750_s1 + $0x4e4] ss:$16 sps:$4 sm:$0xff]  }
  0x73   :  { %5364 = vmatpush1.bf16.msra.mxu0 %v7961_v14  ;;  %5923 = vmatpush1.bf16.msra.mxu1 %v7964_v15  ;;  %v8032_v14 = vld [vmem:[%s11750_s1 + $0x4ec] ss:$16 sps:$4 sm:$0xff]   ;;  %v8027_v15 = vld [vmem:[%s11750_s1 + $0x4e0] ss:$16 sps:$4 sm:$0xff]  }
  0x74   :  { %5365 = vmatprep.subr.bf16.mxu0 %v7969_v18  ;;  %5924 = vmatprep.subr.bf16.mxu1 %v7972_v20  ;;  %v8038_v18 = vld [vmem:[%s11750_s1 + $0x50c] ss:$16 sps:$4 sm:$0xff]   ;;  %v8033_v20 = vld [vmem:[%s11750_s1 + $0x500] ss:$16 sps:$4 sm:$0xff]  }
  0x77   :  { %5366 = vmatpush1.bf16.msra.mxu0 %v7967_v23  ;;  %5925 = vmatpush1.bf16.msra.mxu1 %v7970_v24  ;;  %v8044_v23 = vld [vmem:[%s11750_s1 + $0x52c] ss:$16 sps:$4 sm:$0xff]   ;;  %v8039_v24 = vld [vmem:[%s11750_s1 + $0x520] ss:$16 sps:$4 sm:$0xff]  }
  0x78   :  { %5367 = vmatprep.subr.bf16.mxu0 %v7975_v25  ;;  %5926 = vmatprep.subr.bf16.mxu1 %v7978_v26  ;;  %v8042_v25 = vld [vmem:[%s11750_s1 + $0x528] ss:$16 sps:$4 sm:$0xff]   ;;  %v8047_v26 = vld [vmem:[%s11750_s1 + $0x544] ss:$16 sps:$4 sm:$0xff]  }
  0x7b   :  { %5368 = vmatpush1.bf16.msra.mxu0 %v7973_v31  ;;  %5927 = vmatpush1.bf16.msra.mxu1 %v7976_v32  ;;  %v8056_v31 = vld [vmem:[%s11750_s1 + $0x56c] ss:$16 sps:$4 sm:$0xff]   ;;  %v8051_v32 = vld [vmem:[%s11750_s1 + $0x560] ss:$16 sps:$4 sm:$0xff]  }
  0x7c   :  { %5369 = vmatprep.subr.bf16.mxu0 %v7981_v33  ;;  %5928 = vmatprep.subr.bf16.mxu1 %v7984_v34  ;;  %v8054_v33 = vld [vmem:[%s11750_s1 + $0x568] ss:$16 sps:$4 sm:$0xff]   ;;  %v8059_v34 = vld [vmem:[%s11750_s1 + $0x584] ss:$16 sps:$4 sm:$0xff]  }
  0x7f   :  { %5370 = vmatpush1.bf16.msra.mxu0 %v7979_v37  ;;  %5929 = vmatpush1.bf16.msra.mxu1 %v7982_v38  ;;  %v8060_v37 = vld [vmem:[%s11750_s1 + $0x588] ss:$16 sps:$4 sm:$0xff]   ;;  %v8065_v38 = vld [vmem:[%s11750_s1 + $0x5a4] ss:$16 sps:$4 sm:$0xff]  }
  0x80   :  { %5382 = vmatprep.subr.bf16.mxu0 %v7987_v41  ;;  %5941 = vmatprep.subr.bf16.mxu1 %v7990_v42  ;;  %v8066_v41 = vld [vmem:[%s11750_s1 + $0x5a8] ss:$16 sps:$4 sm:$0xff]   ;;  %v8071_v42 = vld [vmem:[%s11750_s1 + $0x5c4] ss:$16 sps:$4 sm:$0xff]  }
  0x82   :  { %5372 = vmatmul.mubr.bf16.vlgmr.msra.gmra.mrb[0].mxu0 %v9266_v19  ;;  %5931 = vmatmul.mubr.bf16.vlgmr.msra.gmra.mrb[0].mxu1 %v9266_v19  ;;  %v8002_v19 = vld [vmem:[%s11750_s1 + $0x44c] ss:$16 sps:$4 sm:$0xff]  }
  0x83   :  { %5383 = vmatpush1.bf16.msra.mxu0 %v7985_v45  ;;  %5942 = vmatpush1.bf16.msra.mxu1 %v7988_v46  ;;  %v8072_v45 = vld [vmem:[%s11750_s1 + $0x5c8] ss:$16 sps:$4 sm:$0xff]   ;;  %v8077_v46 = vld [vmem:[%s11750_s1 + $0x5e4] ss:$16 sps:$4 sm:$0xff]  }
  0x84   :  { %5384 = vmatprep.subr.bf16.mxu0 %v7993_v50  ;;  %5943 = vmatprep.subr.bf16.mxu1 %v7996_v52  ;;  %v8080_v50 = vld [vmem:[%s11750_s1 + $0x5ec] ss:$16 sps:$4 sm:$0xff]   ;;  %v8075_v52 = vld [vmem:[%s11750_s1 + $0x5e0] ss:$16 sps:$4 sm:$0xff]  }
  0x85   :  { %5414 = vmatprep.mubr.bf16.mxu0 %v1025_v55  ;;  %5973 = vmatprep.mubr.bf16.mxu1 %v1025_v55  ;;  %v8078_v55 = vld [vmem:[%s11750_s1 + $0x5e8] ss:$16 sps:$4 sm:$0xff]  }
  0x87   :  { %5385 = vmatpush1.bf16.msra.mxu0 %v7991_v56  ;;  %5944 = vmatpush1.bf16.msra.mxu1 %v7994_v57  ;;  %v8083_v56 = vld [vmem:[%s11750_s1 + $0x604] ss:$16 sps:$4 sm:$0xff]   ;;  %v8086_v57 = vld [vmem:[%s11750_s1 + $0x60c] ss:$16 sps:$4 sm:$0xff]  }
  0x88   :  { %5386 = vmatprep.subr.bf16.mxu0 %v7999_v58  ;;  %5945 = vmatprep.subr.bf16.mxu1 %v8002_v19  ;;  %v8081_v58 = vld [vmem:[%s11750_s1 + $0x600] ss:$16 sps:$4 sm:$0xff]   ;;  %v8084_v19 = vld [vmem:[%s11750_s1 + $0x608] ss:$16 sps:$4 sm:$0xff]  }
  0x8b   :  { %5387 = vmatpush1.bf16.msra.mxu0 %v7997_v59  ;;  %5946 = vmatpush1.bf16.msra.mxu1 %v8000_v60  ;;  %v1021_v59 = vcombine.low %v9503_v48, %v9506_v49  ;;  %v8089_v60 = vld [vmem:[%s11750_s1 + $0x624] ss:$16 sps:$4 sm:$0xff]   ;;  %v8090_v48 = vld [vmem:[%s11750_s1 + $0x628] ss:$16 sps:$4 sm:$0xff]  }
  0x8c   :  { %5388 = vmatprep.subr.bf16.mxu0 %v8005_v61  ;;  %5947 = vmatprep.subr.bf16.mxu1 %v8008_v62  ;;  %v8092_v61 = vld [vmem:[%s11750_s1 + $0x62c] ss:$16 sps:$4 sm:$0xff]   ;;  %v8087_v62 = vld [vmem:[%s11750_s1 + $0x620] ss:$16 sps:$4 sm:$0xff]   ;;  %v8095_v49 = vld [vmem:[%s11750_s1 + $0x644] ss:$16 sps:$4 sm:$0xff]  }
  0x8f   :  { %5389 = vmatpush1.bf16.msra.mxu0 %v8003_v63  ;;  %5948 = vmatpush1.bf16.msra.mxu1 %v8006_v0  ;;  %v8098_v63 = vld [vmem:[%s11750_s1 + $0x64c] ss:$16 sps:$4 sm:$0xff]   ;;  %v8093_v0 = vld [vmem:[%s11750_s1 + $0x640] ss:$16 sps:$4 sm:$0xff]  }
  0x90   :  { %5390 = vmatprep.subr.bf16.mxu0 %v8011_v1  ;;  %5949 = vmatprep.subr.bf16.mxu1 %v8014_v2  ;;  %v8096_v1 = vld [vmem:[%s11750_s1 + $0x648] ss:$16 sps:$4 sm:$0xff]   ;;  %v8101_v2 = vld [vmem:[%s11750_s1 + $0x664] ss:$16 sps:$4 sm:$0xff]  }
  0x93   :  { %5391 = vmatpush1.bf16.msra.mxu0 %v8009_v3  ;;  %5950 = vmatpush1.bf16.msra.mxu1 %v8012_v4  ;;  %v8099_v3 = vld [vmem:[%s11750_s1 + $0x660] ss:$16 sps:$4 sm:$0xff]   ;;  %v8102_v4 = vld [vmem:[%s11750_s1 + $0x668] ss:$16 sps:$4 sm:$0xff]  }
  0x94   :  { %5392 = vmatprep.subr.bf16.mxu0 %v8017_v5  ;;  %5951 = vmatprep.subr.bf16.mxu1 %v8020_v6  ;;  %v8107_v5 = vld [vmem:[%s11750_s1 + $0x684] ss:$16 sps:$4 sm:$0xff]   ;;  %v8110_v6 = vld [vmem:[%s11750_s1 + $0x68c] ss:$16 sps:$4 sm:$0xff]  }
  0x97   :  { %5393 = vmatpush1.bf16.msra.mxu0 %v8015_v7  ;;  %5952 = vmatpush1.bf16.msra.mxu1 %v8018_v8  ;;  %v8105_v7 = vld [vmem:[%s11750_s1 + $0x680] ss:$16 sps:$4 sm:$0xff]   ;;  %v8108_v8 = vld [vmem:[%s11750_s1 + $0x688] ss:$16 sps:$4 sm:$0xff]  }
  0x98   :  { %5394 = vmatprep.subr.bf16.mxu0 %v8023_v9  ;;  %5953 = vmatprep.subr.bf16.mxu1 %v8026_v10  ;;  %v8113_v9 = vld [vmem:[%s11750_s1 + $0x6a4] ss:$16 sps:$4 sm:$0xff]   ;;  %v8116_v10 = vld [vmem:[%s11750_s1 + $0x6ac] ss:$16 sps:$4 sm:$0xff]  }
  0x9b   :  { %5395 = vmatpush1.bf16.msra.mxu0 %v8021_v11  ;;  %5954 = vmatpush1.bf16.msra.mxu1 %v8024_v12  ;;  %v8111_v11 = vld [vmem:[%s11750_s1 + $0x6a0] ss:$16 sps:$4 sm:$0xff]   ;;  %v8114_v12 = vld [vmem:[%s11750_s1 + $0x6a8] ss:$16 sps:$4 sm:$0xff]  }
  0x9c   :  { %5396 = vmatprep.subr.bf16.mxu0 %v8029_v13  ;;  %5955 = vmatprep.subr.bf16.mxu1 %v8032_v14  ;;  %v8119_v13 = vld [vmem:[%s11750_s1 + $0x6c4] ss:$16 sps:$4 sm:$0xff]   ;;  %v8122_v14 = vld [vmem:[%s11750_s1 + $0x6cc] ss:$16 sps:$4 sm:$0xff]  }
  0x9f   :  { %5397 = vmatpush1.bf16.msra.mxu0 %v8027_v15  ;;  %5956 = vmatpush1.bf16.msra.mxu1 %v8030_v16  ;;  %v8117_v15 = vld [vmem:[%s11750_s1 + $0x6c0] ss:$16 sps:$4 sm:$0xff]   ;;  %v8120_v16 = vld [vmem:[%s11750_s1 + $0x6c8] ss:$16 sps:$4 sm:$0xff]  }
  0xa0   :  { %5398 = vmatprep.subr.bf16.mxu0 %v8035_v17  ;;  %5957 = vmatprep.subr.bf16.mxu1 %v8038_v18  ;;  %v8125_v17 = vld [vmem:[%s11750_s1 + $0x6e4] ss:$16 sps:$4 sm:$0xff]   ;;  %v8128_v18 = vld [vmem:[%s11750_s1 + $0x6ec] ss:$16 sps:$4 sm:$0xff]  }
  0xa3   :  { %5399 = vmatpush1.bf16.msra.mxu0 %v8033_v20  ;;  %5958 = vmatpush1.bf16.msra.mxu1 %v8036_v21  ;;  %v8123_v20 = vld [vmem:[%s11750_s1 + $0x6e0] ss:$16 sps:$4 sm:$0xff]   ;;  %v8126_v21 = vld [vmem:[%s11750_s1 + $0x6e8] ss:$16 sps:$4 sm:$0xff]  }
  0xa4   :  { %5400 = vmatprep.subr.bf16.mxu0 %v8041_v22  ;;  %5959 = vmatprep.subr.bf16.mxu1 %v8044_v23  ;;  %v8131_v22 = vld [vmem:[%s11750_s1 + $0x704] ss:$16 sps:$4 sm:$0xff]   ;;  %v8134_v23 = vld [vmem:[%s11750_s1 + $0x70c] ss:$16 sps:$4 sm:$0xff]  }
  0xa7   :  { %5401 = vmatpush1.bf16.msra.mxu0 %v8039_v24  ;;  %5960 = vmatpush1.bf16.msra.mxu1 %v8042_v25  ;;  %v8129_v24 = vld [vmem:[%s11750_s1 + $0x700] ss:$16 sps:$4 sm:$0xff]   ;;  %v8132_v25 = vld [vmem:[%s11750_s1 + $0x708] ss:$16 sps:$4 sm:$0xff]  }
  0xa8   :  { %5402 = vmatprep.subr.bf16.mxu0 %v8047_v26  ;;  %5961 = vmatprep.subr.bf16.mxu1 %v8050_v27  ;;  %v8137_v26 = vld [vmem:[%s11750_s1 + $0x724] ss:$16 sps:$4 sm:$0xff]   ;;  %v8140_v27 = vld [vmem:[%s11750_s1 + $0x72c] ss:$16 sps:$4 sm:$0xff]  }
  0xab   :  { %5403 = vmatpush1.bf16.msra.mxu0 %v8045_v28  ;;  %5962 = vmatpush1.bf16.msra.mxu1 %v8048_v29  ;;  %v8135_v28 = vld [vmem:[%s11750_s1 + $0x720] ss:$16 sps:$4 sm:$0xff]   ;;  %v8138_v29 = vld [vmem:[%s11750_s1 + $0x728] ss:$16 sps:$4 sm:$0xff]  }
  0xac   :  { %5404 = vmatprep.subr.bf16.mxu0 %v8053_v30  ;;  %5963 = vmatprep.subr.bf16.mxu1 %v8056_v31  ;;  %v8143_v30 = vld [vmem:[%s11750_s1 + $0x744] ss:$16 sps:$4 sm:$0xff]   ;;  %v8146_v31 = vld [vmem:[%s11750_s1 + $0x74c] ss:$16 sps:$4 sm:$0xff]  }
  0xaf   :  { %5405 = vmatpush1.bf16.msra.mxu0 %v8051_v32  ;;  %5964 = vmatpush1.bf16.msra.mxu1 %v8054_v33  ;;  %v8141_v32 = vld [vmem:[%s11750_s1 + $0x740] ss:$16 sps:$4 sm:$0xff]   ;;  %v8144_v33 = vld [vmem:[%s11750_s1 + $0x748] ss:$16 sps:$4 sm:$0xff]  }
  0xb0   :  { %5406 = vmatprep.subr.bf16.mxu0 %v8059_v34  ;;  %5965 = vmatprep.subr.bf16.mxu1 %v8062_v35  ;;  %v8149_v34 = vld [vmem:[%s11750_s1 + $0x764] ss:$16 sps:$4 sm:$0xff]   ;;  %v8152_v35 = vld [vmem:[%s11750_s1 + $0x76c] ss:$16 sps:$4 sm:$0xff]  }
  0xb3   :  { %5407 = vmatpush1.bf16.msra.mxu0 %v8057_v36  ;;  %5966 = vmatpush1.bf16.msra.mxu1 %v8060_v37  ;;  %v8147_v36 = vld [vmem:[%s11750_s1 + $0x760] ss:$16 sps:$4 sm:$0xff]   ;;  %v8150_v37 = vld [vmem:[%s11750_s1 + $0x768] ss:$16 sps:$4 sm:$0xff]  }
  0xb4   :  { %5408 = vmatprep.subr.bf16.mxu0 %v8065_v38  ;;  %5967 = vmatprep.subr.bf16.mxu1 %v8068_v39  ;;  %v8155_v38 = vld [vmem:[%s11750_s1 + $0x784] ss:$16 sps:$4 sm:$0xff]   ;;  %v8158_v39 = vld [vmem:[%s11750_s1 + $0x78c] ss:$16 sps:$4 sm:$0xff]  }
  0xb7   :  { %5409 = vmatpush1.bf16.msra.mxu0 %v8063_v40  ;;  %5968 = vmatpush1.bf16.msra.mxu1 %v8066_v41  ;;  %v8153_v40 = vld [vmem:[%s11750_s1 + $0x780] ss:$16 sps:$4 sm:$0xff]   ;;  %v8156_v41 = vld [vmem:[%s11750_s1 + $0x788] ss:$16 sps:$4 sm:$0xff]  }
  0xb8   :  { %5410 = vmatprep.subr.bf16.mxu0 %v8071_v42  ;;  %5969 = vmatprep.subr.bf16.mxu1 %v8074_v43  ;;  %v8161_v42 = vld [vmem:[%s11750_s1 + $0x7a4] ss:$16 sps:$4 sm:$0xff]   ;;  %v8164_v43 = vld [vmem:[%s11750_s1 + $0x7ac] ss:$16 sps:$4 sm:$0xff]  }
  0xbb   :  { %5411 = vmatpush1.bf16.msra.mxu0 %v8069_v44  ;;  %5970 = vmatpush1.bf16.msra.mxu1 %v8072_v45  ;;  %v8273_v44 = vld [vmem:[%s11749_s0 + $0x8] ss:$25 sps:$4 sm:$0xff]   ;;  %v8275_v45 = vld [vmem:[%s11749_s0 + $0x3a] ss:$25 sps:$4 sm:$0xff]  }
  0xbc   :  { %5412 = vmatprep.subr.bf16.mxu0 %v8077_v46  ;;  %5971 = vmatprep.subr.bf16.mxu1 %v8080_v50  ;;  %v8277_v46 = vld [vmem:[%s11749_s0 + $0x6c] ss:$25 sps:$4 sm:$0xff]   ;;  %v8279_v50 = vld [vmem:[%s11749_s0 + $0x9e] ss:$25 sps:$4 sm:$0xff]  }
  0xbf   :  { %5413 = vmatpush1.bf16.msra.mxu0 %v8075_v52  ;;  %5972 = vmatpush1.bf16.msra.mxu1 %v8078_v55  ;;  %v8159_v52 = vld [vmem:[%s11750_s1 + $0x7a0] ss:$16 sps:$4 sm:$0xff]   ;;  %v8162_v55 = vld [vmem:[%s11750_s1 + $0x7a8] ss:$16 sps:$4 sm:$0xff]  }
  0xc0   :  { %5425 = vmatprep.subr.bf16.mxu0 %v8083_v56  ;;  %5984 = vmatprep.subr.bf16.mxu1 %v8086_v57  ;;  %v8167_v56 = vld [vmem:[%s11750_s1 + $0x7c4] ss:$16 sps:$4 sm:$0xff]   ;;  %v8170_v57 = vld [vmem:[%s11750_s1 + $0x7cc] ss:$16 sps:$4 sm:$0xff]  }
  0xc2   :  { %5415 = vmatmul.mubr.bf16.vlgmr.msra.gmra.mrb[0].mxu0 %v1021_v59  ;;  %5974 = vmatmul.mubr.bf16.vlgmr.msra.gmra.mrb[0].mxu1 %v1021_v59  ;;  %v1069_v59 = vrot.slane %v8277_v46, %v9211_v54  ;;  %v8228_v46 = vld [vmem:[%s11750_s1 + $0x908] ss:$16 sps:$4 sm:$0xff]  }
  0xc3   :  { %5426 = vmatpush1.bf16.msra.mxu0 %v8081_v58  ;;  %5985 = vmatpush1.bf16.msra.mxu1 %v8084_v19  ;;  %v1041_v58 = vrot.slane %v8273_v44, %v9211_v54  ;;  %v1055_v19 = vrot.slane %v8275_v45, %v9211_v54  ;;  %v8230_v44 = vld [vmem:[%s11750_s1 + $0x90c] ss:$16 sps:$4 sm:$0xff]   ;;  %v8225_v45 = vld [vmem:[%s11750_s1 + $0x900] ss:$16 sps:$4 sm:$0xff]  }
  0xc4   :  { %5427 = vmatprep.subr.bf16.mxu0 %v8089_v60  ;;  %5986 = vmatprep.subr.bf16.mxu1 %v8092_v61  ;;  %v1083_v60 = vrot.slane %v8279_v50, %v9211_v54  ;;  %v8165_v61 = vld [vmem:[%s11750_s1 + $0x7c0] ss:$16 sps:$4 sm:$0xff]   ;;  %v8233_v50 = vld [vmem:[%s11750_s1 + $0x924] ss:$16 sps:$4 sm:$0xff]  }
  0xc5   :  { %5457 = vmatprep.mubr.bf16.mxu0 %v9511_v51  ;;  %6016 = vmatprep.mubr.bf16.mxu1 %v9511_v51  ;;  %v8104_v51 = vld [vmem:[%s11750_s1 + $0x66c] ss:$16 sps:$4 sm:$0xff]  }
  0xc7   :  { %5428 = vmatpush1.bf16.msra.mxu0 %v8087_v62  ;;  %5987 = vmatpush1.bf16.msra.mxu1 %v8090_v48  ;;  %v8168_v62 = vld [vmem:[%s11750_s1 + $0x7c8] ss:$16 sps:$4 sm:$0xff]   ;;  %v8173_v48 = vld [vmem:[%s11750_s1 + $0x7e4] ss:$16 sps:$4 sm:$0xff]  }
  0xc8   :  { %5429 = vmatprep.subr.bf16.mxu0 %v8095_v49  ;;  %5988 = vmatprep.subr.bf16.mxu1 %v8098_v63  ;;  %v8176_v49 = vld [vmem:[%s11750_s1 + $0x7ec] ss:$16 sps:$4 sm:$0xff]   ;;  %v1092_v63 = vcombine.high %v1041_v58, %v1055_v19 }
  0xcb   :  { %5430 = vmatpush1.bf16.msra.mxu0 %v8093_v0  ;;  %5989 = vmatpush1.bf16.msra.mxu1 %v8096_v1  ;;  %v1096_v0 = vcombine.high %v1069_v59, %v1083_v60  ;;  %v8171_v1 = vld [vmem:[%s11750_s1 + $0x7e0] ss:$16 sps:$4 sm:$0xff]  }
  0xcc   :  { %5431 = vmatprep.subr.bf16.mxu0 %v8101_v2  ;;  %5990 = vmatprep.subr.bf16.mxu1 %v8104_v51  ;;  %v8174_v2 = vld [vmem:[%s11750_s1 + $0x7e8] ss:$16 sps:$4 sm:$0xff]   ;;  %v1091_v51 = vcombine.low %v1041_v58, %v1055_v19  ;;  %v8242_v58 = vld [vmem:[%s11750_s1 + $0x94c] ss:$16 sps:$4 sm:$0xff]   ;;  %v8237_v19 = vld [vmem:[%s11750_s1 + $0x940] ss:$16 sps:$4 sm:$0xff]  }
  0xcf   :  { %5432 = vmatpush1.bf16.msra.mxu0 %v8099_v3  ;;  %5991 = vmatpush1.bf16.msra.mxu1 %v8102_v4  ;;  %v1095_v3 = vcombine.low %v1069_v59, %v1083_v60  ;;  %v8179_v4 = vld [vmem:[%s11750_s1 + $0x804] ss:$16 sps:$4 sm:$0xff]   ;;  %v8240_v59 = vld [vmem:[%s11750_s1 + $0x948] ss:$16 sps:$4 sm:$0xff]  }
  0xd0   :  { %5433 = vmatprep.subr.bf16.mxu0 %v8107_v5  ;;  %5992 = vmatprep.subr.bf16.mxu1 %v8110_v6  ;;  %v8182_v5 = vld [vmem:[%s11750_s1 + $0x80c] ss:$16 sps:$4 sm:$0xff]   ;;  %v1119_v6 = vrot.slane %v1092_v63, %v9211_v54  ;;  %v8245_v60 = vld [vmem:[%s11750_s1 + $0x964] ss:$16 sps:$4 sm:$0xff]  }
  0xd1   :  { %v8254_v63 = vld [vmem:[%s11750_s1 + $0x98c] ss:$16 sps:$4 sm:$0xff]  }
  0xd3   :  { %5434 = vmatpush1.bf16.msra.mxu0 %v8105_v7  ;;  %5993 = vmatpush1.bf16.msra.mxu1 %v8108_v8  ;;  %v1147_v7 = vrot.slane %v1096_v0, %v9211_v54  ;;  %v8177_v8 = vld [vmem:[%s11750_s1 + $0x800] ss:$16 sps:$4 sm:$0xff]  }
  0xd4   :  { %5435 = vmatprep.subr.bf16.mxu0 %v8113_v9  ;;  %5994 = vmatprep.subr.bf16.mxu1 %v8116_v10  ;;  %v8180_v9 = vld [vmem:[%s11750_s1 + $0x808] ss:$16 sps:$4 sm:$0xff]   ;;  %v9923_v10 = vrot.slane %v1091_v51, %v9211_v54  ;;  %v8249_v0 = vld [vmem:[%s11750_s1 + $0x980] ss:$16 sps:$4 sm:$0xff]   ;;  %v8260_v51 = vld [vmem:[%s11750_s1 + $0x9ac] ss:$16 sps:$4 sm:$0xff]  }
  0xd7   :  { %5436 = vmatpush1.bf16.msra.mxu0 %v8111_v11  ;;  %5995 = vmatpush1.bf16.msra.mxu1 %v8114_v12  ;;  %v9926_v11 = vrot.slane %v1095_v3, %v9211_v54  ;;  %v8185_v12 = vld [vmem:[%s11750_s1 + $0x824] ss:$16 sps:$4 sm:$0xff]   ;;  %v8255_v3 = vld [vmem:[%s11750_s1 + $0x9a0] ss:$16 sps:$4 sm:$0xff]  }
  0xd8   :  { %5437 = vmatprep.subr.bf16.mxu0 %v8119_v13  ;;  %5996 = vmatprep.subr.bf16.mxu1 %v8122_v14  ;;  %v9931_v13 = vcombine.high %v1119_v6, %v1147_v7  ;;  %v8188_v14 = vld [vmem:[%s11750_s1 + $0x82c] ss:$16 sps:$4 sm:$0xff]  }
  0xdb   :  { %5438 = vmatpush1.bf16.msra.mxu0 %v8117_v15  ;;  %5997 = vmatpush1.bf16.msra.mxu1 %v8120_v16  ;;  %v9938_v15 = vcombine.high %v9923_v10, %v9926_v11  ;;  %v1159_v16 = vcombine.low %v1119_v6, %v1147_v7  ;;  %v8266_v6 = vld [vmem:[%s11750_s1 + $0x9cc] ss:$16 sps:$4 sm:$0xff]   ;;  %v8261_v7 = vld [vmem:[%s11750_s1 + $0x9c0] ss:$16 sps:$4 sm:$0xff]  }
  0xdc   :  { %5439 = vmatprep.subr.bf16.mxu0 %v8125_v17  ;;  %5998 = vmatprep.subr.bf16.mxu1 %v8128_v18  ;;  %v8183_v17 = vld [vmem:[%s11750_s1 + $0x820] ss:$16 sps:$4 sm:$0xff]   ;;  %v8186_v18 = vld [vmem:[%s11750_s1 + $0x828] ss:$16 sps:$4 sm:$0xff]  }
  0xdf   :  { %5440 = vmatpush1.bf16.msra.mxu0 %v8123_v20  ;;  %5999 = vmatpush1.bf16.msra.mxu1 %v8126_v21  ;;  %v8191_v20 = vld [vmem:[%s11750_s1 + $0x844] ss:$16 sps:$4 sm:$0xff]   ;;  %v8189_v21 = vld [vmem:[%s11750_s1 + $0x840] ss:$16 sps:$4 sm:$0xff]  }
  0xe0   :  { %5441 = vmatprep.subr.bf16.mxu0 %v8131_v22  ;;  %6000 = vmatprep.subr.bf16.mxu1 %v8134_v23  ;;  %v8192_v22 = vld [vmem:[%s11750_s1 + $0x848] ss:$16 sps:$4 sm:$0xff]   ;;  %v8197_v23 = vld [vmem:[%s11750_s1 + $0x864] ss:$16 sps:$4 sm:$0xff]  }
  0xe3   :  { %5442 = vmatpush1.bf16.msra.mxu0 %v8129_v24  ;;  %6001 = vmatpush1.bf16.msra.mxu1 %v8132_v25  ;;  %v8200_v24 = vld [vmem:[%s11750_s1 + $0x86c] ss:$16 sps:$4 sm:$0xff]   ;;  %v8195_v25 = vld [vmem:[%s11750_s1 + $0x860] ss:$16 sps:$4 sm:$0xff]  }
  0xe4   :  { %5443 = vmatprep.subr.bf16.mxu0 %v8137_v26  ;;  %6002 = vmatprep.subr.bf16.mxu1 %v8140_v27  ;;  %v8198_v26 = vld [vmem:[%s11750_s1 + $0x868] ss:$16 sps:$4 sm:$0xff]   ;;  %v8203_v27 = vld [vmem:[%s11750_s1 + $0x884] ss:$16 sps:$4 sm:$0xff]  }
  0xe7   :  { %5444 = vmatpush1.bf16.msra.mxu0 %v8135_v28  ;;  %6003 = vmatpush1.bf16.msra.mxu1 %v8138_v29  ;;  %v8206_v28 = vld [vmem:[%s11750_s1 + $0x88c] ss:$16 sps:$4 sm:$0xff]   ;;  %v8201_v29 = vld [vmem:[%s11750_s1 + $0x880] ss:$16 sps:$4 sm:$0xff]  }
  0xe8   :  { %5445 = vmatprep.subr.bf16.mxu0 %v8143_v30  ;;  %6004 = vmatprep.subr.bf16.mxu1 %v8146_v31  ;;  %v8204_v30 = vld [vmem:[%s11750_s1 + $0x888] ss:$16 sps:$4 sm:$0xff]   ;;  %v8209_v31 = vld [vmem:[%s11750_s1 + $0x8a4] ss:$16 sps:$4 sm:$0xff]  }
  0xeb   :  { %5446 = vmatpush1.bf16.msra.mxu0 %v8141_v32  ;;  %6005 = vmatpush1.bf16.msra.mxu1 %v8144_v33  ;;  %v8212_v32 = vld [vmem:[%s11750_s1 + $0x8ac] ss:$16 sps:$4 sm:$0xff]   ;;  %v8207_v33 = vld [vmem:[%s11750_s1 + $0x8a0] ss:$16 sps:$4 sm:$0xff]  }
  0xec   :  { %5447 = vmatprep.subr.bf16.mxu0 %v8149_v34  ;;  %6006 = vmatprep.subr.bf16.mxu1 %v8152_v35  ;;  %v8210_v34 = vld [vmem:[%s11750_s1 + $0x8a8] ss:$16 sps:$4 sm:$0xff]   ;;  %v8215_v35 = vld [vmem:[%s11750_s1 + $0x8c4] ss:$16 sps:$4 sm:$0xff]  }
  0xef   :  { %5448 = vmatpush1.bf16.msra.mxu0 %v8147_v36  ;;  %6007 = vmatpush1.bf16.msra.mxu1 %v8150_v37  ;;  %v8218_v36 = vld [vmem:[%s11750_s1 + $0x8cc] ss:$16 sps:$4 sm:$0xff]   ;;  %v8213_v37 = vld [vmem:[%s11750_s1 + $0x8c0] ss:$16 sps:$4 sm:$0xff]  }
  0xf0   :  { %5449 = vmatprep.subr.bf16.mxu0 %v8155_v38  ;;  %6008 = vmatprep.subr.bf16.mxu1 %v8158_v39  ;;  %v8216_v38 = vld [vmem:[%s11750_s1 + $0x8c8] ss:$16 sps:$4 sm:$0xff]   ;;  %v8221_v39 = vld [vmem:[%s11750_s1 + $0x8e4] ss:$16 sps:$4 sm:$0xff]  }
  0xf3   :  { %5450 = vmatpush1.bf16.msra.mxu0 %v8153_v40  ;;  %6009 = vmatpush1.bf16.msra.mxu1 %v8156_v41  ;;  %v8224_v40 = vld [vmem:[%s11750_s1 + $0x8ec] ss:$16 sps:$4 sm:$0xff]   ;;  %v8219_v41 = vld [vmem:[%s11750_s1 + $0x8e0] ss:$16 sps:$4 sm:$0xff]  }
  0xf4   :  { %5451 = vmatprep.subr.bf16.mxu0 %v8161_v42  ;;  %6010 = vmatprep.subr.bf16.mxu1 %v8164_v43  ;;  %v8222_v42 = vld [vmem:[%s11750_s1 + $0x8e8] ss:$16 sps:$4 sm:$0xff]   ;;  %v8227_v43 = vld [vmem:[%s11750_s1 + $0x904] ss:$16 sps:$4 sm:$0xff]  }
  0xf7   :  { %5452 = vmatpush1.bf16.msra.mxu0 %v8159_v52  ;;  %6011 = vmatpush1.bf16.msra.mxu1 %v8162_v55  ;;  %v8236_v52 = vld [vmem:[%s11750_s1 + $0x92c] ss:$16 sps:$4 sm:$0xff]   ;;  %v8231_v55 = vld [vmem:[%s11750_s1 + $0x920] ss:$16 sps:$4 sm:$0xff]  }
  0xf8   :  { %5453 = vmatprep.subr.bf16.mxu0 %v8167_v56  ;;  %6012 = vmatprep.subr.bf16.mxu1 %v8170_v57  ;;  %v8234_v56 = vld [vmem:[%s11750_s1 + $0x928] ss:$16 sps:$4 sm:$0xff]   ;;  %v8239_v57 = vld [vmem:[%s11750_s1 + $0x944] ss:$16 sps:$4 sm:$0xff]  }
  0xfb   :  { %5454 = vmatpush1.bf16.msra.mxu0 %v8165_v61  ;;  %6013 = vmatpush1.bf16.msra.mxu1 %v8168_v62  ;;  %v8248_v61 = vld [vmem:[%s11750_s1 + $0x96c] ss:$16 sps:$4 sm:$0xff]   ;;  %v8243_v62 = vld [vmem:[%s11750_s1 + $0x960] ss:$16 sps:$4 sm:$0xff]  }
  0xfc   :  { %5455 = vmatprep.subr.bf16.mxu0 %v8173_v48  ;;  %6014 = vmatprep.subr.bf16.mxu1 %v8176_v49  ;;  %v8246_v48 = vld [vmem:[%s11750_s1 + $0x968] ss:$16 sps:$4 sm:$0xff]   ;;  %v8251_v49 = vld [vmem:[%s11750_s1 + $0x984] ss:$16 sps:$4 sm:$0xff]  }
  0xff   :  { %5456 = vmatpush1.bf16.msra.mxu0 %v8171_v1  ;;  %6015 = vmatpush1.bf16.msra.mxu1 %v8174_v2  ;;  %v8252_v1 = vld [vmem:[%s11750_s1 + $0x988] ss:$16 sps:$4 sm:$0xff]   ;;  %v8257_v2 = vld [vmem:[%s11750_s1 + $0x9a4] ss:$16 sps:$4 sm:$0xff]  }
 0x100   :  { %5468 = vmatprep.subr.bf16.mxu0 %v8179_v4  ;;  %6027 = vmatprep.subr.bf16.mxu1 %v8182_v5  ;;  %v8258_v4 = vld [vmem:[%s11750_s1 + $0x9a8] ss:$16 sps:$4 sm:$0xff]   ;;  %v8263_v5 = vld [vmem:[%s11750_s1 + $0x9c4] ss:$16 sps:$4 sm:$0xff]  }
 0x102   :  { %5458 = vmatmul.mubr.bf16.vlgmr.msra.gmra.mrb[0].mxu0 %v9518_v53  ;;  %6017 = vmatmul.mubr.bf16.vlgmr.msra.gmra.mrb[0].mxu1 %v9518_v53  ;;  %v8194_v53 = vld [vmem:[%s11750_s1 + $0x84c] ss:$16 sps:$4 sm:$0xff]  }
 0x103   :  { %5469 = vmatpush1.bf16.msra.mxu0 %v8177_v8  ;;  %6028 = vmatpush1.bf16.msra.mxu1 %v8180_v9  ;;  %v8264_v8 = vld [vmem:[%s11750_s1 + $0x9c8] ss:$16 sps:$4 sm:$0xff]   ;;  %v8269_v9 = vld [vmem:[%s11750_s1 + $0x9e4] ss:$16 sps:$4 sm:$0xff]  }
 0x104   :  { %5470 = vmatprep.subr.bf16.mxu0 %v8185_v12  ;;  %6029 = vmatprep.subr.bf16.mxu1 %v8188_v14  ;;  %v8272_v12 = vld [vmem:[%s11750_s1 + $0x9ec] ss:$16 sps:$4 sm:$0xff]   ;;  %v8267_v14 = vld [vmem:[%s11750_s1 + $0x9e0] ss:$16 sps:$4 sm:$0xff]  }
 0x105   :  { %5500 = vmatprep.mubr.bf16.mxu0 %v1159_v16  ;;  %6059 = vmatprep.mubr.bf16.mxu1 %v1159_v16  ;;  %v8270_v16 = vld [vmem:[%s11750_s1 + $0x9e8] ss:$16 sps:$4 sm:$0xff]  }
 0x107   :  { %5471 = vmatpush1.bf16.msra.mxu0 %v8183_v17  ;;  %6030 = vmatpush1.bf16.msra.mxu1 %v8186_v18  ;;  %v8283_v17 = vld [vmem:[%s11750_s1 + $0xa04] ss:$16 sps:$4 sm:$0xff]   ;;  %v8286_v18 = vld [vmem:[%s11750_s1 + $0xa0c] ss:$16 sps:$4 sm:$0xff]  }
 0x108   :  { %5472 = vmatprep.subr.bf16.mxu0 %v8191_v20  ;;  %6031 = vmatprep.subr.bf16.mxu1 %v8194_v53  ;;  %v1155_v20 = vcombine.low %v9923_v10, %v9926_v11  ;;  %v8281_v53 = vld [vmem:[%s11750_s1 + $0xa00] ss:$16 sps:$4 sm:$0xff]   ;;  %v8292_v10 = vld [vmem:[%s11750_s1 + $0xa2c] ss:$16 sps:$4 sm:$0xff]  }
 0x109   :  { %v8287_v11 = vld [vmem:[%s11750_s1 + $0xa20] ss:$16 sps:$4 sm:$0xff]  }
 0x10b   :  { %5473 = vmatpush1.bf16.msra.mxu0 %v8189_v21  ;;  %6032 = vmatpush1.bf16.msra.mxu1 %v8192_v22  ;;  %v8284_v21 = vld [vmem:[%s11750_s1 + $0xa08] ss:$16 sps:$4 sm:$0xff]   ;;  %v8289_v22 = vld [vmem:[%s11750_s1 + $0xa24] ss:$16 sps:$4 sm:$0xff]  }
 0x10c   :  { %5474 = vmatprep.subr.bf16.mxu0 %v8197_v23  ;;  %6033 = vmatprep.subr.bf16.mxu1 %v8200_v24  ;;  %v8290_v23 = vld [vmem:[%s11750_s1 + $0xa28] ss:$16 sps:$4 sm:$0xff]   ;;  %v8295_v24 = vld [vmem:[%s11750_s1 + $0xa44] ss:$16 sps:$4 sm:$0xff]  }
 0x10f   :  { %5475 = vmatpush1.bf16.msra.mxu0 %v8195_v25  ;;  %6034 = vmatpush1.bf16.msra.mxu1 %v8198_v26  ;;  %v8298_v25 = vld [vmem:[%s11750_s1 + $0xa4c] ss:$16 sps:$4 sm:$0xff]   ;;  %v8293_v26 = vld [vmem:[%s11750_s1 + $0xa40] ss:$16 sps:$4 sm:$0xff]  }
 0x110   :  { %5476 = vmatprep.subr.bf16.mxu0 %v8203_v27  ;;  %6035 = vmatprep.subr.bf16.mxu1 %v8206_v28  ;;  %v8296_v27 = vld [vmem:[%s11750_s1 + $0xa48] ss:$16 sps:$4 sm:$0xff]   ;;  %v8301_v28 = vld [vmem:[%s11750_s1 + $0xa64] ss:$16 sps:$4 sm:$0xff]  }
 0x113   :  { %5477 = vmatpush1.bf16.msra.mxu0 %v8201_v29  ;;  %6036 = vmatpush1.bf16.msra.mxu1 %v8204_v30  ;;  %v8299_v29 = vld [vmem:[%s11750_s1 + $0xa60] ss:$16 sps:$4 sm:$0xff]   ;;  %v8302_v30 = vld [vmem:[%s11750_s1 + $0xa68] ss:$16 sps:$4 sm:$0xff]  }
 0x114   :  { %5478 = vmatprep.subr.bf16.mxu0 %v8209_v31  ;;  %6037 = vmatprep.subr.bf16.mxu1 %v8212_v32  ;;  %v8307_v31 = vld [vmem:[%s11750_s1 + $0xa84] ss:$16 sps:$4 sm:$0xff]   ;;  %v8310_v32 = vld [vmem:[%s11750_s1 + $0xa8c] ss:$16 sps:$4 sm:$0xff]  }
 0x117   :  { %5479 = vmatpush1.bf16.msra.mxu0 %v8207_v33  ;;  %6038 = vmatpush1.bf16.msra.mxu1 %v8210_v34  ;;  %v8305_v33 = vld [vmem:[%s11750_s1 + $0xa80] ss:$16 sps:$4 sm:$0xff]   ;;  %v8308_v34 = vld [vmem:[%s11750_s1 + $0xa88] ss:$16 sps:$4 sm:$0xff]  }
 0x118   :  { %5480 = vmatprep.subr.bf16.mxu0 %v8215_v35  ;;  %6039 = vmatprep.subr.bf16.mxu1 %v8218_v36  ;;  %v8313_v35 = vld [vmem:[%s11750_s1 + $0xaa4] ss:$16 sps:$4 sm:$0xff]   ;;  %v8316_v36 = vld [vmem:[%s11750_s1 + $0xaac] ss:$16 sps:$4 sm:$0xff]  }
 0x11b   :  { %5481 = vmatpush1.bf16.msra.mxu0 %v8213_v37  ;;  %6040 = vmatpush1.bf16.msra.mxu1 %v8216_v38  ;;  %v8311_v37 = vld [vmem:[%s11750_s1 + $0xaa0] ss:$16 sps:$4 sm:$0xff]   ;;  %v8314_v38 = vld [vmem:[%s11750_s1 + $0xaa8] ss:$16 sps:$4 sm:$0xff]  }
 0x11c   :  { %5482 = vmatprep.subr.bf16.mxu0 %v8221_v39  ;;  %6041 = vmatprep.subr.bf16.mxu1 %v8224_v40  ;;  %v8319_v39 = vld [vmem:[%s11750_s1 + $0xac4] ss:$16 sps:$4 sm:$0xff]   ;;  %v8322_v40 = vld [vmem:[%s11750_s1 + $0xacc] ss:$16 sps:$4 sm:$0xff]  }
 0x11f   :  { %5483 = vmatpush1.bf16.msra.mxu0 %v8219_v41  ;;  %6042 = vmatpush1.bf16.msra.mxu1 %v8222_v42  ;;  %v8317_v41 = vld [vmem:[%s11750_s1 + $0xac0] ss:$16 sps:$4 sm:$0xff]   ;;  %v8320_v42 = vld [vmem:[%s11750_s1 + $0xac8] ss:$16 sps:$4 sm:$0xff]  }
 0x120   :  { %5484 = vmatprep.subr.bf16.mxu0 %v8227_v43  ;;  %6043 = vmatprep.subr.bf16.mxu1 %v8230_v44  ;;  %v8325_v43 = vld [vmem:[%s11750_s1 + $0xae4] ss:$16 sps:$4 sm:$0xff]   ;;  %v8328_v44 = vld [vmem:[%s11750_s1 + $0xaec] ss:$16 sps:$4 sm:$0xff]  }
 0x123   :  { %5485 = vmatpush1.bf16.msra.mxu0 %v8225_v45  ;;  %6044 = vmatpush1.bf16.msra.mxu1 %v8228_v46  ;;  %v8323_v45 = vld [vmem:[%s11750_s1 + $0xae0] ss:$16 sps:$4 sm:$0xff]   ;;  %v8326_v46 = vld [vmem:[%s11750_s1 + $0xae8] ss:$16 sps:$4 sm:$0xff]  }
 0x124   :  { %5486 = vmatprep.subr.bf16.mxu0 %v8233_v50  ;;  %6045 = vmatprep.subr.bf16.mxu1 %v8236_v52  ;;  %v8331_v50 = vld [vmem:[%s11750_s1 + $0xb04] ss:$16 sps:$4 sm:$0xff]   ;;  %v8334_v52 = vld [vmem:[%s11750_s1 + $0xb0c] ss:$16 sps:$4 sm:$0xff]  }
 0x127   :  { %5487 = vmatpush1.bf16.msra.mxu0 %v8231_v55  ;;  %6046 = vmatpush1.bf16.msra.mxu1 %v8234_v56  ;;  %v8329_v55 = vld [vmem:[%s11750_s1 + $0xb00] ss:$16 sps:$4 sm:$0xff]   ;;  %v8332_v56 = vld [vmem:[%s11750_s1 + $0xb08] ss:$16 sps:$4 sm:$0xff]  }
 0x128   :  { %5488 = vmatprep.subr.bf16.mxu0 %v8239_v57  ;;  %6047 = vmatprep.subr.bf16.mxu1 %v8242_v58  ;;  %v8337_v57 = vld [vmem:[%s11750_s1 + $0xb24] ss:$16 sps:$4 sm:$0xff]   ;;  %v8340_v58 = vld [vmem:[%s11750_s1 + $0xb2c] ss:$16 sps:$4 sm:$0xff]  }
 0x12b   :  { %5489 = vmatpush1.bf16.msra.mxu0 %v8237_v19  ;;  %6048 = vmatpush1.bf16.msra.mxu1 %v8240_v59  ;;  %v8335_v19 = vld [vmem:[%s11750_s1 + $0xb20] ss:$16 sps:$4 sm:$0xff]   ;;  %v8338_v59 = vld [vmem:[%s11750_s1 + $0xb28] ss:$16 sps:$4 sm:$0xff]  }
 0x12c   :  { %5490 = vmatprep.subr.bf16.mxu0 %v8245_v60  ;;  %6049 = vmatprep.subr.bf16.mxu1 %v8248_v61  ;;  %v8343_v60 = vld [vmem:[%s11750_s1 + $0xb44] ss:$16 sps:$4 sm:$0xff]   ;;  %v8346_v61 = vld [vmem:[%s11750_s1 + $0xb4c] ss:$16 sps:$4 sm:$0xff]  }
 0x12f   :  { %5491 = vmatpush1.bf16.msra.mxu0 %v8243_v62  ;;  %6050 = vmatpush1.bf16.msra.mxu1 %v8246_v48  ;;  %v8341_v62 = vld [vmem:[%s11750_s1 + $0xb40] ss:$16 sps:$4 sm:$0xff]   ;;  %v8344_v48 = vld [vmem:[%s11750_s1 + $0xb48] ss:$16 sps:$4 sm:$0xff]  }
 0x130   :  { %5492 = vmatprep.subr.bf16.mxu0 %v8251_v49  ;;  %6051 = vmatprep.subr.bf16.mxu1 %v8254_v63  ;;  %v8349_v49 = vld [vmem:[%s11750_s1 + $0xb64] ss:$16 sps:$4 sm:$0xff]   ;;  %v8352_v63 = vld [vmem:[%s11750_s1 + $0xb6c] ss:$16 sps:$4 sm:$0xff]  }
 0x133   :  { %5493 = vmatpush1.bf16.msra.mxu0 %v8249_v0  ;;  %6052 = vmatpush1.bf16.msra.mxu1 %v8252_v1  ;;  %v8347_v0 = vld [vmem:[%s11750_s1 + $0xb60] ss:$16 sps:$4 sm:$0xff]   ;;  %v8350_v1 = vld [vmem:[%s11750_s1 + $0xb68] ss:$16 sps:$4 sm:$0xff]  }
 0x134   :  { %5494 = vmatprep.subr.bf16.mxu0 %v8257_v2  ;;  %6053 = vmatprep.subr.bf16.mxu1 %v8260_v51  ;;  %v8355_v2 = vld [vmem:[%s11750_s1 + $0xb84] ss:$16 sps:$4 sm:$0xff]   ;;  %v8358_v51 = vld [vmem:[%s11750_s1 + $0xb8c] ss:$16 sps:$4 sm:$0xff]  }
 0x137   :  { %5495 = vmatpush1.bf16.msra.mxu0 %v8255_v3  ;;  %6054 = vmatpush1.bf16.msra.mxu1 %v8258_v4  ;;  %v8353_v3 = vld [vmem:[%s11750_s1 + $0xb80] ss:$16 sps:$4 sm:$0xff]   ;;  %v8356_v4 = vld [vmem:[%s11750_s1 + $0xb88] ss:$16 sps:$4 sm:$0xff]  }
 0x138   :  { %5496 = vmatprep.subr.bf16.mxu0 %v8263_v5  ;;  %6055 = vmatprep.subr.bf16.mxu1 %v8266_v6  ;;  %v8361_v5 = vld [vmem:[%s11750_s1 + $0xba4] ss:$16 sps:$4 sm:$0xff]   ;;  %v8364_v6 = vld [vmem:[%s11750_s1 + $0xbac] ss:$16 sps:$4 sm:$0xff]  }
 0x13b   :  { %5497 = vmatpush1.bf16.msra.mxu0 %v8261_v7  ;;  %6056 = vmatpush1.bf16.msra.mxu1 %v8264_v8  ;;  %v8473_v7 = vld [vmem:[%s11749_s0 + $0xc] ss:$25 sps:$4 sm:$0xff]   ;;  %v8474_v8 = vld [vmem:[%s11749_s0 + $0x3e] ss:$25 sps:$4 sm:$0xff]  }
 0x13c   :  { %5498 = vmatprep.subr.bf16.mxu0 %v8269_v9  ;;  %6057 = vmatprep.subr.bf16.mxu1 %v8272_v12  ;;  %v8475_v9 = vld [vmem:[%s11749_s0 + $0x70] ss:$25 sps:$4 sm:$0xff]   ;;  %v8476_v12 = vld [vmem:[%s11749_s0 + $0xa2] ss:$25 sps:$4 sm:$0xff]  }
 0x13f   :  { %5499 = vmatpush1.bf16.msra.mxu0 %v8267_v14  ;;  %6058 = vmatpush1.bf16.msra.mxu1 %v8270_v16  ;;  %v8359_v14 = vld [vmem:[%s11750_s1 + $0xba0] ss:$16 sps:$4 sm:$0xff]   ;;  %v8362_v16 = vld [vmem:[%s11750_s1 + $0xba8] ss:$16 sps:$4 sm:$0xff]  }
 0x140   :  { %5511 = vmatprep.subr.bf16.mxu0 %v8283_v17  ;;  %6070 = vmatprep.subr.bf16.mxu1 %v8286_v18  ;;  %v8367_v17 = vld [vmem:[%s11750_s1 + $0xbc4] ss:$16 sps:$4 sm:$0xff]   ;;  %v8370_v18 = vld [vmem:[%s11750_s1 + $0xbcc] ss:$16 sps:$4 sm:$0xff]  }
 0x142   :  { %5501 = vmatmul.mubr.bf16.vlgmr.msra.gmra.mrb[0].mxu0 %v1155_v20  ;;  %6060 = vmatmul.mubr.bf16.vlgmr.msra.gmra.mrb[0].mxu1 %v1155_v20  ;;  %v1048_v20 = vrot.slane %v8473_v7, %v9211_v54  ;;  %v8430_v7 = vld [vmem:[%s11750_s1 + $0xd0c] ss:$16 sps:$4 sm:$0xff]  }
 0x143   :  { %5512 = vmatpush1.bf16.msra.mxu0 %v8281_v53  ;;  %6071 = vmatpush1.bf16.msra.mxu1 %v8284_v21  ;;  %v1062_v53 = vrot.slane %v8474_v8, %v9211_v54  ;;  %v1076_v21 = vrot.slane %v8475_v9, %v9211_v54  ;;  %v8425_v8 = vld [vmem:[%s11750_s1 + $0xd00] ss:$16 sps:$4 sm:$0xff]   ;;  %v8428_v9 = vld [vmem:[%s11750_s1 + $0xd08] ss:$16 sps:$4 sm:$0xff]  }
 0x144   :  { %5513 = vmatprep.subr.bf16.mxu0 %v8289_v22  ;;  %6072 = vmatprep.subr.bf16.mxu1 %v8292_v10  ;;  %v1090_v22 = vrot.slane %v8476_v12, %v9211_v54  ;;  %v8365_v10 = vld [vmem:[%s11750_s1 + $0xbc0] ss:$16 sps:$4 sm:$0xff]   ;;  %v8433_v12 = vld [vmem:[%s11750_s1 + $0xd24] ss:$16 sps:$4 sm:$0xff]  }
 0x145   :  { %5543 = vmatprep.mubr.bf16.mxu0 %v9931_v13  ;;  %6102 = vmatprep.mubr.bf16.mxu1 %v9931_v13  ;;  %v8304_v13 = vld [vmem:[%s11750_s1 + $0xa6c] ss:$16 sps:$4 sm:$0xff]  }
 0x147   :  { %5514 = vmatpush1.bf16.msra.mxu0 %v8287_v11  ;;  %6073 = vmatpush1.bf16.msra.mxu1 %v8290_v23  ;;  %v8368_v11 = vld [vmem:[%s11750_s1 + $0xbc8] ss:$16 sps:$4 sm:$0xff]   ;;  %v8373_v23 = vld [vmem:[%s11750_s1 + $0xbe4] ss:$16 sps:$4 sm:$0xff]  }
 0x148   :  { %5515 = vmatprep.subr.bf16.mxu0 %v8295_v24  ;;  %6074 = vmatprep.subr.bf16.mxu1 %v8298_v25  ;;  %v8376_v24 = vld [vmem:[%s11750_s1 + $0xbec] ss:$16 sps:$4 sm:$0xff]   ;;  %v1094_v25 = vcombine.high %v1048_v20, %v1062_v53 }
 0x14b   :  { %5516 = vmatpush1.bf16.msra.mxu0 %v8293_v26  ;;  %6075 = vmatpush1.bf16.msra.mxu1 %v8296_v27  ;;  %v1098_v26 = vcombine.high %v1076_v21, %v1090_v22  ;;  %v1093_v27 = vcombine.low %v1048_v20, %v1062_v53  ;;  %v8442_v20 = vld [vmem:[%s11750_s1 + $0xd4c] ss:$16 sps:$4 sm:$0xff]   ;;  %v8437_v53 = vld [vmem:[%s11750_s1 + $0xd40] ss:$16 sps:$4 sm:$0xff]  }
 0x14c   :  { %5517 = vmatprep.subr.bf16.mxu0 %v8301_v28  ;;  %6076 = vmatprep.subr.bf16.mxu1 %v8304_v13  ;;  %v1097_v28 = vcombine.low %v1076_v21, %v1090_v22  ;;  %v8371_v13 = vld [vmem:[%s11750_s1 + $0xbe0] ss:$16 sps:$4 sm:$0xff]   ;;  %v8440_v21 = vld [vmem:[%s11750_s1 + $0xd48] ss:$16 sps:$4 sm:$0xff]   ;;  %v8445_v22 = vld [vmem:[%s11750_s1 + $0xd64] ss:$16 sps:$4 sm:$0xff]  }
 0x14f   :  { %5518 = vmatpush1.bf16.msra.mxu0 %v8299_v29  ;;  %6077 = vmatpush1.bf16.msra.mxu1 %v8302_v30  ;;  %v8374_v29 = vld [vmem:[%s11750_s1 + $0xbe8] ss:$16 sps:$4 sm:$0xff]   ;;  %v8379_v30 = vld [vmem:[%s11750_s1 + $0xc04] ss:$16 sps:$4 sm:$0xff]  }
 0x150   :  { %5519 = vmatprep.subr.bf16.mxu0 %v8307_v31  ;;  %6078 = vmatprep.subr.bf16.mxu1 %v8310_v32  ;;  %v8382_v31 = vld [vmem:[%s11750_s1 + $0xc0c] ss:$16 sps:$4 sm:$0xff]   ;;  %v1126_v32 = vrot.slane %v1094_v25, %v9211_v54 }
 0x151   :  { %v8454_v25 = vld [vmem:[%s11750_s1 + $0xd8c] ss:$16 sps:$4 sm:$0xff]  }
 0x153   :  { %5520 = vmatpush1.bf16.msra.mxu0 %v8305_v33  ;;  %6079 = vmatpush1.bf16.msra.mxu1 %v8308_v34  ;;  %v1154_v33 = vrot.slane %v1098_v26, %v9211_v54  ;;  %v10337_v34 = vrot.slane %v1093_v27, %v9211_v54  ;;  %v8449_v26 = vld [vmem:[%s11750_s1 + $0xd80] ss:$16 sps:$4 sm:$0xff]   ;;  %v8452_v27 = vld [vmem:[%s11750_s1 + $0xd88] ss:$16 sps:$4 sm:$0xff]  }
 0x154   :  { %5521 = vmatprep.subr.bf16.mxu0 %v8313_v35  ;;  %6080 = vmatprep.subr.bf16.mxu1 %v8316_v36  ;;  %v10340_v35 = vrot.slane %v1097_v28, %v9211_v54  ;;  %v8377_v36 = vld [vmem:[%s11750_s1 + $0xc00] ss:$16 sps:$4 sm:$0xff]   ;;  %v8457_v28 = vld [vmem:[%s11750_s1 + $0xda4] ss:$16 sps:$4 sm:$0xff]  }
 0x157   :  { %5522 = vmatpush1.bf16.msra.mxu0 %v8311_v37  ;;  %6081 = vmatpush1.bf16.msra.mxu1 %v8314_v38  ;;  %v8380_v37 = vld [vmem:[%s11750_s1 + $0xc08] ss:$16 sps:$4 sm:$0xff]   ;;  %v10348_v38 = vcombine.high %v1126_v32, %v1154_v33 }
 0x158   :  { %5523 = vmatprep.subr.bf16.mxu0 %v8319_v39  ;;  %6082 = vmatprep.subr.bf16.mxu1 %v8322_v40  ;;  %v8385_v39 = vld [vmem:[%s11750_s1 + $0xc24] ss:$16 sps:$4 sm:$0xff]   ;;  %v8388_v40 = vld [vmem:[%s11750_s1 + $0xc2c] ss:$16 sps:$4 sm:$0xff]  }
 0x15b   :  { %5524 = vmatpush1.bf16.msra.mxu0 %v8317_v41  ;;  %6083 = vmatpush1.bf16.msra.mxu1 %v8320_v42  ;;  %v10358_v41 = vcombine.high %v10337_v34, %v10340_v35  ;;  %v1161_v42 = vcombine.low %v1126_v32, %v1154_v33  ;;  %v8466_v32 = vld [vmem:[%s11750_s1 + $0xdcc] ss:$16 sps:$4 sm:$0xff]   ;;  %v8461_v33 = vld [vmem:[%s11750_s1 + $0xdc0] ss:$16 sps:$4 sm:$0xff]  }
 0x15c   :  { %5525 = vmatprep.subr.bf16.mxu0 %v8325_v43  ;;  %6084 = vmatprep.subr.bf16.mxu1 %v8328_v44  ;;  %v8383_v43 = vld [vmem:[%s11750_s1 + $0xc20] ss:$16 sps:$4 sm:$0xff]   ;;  %v8386_v44 = vld [vmem:[%s11750_s1 + $0xc28] ss:$16 sps:$4 sm:$0xff]  }
 0x15f   :  { %5526 = vmatpush1.bf16.msra.mxu0 %v8323_v45  ;;  %6085 = vmatpush1.bf16.msra.mxu1 %v8326_v46  ;;  %v8391_v45 = vld [vmem:[%s11750_s1 + $0xc44] ss:$16 sps:$4 sm:$0xff]   ;;  %v8389_v46 = vld [vmem:[%s11750_s1 + $0xc40] ss:$16 sps:$4 sm:$0xff]  }
 0x160   :  { %5527 = vmatprep.subr.bf16.mxu0 %v8331_v50  ;;  %6086 = vmatprep.subr.bf16.mxu1 %v8334_v52  ;;  %v8392_v50 = vld [vmem:[%s11750_s1 + $0xc48] ss:$16 sps:$4 sm:$0xff]   ;;  %v8397_v52 = vld [vmem:[%s11750_s1 + $0xc64] ss:$16 sps:$4 sm:$0xff]  }
 0x163   :  { %5528 = vmatpush1.bf16.msra.mxu0 %v8329_v55  ;;  %6087 = vmatpush1.bf16.msra.mxu1 %v8332_v56  ;;  %v8400_v55 = vld [vmem:[%s11750_s1 + $0xc6c] ss:$16 sps:$4 sm:$0xff]   ;;  %v8395_v56 = vld [vmem:[%s11750_s1 + $0xc60] ss:$16 sps:$4 sm:$0xff]  }
 0x164   :  { %5529 = vmatprep.subr.bf16.mxu0 %v8337_v57  ;;  %6088 = vmatprep.subr.bf16.mxu1 %v8340_v58  ;;  %v8398_v57 = vld [vmem:[%s11750_s1 + $0xc68] ss:$16 sps:$4 sm:$0xff]   ;;  %v8403_v58 = vld [vmem:[%s11750_s1 + $0xc84] ss:$16 sps:$4 sm:$0xff]  }
 0x167   :  { %5530 = vmatpush1.bf16.msra.mxu0 %v8335_v19  ;;  %6089 = vmatpush1.bf16.msra.mxu1 %v8338_v59  ;;  %v8406_v19 = vld [vmem:[%s11750_s1 + $0xc8c] ss:$16 sps:$4 sm:$0xff]   ;;  %v8401_v59 = vld [vmem:[%s11750_s1 + $0xc80] ss:$16 sps:$4 sm:$0xff]  }
 0x168   :  { %5531 = vmatprep.subr.bf16.mxu0 %v8343_v60  ;;  %6090 = vmatprep.subr.bf16.mxu1 %v8346_v61  ;;  %v8404_v60 = vld [vmem:[%s11750_s1 + $0xc88] ss:$16 sps:$4 sm:$0xff]   ;;  %v8409_v61 = vld [vmem:[%s11750_s1 + $0xca4] ss:$16 sps:$4 sm:$0xff]  }
 0x16b   :  { %5532 = vmatpush1.bf16.msra.mxu0 %v8341_v62  ;;  %6091 = vmatpush1.bf16.msra.mxu1 %v8344_v48  ;;  %v8412_v62 = vld [vmem:[%s11750_s1 + $0xcac] ss:$16 sps:$4 sm:$0xff]   ;;  %v8407_v48 = vld [vmem:[%s11750_s1 + $0xca0] ss:$16 sps:$4 sm:$0xff]  }
 0x16c   :  { %5533 = vmatprep.subr.bf16.mxu0 %v8349_v49  ;;  %6092 = vmatprep.subr.bf16.mxu1 %v8352_v63  ;;  %v8410_v49 = vld [vmem:[%s11750_s1 + $0xca8] ss:$16 sps:$4 sm:$0xff]   ;;  %v8415_v63 = vld [vmem:[%s11750_s1 + $0xcc4] ss:$16 sps:$4 sm:$0xff]  }
 0x16f   :  { %5534 = vmatpush1.bf16.msra.mxu0 %v8347_v0  ;;  %6093 = vmatpush1.bf16.msra.mxu1 %v8350_v1  ;;  %v8418_v0 = vld [vmem:[%s11750_s1 + $0xccc] ss:$16 sps:$4 sm:$0xff]   ;;  %v8413_v1 = vld [vmem:[%s11750_s1 + $0xcc0] ss:$16 sps:$4 sm:$0xff]  }
 0x170   :  { %5535 = vmatprep.subr.bf16.mxu0 %v8355_v2  ;;  %6094 = vmatprep.subr.bf16.mxu1 %v8358_v51  ;;  %v8416_v2 = vld [vmem:[%s11750_s1 + $0xcc8] ss:$16 sps:$4 sm:$0xff]   ;;  %v8421_v51 = vld [vmem:[%s11750_s1 + $0xce4] ss:$16 sps:$4 sm:$0xff]  }
 0x173   :  { %5536 = vmatpush1.bf16.msra.mxu0 %v8353_v3  ;;  %6095 = vmatpush1.bf16.msra.mxu1 %v8356_v4  ;;  %v8424_v3 = vld [vmem:[%s11750_s1 + $0xcec] ss:$16 sps:$4 sm:$0xff]   ;;  %v8419_v4 = vld [vmem:[%s11750_s1 + $0xce0] ss:$16 sps:$4 sm:$0xff]  }
 0x174   :  { %5537 = vmatprep.subr.bf16.mxu0 %v8361_v5  ;;  %6096 = vmatprep.subr.bf16.mxu1 %v8364_v6  ;;  %v8422_v5 = vld [vmem:[%s11750_s1 + $0xce8] ss:$16 sps:$4 sm:$0xff]   ;;  %v8427_v6 = vld [vmem:[%s11750_s1 + $0xd04] ss:$16 sps:$4 sm:$0xff]  }
 0x177   :  { %5538 = vmatpush1.bf16.msra.mxu0 %v8359_v14  ;;  %6097 = vmatpush1.bf16.msra.mxu1 %v8362_v16  ;;  %v8436_v14 = vld [vmem:[%s11750_s1 + $0xd2c] ss:$16 sps:$4 sm:$0xff]   ;;  %v8431_v16 = vld [vmem:[%s11750_s1 + $0xd20] ss:$16 sps:$4 sm:$0xff]  }
 0x178   :  { %5539 = vmatprep.subr.bf16.mxu0 %v8367_v17  ;;  %6098 = vmatprep.subr.bf16.mxu1 %v8370_v18  ;;  %v8434_v17 = vld [vmem:[%s11750_s1 + $0xd28] ss:$16 sps:$4 sm:$0xff]   ;;  %v8439_v18 = vld [vmem:[%s11750_s1 + $0xd44] ss:$16 sps:$4 sm:$0xff]  }
 0x17b   :  { %5540 = vmatpush1.bf16.msra.mxu0 %v8365_v10  ;;  %6099 = vmatpush1.bf16.msra.mxu1 %v8368_v11  ;;  %v8448_v10 = vld [vmem:[%s11750_s1 + $0xd6c] ss:$16 sps:$4 sm:$0xff]   ;;  %v8443_v11 = vld [vmem:[%s11750_s1 + $0xd60] ss:$16 sps:$4 sm:$0xff]  }
 0x17c   :  { %5541 = vmatprep.subr.bf16.mxu0 %v8373_v23  ;;  %6100 = vmatprep.subr.bf16.mxu1 %v8376_v24  ;;  %v8446_v23 = vld [vmem:[%s11750_s1 + $0xd68] ss:$16 sps:$4 sm:$0xff]   ;;  %v8451_v24 = vld [vmem:[%s11750_s1 + $0xd84] ss:$16 sps:$4 sm:$0xff]  }
 0x17f   :  { %5542 = vmatpush1.bf16.msra.mxu0 %v8371_v13  ;;  %6101 = vmatpush1.bf16.msra.mxu1 %v8374_v29  ;;  %v8460_v13 = vld [vmem:[%s11750_s1 + $0xdac] ss:$16 sps:$4 sm:$0xff]   ;;  %v8455_v29 = vld [vmem:[%s11750_s1 + $0xda0] ss:$16 sps:$4 sm:$0xff]  }
 0x180   :  { %5554 = vmatprep.subr.bf16.mxu0 %v8379_v30  ;;  %6113 = vmatprep.subr.bf16.mxu1 %v8382_v31  ;;  %v8458_v30 = vld [vmem:[%s11750_s1 + $0xda8] ss:$16 sps:$4 sm:$0xff]   ;;  %v8463_v31 = vld [vmem:[%s11750_s1 + $0xdc4] ss:$16 sps:$4 sm:$0xff]  }
 0x182   :  { %5544 = vmatmul.mubr.bf16.vlgmr.msra.gmra.mrb[0].mxu0 %v9938_v15  ;;  %6103 = vmatmul.mubr.bf16.vlgmr.msra.gmra.mrb[0].mxu1 %v9938_v15  ;;  %v8394_v15 = vld [vmem:[%s11750_s1 + $0xc4c] ss:$16 sps:$4 sm:$0xff]  }
 0x183   :  { %5555 = vmatpush1.bf16.msra.mxu0 %v8377_v36  ;;  %6114 = vmatpush1.bf16.msra.mxu1 %v8380_v37  ;;  %v8464_v36 = vld [vmem:[%s11750_s1 + $0xdc8] ss:$16 sps:$4 sm:$0xff]   ;;  %v8469_v37 = vld [vmem:[%s11750_s1 + $0xde4] ss:$16 sps:$4 sm:$0xff]  }
 0x184   :  { %5556 = vmatprep.subr.bf16.mxu0 %v8385_v39  ;;  %6115 = vmatprep.subr.bf16.mxu1 %v8388_v40  ;;  %v8472_v39 = vld [vmem:[%s11750_s1 + $0xdec] ss:$16 sps:$4 sm:$0xff]   ;;  %v8467_v40 = vld [vmem:[%s11750_s1 + $0xde0] ss:$16 sps:$4 sm:$0xff]  }
 0x185   :  { %5586 = vmatprep.mubr.bf16.mxu0 %v1161_v42  ;;  %6145 = vmatprep.mubr.bf16.mxu1 %v1161_v42  ;;  %v8470_v42 = vld [vmem:[%s11750_s1 + $0xde8] ss:$16 sps:$4 sm:$0xff]  }
 0x187   :  { %5557 = vmatpush1.bf16.msra.mxu0 %v8383_v43  ;;  %6116 = vmatpush1.bf16.msra.mxu1 %v8386_v44  ;;  %v8479_v43 = vld [vmem:[%s11750_s1 + $0xe04] ss:$16 sps:$4 sm:$0xff]   ;;  %v8482_v44 = vld [vmem:[%s11750_s1 + $0xe0c] ss:$16 sps:$4 sm:$0xff]  }
 0x188   :  { %5558 = vmatprep.subr.bf16.mxu0 %v8391_v45  ;;  %6117 = vmatprep.subr.bf16.mxu1 %v8394_v15  ;;  %v1157_v45 = vcombine.low %v10337_v34, %v10340_v35  ;;  %v8477_v15 = vld [vmem:[%s11750_s1 + $0xe00] ss:$16 sps:$4 sm:$0xff]   ;;  %v8488_v34 = vld [vmem:[%s11750_s1 + $0xe2c] ss:$16 sps:$4 sm:$0xff]  }
 0x189   :  { %v8483_v35 = vld [vmem:[%s11750_s1 + $0xe20] ss:$16 sps:$4 sm:$0xff]  }
 0x18b   :  { %5559 = vmatpush1.bf16.msra.mxu0 %v8389_v46  ;;  %6118 = vmatpush1.bf16.msra.mxu1 %v8392_v50  ;;  %v8480_v46 = vld [vmem:[%s11750_s1 + $0xe08] ss:$16 sps:$4 sm:$0xff]   ;;  %v8485_v50 = vld [vmem:[%s11750_s1 + $0xe24] ss:$16 sps:$4 sm:$0xff]  }
 0x18c   :  { %5560 = vmatprep.subr.bf16.mxu0 %v8397_v52  ;;  %6119 = vmatprep.subr.bf16.mxu1 %v8400_v55  ;;  %v8486_v52 = vld [vmem:[%s11750_s1 + $0xe28] ss:$16 sps:$4 sm:$0xff]   ;;  %v8491_v55 = vld [vmem:[%s11750_s1 + $0xe44] ss:$16 sps:$4 sm:$0xff]  }
 0x18f   :  { %5561 = vmatpush1.bf16.msra.mxu0 %v8395_v56  ;;  %6120 = vmatpush1.bf16.msra.mxu1 %v8398_v57  ;;  %v8494_v56 = vld [vmem:[%s11750_s1 + $0xe4c] ss:$16 sps:$4 sm:$0xff]   ;;  %v8489_v57 = vld [vmem:[%s11750_s1 + $0xe40] ss:$16 sps:$4 sm:$0xff]  }
 0x190   :  { %5562 = vmatprep.subr.bf16.mxu0 %v8403_v58  ;;  %6121 = vmatprep.subr.bf16.mxu1 %v8406_v19  ;;  %v8492_v58 = vld [vmem:[%s11750_s1 + $0xe48] ss:$16 sps:$4 sm:$0xff]   ;;  %v8497_v19 = vld [vmem:[%s11750_s1 + $0xe64] ss:$16 sps:$4 sm:$0xff]  }
 0x193   :  { %5563 = vmatpush1.bf16.msra.mxu0 %v8401_v59  ;;  %6122 = vmatpush1.bf16.msra.mxu1 %v8404_v60  ;;  %v8495_v59 = vld [vmem:[%s11750_s1 + $0xe60] ss:$16 sps:$4 sm:$0xff]   ;;  %v8498_v60 = vld [vmem:[%s11750_s1 + $0xe68] ss:$16 sps:$4 sm:$0xff]  }
 0x194   :  { %5564 = vmatprep.subr.bf16.mxu0 %v8409_v61  ;;  %6123 = vmatprep.subr.bf16.mxu1 %v8412_v62  ;;  %v8503_v61 = vld [vmem:[%s11750_s1 + $0xe84] ss:$16 sps:$4 sm:$0xff]   ;;  %v8506_v62 = vld [vmem:[%s11750_s1 + $0xe8c] ss:$16 sps:$4 sm:$0xff]  }
 0x197   :  { %5565 = vmatpush1.bf16.msra.mxu0 %v8407_v48  ;;  %6124 = vmatpush1.bf16.msra.mxu1 %v8410_v49  ;;  %v8501_v48 = vld [vmem:[%s11750_s1 + $0xe80] ss:$16 sps:$4 sm:$0xff]   ;;  %v8504_v49 = vld [vmem:[%s11750_s1 + $0xe88] ss:$16 sps:$4 sm:$0xff]  }
 0x198   :  { %5566 = vmatprep.subr.bf16.mxu0 %v8415_v63  ;;  %6125 = vmatprep.subr.bf16.mxu1 %v8418_v0  ;;  %v8509_v63 = vld [vmem:[%s11750_s1 + $0xea4] ss:$16 sps:$4 sm:$0xff]   ;;  %v8512_v0 = vld [vmem:[%s11750_s1 + $0xeac] ss:$16 sps:$4 sm:$0xff]  }
 0x19b   :  { %5567 = vmatpush1.bf16.msra.mxu0 %v8413_v1  ;;  %6126 = vmatpush1.bf16.msra.mxu1 %v8416_v2  ;;  %v8507_v1 = vld [vmem:[%s11750_s1 + $0xea0] ss:$16 sps:$4 sm:$0xff]   ;;  %v8510_v2 = vld [vmem:[%s11750_s1 + $0xea8] ss:$16 sps:$4 sm:$0xff]  }
 0x19c   :  { %5568 = vmatprep.subr.bf16.mxu0 %v8421_v51  ;;  %6127 = vmatprep.subr.bf16.mxu1 %v8424_v3  ;;  %v8515_v51 = vld [vmem:[%s11750_s1 + $0xec4] ss:$16 sps:$4 sm:$0xff]   ;;  %v8518_v3 = vld [vmem:[%s11750_s1 + $0xecc] ss:$16 sps:$4 sm:$0xff]  }
 0x19f   :  { %5569 = vmatpush1.bf16.msra.mxu0 %v8419_v4  ;;  %6128 = vmatpush1.bf16.msra.mxu1 %v8422_v5  ;;  %v8513_v4 = vld [vmem:[%s11750_s1 + $0xec0] ss:$16 sps:$4 sm:$0xff]   ;;  %v8516_v5 = vld [vmem:[%s11750_s1 + $0xec8] ss:$16 sps:$4 sm:$0xff]  }
 0x1a0   :  { %5570 = vmatprep.subr.bf16.mxu0 %v8427_v6  ;;  %6129 = vmatprep.subr.bf16.mxu1 %v8430_v7  ;;  %v8521_v6 = vld [vmem:[%s11750_s1 + $0xee4] ss:$16 sps:$4 sm:$0xff]   ;;  %v8524_v7 = vld [vmem:[%s11750_s1 + $0xeec] ss:$16 sps:$4 sm:$0xff]  }
 0x1a3   :  { %5571 = vmatpush1.bf16.msra.mxu0 %v8425_v8  ;;  %6130 = vmatpush1.bf16.msra.mxu1 %v8428_v9  ;;  %v8519_v8 = vld [vmem:[%s11750_s1 + $0xee0] ss:$16 sps:$4 sm:$0xff]   ;;  %v8522_v9 = vld [vmem:[%s11750_s1 + $0xee8] ss:$16 sps:$4 sm:$0xff]  }
 0x1a4   :  { %5572 = vmatprep.subr.bf16.mxu0 %v8433_v12  ;;  %6131 = vmatprep.subr.bf16.mxu1 %v8436_v14  ;;  %v8527_v12 = vld [vmem:[%s11750_s1 + $0xf04] ss:$16 sps:$4 sm:$0xff]   ;;  %v8530_v14 = vld [vmem:[%s11750_s1 + $0xf0c] ss:$16 sps:$4 sm:$0xff]  }
 0x1a7   :  { %5573 = vmatpush1.bf16.msra.mxu0 %v8431_v16  ;;  %6132 = vmatpush1.bf16.msra.mxu1 %v8434_v17  ;;  %v8525_v16 = vld [vmem:[%s11750_s1 + $0xf00] ss:$16 sps:$4 sm:$0xff]   ;;  %v8528_v17 = vld [vmem:[%s11750_s1 + $0xf08] ss:$16 sps:$4 sm:$0xff]  }
 0x1a8   :  { %5574 = vmatprep.subr.bf16.mxu0 %v8439_v18  ;;  %6133 = vmatprep.subr.bf16.mxu1 %v8442_v20  ;;  %v8533_v18 = vld [vmem:[%s11750_s1 + $0xf24] ss:$16 sps:$4 sm:$0xff]   ;;  %v8536_v20 = vld [vmem:[%s11750_s1 + $0xf2c] ss:$16 sps:$4 sm:$0xff]  }
 0x1ab   :  { %5575 = vmatpush1.bf16.msra.mxu0 %v8437_v53  ;;  %6134 = vmatpush1.bf16.msra.mxu1 %v8440_v21  ;;  %v8531_v53 = vld [vmem:[%s11750_s1 + $0xf20] ss:$16 sps:$4 sm:$0xff]   ;;  %v8534_v21 = vld [vmem:[%s11750_s1 + $0xf28] ss:$16 sps:$4 sm:$0xff]  }
 0x1ac   :  { %5576 = vmatprep.subr.bf16.mxu0 %v8445_v22  ;;  %6135 = vmatprep.subr.bf16.mxu1 %v8448_v10  ;;  %v8539_v22 = vld [vmem:[%s11750_s1 + $0xf44] ss:$16 sps:$4 sm:$0xff]   ;;  %v8542_v10 = vld [vmem:[%s11750_s1 + $0xf4c] ss:$16 sps:$4 sm:$0xff]  }
 0x1af   :  { %5577 = vmatpush1.bf16.msra.mxu0 %v8443_v11  ;;  %6136 = vmatpush1.bf16.msra.mxu1 %v8446_v23  ;;  %v8537_v11 = vld [vmem:[%s11750_s1 + $0xf40] ss:$16 sps:$4 sm:$0xff]   ;;  %v8540_v23 = vld [vmem:[%s11750_s1 + $0xf48] ss:$16 sps:$4 sm:$0xff]  }
 0x1b0   :  { %5578 = vmatprep.subr.bf16.mxu0 %v8451_v24  ;;  %6137 = vmatprep.subr.bf16.mxu1 %v8454_v25  ;;  %v8545_v24 = vld [vmem:[%s11750_s1 + $0xf64] ss:$16 sps:$4 sm:$0xff]   ;;  %v8548_v25 = vld [vmem:[%s11750_s1 + $0xf6c] ss:$16 sps:$4 sm:$0xff]  }
 0x1b3   :  { %5579 = vmatpush1.bf16.msra.mxu0 %v8449_v26  ;;  %6138 = vmatpush1.bf16.msra.mxu1 %v8452_v27  ;;  %v8543_v26 = vld [vmem:[%s11750_s1 + $0xf60] ss:$16 sps:$4 sm:$0xff]   ;;  %v8546_v27 = vld [vmem:[%s11750_s1 + $0xf68] ss:$16 sps:$4 sm:$0xff]  }
 0x1b4   :  { %5580 = vmatprep.subr.bf16.mxu0 %v8457_v28  ;;  %6139 = vmatprep.subr.bf16.mxu1 %v8460_v13  ;;  %v8551_v28 = vld [vmem:[%s11750_s1 + $0xf84] ss:$16 sps:$4 sm:$0xff]   ;;  %v8554_v13 = vld [vmem:[%s11750_s1 + $0xf8c] ss:$16 sps:$4 sm:$0xff]  }
 0x1b7   :  { %5581 = vmatpush1.bf16.msra.mxu0 %v8455_v29  ;;  %6140 = vmatpush1.bf16.msra.mxu1 %v8458_v30  ;;  %v8549_v29 = vld [vmem:[%s11750_s1 + $0xf80] ss:$16 sps:$4 sm:$0xff]   ;;  %v8552_v30 = vld [vmem:[%s11750_s1 + $0xf88] ss:$16 sps:$4 sm:$0xff]  }
 0x1b8   :  { %5582 = vmatprep.subr.bf16.mxu0 %v8463_v31  ;;  %6141 = vmatprep.subr.bf16.mxu1 %v8466_v32  ;;  %v8557_v31 = vld [vmem:[%s11750_s1 + $0xfa4] ss:$16 sps:$4 sm:$0xff]   ;;  %v8560_v32 = vld [vmem:[%s11750_s1 + $0xfac] ss:$16 sps:$4 sm:$0xff]  }
 0x1bb   :  { %5583 = vmatpush1.bf16.msra.mxu0 %v8461_v33  ;;  %6142 = vmatpush1.bf16.msra.mxu1 %v8464_v36  ;;  %v8669_v33 = vld [vmem:[%s11749_s0 + $0x10] ss:$25 sps:$4 sm:$0xff]   ;;  %v8671_v36 = vld [vmem:[%s11749_s0 + $0x42] ss:$25 sps:$4 sm:$0xff]  }
 0x1bc   :  { %5584 = vmatprep.subr.bf16.mxu0 %v8469_v37  ;;  %6143 = vmatprep.subr.bf16.mxu1 %v8472_v39  ;;  %v8673_v37 = vld [vmem:[%s11749_s0 + $0x74] ss:$25 sps:$4 sm:$0xff]   ;;  %v8675_v39 = vld [vmem:[%s11749_s0 + $0xa6] ss:$25 sps:$4 sm:$0xff]  }
 0x1bf   :  { %5585 = vmatpush1.bf16.msra.mxu0 %v8467_v40  ;;  %6144 = vmatpush1.bf16.msra.mxu1 %v8470_v42  ;;  %v8555_v40 = vld [vmem:[%s11750_s1 + $0xfa0] ss:$16 sps:$4 sm:$0xff]   ;;  %v8558_v42 = vld [vmem:[%s11750_s1 + $0xfa8] ss:$16 sps:$4 sm:$0xff]  }
 0x1c0   :  { %5597 = vmatprep.subr.bf16.mxu0 %v8479_v43  ;;  %6156 = vmatprep.subr.bf16.mxu1 %v8482_v44  ;;  %v8563_v43 = vld [vmem:[%s11750_s1 + $0xfc4] ss:$16 sps:$4 sm:$0xff]   ;;  %v8566_v44 = vld [vmem:[%s11750_s1 + $0xfcc] ss:$16 sps:$4 sm:$0xff]  }
 0x1c2   :  { %5587 = vmatmul.mubr.bf16.vlgmr.msra.gmra.mrb[0].mxu0 %v1157_v45  ;;  %6146 = vmatmul.mubr.bf16.vlgmr.msra.gmra.mrb[0].mxu1 %v1157_v45  ;;  %v1177_v45 = vrot.slane %v8669_v33, %v9211_v54  ;;  %v8626_v33 = vld [vmem:[%s11750_s1 + $0x110c] ss:$16 sps:$4 sm:$0xff]  }
 0x1c3   :  { %5598 = vmatpush1.bf16.msra.mxu0 %v8477_v15  ;;  %6157 = vmatpush1.bf16.msra.mxu1 %v8480_v46  ;;  %v1191_v15 = vrot.slane %v8671_v36, %v9211_v54  ;;  %v1205_v46 = vrot.slane %v8673_v37, %v9211_v54  ;;  %v8621_v36 = vld [vmem:[%s11750_s1 + $0x1100] ss:$16 sps:$4 sm:$0xff]   ;;  %v8624_v37 = vld [vmem:[%s11750_s1 + $0x1108] ss:$16 sps:$4 sm:$0xff]  }
 0x1c4   :  { %5599 = vmatprep.subr.bf16.mxu0 %v8485_v50  ;;  %6158 = vmatprep.subr.bf16.mxu1 %v8488_v34  ;;  %v1219_v50 = vrot.slane %v8675_v39, %v9211_v54  ;;  %v8561_v34 = vld [vmem:[%s11750_s1 + $0xfc0] ss:$16 sps:$4 sm:$0xff]   ;;  %v8629_v39 = vld [vmem:[%s11750_s1 + $0x1124] ss:$16 sps:$4 sm:$0xff]  }
 0x1c5   :  { %5629 = vmatprep.mubr.bf16.mxu0 %v10348_v38  ;;  %6188 = vmatprep.mubr.bf16.mxu1 %v10348_v38  ;;  %v8500_v38 = vld [vmem:[%s11750_s1 + $0xe6c] ss:$16 sps:$4 sm:$0xff]  }
 0x1c7   :  { %5600 = vmatpush1.bf16.msra.mxu0 %v8483_v35  ;;  %6159 = vmatpush1.bf16.msra.mxu1 %v8486_v52  ;;  %v8564_v35 = vld [vmem:[%s11750_s1 + $0xfc8] ss:$16 sps:$4 sm:$0xff]   ;;  %v8569_v52 = vld [vmem:[%s11750_s1 + $0xfe4] ss:$16 sps:$4 sm:$0xff]  }
 0x1c8   :  { %5601 = vmatprep.subr.bf16.mxu0 %v8491_v55  ;;  %6160 = vmatprep.subr.bf16.mxu1 %v8494_v56  ;;  %v8572_v55 = vld [vmem:[%s11750_s1 + $0xfec] ss:$16 sps:$4 sm:$0xff]   ;;  %v1228_v56 = vcombine.high %v1177_v45, %v1191_v15 }
 0x1cb   :  { %5602 = vmatpush1.bf16.msra.mxu0 %v8489_v57  ;;  %6161 = vmatpush1.bf16.msra.mxu1 %v8492_v58  ;;  %v1232_v57 = vcombine.high %v1205_v46, %v1219_v50  ;;  %v1227_v58 = vcombine.low %v1177_v45, %v1191_v15  ;;  %v8638_v45 = vld [vmem:[%s11750_s1 + $0x114c] ss:$16 sps:$4 sm:$0xff]   ;;  %v8633_v15 = vld [vmem:[%s11750_s1 + $0x1140] ss:$16 sps:$4 sm:$0xff]  }
 0x1cc   :  { %5603 = vmatprep.subr.bf16.mxu0 %v8497_v19  ;;  %6162 = vmatprep.subr.bf16.mxu1 %v8500_v38  ;;  %v1231_v19 = vcombine.low %v1205_v46, %v1219_v50  ;;  %v8567_v38 = vld [vmem:[%s11750_s1 + $0xfe0] ss:$16 sps:$4 sm:$0xff]   ;;  %v8636_v46 = vld [vmem:[%s11750_s1 + $0x1148] ss:$16 sps:$4 sm:$0xff]   ;;  %v8641_v50 = vld [vmem:[%s11750_s1 + $0x1164] ss:$16 sps:$4 sm:$0xff]  }
 0x1cf   :  { %5604 = vmatpush1.bf16.msra.mxu0 %v8495_v59  ;;  %6163 = vmatpush1.bf16.msra.mxu1 %v8498_v60  ;;  %v8570_v59 = vld [vmem:[%s11750_s1 + $0xfe8] ss:$16 sps:$4 sm:$0xff]   ;;  %v8575_v60 = vld [vmem:[%s11750_s1 + $0x1004] ss:$16 sps:$4 sm:$0xff]  }
 0x1d0   :  { %5605 = vmatprep.subr.bf16.mxu0 %v8503_v61  ;;  %6164 = vmatprep.subr.bf16.mxu1 %v8506_v62  ;;  %v8578_v61 = vld [vmem:[%s11750_s1 + $0x100c] ss:$16 sps:$4 sm:$0xff]   ;;  %v1255_v62 = vrot.slane %v1228_v56, %v9211_v54 }
 0x1d1   :  { %v8650_v56 = vld [vmem:[%s11750_s1 + $0x118c] ss:$16 sps:$4 sm:$0xff]  }
 0x1d3   :  { %5606 = vmatpush1.bf16.msra.mxu0 %v8501_v48  ;;  %6165 = vmatpush1.bf16.msra.mxu1 %v8504_v49  ;;  %v1283_v48 = vrot.slane %v1232_v57, %v9211_v54  ;;  %v10757_v49 = vrot.slane %v1227_v58, %v9211_v54  ;;  %v8645_v57 = vld [vmem:[%s11750_s1 + $0x1180] ss:$16 sps:$4 sm:$0xff]   ;;  %v8648_v58 = vld [vmem:[%s11750_s1 + $0x1188] ss:$16 sps:$4 sm:$0xff]  }
 0x1d4   :  { %5607 = vmatprep.subr.bf16.mxu0 %v8509_v63  ;;  %6166 = vmatprep.subr.bf16.mxu1 %v8512_v0  ;;  %v10760_v63 = vrot.slane %v1231_v19, %v9211_v54  ;;  %v8573_v0 = vld [vmem:[%s11750_s1 + $0x1000] ss:$16 sps:$4 sm:$0xff]   ;;  %v8653_v19 = vld [vmem:[%s11750_s1 + $0x11a4] ss:$16 sps:$4 sm:$0xff]  }
 0x1d7   :  { %5608 = vmatpush1.bf16.msra.mxu0 %v8507_v1  ;;  %6167 = vmatpush1.bf16.msra.mxu1 %v8510_v2  ;;  %v8576_v1 = vld [vmem:[%s11750_s1 + $0x1008] ss:$16 sps:$4 sm:$0xff]   ;;  %v10768_v2 = vcombine.high %v1255_v62, %v1283_v48 }
 0x1d8   :  { %5609 = vmatprep.subr.bf16.mxu0 %v8515_v51  ;;  %6168 = vmatprep.subr.bf16.mxu1 %v8518_v3  ;;  %v8581_v51 = vld [vmem:[%s11750_s1 + $0x1024] ss:$16 sps:$4 sm:$0xff]   ;;  %v8584_v3 = vld [vmem:[%s11750_s1 + $0x102c] ss:$16 sps:$4 sm:$0xff]  }
 0x1db   :  { %5610 = vmatpush1.bf16.msra.mxu0 %v8513_v4  ;;  %6169 = vmatpush1.bf16.msra.mxu1 %v8516_v5  ;;  %v10778_v4 = vcombine.high %v10757_v49, %v10760_v63  ;;  %v1295_v5 = vcombine.low %v1255_v62, %v1283_v48  ;;  %v8662_v62 = vld [vmem:[%s11750_s1 + $0x11cc] ss:$16 sps:$4 sm:$0xff]   ;;  %v8657_v48 = vld [vmem:[%s11750_s1 + $0x11c0] ss:$16 sps:$4 sm:$0xff]  }
 0x1dc   :  { %5611 = vmatprep.subr.bf16.mxu0 %v8521_v6  ;;  %6170 = vmatprep.subr.bf16.mxu1 %v8524_v7  ;;  %v8579_v6 = vld [vmem:[%s11750_s1 + $0x1020] ss:$16 sps:$4 sm:$0xff]   ;;  %v8582_v7 = vld [vmem:[%s11750_s1 + $0x1028] ss:$16 sps:$4 sm:$0xff]  }
 0x1df   :  { %5612 = vmatpush1.bf16.msra.mxu0 %v8519_v8  ;;  %6171 = vmatpush1.bf16.msra.mxu1 %v8522_v9  ;;  %v8587_v8 = vld [vmem:[%s11750_s1 + $0x1044] ss:$16 sps:$4 sm:$0xff]   ;;  %v8585_v9 = vld [vmem:[%s11750_s1 + $0x1040] ss:$16 sps:$4 sm:$0xff]  }
 0x1e0   :  { %5613 = vmatprep.subr.bf16.mxu0 %v8527_v12  ;;  %6172 = vmatprep.subr.bf16.mxu1 %v8530_v14  ;;  %v8588_v12 = vld [vmem:[%s11750_s1 + $0x1048] ss:$16 sps:$4 sm:$0xff]   ;;  %v8593_v14 = vld [vmem:[%s11750_s1 + $0x1064] ss:$16 sps:$4 sm:$0xff]  }
 0x1e3   :  { %5614 = vmatpush1.bf16.msra.mxu0 %v8525_v16  ;;  %6173 = vmatpush1.bf16.msra.mxu1 %v8528_v17  ;;  %v8596_v16 = vld [vmem:[%s11750_s1 + $0x106c] ss:$16 sps:$4 sm:$0xff]   ;;  %v8591_v17 = vld [vmem:[%s11750_s1 + $0x1060] ss:$16 sps:$4 sm:$0xff]  }
 0x1e4   :  { %5615 = vmatprep.subr.bf16.mxu0 %v8533_v18  ;;  %6174 = vmatprep.subr.bf16.mxu1 %v8536_v20  ;;  %v8594_v18 = vld [vmem:[%s11750_s1 + $0x1068] ss:$16 sps:$4 sm:$0xff]   ;;  %v8599_v20 = vld [vmem:[%s11750_s1 + $0x1084] ss:$16 sps:$4 sm:$0xff]  }
 0x1e7   :  { %5616 = vmatpush1.bf16.msra.mxu0 %v8531_v53  ;;  %6175 = vmatpush1.bf16.msra.mxu1 %v8534_v21  ;;  %v8602_v53 = vld [vmem:[%s11750_s1 + $0x108c] ss:$16 sps:$4 sm:$0xff]   ;;  %v8597_v21 = vld [vmem:[%s11750_s1 + $0x1080] ss:$16 sps:$4 sm:$0xff]  }
 0x1e8   :  { %5617 = vmatprep.subr.bf16.mxu0 %v8539_v22  ;;  %6176 = vmatprep.subr.bf16.mxu1 %v8542_v10  ;;  %v8600_v22 = vld [vmem:[%s11750_s1 + $0x1088] ss:$16 sps:$4 sm:$0xff]   ;;  %v8605_v10 = vld [vmem:[%s11750_s1 + $0x10a4] ss:$16 sps:$4 sm:$0xff]  }
 0x1eb   :  { %5618 = vmatpush1.bf16.msra.mxu0 %v8537_v11  ;;  %6177 = vmatpush1.bf16.msra.mxu1 %v8540_v23  ;;  %v8608_v11 = vld [vmem:[%s11750_s1 + $0x10ac] ss:$16 sps:$4 sm:$0xff]   ;;  %v8603_v23 = vld [vmem:[%s11750_s1 + $0x10a0] ss:$16 sps:$4 sm:$0xff]  }
 0x1ec   :  { %5619 = vmatprep.subr.bf16.mxu0 %v8545_v24  ;;  %6178 = vmatprep.subr.bf16.mxu1 %v8548_v25  ;;  %v8606_v24 = vld [vmem:[%s11750_s1 + $0x10a8] ss:$16 sps:$4 sm:$0xff]   ;;  %v8611_v25 = vld [vmem:[%s11750_s1 + $0x10c4] ss:$16 sps:$4 sm:$0xff]  }
 0x1ef   :  { %5620 = vmatpush1.bf16.msra.mxu0 %v8543_v26  ;;  %6179 = vmatpush1.bf16.msra.mxu1 %v8546_v27  ;;  %v8614_v26 = vld [vmem:[%s11750_s1 + $0x10cc] ss:$16 sps:$4 sm:$0xff]   ;;  %v8609_v27 = vld [vmem:[%s11750_s1 + $0x10c0] ss:$16 sps:$4 sm:$0xff]  }
 0x1f0   :  { %5621 = vmatprep.subr.bf16.mxu0 %v8551_v28  ;;  %6180 = vmatprep.subr.bf16.mxu1 %v8554_v13  ;;  %v8612_v28 = vld [vmem:[%s11750_s1 + $0x10c8] ss:$16 sps:$4 sm:$0xff]   ;;  %v8617_v13 = vld [vmem:[%s11750_s1 + $0x10e4] ss:$16 sps:$4 sm:$0xff]  }
 0x1f3   :  { %5622 = vmatpush1.bf16.msra.mxu0 %v8549_v29  ;;  %6181 = vmatpush1.bf16.msra.mxu1 %v8552_v30  ;;  %v8620_v29 = vld [vmem:[%s11750_s1 + $0x10ec] ss:$16 sps:$4 sm:$0xff]   ;;  %v8615_v30 = vld [vmem:[%s11750_s1 + $0x10e0] ss:$16 sps:$4 sm:$0xff]  }
 0x1f4   :  { %5623 = vmatprep.subr.bf16.mxu0 %v8557_v31  ;;  %6182 = vmatprep.subr.bf16.mxu1 %v8560_v32  ;;  %v8618_v31 = vld [vmem:[%s11750_s1 + $0x10e8] ss:$16 sps:$4 sm:$0xff]   ;;  %v8623_v32 = vld [vmem:[%s11750_s1 + $0x1104] ss:$16 sps:$4 sm:$0xff]  }
 0x1f7   :  { %5624 = vmatpush1.bf16.msra.mxu0 %v8555_v40  ;;  %6183 = vmatpush1.bf16.msra.mxu1 %v8558_v42  ;;  %v8632_v40 = vld [vmem:[%s11750_s1 + $0x112c] ss:$16 sps:$4 sm:$0xff]   ;;  %v8627_v42 = vld [vmem:[%s11750_s1 + $0x1120] ss:$16 sps:$4 sm:$0xff]  }
 0x1f8   :  { %5625 = vmatprep.subr.bf16.mxu0 %v8563_v43  ;;  %6184 = vmatprep.subr.bf16.mxu1 %v8566_v44  ;;  %v8630_v43 = vld [vmem:[%s11750_s1 + $0x1128] ss:$16 sps:$4 sm:$0xff]   ;;  %v8635_v44 = vld [vmem:[%s11750_s1 + $0x1144] ss:$16 sps:$4 sm:$0xff]  }
 0x1fb   :  { %5626 = vmatpush1.bf16.msra.mxu0 %v8561_v34  ;;  %6185 = vmatpush1.bf16.msra.mxu1 %v8564_v35  ;;  %v8644_v34 = vld [vmem:[%s11750_s1 + $0x116c] ss:$16 sps:$4 sm:$0xff]   ;;  %v8639_v35 = vld [vmem:[%s11750_s1 + $0x1160] ss:$16 sps:$4 sm:$0xff]  }
 0x1fc   :  { %5627 = vmatprep.subr.bf16.mxu0 %v8569_v52  ;;  %6186 = vmatprep.subr.bf16.mxu1 %v8572_v55  ;;  %v8642_v52 = vld [vmem:[%s11750_s1 + $0x1168] ss:$16 sps:$4 sm:$0xff]   ;;  %v8647_v55 = vld [vmem:[%s11750_s1 + $0x1184] ss:$16 sps:$4 sm:$0xff]  }
 0x1ff   :  { %5628 = vmatpush1.bf16.msra.mxu0 %v8567_v38  ;;  %6187 = vmatpush1.bf16.msra.mxu1 %v8570_v59  ;;  %v8656_v38 = vld [vmem:[%s11750_s1 + $0x11ac] ss:$16 sps:$4 sm:$0xff]   ;;  %v8651_v59 = vld [vmem:[%s11750_s1 + $0x11a0] ss:$16 sps:$4 sm:$0xff]  }
 0x200   :  { %5640 = vmatprep.subr.bf16.mxu0 %v8575_v60  ;;  %6199 = vmatprep.subr.bf16.mxu1 %v8578_v61  ;;  %v8654_v60 = vld [vmem:[%s11750_s1 + $0x11a8] ss:$16 sps:$4 sm:$0xff]   ;;  %v8659_v61 = vld [vmem:[%s11750_s1 + $0x11c4] ss:$16 sps:$4 sm:$0xff]  }
 0x202   :  { %5630 = vmatmul.mubr.bf16.vlgmr.msra.gmra.mrb[0].mxu0 %v10358_v41  ;;  %6189 = vmatmul.mubr.bf16.vlgmr.msra.gmra.mrb[0].mxu1 %v10358_v41  ;;  %v8590_v41 = vld [vmem:[%s11750_s1 + $0x104c] ss:$16 sps:$4 sm:$0xff]  }
 0x203   :  { %5641 = vmatpush1.bf16.msra.mxu0 %v8573_v0  ;;  %6200 = vmatpush1.bf16.msra.mxu1 %v8576_v1  ;;  %v8660_v0 = vld [vmem:[%s11750_s1 + $0x11c8] ss:$16 sps:$4 sm:$0xff]   ;;  %v8665_v1 = vld [vmem:[%s11750_s1 + $0x11e4] ss:$16 sps:$4 sm:$0xff]  }
 0x204   :  { %5642 = vmatprep.subr.bf16.mxu0 %v8581_v51  ;;  %6201 = vmatprep.subr.bf16.mxu1 %v8584_v3  ;;  %v8668_v51 = vld [vmem:[%s11750_s1 + $0x11ec] ss:$16 sps:$4 sm:$0xff]   ;;  %v8663_v3 = vld [vmem:[%s11750_s1 + $0x11e0] ss:$16 sps:$4 sm:$0xff]  }
 0x205   :  { %5672 = vmatprep.mubr.bf16.mxu0 %v1295_v5  ;;  %6231 = vmatprep.mubr.bf16.mxu1 %v1295_v5  ;;  %v8666_v5 = vld [vmem:[%s11750_s1 + $0x11e8] ss:$16 sps:$4 sm:$0xff]  }
 0x207   :  { %5643 = vmatpush1.bf16.msra.mxu0 %v8579_v6  ;;  %6202 = vmatpush1.bf16.msra.mxu1 %v8582_v7  ;;  %v8679_v6 = vld [vmem:[%s11750_s1 + $0x1204] ss:$16 sps:$4 sm:$0xff]   ;;  %v8682_v7 = vld [vmem:[%s11750_s1 + $0x120c] ss:$16 sps:$4 sm:$0xff]  }
 0x208   :  { %5644 = vmatprep.subr.bf16.mxu0 %v8587_v8  ;;  %6203 = vmatprep.subr.bf16.mxu1 %v8590_v41  ;;  %v1291_v8 = vcombine.low %v10757_v49, %v10760_v63  ;;  %v8677_v41 = vld [vmem:[%s11750_s1 + $0x1200] ss:$16 sps:$4 sm:$0xff]   ;;  %v8688_v49 = vld [vmem:[%s11750_s1 + $0x122c] ss:$16 sps:$4 sm:$0xff]  }
 0x209   :  { %v8683_v63 = vld [vmem:[%s11750_s1 + $0x1220] ss:$16 sps:$4 sm:$0xff]  }
 0x20b   :  { %5645 = vmatpush1.bf16.msra.mxu0 %v8585_v9  ;;  %6204 = vmatpush1.bf16.msra.mxu1 %v8588_v12  ;;  %v8680_v9 = vld [vmem:[%s11750_s1 + $0x1208] ss:$16 sps:$4 sm:$0xff]   ;;  %v8685_v12 = vld [vmem:[%s11750_s1 + $0x1224] ss:$16 sps:$4 sm:$0xff]  }
 0x20c   :  { %5646 = vmatprep.subr.bf16.mxu0 %v8593_v14  ;;  %6205 = vmatprep.subr.bf16.mxu1 %v8596_v16  ;;  %v8686_v14 = vld [vmem:[%s11750_s1 + $0x1228] ss:$16 sps:$4 sm:$0xff]   ;;  %v8691_v16 = vld [vmem:[%s11750_s1 + $0x1244] ss:$16 sps:$4 sm:$0xff]  }
 0x20f   :  { %5647 = vmatpush1.bf16.msra.mxu0 %v8591_v17  ;;  %6206 = vmatpush1.bf16.msra.mxu1 %v8594_v18  ;;  %v8694_v17 = vld [vmem:[%s11750_s1 + $0x124c] ss:$16 sps:$4 sm:$0xff]   ;;  %v8689_v18 = vld [vmem:[%s11750_s1 + $0x1240] ss:$16 sps:$4 sm:$0xff]  }
 0x210   :  { %5648 = vmatprep.subr.bf16.mxu0 %v8599_v20  ;;  %6207 = vmatprep.subr.bf16.mxu1 %v8602_v53  ;;  %v8692_v20 = vld [vmem:[%s11750_s1 + $0x1248] ss:$16 sps:$4 sm:$0xff]   ;;  %v8697_v53 = vld [vmem:[%s11750_s1 + $0x1264] ss:$16 sps:$4 sm:$0xff]  }
 0x213   :  { %5649 = vmatpush1.bf16.msra.mxu0 %v8597_v21  ;;  %6208 = vmatpush1.bf16.msra.mxu1 %v8600_v22  ;;  %v8695_v21 = vld [vmem:[%s11750_s1 + $0x1260] ss:$16 sps:$4 sm:$0xff]   ;;  %v8698_v22 = vld [vmem:[%s11750_s1 + $0x1268] ss:$16 sps:$4 sm:$0xff]  }
 0x214   :  { %5650 = vmatprep.subr.bf16.mxu0 %v8605_v10  ;;  %6209 = vmatprep.subr.bf16.mxu1 %v8608_v11  ;;  %v8703_v10 = vld [vmem:[%s11750_s1 + $0x1284] ss:$16 sps:$4 sm:$0xff]   ;;  %v8706_v11 = vld [vmem:[%s11750_s1 + $0x128c] ss:$16 sps:$4 sm:$0xff]  }
 0x217   :  { %5651 = vmatpush1.bf16.msra.mxu0 %v8603_v23  ;;  %6210 = vmatpush1.bf16.msra.mxu1 %v8606_v24  ;;  %v8701_v23 = vld [vmem:[%s11750_s1 + $0x1280] ss:$16 sps:$4 sm:$0xff]   ;;  %v8704_v24 = vld [vmem:[%s11750_s1 + $0x1288] ss:$16 sps:$4 sm:$0xff]  }
 0x218   :  { %5652 = vmatprep.subr.bf16.mxu0 %v8611_v25  ;;  %6211 = vmatprep.subr.bf16.mxu1 %v8614_v26  ;;  %v8709_v25 = vld [vmem:[%s11750_s1 + $0x12a4] ss:$16 sps:$4 sm:$0xff]   ;;  %v8712_v26 = vld [vmem:[%s11750_s1 + $0x12ac] ss:$16 sps:$4 sm:$0xff]  }
 0x21b   :  { %5653 = vmatpush1.bf16.msra.mxu0 %v8609_v27  ;;  %6212 = vmatpush1.bf16.msra.mxu1 %v8612_v28  ;;  %v8707_v27 = vld [vmem:[%s11750_s1 + $0x12a0] ss:$16 sps:$4 sm:$0xff]   ;;  %v8710_v28 = vld [vmem:[%s11750_s1 + $0x12a8] ss:$16 sps:$4 sm:$0xff]  }
 0x21c   :  { %5654 = vmatprep.subr.bf16.mxu0 %v8617_v13  ;;  %6213 = vmatprep.subr.bf16.mxu1 %v8620_v29  ;;  %v8715_v13 = vld [vmem:[%s11750_s1 + $0x12c4] ss:$16 sps:$4 sm:$0xff]   ;;  %v8718_v29 = vld [vmem:[%s11750_s1 + $0x12cc] ss:$16 sps:$4 sm:$0xff]  }
 0x21f   :  { %5655 = vmatpush1.bf16.msra.mxu0 %v8615_v30  ;;  %6214 = vmatpush1.bf16.msra.mxu1 %v8618_v31  ;;  %v8713_v30 = vld [vmem:[%s11750_s1 + $0x12c0] ss:$16 sps:$4 sm:$0xff]   ;;  %v8716_v31 = vld [vmem:[%s11750_s1 + $0x12c8] ss:$16 sps:$4 sm:$0xff]  }
 0x220   :  { %5656 = vmatprep.subr.bf16.mxu0 %v8623_v32  ;;  %6215 = vmatprep.subr.bf16.mxu1 %v8626_v33  ;;  %v8721_v32 = vld [vmem:[%s11750_s1 + $0x12e4] ss:$16 sps:$4 sm:$0xff]   ;;  %v8724_v33 = vld [vmem:[%s11750_s1 + $0x12ec] ss:$16 sps:$4 sm:$0xff]  }
 0x223   :  { %5657 = vmatpush1.bf16.msra.mxu0 %v8621_v36  ;;  %6216 = vmatpush1.bf16.msra.mxu1 %v8624_v37  ;;  %v8719_v36 = vld [vmem:[%s11750_s1 + $0x12e0] ss:$16 sps:$4 sm:$0xff]   ;;  %v8722_v37 = vld [vmem:[%s11750_s1 + $0x12e8] ss:$16 sps:$4 sm:$0xff]  }
 0x224   :  { %5658 = vmatprep.subr.bf16.mxu0 %v8629_v39  ;;  %6217 = vmatprep.subr.bf16.mxu1 %v8632_v40  ;;  %v8727_v39 = vld [vmem:[%s11750_s1 + $0x1304] ss:$16 sps:$4 sm:$0xff]   ;;  %v8730_v40 = vld [vmem:[%s11750_s1 + $0x130c] ss:$16 sps:$4 sm:$0xff]  }
 0x227   :  { %5659 = vmatpush1.bf16.msra.mxu0 %v8627_v42  ;;  %6218 = vmatpush1.bf16.msra.mxu1 %v8630_v43  ;;  %v8725_v42 = vld [vmem:[%s11750_s1 + $0x1300] ss:$16 sps:$4 sm:$0xff]   ;;  %v8728_v43 = vld [vmem:[%s11750_s1 + $0x1308] ss:$16 sps:$4 sm:$0xff]  }
 0x228   :  { %5660 = vmatprep.subr.bf16.mxu0 %v8635_v44  ;;  %6219 = vmatprep.subr.bf16.mxu1 %v8638_v45  ;;  %v8733_v44 = vld [vmem:[%s11750_s1 + $0x1324] ss:$16 sps:$4 sm:$0xff]   ;;  %v8736_v45 = vld [vmem:[%s11750_s1 + $0x132c] ss:$16 sps:$4 sm:$0xff]  }
 0x22b   :  { %5661 = vmatpush1.bf16.msra.mxu0 %v8633_v15  ;;  %6220 = vmatpush1.bf16.msra.mxu1 %v8636_v46  ;;  %v8731_v15 = vld [vmem:[%s11750_s1 + $0x1320] ss:$16 sps:$4 sm:$0xff]   ;;  %v8734_v46 = vld [vmem:[%s11750_s1 + $0x1328] ss:$16 sps:$4 sm:$0xff]  }
 0x22c   :  { %5662 = vmatprep.subr.bf16.mxu0 %v8641_v50  ;;  %6221 = vmatprep.subr.bf16.mxu1 %v8644_v34  ;;  %v8739_v50 = vld [vmem:[%s11750_s1 + $0x1344] ss:$16 sps:$4 sm:$0xff]   ;;  %v8742_v34 = vld [vmem:[%s11750_s1 + $0x134c] ss:$16 sps:$4 sm:$0xff]  }
 0x22f   :  { %5663 = vmatpush1.bf16.msra.mxu0 %v8639_v35  ;;  %6222 = vmatpush1.bf16.msra.mxu1 %v8642_v52  ;;  %v8737_v35 = vld [vmem:[%s11750_s1 + $0x1340] ss:$16 sps:$4 sm:$0xff]   ;;  %v8740_v52 = vld [vmem:[%s11750_s1 + $0x1348] ss:$16 sps:$4 sm:$0xff]  }
 0x230   :  { %5664 = vmatprep.subr.bf16.mxu0 %v8647_v55  ;;  %6223 = vmatprep.subr.bf16.mxu1 %v8650_v56  ;;  %v8745_v55 = vld [vmem:[%s11750_s1 + $0x1364] ss:$16 sps:$4 sm:$0xff]   ;;  %v8748_v56 = vld [vmem:[%s11750_s1 + $0x136c] ss:$16 sps:$4 sm:$0xff]  }
 0x233   :  { %5665 = vmatpush1.bf16.msra.mxu0 %v8645_v57  ;;  %6224 = vmatpush1.bf16.msra.mxu1 %v8648_v58  ;;  %v8743_v57 = vld [vmem:[%s11750_s1 + $0x1360] ss:$16 sps:$4 sm:$0xff]   ;;  %v8746_v58 = vld [vmem:[%s11750_s1 + $0x1368] ss:$16 sps:$4 sm:$0xff]  }
 0x234   :  { %5666 = vmatprep.subr.bf16.mxu0 %v8653_v19  ;;  %6225 = vmatprep.subr.bf16.mxu1 %v8656_v38  ;;  %v8751_v19 = vld [vmem:[%s11750_s1 + $0x1384] ss:$16 sps:$4 sm:$0xff]   ;;  %v8754_v38 = vld [vmem:[%s11750_s1 + $0x138c] ss:$16 sps:$4 sm:$0xff]  }
 0x237   :  { %5667 = vmatpush1.bf16.msra.mxu0 %v8651_v59  ;;  %6226 = vmatpush1.bf16.msra.mxu1 %v8654_v60  ;;  %v8749_v59 = vld [vmem:[%s11750_s1 + $0x1380] ss:$16 sps:$4 sm:$0xff]   ;;  %v8752_v60 = vld [vmem:[%s11750_s1 + $0x1388] ss:$16 sps:$4 sm:$0xff]  }
 0x238   :  { %5668 = vmatprep.subr.bf16.mxu0 %v8659_v61  ;;  %6227 = vmatprep.subr.bf16.mxu1 %v8662_v62  ;;  %v8757_v61 = vld [vmem:[%s11750_s1 + $0x13a4] ss:$16 sps:$4 sm:$0xff]   ;;  %v8760_v62 = vld [vmem:[%s11750_s1 + $0x13ac] ss:$16 sps:$4 sm:$0xff]  }
 0x23b   :  { %5669 = vmatpush1.bf16.msra.mxu0 %v8657_v48  ;;  %6228 = vmatpush1.bf16.msra.mxu1 %v8660_v0  ;;  %v8869_v48 = vld [vmem:[%s11749_s0 + $0x14] ss:$25 sps:$4 sm:$0xff]   ;;  %v8870_v0 = vld [vmem:[%s11749_s0 + $0x46] ss:$25 sps:$4 sm:$0xff]  }
 0x23c   :  { %5670 = vmatprep.subr.bf16.mxu0 %v8665_v1  ;;  %6229 = vmatprep.subr.bf16.mxu1 %v8668_v51  ;;  %v8871_v1 = vld [vmem:[%s11749_s0 + $0x78] ss:$25 sps:$4 sm:$0xff]   ;;  %v8872_v51 = vld [vmem:[%s11749_s0 + $0xaa] ss:$25 sps:$4 sm:$0xff]  }
 0x23f   :  { %5671 = vmatpush1.bf16.msra.mxu0 %v8663_v3  ;;  %6230 = vmatpush1.bf16.msra.mxu1 %v8666_v5  ;;  %v8755_v3 = vld [vmem:[%s11750_s1 + $0x13a0] ss:$16 sps:$4 sm:$0xff]   ;;  %v8758_v5 = vld [vmem:[%s11750_s1 + $0x13a8] ss:$16 sps:$4 sm:$0xff]  }
 0x240   :  { %5683 = vmatprep.subr.bf16.mxu0 %v8679_v6  ;;  %6242 = vmatprep.subr.bf16.mxu1 %v8682_v7  ;;  %v8763_v6 = vld [vmem:[%s11750_s1 + $0x13c4] ss:$16 sps:$4 sm:$0xff]   ;;  %v8766_v7 = vld [vmem:[%s11750_s1 + $0x13cc] ss:$16 sps:$4 sm:$0xff]  }
 0x242   :  { %5673 = vmatmul.mubr.bf16.vlgmr.msra.gmra.mrb[0].mxu0 %v1291_v8  ;;  %6232 = vmatmul.mubr.bf16.vlgmr.msra.gmra.mrb[0].mxu1 %v1291_v8  ;;  %v1184_v8 = vrot.slane %v8869_v48, %v9211_v54  ;;  %v8826_v48 = vld [vmem:[%s11750_s1 + $0x150c] ss:$16 sps:$4 sm:$0xff]  }
 0x243   :  { %5684 = vmatpush1.bf16.msra.mxu0 %v8677_v41  ;;  %6243 = vmatpush1.bf16.msra.mxu1 %v8680_v9  ;;  %v1198_v41 = vrot.slane %v8870_v0, %v9211_v54  ;;  %v1212_v9 = vrot.slane %v8871_v1, %v9211_v54  ;;  %v8821_v0 = vld [vmem:[%s11750_s1 + $0x1500] ss:$16 sps:$4 sm:$0xff]   ;;  %v8824_v1 = vld [vmem:[%s11750_s1 + $0x1508] ss:$16 sps:$4 sm:$0xff]  }
 0x244   :  { %5685 = vmatprep.subr.bf16.mxu0 %v8685_v12  ;;  %6244 = vmatprep.subr.bf16.mxu1 %v8688_v49  ;;  %v1226_v12 = vrot.slane %v8872_v51, %v9211_v54  ;;  %v8761_v49 = vld [vmem:[%s11750_s1 + $0x13c0] ss:$16 sps:$4 sm:$0xff]   ;;  %v8829_v51 = vld [vmem:[%s11750_s1 + $0x1524] ss:$16 sps:$4 sm:$0xff]  }
 0x245   :  { %5715 = vmatprep.mubr.bf16.mxu0 %v10768_v2  ;;  %6274 = vmatprep.mubr.bf16.mxu1 %v10768_v2  ;;  %v8700_v2 = vld [vmem:[%s11750_s1 + $0x126c] ss:$16 sps:$4 sm:$0xff]  }
 0x247   :  { %5686 = vmatpush1.bf16.msra.mxu0 %v8683_v63  ;;  %6245 = vmatpush1.bf16.msra.mxu1 %v8686_v14  ;;  %v8764_v63 = vld [vmem:[%s11750_s1 + $0x13c8] ss:$16 sps:$4 sm:$0xff]   ;;  %v8769_v14 = vld [vmem:[%s11750_s1 + $0x13e4] ss:$16 sps:$4 sm:$0xff]  }
 0x248   :  { %5687 = vmatprep.subr.bf16.mxu0 %v8691_v16  ;;  %6246 = vmatprep.subr.bf16.mxu1 %v8694_v17  ;;  %v8772_v16 = vld [vmem:[%s11750_s1 + $0x13ec] ss:$16 sps:$4 sm:$0xff]   ;;  %v1230_v17 = vcombine.high %v1184_v8, %v1198_v41 }
 0x24b   :  { %5688 = vmatpush1.bf16.msra.mxu0 %v8689_v18  ;;  %6247 = vmatpush1.bf16.msra.mxu1 %v8692_v20  ;;  %v1234_v18 = vcombine.high %v1212_v9, %v1226_v12  ;;  %v1229_v20 = vcombine.low %v1184_v8, %v1198_v41  ;;  %v8838_v8 = vld [vmem:[%s11750_s1 + $0x154c] ss:$16 sps:$4 sm:$0xff]   ;;  %v8833_v41 = vld [vmem:[%s11750_s1 + $0x1540] ss:$16 sps:$4 sm:$0xff]  }
 0x24c   :  { %5689 = vmatprep.subr.bf16.mxu0 %v8697_v53  ;;  %6248 = vmatprep.subr.bf16.mxu1 %v8700_v2  ;;  %v1233_v53 = vcombine.low %v1212_v9, %v1226_v12  ;;  %v8767_v2 = vld [vmem:[%s11750_s1 + $0x13e0] ss:$16 sps:$4 sm:$0xff]   ;;  %v8836_v9 = vld [vmem:[%s11750_s1 + $0x1548] ss:$16 sps:$4 sm:$0xff]   ;;  %v8841_v12 = vld [vmem:[%s11750_s1 + $0x1564] ss:$16 sps:$4 sm:$0xff]  }
 0x24f   :  { %5690 = vmatpush1.bf16.msra.mxu0 %v8695_v21  ;;  %6249 = vmatpush1.bf16.msra.mxu1 %v8698_v22  ;;  %v8770_v21 = vld [vmem:[%s11750_s1 + $0x13e8] ss:$16 sps:$4 sm:$0xff]   ;;  %v8775_v22 = vld [vmem:[%s11750_s1 + $0x1404] ss:$16 sps:$4 sm:$0xff]  }
 0x250   :  { %5691 = vmatprep.subr.bf16.mxu0 %v8703_v10  ;;  %6250 = vmatprep.subr.bf16.mxu1 %v8706_v11  ;;  %v8778_v10 = vld [vmem:[%s11750_s1 + $0x140c] ss:$16 sps:$4 sm:$0xff]   ;;  %v1262_v11 = vrot.slane %v1230_v17, %v9211_v54 }
 0x251   :  { %v8850_v17 = vld [vmem:[%s11750_s1 + $0x158c] ss:$16 sps:$4 sm:$0xff]  }
 0x253   :  { %5692 = vmatpush1.bf16.msra.mxu0 %v8701_v23  ;;  %6251 = vmatpush1.bf16.msra.mxu1 %v8704_v24  ;;  %v1290_v23 = vrot.slane %v1234_v18, %v9211_v54  ;;  %v11177_v24 = vrot.slane %v1229_v20, %v9211_v54  ;;  %v8845_v18 = vld [vmem:[%s11750_s1 + $0x1580] ss:$16 sps:$4 sm:$0xff]   ;;  %v8848_v20 = vld [vmem:[%s11750_s1 + $0x1588] ss:$16 sps:$4 sm:$0xff]  }
 0x254   :  { %5693 = vmatprep.subr.bf16.mxu0 %v8709_v25  ;;  %6252 = vmatprep.subr.bf16.mxu1 %v8712_v26  ;;  %v11180_v25 = vrot.slane %v1233_v53, %v9211_v54  ;;  %v8773_v26 = vld [vmem:[%s11750_s1 + $0x1400] ss:$16 sps:$4 sm:$0xff]   ;;  %v8853_v53 = vld [vmem:[%s11750_s1 + $0x15a4] ss:$16 sps:$4 sm:$0xff]  }
 0x257   :  { %5694 = vmatpush1.bf16.msra.mxu0 %v8707_v27  ;;  %6253 = vmatpush1.bf16.msra.mxu1 %v8710_v28  ;;  %v8776_v27 = vld [vmem:[%s11750_s1 + $0x1408] ss:$16 sps:$4 sm:$0xff]   ;;  %v11188_v28 = vcombine.high %v1262_v11, %v1290_v23 }
 0x258   :  { %5695 = vmatprep.subr.bf16.mxu0 %v8715_v13  ;;  %6254 = vmatprep.subr.bf16.mxu1 %v8718_v29  ;;  %v8781_v13 = vld [vmem:[%s11750_s1 + $0x1424] ss:$16 sps:$4 sm:$0xff]   ;;  %v8784_v29 = vld [vmem:[%s11750_s1 + $0x142c] ss:$16 sps:$4 sm:$0xff]  }
 0x25b   :  { %5696 = vmatpush1.bf16.msra.mxu0 %v8713_v30  ;;  %6255 = vmatpush1.bf16.msra.mxu1 %v8716_v31  ;;  %v11198_v30 = vcombine.high %v11177_v24, %v11180_v25  ;;  %v1297_v31 = vcombine.low %v1262_v11, %v1290_v23  ;;  %v8862_v11 = vld [vmem:[%s11750_s1 + $0x15cc] ss:$16 sps:$4 sm:$0xff]   ;;  %v8857_v23 = vld [vmem:[%s11750_s1 + $0x15c0] ss:$16 sps:$4 sm:$0xff]  }
 0x25c   :  { %5697 = vmatprep.subr.bf16.mxu0 %v8721_v32  ;;  %6256 = vmatprep.subr.bf16.mxu1 %v8724_v33  ;;  %v8779_v32 = vld [vmem:[%s11750_s1 + $0x1420] ss:$16 sps:$4 sm:$0xff]   ;;  %v8782_v33 = vld [vmem:[%s11750_s1 + $0x1428] ss:$16 sps:$4 sm:$0xff]  }
 0x25f   :  { %5698 = vmatpush1.bf16.msra.mxu0 %v8719_v36  ;;  %6257 = vmatpush1.bf16.msra.mxu1 %v8722_v37  ;;  %v8787_v36 = vld [vmem:[%s11750_s1 + $0x1444] ss:$16 sps:$4 sm:$0xff]   ;;  %v8785_v37 = vld [vmem:[%s11750_s1 + $0x1440] ss:$16 sps:$4 sm:$0xff]  }
 0x260   :  { %5699 = vmatprep.subr.bf16.mxu0 %v8727_v39  ;;  %6258 = vmatprep.subr.bf16.mxu1 %v8730_v40  ;;  %v8788_v39 = vld [vmem:[%s11750_s1 + $0x1448] ss:$16 sps:$4 sm:$0xff]   ;;  %v8793_v40 = vld [vmem:[%s11750_s1 + $0x1464] ss:$16 sps:$4 sm:$0xff]  }
 0x263   :  { %5700 = vmatpush1.bf16.msra.mxu0 %v8725_v42  ;;  %6259 = vmatpush1.bf16.msra.mxu1 %v8728_v43  ;;  %v8796_v42 = vld [vmem:[%s11750_s1 + $0x146c] ss:$16 sps:$4 sm:$0xff]   ;;  %v8791_v43 = vld [vmem:[%s11750_s1 + $0x1460] ss:$16 sps:$4 sm:$0xff]  }
 0x264   :  { %5701 = vmatprep.subr.bf16.mxu0 %v8733_v44  ;;  %6260 = vmatprep.subr.bf16.mxu1 %v8736_v45  ;;  %v8794_v44 = vld [vmem:[%s11750_s1 + $0x1468] ss:$16 sps:$4 sm:$0xff]   ;;  %v8799_v45 = vld [vmem:[%s11750_s1 + $0x1484] ss:$16 sps:$4 sm:$0xff]  }
 0x267   :  { %5702 = vmatpush1.bf16.msra.mxu0 %v8731_v15  ;;  %6261 = vmatpush1.bf16.msra.mxu1 %v8734_v46  ;;  %v8802_v15 = vld [vmem:[%s11750_s1 + $0x148c] ss:$16 sps:$4 sm:$0xff]   ;;  %v8797_v46 = vld [vmem:[%s11750_s1 + $0x1480] ss:$16 sps:$4 sm:$0xff]  }
 0x268   :  { %5703 = vmatprep.subr.bf16.mxu0 %v8739_v50  ;;  %6262 = vmatprep.subr.bf16.mxu1 %v8742_v34  ;;  %v8800_v50 = vld [vmem:[%s11750_s1 + $0x1488] ss:$16 sps:$4 sm:$0xff]   ;;  %v8805_v34 = vld [vmem:[%s11750_s1 + $0x14a4] ss:$16 sps:$4 sm:$0xff]  }
 0x26b   :  { %5704 = vmatpush1.bf16.msra.mxu0 %v8737_v35  ;;  %6263 = vmatpush1.bf16.msra.mxu1 %v8740_v52  ;;  %v8808_v35 = vld [vmem:[%s11750_s1 + $0x14ac] ss:$16 sps:$4 sm:$0xff]   ;;  %v8803_v52 = vld [vmem:[%s11750_s1 + $0x14a0] ss:$16 sps:$4 sm:$0xff]  }
 0x26c   :  { %5705 = vmatprep.subr.bf16.mxu0 %v8745_v55  ;;  %6264 = vmatprep.subr.bf16.mxu1 %v8748_v56  ;;  %v8806_v55 = vld [vmem:[%s11750_s1 + $0x14a8] ss:$16 sps:$4 sm:$0xff]   ;;  %v8811_v56 = vld [vmem:[%s11750_s1 + $0x14c4] ss:$16 sps:$4 sm:$0xff]  }
 0x26f   :  { %5706 = vmatpush1.bf16.msra.mxu0 %v8743_v57  ;;  %6265 = vmatpush1.bf16.msra.mxu1 %v8746_v58  ;;  %v8814_v57 = vld [vmem:[%s11750_s1 + $0x14cc] ss:$16 sps:$4 sm:$0xff]   ;;  %v8809_v58 = vld [vmem:[%s11750_s1 + $0x14c0] ss:$16 sps:$4 sm:$0xff]  }
 0x270   :  { %5707 = vmatprep.subr.bf16.mxu0 %v8751_v19  ;;  %6266 = vmatprep.subr.bf16.mxu1 %v8754_v38  ;;  %v8812_v19 = vld [vmem:[%s11750_s1 + $0x14c8] ss:$16 sps:$4 sm:$0xff]   ;;  %v8817_v38 = vld [vmem:[%s11750_s1 + $0x14e4] ss:$16 sps:$4 sm:$0xff]  }
 0x273   :  { %5708 = vmatpush1.bf16.msra.mxu0 %v8749_v59  ;;  %6267 = vmatpush1.bf16.msra.mxu1 %v8752_v60  ;;  %v8820_v59 = vld [vmem:[%s11750_s1 + $0x14ec] ss:$16 sps:$4 sm:$0xff]   ;;  %v8815_v60 = vld [vmem:[%s11750_s1 + $0x14e0] ss:$16 sps:$4 sm:$0xff]  }
 0x274   :  { %5709 = vmatprep.subr.bf16.mxu0 %v8757_v61  ;;  %6268 = vmatprep.subr.bf16.mxu1 %v8760_v62  ;;  %v8818_v61 = vld [vmem:[%s11750_s1 + $0x14e8] ss:$16 sps:$4 sm:$0xff]   ;;  %v8823_v62 = vld [vmem:[%s11750_s1 + $0x1504] ss:$16 sps:$4 sm:$0xff]  }
 0x277   :  { %5710 = vmatpush1.bf16.msra.mxu0 %v8755_v3  ;;  %6269 = vmatpush1.bf16.msra.mxu1 %v8758_v5  ;;  %v8832_v3 = vld [vmem:[%s11750_s1 + $0x152c] ss:$16 sps:$4 sm:$0xff]   ;;  %v8827_v5 = vld [vmem:[%s11750_s1 + $0x1520] ss:$16 sps:$4 sm:$0xff]  }
 0x278   :  { %5711 = vmatprep.subr.bf16.mxu0 %v8763_v6  ;;  %6270 = vmatprep.subr.bf16.mxu1 %v8766_v7  ;;  %v8830_v6 = vld [vmem:[%s11750_s1 + $0x1528] ss:$16 sps:$4 sm:$0xff]   ;;  %v8835_v7 = vld [vmem:[%s11750_s1 + $0x1544] ss:$16 sps:$4 sm:$0xff]  }
 0x27b   :  { %5712 = vmatpush1.bf16.msra.mxu0 %v8761_v49  ;;  %6271 = vmatpush1.bf16.msra.mxu1 %v8764_v63  ;;  %v8844_v49 = vld [vmem:[%s11750_s1 + $0x156c] ss:$16 sps:$4 sm:$0xff]   ;;  %v8839_v63 = vld [vmem:[%s11750_s1 + $0x1560] ss:$16 sps:$4 sm:$0xff]  }
 0x27c   :  { %5713 = vmatprep.subr.bf16.mxu0 %v8769_v14  ;;  %6272 = vmatprep.subr.bf16.mxu1 %v8772_v16  ;;  %v8842_v14 = vld [vmem:[%s11750_s1 + $0x1568] ss:$16 sps:$4 sm:$0xff]   ;;  %v8847_v16 = vld [vmem:[%s11750_s1 + $0x1584] ss:$16 sps:$4 sm:$0xff]  }
 0x27f   :  { %5714 = vmatpush1.bf16.msra.mxu0 %v8767_v2  ;;  %6273 = vmatpush1.bf16.msra.mxu1 %v8770_v21  ;;  %v8856_v2 = vld [vmem:[%s11750_s1 + $0x15ac] ss:$16 sps:$4 sm:$0xff]   ;;  %v8851_v21 = vld [vmem:[%s11750_s1 + $0x15a0] ss:$16 sps:$4 sm:$0xff]  }
 0x280   :  { %5726 = vmatprep.subr.bf16.mxu0 %v8775_v22  ;;  %6285 = vmatprep.subr.bf16.mxu1 %v8778_v10  ;;  %v8854_v22 = vld [vmem:[%s11750_s1 + $0x15a8] ss:$16 sps:$4 sm:$0xff]   ;;  %v8859_v10 = vld [vmem:[%s11750_s1 + $0x15c4] ss:$16 sps:$4 sm:$0xff]  }
 0x282   :  { %5716 = vmatmul.mubr.bf16.vlgmr.msra.gmra.mrb[0].mxu0 %v10778_v4  ;;  %6275 = vmatmul.mubr.bf16.vlgmr.msra.gmra.mrb[0].mxu1 %v10778_v4  ;;  %v8790_v4 = vld [vmem:[%s11750_s1 + $0x144c] ss:$16 sps:$4 sm:$0xff]  }
 0x283   :  { %5727 = vmatpush1.bf16.msra.mxu0 %v8773_v26  ;;  %6286 = vmatpush1.bf16.msra.mxu1 %v8776_v27  ;;  %v8860_v26 = vld [vmem:[%s11750_s1 + $0x15c8] ss:$16 sps:$4 sm:$0xff]   ;;  %v8865_v27 = vld [vmem:[%s11750_s1 + $0x15e4] ss:$16 sps:$4 sm:$0xff]  }
 0x284   :  { %5728 = vmatprep.subr.bf16.mxu0 %v8781_v13  ;;  %6287 = vmatprep.subr.bf16.mxu1 %v8784_v29  ;;  %v8868_v13 = vld [vmem:[%s11750_s1 + $0x15ec] ss:$16 sps:$4 sm:$0xff]   ;;  %v8863_v29 = vld [vmem:[%s11750_s1 + $0x15e0] ss:$16 sps:$4 sm:$0xff]  }
 0x285   :  { %5758 = vmatprep.mubr.bf16.mxu0 %v1297_v31  ;;  %6317 = vmatprep.mubr.bf16.mxu1 %v1297_v31  ;;  %v8866_v31 = vld [vmem:[%s11750_s1 + $0x15e8] ss:$16 sps:$4 sm:$0xff]  }
 0x287   :  { %5729 = vmatpush1.bf16.msra.mxu0 %v8779_v32  ;;  %6288 = vmatpush1.bf16.msra.mxu1 %v8782_v33  ;;  %v8875_v32 = vld [vmem:[%s11750_s1 + $0x1604] ss:$16 sps:$4 sm:$0xff]   ;;  %v8878_v33 = vld [vmem:[%s11750_s1 + $0x160c] ss:$16 sps:$4 sm:$0xff]  }
 0x288   :  { %5730 = vmatprep.subr.bf16.mxu0 %v8787_v36  ;;  %6289 = vmatprep.subr.bf16.mxu1 %v8790_v4  ;;  %v1293_v36 = vcombine.low %v11177_v24, %v11180_v25  ;;  %v8873_v4 = vld [vmem:[%s11750_s1 + $0x1600] ss:$16 sps:$4 sm:$0xff]   ;;  %v8884_v24 = vld [vmem:[%s11750_s1 + $0x162c] ss:$16 sps:$4 sm:$0xff]  }
 0x289   :  { %v8879_v25 = vld [vmem:[%s11750_s1 + $0x1620] ss:$16 sps:$4 sm:$0xff]  }
 0x28b   :  { %5731 = vmatpush1.bf16.msra.mxu0 %v8785_v37  ;;  %6290 = vmatpush1.bf16.msra.mxu1 %v8788_v39  ;;  %v8876_v37 = vld [vmem:[%s11750_s1 + $0x1608] ss:$16 sps:$4 sm:$0xff]   ;;  %v8881_v39 = vld [vmem:[%s11750_s1 + $0x1624] ss:$16 sps:$4 sm:$0xff]  }
 0x28c   :  { %5732 = vmatprep.subr.bf16.mxu0 %v8793_v40  ;;  %6291 = vmatprep.subr.bf16.mxu1 %v8796_v42  ;;  %v8882_v40 = vld [vmem:[%s11750_s1 + $0x1628] ss:$16 sps:$4 sm:$0xff]   ;;  %v8887_v42 = vld [vmem:[%s11750_s1 + $0x1644] ss:$16 sps:$4 sm:$0xff]  }
 0x28f   :  { %5733 = vmatpush1.bf16.msra.mxu0 %v8791_v43  ;;  %6292 = vmatpush1.bf16.msra.mxu1 %v8794_v44  ;;  %v8890_v43 = vld [vmem:[%s11750_s1 + $0x164c] ss:$16 sps:$4 sm:$0xff]   ;;  %v8885_v44 = vld [vmem:[%s11750_s1 + $0x1640] ss:$16 sps:$4 sm:$0xff]  }
 0x290   :  { %5734 = vmatprep.subr.bf16.mxu0 %v8799_v45  ;;  %6293 = vmatprep.subr.bf16.mxu1 %v8802_v15  ;;  %v8888_v45 = vld [vmem:[%s11750_s1 + $0x1648] ss:$16 sps:$4 sm:$0xff]   ;;  %v8893_v15 = vld [vmem:[%s11750_s1 + $0x1664] ss:$16 sps:$4 sm:$0xff]  }
 0x293   :  { %5735 = vmatpush1.bf16.msra.mxu0 %v8797_v46  ;;  %6294 = vmatpush1.bf16.msra.mxu1 %v8800_v50  ;;  %v8891_v46 = vld [vmem:[%s11750_s1 + $0x1660] ss:$16 sps:$4 sm:$0xff]   ;;  %v8894_v50 = vld [vmem:[%s11750_s1 + $0x1668] ss:$16 sps:$4 sm:$0xff]  }
 0x294   :  { %5736 = vmatprep.subr.bf16.mxu0 %v8805_v34  ;;  %6295 = vmatprep.subr.bf16.mxu1 %v8808_v35  ;;  %v8899_v34 = vld [vmem:[%s11750_s1 + $0x1684] ss:$16 sps:$4 sm:$0xff]   ;;  %v8902_v35 = vld [vmem:[%s11750_s1 + $0x168c] ss:$16 sps:$4 sm:$0xff]  }
 0x297   :  { %5737 = vmatpush1.bf16.msra.mxu0 %v8803_v52  ;;  %6296 = vmatpush1.bf16.msra.mxu1 %v8806_v55  ;;  %v8897_v52 = vld [vmem:[%s11750_s1 + $0x1680] ss:$16 sps:$4 sm:$0xff]   ;;  %v8900_v55 = vld [vmem:[%s11750_s1 + $0x1688] ss:$16 sps:$4 sm:$0xff]  }
 0x298   :  { %5738 = vmatprep.subr.bf16.mxu0 %v8811_v56  ;;  %6297 = vmatprep.subr.bf16.mxu1 %v8814_v57  ;;  %v8905_v56 = vld [vmem:[%s11750_s1 + $0x16a4] ss:$16 sps:$4 sm:$0xff]   ;;  %v8908_v57 = vld [vmem:[%s11750_s1 + $0x16ac] ss:$16 sps:$4 sm:$0xff]  }
 0x29b   :  { %5739 = vmatpush1.bf16.msra.mxu0 %v8809_v58  ;;  %6298 = vmatpush1.bf16.msra.mxu1 %v8812_v19  ;;  %v8903_v58 = vld [vmem:[%s11750_s1 + $0x16a0] ss:$16 sps:$4 sm:$0xff]   ;;  %v8906_v19 = vld [vmem:[%s11750_s1 + $0x16a8] ss:$16 sps:$4 sm:$0xff]  }
 0x29c   :  { %5740 = vmatprep.subr.bf16.mxu0 %v8817_v38  ;;  %6299 = vmatprep.subr.bf16.mxu1 %v8820_v59  ;;  %v8911_v38 = vld [vmem:[%s11750_s1 + $0x16c4] ss:$16 sps:$4 sm:$0xff]   ;;  %v8914_v59 = vld [vmem:[%s11750_s1 + $0x16cc] ss:$16 sps:$4 sm:$0xff]  }
 0x29f   :  { %5741 = vmatpush1.bf16.msra.mxu0 %v8815_v60  ;;  %6300 = vmatpush1.bf16.msra.mxu1 %v8818_v61  ;;  %v8909_v60 = vld [vmem:[%s11750_s1 + $0x16c0] ss:$16 sps:$4 sm:$0xff]   ;;  %v8912_v61 = vld [vmem:[%s11750_s1 + $0x16c8] ss:$16 sps:$4 sm:$0xff]  }
 0x2a0   :  { %5742 = vmatprep.subr.bf16.mxu0 %v8823_v62  ;;  %6301 = vmatprep.subr.bf16.mxu1 %v8826_v48  ;;  %v8917_v62 = vld [vmem:[%s11750_s1 + $0x16e4] ss:$16 sps:$4 sm:$0xff]   ;;  %v8920_v48 = vld [vmem:[%s11750_s1 + $0x16ec] ss:$16 sps:$4 sm:$0xff]  }
 0x2a3   :  { %5743 = vmatpush1.bf16.msra.mxu0 %v8821_v0  ;;  %6302 = vmatpush1.bf16.msra.mxu1 %v8824_v1  ;;  %v8915_v0 = vld [vmem:[%s11750_s1 + $0x16e0] ss:$16 sps:$4 sm:$0xff]   ;;  %v8918_v1 = vld [vmem:[%s11750_s1 + $0x16e8] ss:$16 sps:$4 sm:$0xff]  }
 0x2a4   :  { %5744 = vmatprep.subr.bf16.mxu0 %v8829_v51  ;;  %6303 = vmatprep.subr.bf16.mxu1 %v8832_v3  ;;  %v8923_v51 = vld [vmem:[%s11750_s1 + $0x1704] ss:$16 sps:$4 sm:$0xff]   ;;  %v8926_v3 = vld [vmem:[%s11750_s1 + $0x170c] ss:$16 sps:$4 sm:$0xff]  }
 0x2a7   :  { %5745 = vmatpush1.bf16.msra.mxu0 %v8827_v5  ;;  %6304 = vmatpush1.bf16.msra.mxu1 %v8830_v6  ;;  %v8921_v5 = vld [vmem:[%s11750_s1 + $0x1700] ss:$16 sps:$4 sm:$0xff]   ;;  %v8924_v6 = vld [vmem:[%s11750_s1 + $0x1708] ss:$16 sps:$4 sm:$0xff]  }
 0x2a8   :  { %5746 = vmatprep.subr.bf16.mxu0 %v8835_v7  ;;  %6305 = vmatprep.subr.bf16.mxu1 %v8838_v8  ;;  %v8929_v7 = vld [vmem:[%s11750_s1 + $0x1724] ss:$16 sps:$4 sm:$0xff]   ;;  %v8932_v8 = vld [vmem:[%s11750_s1 + $0x172c] ss:$16 sps:$4 sm:$0xff]  }
 0x2ab   :  { %5747 = vmatpush1.bf16.msra.mxu0 %v8833_v41  ;;  %6306 = vmatpush1.bf16.msra.mxu1 %v8836_v9  ;;  %v8927_v41 = vld [vmem:[%s11750_s1 + $0x1720] ss:$16 sps:$4 sm:$0xff]   ;;  %v8930_v9 = vld [vmem:[%s11750_s1 + $0x1728] ss:$16 sps:$4 sm:$0xff]  }
 0x2ac   :  { %5748 = vmatprep.subr.bf16.mxu0 %v8841_v12  ;;  %6307 = vmatprep.subr.bf16.mxu1 %v8844_v49  ;;  %v8935_v12 = vld [vmem:[%s11750_s1 + $0x1744] ss:$16 sps:$4 sm:$0xff]   ;;  %v8938_v49 = vld [vmem:[%s11750_s1 + $0x174c] ss:$16 sps:$4 sm:$0xff]  }
 0x2af   :  { %5749 = vmatpush1.bf16.msra.mxu0 %v8839_v63  ;;  %6308 = vmatpush1.bf16.msra.mxu1 %v8842_v14  ;;  %v8933_v63 = vld [vmem:[%s11750_s1 + $0x1740] ss:$16 sps:$4 sm:$0xff]   ;;  %v8936_v14 = vld [vmem:[%s11750_s1 + $0x1748] ss:$16 sps:$4 sm:$0xff]  }
 0x2b0   :  { %5750 = vmatprep.subr.bf16.mxu0 %v8847_v16  ;;  %6309 = vmatprep.subr.bf16.mxu1 %v8850_v17  ;;  %v8941_v16 = vld [vmem:[%s11750_s1 + $0x1764] ss:$16 sps:$4 sm:$0xff]   ;;  %v8944_v17 = vld [vmem:[%s11750_s1 + $0x176c] ss:$16 sps:$4 sm:$0xff]  }
 0x2b3   :  { %5751 = vmatpush1.bf16.msra.mxu0 %v8845_v18  ;;  %6310 = vmatpush1.bf16.msra.mxu1 %v8848_v20  ;;  %v8939_v18 = vld [vmem:[%s11750_s1 + $0x1760] ss:$16 sps:$4 sm:$0xff]   ;;  %v8942_v20 = vld [vmem:[%s11750_s1 + $0x1768] ss:$16 sps:$4 sm:$0xff]  }
 0x2b4   :  { %5752 = vmatprep.subr.bf16.mxu0 %v8853_v53  ;;  %6311 = vmatprep.subr.bf16.mxu1 %v8856_v2  ;;  %v8947_v53 = vld [vmem:[%s11750_s1 + $0x1784] ss:$16 sps:$4 sm:$0xff]   ;;  %v8950_v2 = vld [vmem:[%s11750_s1 + $0x178c] ss:$16 sps:$4 sm:$0xff]  }
 0x2b7   :  { %5753 = vmatpush1.bf16.msra.mxu0 %v8851_v21  ;;  %6312 = vmatpush1.bf16.msra.mxu1 %v8854_v22  ;;  %v8945_v21 = vld [vmem:[%s11750_s1 + $0x1780] ss:$16 sps:$4 sm:$0xff]   ;;  %v8948_v22 = vld [vmem:[%s11750_s1 + $0x1788] ss:$16 sps:$4 sm:$0xff]  }
 0x2b8   :  { %5754 = vmatprep.subr.bf16.mxu0 %v8859_v10  ;;  %6313 = vmatprep.subr.bf16.mxu1 %v8862_v11  ;;  %v8953_v10 = vld [vmem:[%s11750_s1 + $0x17a4] ss:$16 sps:$4 sm:$0xff]   ;;  %v8956_v11 = vld [vmem:[%s11750_s1 + $0x17ac] ss:$16 sps:$4 sm:$0xff]  }
 0x2bb   :  { %5755 = vmatpush1.bf16.msra.mxu0 %v8857_v23  ;;  %6314 = vmatpush1.bf16.msra.mxu1 %v8860_v26  ;;  %v8951_v23 = vld [vmem:[%s11750_s1 + $0x17a0] ss:$16 sps:$4 sm:$0xff]   ;;  %v8954_v26 = vld [vmem:[%s11750_s1 + $0x17a8] ss:$16 sps:$4 sm:$0xff]  }
 0x2bc   :  { %5756 = vmatprep.subr.bf16.mxu0 %v8865_v27  ;;  %6315 = vmatprep.subr.bf16.mxu1 %v8868_v13  ;;  %v8959_v27 = vld [vmem:[%s11750_s1 + $0x17c4] ss:$16 sps:$4 sm:$0xff]   ;;  %v8962_v13 = vld [vmem:[%s11750_s1 + $0x17cc] ss:$16 sps:$4 sm:$0xff]  }
 0x2bf   :  { %5757 = vmatpush1.bf16.msra.mxu0 %v8863_v29  ;;  %6316 = vmatpush1.bf16.msra.mxu1 %v8866_v31  ;;  %v8957_v29 = vld [vmem:[%s11750_s1 + $0x17c0] ss:$16 sps:$4 sm:$0xff]   ;;  %v8960_v31 = vld [vmem:[%s11750_s1 + $0x17c8] ss:$16 sps:$4 sm:$0xff]  }
 0x2c0   :  { %5769 = vmatprep.subr.bf16.mxu0 %v8875_v32  ;;  %6328 = vmatprep.subr.bf16.mxu1 %v8878_v33  ;;  %v8965_v32 = vld [vmem:[%s11750_s1 + $0x17e4] ss:$16 sps:$4 sm:$0xff]   ;;  %v8968_v33 = vld [vmem:[%s11750_s1 + $0x17ec] ss:$16 sps:$4 sm:$0xff]  }
 0x2c2   :  { %5759 = vmatmul.mubr.bf16.vlgmr.msra.gmra.mrb[0].mxu0 %v1293_v36  ;;  %6318 = vmatmul.mubr.bf16.vlgmr.msra.gmra.mrb[0].mxu1 %v1293_v36  ;;  %v8963_v36 = vld [vmem:[%s11750_s1 + $0x17e0] ss:$16 sps:$4 sm:$0xff]  }
 0x2c3   :  { %5770 = vmatpush1.bf16.msra.mxu0 %v8873_v4  ;;  %6329 = vmatpush1.bf16.msra.mxu1 %v8876_v37  ;;  %v8966_v4 = vld [vmem:[%s11750_s1 + $0x17e8] ss:$16 sps:$4 sm:$0xff]   ;;  %v8971_v37 = vld [vmem:[%s11750_s1 + $0x1804] ss:$16 sps:$4 sm:$0xff]  }
 0x2c4   :  { %5771 = vmatprep.subr.bf16.mxu0 %v8881_v39  ;;  %6330 = vmatprep.subr.bf16.mxu1 %v8884_v24  ;;  %v8974_v39 = vld [vmem:[%s11750_s1 + $0x180c] ss:$16 sps:$4 sm:$0xff]   ;;  %v8993_v24 = vld [vmem:[%s11749_s0 + $0x18] ss:$25 sps:$4 sm:$0x11]  }
 0x2c5   :  { %5801 = vmatprep.mubr.bf16.mxu0 %v11188_v28  ;;  %6360 = vmatprep.mubr.bf16.mxu1 %v11188_v28  ;;  %v8896_v28 = vld [vmem:[%s11750_s1 + $0x166c] ss:$16 sps:$4 sm:$0xff]  }
 0x2c7   :  { %5772 = vmatpush1.bf16.msra.mxu0 %v8879_v25  ;;  %6331 = vmatpush1.bf16.msra.mxu1 %v8882_v40  ;;  %v8994_v25 = vld [vmem:[%s11749_s0 + $0x4a] ss:$25 sps:$4 sm:$0x11]   ;;  %v8995_v40 = vld [vmem:[%s11749_s0 + $0x7c] ss:$25 sps:$4 sm:$0x11]  }
 0x2c8   :  { %5773 = vmatprep.subr.bf16.mxu0 %v8887_v42  ;;  %6332 = vmatprep.subr.bf16.mxu1 %v8890_v43  ;;  %v8996_v42 = vld [vmem:[%s11749_s0 + $0xae] ss:$25 sps:$4 sm:$0x11]   ;;  %v8969_v43 = vld [vmem:[%s11750_s1 + $0x1800] ss:$16 sps:$4 sm:$0xff]  }
 0x2cb   :  { %5774 = vmatpush1.bf16.msra.mxu0 %v8885_v44  ;;  %6333 = vmatpush1.bf16.msra.mxu1 %v8888_v45  ;;  %v8972_v44 = vld [vmem:[%s11750_s1 + $0x1808] ss:$16 sps:$4 sm:$0xff]   ;;  %v8977_v45 = vld [vmem:[%s11750_s1 + $0x1824] ss:$16 sps:$4 sm:$0xff]  }
 0x2cc   :  { %5775 = vmatprep.subr.bf16.mxu0 %v8893_v15  ;;  %6334 = vmatprep.subr.bf16.mxu1 %v8896_v28  ;;  %v8980_v15 = vld [vmem:[%s11750_s1 + $0x182c] ss:$16 sps:$4 sm:$0xff]   ;;  %v1309_v28 = vrot.slane %v8993_v24, %v9211_v54  ;;  %v845_v24 = vsub.s32 1, %v9193_v47 }
 0x2cf   :  { %5776 = vmatpush1.bf16.msra.mxu0 %v8891_v46  ;;  %6335 = vmatpush1.bf16.msra.mxu1 %v8894_v50  ;;  %v1316_v46 = vrot.slane %v8994_v25, %v9211_v54  ;;  %v1323_v50 = vrot.slane %v8995_v40, %v9211_v54  ;;  %v853_v25 = vsub.s32 3, %v9193_v47 }
 0x2d0   :  { %5777 = vmatprep.subr.bf16.mxu0 %v8899_v34  ;;  %6336 = vmatprep.subr.bf16.mxu1 %v8902_v35  ;;  %v1330_v34 = vrot.slane %v8996_v42, %v9211_v54  ;;  %v8975_v35 = vld [vmem:[%s11750_s1 + $0x1820] ss:$16 sps:$4 sm:$0xff]  }
 0x2d3   :  { %5778 = vmatpush1.bf16.msra.mxu0 %v8897_v52  ;;  %6337 = vmatpush1.bf16.msra.mxu1 %v8900_v55  ;;  %v8978_v52 = vld [vmem:[%s11750_s1 + $0x1828] ss:$16 sps:$4 sm:$0xff]   ;;  %v8986_v55 = vld [vmem:[%s11750_s1 + $0x184c] ss:$16 sps:$4 sm:$0xff]  }
 0x2d4   :  { %5779 = vmatprep.subr.bf16.mxu0 %v8905_v56  ;;  %6338 = vmatprep.subr.bf16.mxu1 %v8908_v57  ;;  %v9030_v56 = vmov 0   ;;  %v1331_v57 = vcombine.low %v1309_v28, %v1316_v46 }
 0x2d7   :  { %5780 = vmatpush1.bf16.msra.mxu0 %v8903_v58  ;;  %6339 = vmatpush1.bf16.msra.mxu1 %v8906_v19  ;;  %v1332_v58 = vcombine.low %v1323_v50, %v1330_v34  ;;  %v8981_v19 = vld [vmem:[%s11750_s1 + $0x1840] ss:$16 sps:$4 sm:$0xff]  }
 0x2d8   :  { %5781 = vmatprep.subr.bf16.mxu0 %v8911_v38  ;;  %6340 = vmatprep.subr.bf16.mxu1 %v8914_v59  ;;  %v8984_v38 = vld [vmem:[%s11750_s1 + $0x1848] ss:$16 sps:$4 sm:$0xff]   ;;  %v8989_v59 = vld [vmem:[%s11750_s1 + $0x1864] ss:$16 sps:$4 sm:$0xff]  }
 0x2db   :  { %5782 = vmatpush1.bf16.msra.mxu0 %v8909_v60  ;;  %6341 = vmatpush1.bf16.msra.mxu1 %v8912_v61  ;;  %v8992_v60 = vld [vmem:[%s11750_s1 + $0x186c] ss:$16 sps:$4 sm:$0xff]   ;;  %v1339_v61 = vrot.slane %v1331_v57, %v9211_v54 }
 0x2dc   :  { %5783 = vmatprep.subr.bf16.mxu0 %v8917_v62  ;;  %6342 = vmatprep.subr.bf16.mxu1 %v8920_v48  ;;  %v1346_v62 = vrot.slane %v1332_v58, %v9211_v54  ;;  %v8987_v48 = vld [vmem:[%s11750_s1 + $0x1860] ss:$16 sps:$4 sm:$0xff]  }
 0x2dd   :  { %v8998_v54 = vld [vmem:[%s11752_s3 + $0xc0] sm:$0xff]  }
 0x2df   :  { %5784 = vmatpush1.bf16.msra.mxu0 %v8915_v0  ;;  %6343 = vmatpush1.bf16.msra.mxu1 %v8918_v1  ;;  %v8990_v0 = vld [vmem:[%s11750_s1 + $0x1868] ss:$16 sps:$4 sm:$0xff]   ;;  %v8997_v1 = vld [vmem:[%s11752_s3 + $0x40] sm:$0xff]  }
 0x2e0   :  { %5785 = vmatprep.subr.bf16.mxu0 %v8923_v51  ;;  %6344 = vmatprep.subr.bf16.mxu1 %v8926_v3  ;;  %v1347_v51 = vcombine.low %v1339_v61, %v1346_v62  ;;  %v8999_v3 = vld [vmem:[%s11752_s3] sm:$0xff]  }
 0x2e3   :  { %5786 = vmatpush1.bf16.msra.mxu0 %v8921_v5  ;;  %6345 = vmatpush1.bf16.msra.mxu1 %v8924_v6  ;;  %v9000_v5 = vld [vmem:[%s11752_s3 + $0x80] sm:$0xff]   ;;  %v9001_v6 = vld [vmem:[%s11752_s3 + $0x48] sm:$0xff]  }
 0x2e4   :  { %5787 = vmatprep.subr.bf16.mxu0 %v8929_v7  ;;  %6346 = vmatprep.subr.bf16.mxu1 %v8932_v8  ;;  %v9002_v7 = vld [vmem:[%s11752_s3 + $0xc8] sm:$0xff]  }
 0x2e5   :  { %v9003_v8 = vld [vmem:[%s11752_s3 + $0x8] sm:$0xff]  }
 0x2e7   :  { %5788 = vmatpush1.bf16.msra.mxu0 %v8927_v41  ;;  %6347 = vmatpush1.bf16.msra.mxu1 %v8930_v9  ;;  %v9004_v41 = vld [vmem:[%s11752_s3 + $0x88] sm:$0xff]   ;;  %v9005_v9 = vld [vmem:[%s11752_s3 + $0x50] sm:$0xff]  }
 0x2e8   :  { %5789 = vmatprep.subr.bf16.mxu0 %v8935_v12  ;;  %6348 = vmatprep.subr.bf16.mxu1 %v8938_v49  ;;  %v9006_v12 = vld [vmem:[%s11752_s3 + $0xd0] sm:$0xff]  }
 0x2e9   :  { %v9007_v49 = vld [vmem:[%s11752_s3 + $0x10] sm:$0xff]  }
 0x2eb   :  { %5790 = vmatpush1.bf16.msra.mxu0 %v8933_v63  ;;  %6349 = vmatpush1.bf16.msra.mxu1 %v8936_v14  ;;  %v9008_v63 = vld [vmem:[%s11752_s3 + $0x90] sm:$0xff]   ;;  %v9009_v14 = vld [vmem:[%s11752_s3 + $0x58] sm:$0xff]  }
 0x2ec   :  { %5791 = vmatprep.subr.bf16.mxu0 %v8941_v16  ;;  %6350 = vmatprep.subr.bf16.mxu1 %v8944_v17  ;;  %v9010_v16 = vld [vmem:[%s11752_s3 + $0xd8] sm:$0xff]  }
 0x2ed   :  { %v9011_v17 = vld [vmem:[%s11752_s3 + $0x18] sm:$0xff]  }
 0x2ef   :  { %5792 = vmatpush1.bf16.msra.mxu0 %v8939_v18  ;;  %6351 = vmatpush1.bf16.msra.mxu1 %v8942_v20  ;;  %v9012_v18 = vld [vmem:[%s11752_s3 + $0x98] sm:$0xff]   ;;  %v9013_v20 = vld [vmem:[%s11752_s3 + $0x60] sm:$0xff]  }
 0x2f0   :  { %5793 = vmatprep.subr.bf16.mxu0 %v8947_v53  ;;  %6352 = vmatprep.subr.bf16.mxu1 %v8950_v2  ;;  %v9014_v53 = vld [vmem:[%s11752_s3 + $0xe0] sm:$0xff]  }
 0x2f1   :  { %v9015_v2 = vld [vmem:[%s11752_s3 + $0x20] sm:$0xff]  }
 0x2f3   :  { %5794 = vmatpush1.bf16.msra.mxu0 %v8945_v21  ;;  %6353 = vmatpush1.bf16.msra.mxu1 %v8948_v22  ;;  %v9016_v21 = vld [vmem:[%s11752_s3 + $0xa0] sm:$0xff]   ;;  %v9017_v22 = vld [vmem:[%s11752_s3 + $0x68] sm:$0xff]  }
 0x2f4   :  { %5795 = vmatprep.subr.bf16.mxu0 %v8953_v10  ;;  %6354 = vmatprep.subr.bf16.mxu1 %v8956_v11  ;;  %v9018_v10 = vld [vmem:[%s11752_s3 + $0xe8] sm:$0xff]  }
 0x2f5   :  { %v9019_v11 = vld [vmem:[%s11752_s3 + $0x28] sm:$0xff]  }
 0x2f7   :  { %5796 = vmatpush1.bf16.msra.mxu0 %v8951_v23  ;;  %6355 = vmatpush1.bf16.msra.mxu1 %v8954_v26  ;;  %v9020_v23 = vld [vmem:[%s11752_s3 + $0xa8] sm:$0xff]   ;;  %v9021_v26 = vld [vmem:[%s11752_s3 + $0x70] sm:$0xff]  }
 0x2f8   :  { %5797 = vmatprep.subr.bf16.mxu0 %v8959_v27  ;;  %6356 = vmatprep.subr.bf16.mxu1 %v8962_v13  ;;  %v9022_v27 = vld [vmem:[%s11752_s3 + $0xf0] sm:$0xff]  }
 0x2f9   :  { %v9023_v13 = vld [vmem:[%s11752_s3 + $0x30] sm:$0xff]  }
 0x2fb   :  { %5798 = vmatpush1.bf16.msra.mxu0 %v8957_v29  ;;  %6357 = vmatpush1.bf16.msra.mxu1 %v8960_v31  ;;  %v9024_v29 = vld [vmem:[%s11752_s3 + $0xb0] sm:$0xff]   ;;  %v9025_v31 = vld [vmem:[%s11752_s3 + $0x78] sm:$0xff]  }
 0x2fc   :  { %5799 = vmatprep.subr.bf16.mxu0 %v8965_v32  ;;  %6358 = vmatprep.subr.bf16.mxu1 %v8968_v33  ;;  %v9026_v32 = vld [vmem:[%s11752_s3 + $0xf8] sm:$0xff]  }
 0x2fd   :  { %v9027_v33 = vld [vmem:[%s11752_s3 + $0x38] sm:$0xff]  }
 0x2ff   :  { %5800 = vmatpush1.bf16.msra.mxu0 %v8963_v36  ;;  %6359 = vmatpush1.bf16.msra.mxu1 %v8966_v4  ;;  %v9028_v36 = vld [vmem:[%s11752_s3 + $0xb8] sm:$0xff]   ;;  %v841_v4 = vsub.s32 0, %v9193_v47 }
 0x300   :  { %5812 = vmatprep.subr.bf16.mxu0 %v8971_v37  ;;  %6371 = vmatprep.subr.bf16.mxu1 %v8974_v39  ;;  %v849_v37 = vsub.s32 2, %v9193_v47  ;;  %v837_v39 = vld [vmem:[%s11751_s2] sm:$0xf] }
 0x301   :  { %v842_v40 = vrot.slane %v837_v39, %v841_v4 }
 0x302   :  { %5802 = vmatmul.mubr.bf16.vlgmr.msra.gmra.mrb[0].mxu0 %v11198_v30  ;;  %6361 = vmatmul.mubr.bf16.vlgmr.msra.gmra.mrb[0].mxu1 %v11198_v30  ;;  %v8983_v30 = vld [vmem:[%s11750_s1 + $0x1844] ss:$16 sps:$4 sm:$0xff]   ;;  %v850_v42 = vrot.slane %v837_v39, %v849_v37 }
 0x303   :  { %5813 = vmatpush1.bf16.msra.mxu0 %v8969_v43  ;;  %6372 = vmatpush1.bf16.msra.mxu1 %v8972_v44  ;;  %v846_v43 = vrot.slane %v837_v39, %v845_v24  ;;  %v854_v44 = vrot.slane %v837_v39, %v853_v25 }
 0x304   :  { %5814 = vmatprep.subr.bf16.mxu0 %v8977_v45  ;;  %6373 = vmatprep.subr.bf16.mxu1 %v8980_v15 }
 0x305   :  { %5844 = vmatprep.mubr.bf16.mxu0 %v9030_v56  ;;  %6403 = vmatprep.mubr.bf16.mxu1 %v9030_v56 }
 0x307   :  { %5815 = vmatpush1.bf16.msra.mxu0 %v8975_v35  ;;  %6374 = vmatpush1.bf16.msra.mxu1 %v8978_v52 }
 0x308   :  { %5816 = vmatprep.subr.bf16.mxu0 %v8983_v30  ;;  %6375 = vmatprep.subr.bf16.mxu1 %v8986_v55 }
 0x30b   :  { %5817 = vmatpush1.bf16.msra.mxu0 %v8981_v19  ;;  %6376 = vmatpush1.bf16.msra.mxu1 %v8984_v38 }
 0x30c   :  { %5818 = vmatprep.subr.bf16.mxu0 %v8989_v59  ;;  %6377 = vmatprep.subr.bf16.mxu1 %v8992_v60 }
 0x30f   :  { %5819 = vmatpush1.bf16.msra.mxu0 %v8987_v48  ;;  %6378 = vmatpush1.bf16.msra.mxu1 %v8990_v0 }
 0x310   :  { %7631 = vmatprep.subr.bf16.mxu0 %v8997_v1  ;;  %7653 = vmatprep.subr.bf16.mxu1 %v8998_v54 }
 0x312   :  { %7596 = vmatmul.mubr.msk.bf16.vlgmr.msra.gmra.mrb[0].mxu0 %vm5292_vm0, %v1347_v51  ;;  %7597 = vmatmul.mubr.msk.bf16.vlgmr.msra.gmra.mrb[0].mxu1 %vm5292_vm0, %v1347_v51 }
 0x313   :  { %7632 = vmatpush3.bf16.msra.mxu0 %v8999_v3  ;;  %7654 = vmatpush3.bf16.msra.mxu1 %v9000_v5 }
 0x314   :  { %7633 = vmatprep.subr.bf16.mxu0 %v9001_v6  ;;  %7655 = vmatprep.subr.bf16.mxu1 %v9002_v7 }
 0x317   :  { %7634 = vmatpush3.bf16.msra.mxu0 %v9003_v8  ;;  %7656 = vmatpush3.bf16.msra.mxu1 %v9004_v41  ;;  %v7598_v41 = vld [vmem:[%s11753_s4] ss:$0 sm:$0xff] }
 0x318   :  { %7635 = vmatprep.subr.bf16.mxu0 %v9005_v9  ;;  %7657 = vmatprep.subr.bf16.mxu1 %v9006_v12 }
 0x31b   :  { %7636 = vmatpush3.bf16.msra.mxu0 %v9007_v49  ;;  %7658 = vmatpush3.bf16.msra.mxu1 %v9008_v63 }
 0x31c   :  { %7637 = vmatprep.subr.bf16.mxu0 %v9009_v14  ;;  %7659 = vmatprep.subr.bf16.mxu1 %v9010_v16 }
 0x31f   :  { %7638 = vmatpush3.bf16.msra.mxu0 %v9011_v17  ;;  %7660 = vmatpush3.bf16.msra.mxu1 %v9012_v18 }
 0x320   :  { %7639 = vmatprep.subr.bf16.mxu0 %v9013_v20  ;;  %7661 = vmatprep.subr.bf16.mxu1 %v9014_v53 }
 0x323   :  { %7640 = vmatpush3.bf16.msra.mxu0 %v9015_v2  ;;  %7662 = vmatpush3.bf16.msra.mxu1 %v9016_v21 }
 0x324   :  { %7641 = vmatprep.subr.bf16.mxu0 %v9017_v22  ;;  %7663 = vmatprep.subr.bf16.mxu1 %v9018_v10 }
 0x327   :  { %7642 = vmatpush3.bf16.msra.mxu0 %v9019_v11  ;;  %7664 = vmatpush3.bf16.msra.mxu1 %v9020_v23 }
 0x328   :  { %7643 = vmatprep.subr.bf16.mxu0 %v9021_v26  ;;  %7665 = vmatprep.subr.bf16.mxu1 %v9022_v27 }
 0x32b   :  { %7644 = vmatpush3.bf16.msra.mxu0 %v9023_v13  ;;  %7666 = vmatpush3.bf16.msra.mxu1 %v9024_v29 }
 0x32c   :  { %7645 = vmatprep.subr.bf16.mxu0 %v9025_v31  ;;  %7667 = vmatprep.subr.bf16.mxu1 %v9026_v32 }
 0x32f   :  { %7646 = vmatpush3.bf16.msra.mxu0 %v9027_v33  ;;  %7668 = vmatpush3.bf16.msra.mxu1 %v9028_v36 }
 0x3e5   :  { %v5846_v45 = vpop.f32.mrb[0].mxu0  ;;  %v6405_v15 = vpop.f32.mrb[0].mxu1 }
 0x3e6   :  { %v7675_v28 = vadd.f32 %v5846_v45, %v842_v40  ;;  %v7679_v46 = vadd.f32 %v6405_v15, %v850_v42  ;;  %v5848_v50 = vpop.f32.mrb[1].mxu0  ;;  %v6407_v34 = vpop.f32.mrb[1].mxu1 }
 0x3e7   :  { %v7676_v35 = vadd.f32 %v5848_v50, %v846_v43  ;;  %v7680_v52 = vadd.f32 %v6407_v34, %v854_v44  ;;  %v5850_v30 = vpop.f32.mrb[2].mxu0  ;;  %v6409_v55 = vpop.f32.mrb[2].mxu1 }
 0x3e8   :  { %v7677_v56 = vadd.f32 %v5850_v30, %v842_v40  ;;  %v7681_v57 = vadd.f32 %v6409_v55, %v850_v42  ;;  %v5852_v58 = vpop.f32.mrb[3].mxu0  ;;  %v6411_v19 = vpop.f32.mrb[3].mxu1  ;;  %v6414_v59 = vmax.f32 %v7675_v28, 0.0  ;;  %v6416_v60 = vmax.f32 %v7679_v46, 0.0 }
 0x3e9   :  { %v7678_v38 = vadd.f32 %v5852_v58, %v846_v43  ;;  %v7682_v47 = vadd.f32 %v6411_v19, %v854_v44  ;;  %v6415_v48 = vmax.f32 %v7676_v35, 0.0  ;;  %v6417_v0 = vmax.f32 %v7680_v52, 0.0 }
 0x3ea   :  { %v6418_v61 = vmax.f32 %v7677_v56, 0.0  ;;  %v6420_v62 = vmax.f32 %v7681_v57, 0.0 }
 0x3eb   :  { %v6419_v1 = vmax.f32 %v7678_v38, 0.0  ;;  %v6421_v54 = vmax.f32 %v7682_v47, 0.0 }
 0x3ec   :  { %v6422_v51 = vpack.c.bf16 %v6418_v61, %v6414_v59  ;;  %v6424_v3 = vpack.c.bf16 %v6420_v62, %v6416_v60 }
 0x3ed   :  { %v6423_v5 = vpack.c.bf16 %v6419_v1, %v6415_v48  ;;  %v6425_v6 = vpack.c.bf16 %v6421_v54, %v6417_v0 }
 0x3ef   :  { %6721 = vmatprep.mubr.bf16.mxu0 %v6423_v5  ;;  %6762 = vmatprep.mubr.bf16.mxu1 %v6425_v6 }
 0x3f0   :  { %6722 = vmatmul.mubr.bf16.vlgmr.msra.gmra.mrb[4].mxu0 %v6422_v51  ;;  %6763 = vmatmul.mubr.bf16.vlgmr.msra.gmra.mrb[4].mxu1 %v6424_v3 }
 0x4c3   :  { %v7647_v7 = vpop.f32.mrb[4].mxu0  ;;  %v7669_v8 = vpop.f32.mrb[4].mxu1 }
 0x4c4   :  { %v7648_v9 = vpop.f32.mrb[5].mxu0  ;;  %v7670_v12 = vpop.f32.mrb[5].mxu1 }
 0x4c5   :  { %v7649_v49 = vadd.f32 %v7648_v9, %v7647_v7  ;;  %v7671_v63 = vadd.f32 %v7670_v12, %v7669_v8  ;;  %v7650_v14 = vpop.f32.mrb[6].mxu0  ;;  %v7672_v16 = vpop.f32.mrb[6].mxu1 }
 0x4c6   :  { %v7651_v17 = vpop.f32.mrb[7].mxu0  ;;  %v7673_v18 = vpop.f32.mrb[7].mxu1 }
 0x4c7   :  { %v6724_v20 = vadd.f32 %v7649_v49, %v7598_v41 }
 0x4c9   :  { %v6765_v53 = vadd.f32 %v7671_v63, %v6724_v20 }
 0x4cb   :  { %6771 = vst [vmem:[#allocation2] sm:$0xff] %v6765_v53 }
 0x4d2   :  { %v6790_v2 = vld [vmem:[#allocation2] sm:$0x3] }
 0x4d3   :  { %6791 = vst [vmem:[%s11754_s5] sm:$0x3] %v6790_v2 }

// kernel: net_forward.2
= control target key start
LH: loop header
LB: loop body
LE: loop exit
PB: predicated region body
PF: predicated region fallthrough
CT: control target
= control target key end

     0   :  { %s11973_s24 = smov 0   ;;  %s14242_s0 = inlined_call_operand.vmem [shape: bf16[2,200,512], index: 0, kind: input, shape index: {}]   ;;  %s14243_s1 = inlined_call_operand.vmem [shape: bf16[512,64], index: 1, kind: input, shape index: {}]   ;;  %s14244_s2 = inlined_call_operand.vmem [shape: f32[1,64], index: 2, kind: input, shape index: {}]   ;;  %s14245_s3 = inlined_call_operand.vmem [shape: bf16[512,64], index: 3, kind: input, shape index: {}]   ;;  %s14246_s4 = inlined_call_operand.vmem [shape: f32[1,64], index: 4, kind: input, shape index: {}]   ;;  %s14247_s5 = inlined_call_operand.vmem [shape: bf16[576,64], index: 5, kind: input, shape index: {}]   ;;  %s14248_s6 = inlined_call_operand.vmem [shape: f32[1,64], index: 6, kind: input, shape index: {}]   ;;  %s14249_s7 = inlined_call_operand.vmem [shape: bf16[2,49,64], index: 7, kind: output, shape index: {}]  }
   0x1 LB: > { %s9290_s25 = sadd.s32 4294967295, %s11928_s24   ;;  %p9294_p0 = scmp.ge.s32.totalorder %s11928_s24, 1  ;;  %s11928_s24 = sphi %s11973_s24, %s17_s24  }
   0x2   : > { %p237_p1 = scmp.lt.s32.totalorder %s11928_s24, 3 }
   0x4   : > { %p238_p2 = pnand %p9294_p0, %p237_p1 }
   0x5   : > { %v11149_v0 = vld [vmem:[%s14243_s1 + $0x40] sm:$0xff] (!%p238_p2)   ;;  %v11153_v4 = vld [vmem:[%s14243_s1 + $0x48] sm:$0xff] (!%p238_p2)   ;;  %v11157_v8 = vld [vmem:[%s14243_s1 + $0x50] sm:$0xff] (!%p238_p2)   ;;  %p269_p3 = scmp.lt.s32.totalorder (!%p238_p2), %s9290_s25, 1  ;;  %vm1245_vm0 = vcmask (!%p238_p2), 519168   ;;  %s11930_s15 = smov (!%p238_p2), 64  }
   0x6   : > { %241 = sbr.rel (%p238_p2) target bundleno = 1309 (0x51d), region = 48  ;;  %v11150_v1 = vld [vmem:[%s14243_s1 + $0xc0] sm:$0xff] (!%p238_p2)   ;;  %10125 = vmatprep.subr.bf16.mxu0 (!%p238_p2), %v11149_v0  ;;  %v11154_v5 = vld [vmem:[%s14243_s1 + $0xc8] sm:$0xff] (!%p238_p2)   ;;  %v11158_v9 = vld [vmem:[%s14243_s1 + $0xd0] sm:$0xff] (!%p238_p2)   ;;  %vm1341_vm1 = vcmask (!%p238_p2), 523264   ;;  %vm14251_vm2 = vcmask (!%p238_p2), 516096  }
   0x7   : > { %v11151_v2 = vld [vmem:[%s14243_s1] sm:$0xff] (!%p238_p2)   ;;  %10219 = vmatprep.subr.bf16.mxu1 (!%p238_p2), %v11150_v1  ;;  %v11155_v6 = vld [vmem:[%s14243_s1 + $0x8] sm:$0xff] (!%p238_p2)   ;;  %v11159_v10 = vld [vmem:[%s14243_s1 + $0x10] sm:$0xff] (!%p238_p2)   ;;  %vm1714_vm3 = vsmask.f32 (!%p238_p2), 256  ;;  %vm2626_vm9 = vcmask (!%p238_p2), 1040384  }
   0x8   : > { %v11152_v3 = vld [vmem:[%s14243_s1 + $0x80] sm:$0xff] (!%p238_p2)   ;;  %10126 = vmatpush3.bf16.msra.mxu0 (!%p238_p2), %v11151_v2  ;;  %v11156_v7 = vld [vmem:[%s14243_s1 + $0x88] sm:$0xff] (!%p238_p2)   ;;  %v11160_v11 = vld [vmem:[%s14243_s1 + $0x90] sm:$0xff] (!%p238_p2)   ;;  %vm2181_vm5 = vsmask.f32 (!%p238_p2), 7938  ;;  %vm2627_vm10 = vcmask (!%p238_p2), 1044484  }
   0x9   : > { %10220 = vmatpush3.bf16.msra.mxu1 (!%p238_p2), %v11152_v3  ;;  %10127 = vmatprep.subr.bf16.mxu0 (!%p238_p2), %v11153_v4  ;;  %v11161_v12 = vld [vmem:[%s14243_s1 + $0x58] sm:$0xff] (!%p238_p2)   ;;  %v11165_v16 = vld [vmem:[%s14243_s1 + $0x60] sm:$0xff] (!%p238_p2)   ;;  %v11169_v20 = vld [vmem:[%s14243_s1 + $0x68] sm:$0xff] (!%p238_p2)   ;;  %vm2164_vm6 = vsmask.f32 (!%p238_p2), 4368  ;;  %vm14250_vm11 = vcmask (!%p238_p2), 519169  }
   0xa   : > { %10221 = vmatprep.subr.bf16.mxu1 (!%p238_p2), %v11154_v5  ;;  %v11162_v13 = vld [vmem:[%s14243_s1 + $0xd8] sm:$0xff] (!%p238_p2)   ;;  %v11166_v17 = vld [vmem:[%s14243_s1 + $0xe0] sm:$0xff] (!%p238_p2)   ;;  %v11170_v21 = vld [vmem:[%s14243_s1 + $0xe8] sm:$0xff] (!%p238_p2)   ;;  %vm2637_vm12 = vcmask (!%p238_p2), 517120   ;;  %vm2638_vm13 = vsmask.f32 (!%p238_p2), 1280 }
   0xb   : > { %v11163_v14 = vld [vmem:[%s14243_s1 + $0x18] sm:$0xff] (!%p238_p2)   ;;  %v11167_v18 = vld [vmem:[%s14243_s1 + $0x20] sm:$0xff] (!%p238_p2)   ;;  %v11171_v22 = vld [vmem:[%s14243_s1 + $0x28] sm:$0xff] (!%p238_p2)  }
   0xc   : > { %10128 = vmatpush3.bf16.msra.mxu0 (!%p238_p2), %v11155_v6  ;;  %v11164_v15 = vld [vmem:[%s14243_s1 + $0x98] sm:$0xff] (!%p238_p2)   ;;  %v11168_v19 = vld [vmem:[%s14243_s1 + $0xa0] sm:$0xff] (!%p238_p2)   ;;  %v11172_v23 = vld [vmem:[%s14243_s1 + $0xa8] sm:$0xff] (!%p238_p2)  }
   0xd   : > { %10222 = vmatpush3.bf16.msra.mxu1 %v11156_v7  ;;  %10129 = vmatprep.subr.bf16.mxu0 %v11157_v8  ;;  %s14271_s25 = smov (!%p269_p3, %s9290_s25), 1  ;;  %v11173_v24 = vld [vmem:[%s14243_s1 + $0x70] sm:$0xff]   ;;  %v11177_v28 = vld [vmem:[%s14243_s1 + $0x78] sm:$0xff]   ;;  %vm13087_vm4 = vmand %vm14251_vm2, %vm1714_vm3 }
   0xe   : > { %10223 = vmatprep.subr.bf16.mxu1 %v11158_v9  ;;  %v11174_v25 = vld [vmem:[%s14243_s1 + $0xf0] sm:$0xff]   ;;  %s11136_s13 = smul.u32 400, %s14271_s25  ;;  %v11178_v29 = vld [vmem:[%s14243_s1 + $0xf8] sm:$0xff]   ;;  %vm2182_vm7 = vmand %vm1245_vm0, %vm2181_vm5  ;;  %vm3088_vm5 = vsmask.f32 5392 }
   0xf   : > { %v11175_v26 = vld [vmem:[%s14243_s1 + $0x30] sm:$0xff]   ;;  %v11179_v30 = vld [vmem:[%s14243_s1 + $0x38] sm:$0xff]   ;;  %vm2165_vm8 = vmor %vm1714_vm3, %vm2164_vm6  ;;  %vm3107_vm3 = vsmask.f32 7942  ;;  %s11137_s19 = smul.u32 28, %s14271_s25 }
  0x10   : > { %10130 = vmatpush3.bf16.msra.mxu0 %v11159_v10  ;;  %v11176_v27 = vld [vmem:[%s14243_s1 + $0xb0] sm:$0xff]   ;;  %s12081_s26 = scalar_lea.vmem %s14242_s0, %s11136_s13  ;;  %v11180_v31 = vld [vmem:[%s14243_s1 + $0xb8] sm:$0xff]   ;;  %vm2628_vm14 = vmor %vm2626_vm9, %vm2627_vm10  ;;  %vm3553_vm9 = vcmask 1045508   ;;  %vm14252_vm10 = vcmask 519170  }
  0x11   : > { %10224 = vmatpush3.bf16.msra.mxu1 %v11160_v11  ;;  %10131 = vmatprep.subr.bf16.mxu0 %v11161_v12  ;;  %v11181_v32 = vld [vmem:[%s12081_s26] ss:$16 sps:$4 sm:$0xff]   ;;  %v11183_v33 = vld [vmem:[%s12081_s26 + $0x4] ss:$16 sps:$4 sm:$0xff]   ;;  %v11184_v34 = vld [vmem:[%s12081_s26 + $0x8] ss:$16 sps:$4 sm:$0xff]   ;;  %s14127_s8 = scalar_lea.vmem %s14249_s7, %s11137_s19 }
  0x12   : > { %10225 = vmatprep.subr.bf16.mxu1 %v11162_v13  ;;  %v11186_v35 = vld [vmem:[%s12081_s26 + $0xc] ss:$16 sps:$4 sm:$0xff]   ;;  %879 = vmatprep.mubr.bf16.mxu0 %v11183_v33  ;;  %v11187_v36 = vld [vmem:[%s12081_s26 + $0x24] ss:$16 sps:$4 sm:$0xff]   ;;  %v11191_v38 = vld [vmem:[%s12081_s26 + $0x20] ss:$16 sps:$4 sm:$0xff]  }
  0x13   : > { %1015 = vmatprep.mubr.bf16.mxu1 %v11186_v35  ;;  %v11189_v37 = vld [vmem:[%s12081_s26 + $0x2c] ss:$16 sps:$4 sm:$0xff]   ;;  %v11192_v39 = vld [vmem:[%s12081_s26 + $0x28] ss:$16 sps:$4 sm:$0xff]   ;;  %v11193_v40 = vld [vmem:[%s12081_s26 + $0x44] ss:$16 sps:$4 sm:$0xff]  }
  0x14   : > { %10132 = vmatpush3.bf16.msra.mxu0 %v11163_v14  ;;  %v11195_v41 = vld [vmem:[%s12081_s26 + $0x4c] ss:$16 sps:$4 sm:$0xff]   ;;  %v11197_v42 = vld [vmem:[%s12081_s26 + $0x40] ss:$16 sps:$4 sm:$0xff]   ;;  %v11198_v43 = vld [vmem:[%s12081_s26 + $0x48] ss:$16 sps:$4 sm:$0xff]  }
  0x15   : > { %10226 = vmatpush3.bf16.msra.mxu1 %v11164_v15  ;;  %10133 = vmatprep.subr.bf16.mxu0 %v11165_v16  ;;  %v11199_v44 = vld [vmem:[%s12081_s26 + $0x64] ss:$16 sps:$4 sm:$0xff]   ;;  %v11202_v45 = vld [vmem:[%s12081_s26 + $0x6c] ss:$16 sps:$4 sm:$0xff]   ;;  %v11201_v46 = vld [vmem:[%s12081_s26 + $0x60] ss:$16 sps:$4 sm:$0xff]  }
  0x16   : > { %10227 = vmatprep.subr.bf16.mxu1 %v11166_v17  ;;  %v11204_v47 = vld [vmem:[%s12081_s26 + $0x68] ss:$16 sps:$4 sm:$0xff]   ;;  %v11205_v48 = vld [vmem:[%s12081_s26 + $0x84] ss:$16 sps:$4 sm:$0xff]   ;;  %v11208_v49 = vld [vmem:[%s12081_s26 + $0x8c] ss:$16 sps:$4 sm:$0xff]  }
  0x17   : > { %v11207_v50 = vld [vmem:[%s12081_s26 + $0x80] ss:$16 sps:$4 sm:$0xff]   ;;  %v11210_v51 = vld [vmem:[%s12081_s26 + $0x88] ss:$16 sps:$4 sm:$0xff]   ;;  %v11211_v52 = vld [vmem:[%s12081_s26 + $0xa4] ss:$16 sps:$4 sm:$0xff]  }
  0x18   : > { %10134 = vmatpush3.bf16.msra.mxu0 %v11167_v18  ;;  %v11214_v53 = vld [vmem:[%s12081_s26 + $0xac] ss:$16 sps:$4 sm:$0xff]   ;;  %v11213_v54 = vld [vmem:[%s12081_s26 + $0xa0] ss:$16 sps:$4 sm:$0xff]   ;;  %v11216_v55 = vld [vmem:[%s12081_s26 + $0xa8] ss:$16 sps:$4 sm:$0xff]  }
  0x19   : > { %10228 = vmatpush3.bf16.msra.mxu1 %v11168_v19  ;;  %10135 = vmatprep.subr.bf16.mxu0 %v11169_v20  ;;  %v11217_v56 = vld [vmem:[%s12081_s26 + $0xc4] ss:$16 sps:$4 sm:$0xff]   ;;  %v11220_v57 = vld [vmem:[%s12081_s26 + $0xcc] ss:$16 sps:$4 sm:$0xff]   ;;  %v11219_v58 = vld [vmem:[%s12081_s26 + $0xc0] ss:$16 sps:$4 sm:$0xff]  }
  0x1a   : > { %10229 = vmatprep.subr.bf16.mxu1 %v11170_v21  ;;  %v11222_v59 = vld [vmem:[%s12081_s26 + $0xc8] ss:$16 sps:$4 sm:$0xff]   ;;  %v11223_v60 = vld [vmem:[%s12081_s26 + $0xe4] ss:$16 sps:$4 sm:$0xff]   ;;  %v11226_v61 = vld [vmem:[%s12081_s26 + $0xec] ss:$16 sps:$4 sm:$0xff]  }
  0x1b   : > { %v11225_v62 = vld [vmem:[%s12081_s26 + $0xe0] ss:$16 sps:$4 sm:$0xff]   ;;  %v11228_v63 = vld [vmem:[%s12081_s26 + $0xe8] ss:$16 sps:$4 sm:$0xff]   ;;  %v11229_v0 = vld [vmem:[%s12081_s26 + $0x104] ss:$16 sps:$4 sm:$0xff]  }
  0x1c   : > { %10136 = vmatpush3.bf16.msra.mxu0 %v11171_v22  ;;  %v11232_v1 = vld [vmem:[%s12081_s26 + $0x10c] ss:$16 sps:$4 sm:$0xff]   ;;  %v11231_v2 = vld [vmem:[%s12081_s26 + $0x100] ss:$16 sps:$4 sm:$0xff]   ;;  %v11234_v3 = vld [vmem:[%s12081_s26 + $0x108] ss:$16 sps:$4 sm:$0xff]  }
  0x1d   : > { %10230 = vmatpush3.bf16.msra.mxu1 %v11172_v23  ;;  %10137 = vmatprep.subr.bf16.mxu0 %v11173_v24  ;;  %v11235_v4 = vld [vmem:[%s12081_s26 + $0x124] ss:$16 sps:$4 sm:$0xff]   ;;  %v11238_v5 = vld [vmem:[%s12081_s26 + $0x12c] ss:$16 sps:$4 sm:$0xff]   ;;  %v11237_v6 = vld [vmem:[%s12081_s26 + $0x120] ss:$16 sps:$4 sm:$0xff]  }
  0x1e   : > { %10231 = vmatprep.subr.bf16.mxu1 %v11174_v25  ;;  %v11240_v7 = vld [vmem:[%s12081_s26 + $0x128] ss:$16 sps:$4 sm:$0xff]   ;;  %v11241_v8 = vld [vmem:[%s12081_s26 + $0x144] ss:$16 sps:$4 sm:$0xff]   ;;  %v11244_v9 = vld [vmem:[%s12081_s26 + $0x14c] ss:$16 sps:$4 sm:$0xff]  }
  0x1f   : > { %v11243_v10 = vld [vmem:[%s12081_s26 + $0x140] ss:$16 sps:$4 sm:$0xff]   ;;  %v11246_v11 = vld [vmem:[%s12081_s26 + $0x148] ss:$16 sps:$4 sm:$0xff]   ;;  %v11247_v12 = vld [vmem:[%s12081_s26 + $0x164] ss:$16 sps:$4 sm:$0xff]  }
  0x20   : > { %10138 = vmatpush3.bf16.msra.mxu0 %v11175_v26  ;;  %v11250_v13 = vld [vmem:[%s12081_s26 + $0x16c] ss:$16 sps:$4 sm:$0xff]   ;;  %v328_v14 = vld [vmem:[%s12081_s26 + $0x180] sm:$0xff]  ;;  %v11252_v17 = vld [vmem:[%s12081_s26 + $0x168] ss:$16 sps:$4 sm:$0xff]  }
  0x21   : > { %10232 = vmatpush3.bf16.msra.mxu1 %v11176_v27  ;;  %10139 = vmatprep.subr.bf16.mxu0 %v11177_v28  ;;  %v329_v15 = vld [vmem:[%s12081_s26 + $0x188] sm:$0xff]  ;;  %v11249_v16 = vld [vmem:[%s12081_s26 + $0x160] ss:$16 sps:$4 sm:$0xff]   ;;  %v9347_v18 = vcombine.high %v328_v14, %v328_v14  ;;  %v9346_v20 = vcombine.low %v328_v14, %v328_v14  ;;  %v11295_v35 = vld [vmem:[%s14245_s3 + $0x18] sm:$0xff]  }
  0x22   : > { %10233 = vmatprep.subr.bf16.mxu1 %v11178_v29  ;;  %v9349_v19 = vcombine.high %v329_v15, %v329_v15  ;;  %v9348_v21 = vcombine.low %v329_v15, %v329_v15  ;;  %v11265_v22 = vld [vmem:[%s14245_s3 + $0x40] sm:$0xff]   ;;  %v11275_v26 = vld [vmem:[%s14245_s3 + $0x48] sm:$0xff]   ;;  %v11289_v33 = vld [vmem:[%s14245_s3 + $0x90] sm:$0xff]  }
  0x23   : > { %v11266_v23 = vld [vmem:[%s14245_s3] sm:$0xff]   ;;  %v11276_v27 = vld [vmem:[%s14245_s3 + $0x8] sm:$0xff]   ;;  %vm13271_vm15 = vmand %vm2637_vm12, %vm2638_vm13 }
  0x24   : > { %10140 = vmatpush3.bf16.msra.mxu0 %v11179_v30  ;;  %v11268_v24 = vld [vmem:[%s14245_s3 + $0xc0] sm:$0xff]   ;;  %v11277_v28 = vld [vmem:[%s14245_s3 + $0xc8] sm:$0xff]   ;;  %v11284_v30 = vld [vmem:[%s14245_s3 + $0x50] sm:$0xff]  }
  0x25   : > { %10234 = vmatpush3.bf16.msra.mxu1 %v11180_v31  ;;  %10313 = vmatprep.subr.bf16.mxu0 %v11265_v22  ;;  %v11269_v25 = vld [vmem:[%s14245_s3 + $0x80] sm:$0xff]   ;;  %v11279_v29 = vld [vmem:[%s14245_s3 + $0x88] sm:$0xff]   ;;  %v11285_v31 = vld [vmem:[%s14245_s3 + $0x10] sm:$0xff]  }
  0x26   : > { %10335 = vmatprep.subr.bf16.mxu1 %v11268_v24  ;;  %vm13320_vm6 = vmand %vm14250_vm11, %vm3107_vm3 }
  0x27   : > { %880 = vmatmul.mubr.bf16.vlgmr.msra.gmra.mrb[0].mxu0 %v11181_v32  ;;  %v11288_v32 = vld [vmem:[%s14245_s3 + $0xd0] sm:$0xff]  }
  0x28   : > { %1016 = vmatmul.mubr.bf16.vlgmr.msra.gmra.mrb[0].mxu1 %v11184_v34  ;;  %887 = vmatprep.mubr.bf16.mxu0 %v11187_v36  ;;  %v11293_v34 = vld [vmem:[%s14245_s3 + $0x58] sm:$0xff]  }
  0x29   : > { %1023 = vmatprep.mubr.bf16.mxu1 %v11189_v37  ;;  %10314 = vmatpush3.bf16.msra.mxu0 %v11266_v23  ;;  %v11296_v36 = vld [vmem:[%s14245_s3 + $0xd8] sm:$0xff]  }
  0x2a   : > { %10336 = vmatpush3.bf16.msra.mxu1 %v11269_v25  ;;  %10315 = vmatprep.subr.bf16.mxu0 %v11275_v26  ;;  %v11298_v37 = vld [vmem:[%s14245_s3 + $0x98] sm:$0xff]  }
  0x2b   : > { %10337 = vmatprep.subr.bf16.mxu1 %v11277_v28 }
  0x2d   : > { %10316 = vmatpush3.bf16.msra.mxu0 %v11276_v27 }
  0x2e   : > { %10338 = vmatpush3.bf16.msra.mxu1 %v11279_v29  ;;  %10317 = vmatprep.subr.bf16.mxu0 %v11284_v30 }
  0x2f   : > { %888 = vmatmul.mubr.bf16.gmra.mrb[4].mxu0 %v11191_v38  ;;  %10339 = vmatprep.subr.bf16.mxu1 %v11288_v32  ;;  %v11301_v38 = vld [vmem:[%s14245_s3 + $0x60] sm:$0xff]  }
  0x30   : > { %1024 = vmatmul.mubr.bf16.gmra.mrb[4].mxu1 %v11192_v39  ;;  %895 = vmatprep.mubr.bf16.mxu0 %v11193_v40  ;;  %v11302_v39 = vld [vmem:[%s14245_s3 + $0x20] sm:$0xff]  }
  0x31   : > { %1031 = vmatprep.mubr.bf16.mxu1 %v11195_v41  ;;  %10318 = vmatpush3.bf16.msra.mxu0 %v11285_v31  ;;  %v11303_v40 = vld [vmem:[%s14245_s3 + $0xe0] sm:$0xff]  }
  0x32   : > { %10340 = vmatpush3.bf16.msra.mxu1 %v11289_v33  ;;  %10319 = vmatprep.subr.bf16.mxu0 %v11293_v34  ;;  %v11304_v41 = vld [vmem:[%s14245_s3 + $0xa0] sm:$0xff]  }
  0x33   : > { %10341 = vmatprep.subr.bf16.mxu1 %v11296_v36 }
  0x35   : > { %10320 = vmatpush3.bf16.msra.mxu0 %v11295_v35 }
  0x36   : > { %10342 = vmatpush3.bf16.msra.mxu1 %v11298_v37  ;;  %10321 = vmatprep.subr.bf16.mxu0 %v11301_v38 }
  0x37   : > { %896 = vmatmul.mubr.bf16.gmra.mrb[8].mxu0 %v11197_v42  ;;  %v11305_v42 = vld [vmem:[%s14245_s3 + $0x68] sm:$0xff]   ;;  %10343 = vmatprep.subr.bf16.mxu1 %v11303_v40 }
  0x38   : > { %1032 = vmatmul.mubr.bf16.gmra.mrb[8].mxu1 %v11198_v43  ;;  %903 = vmatprep.mubr.bf16.mxu0 %v11199_v44  ;;  %v11307_v43 = vld [vmem:[%s14245_s3 + $0xe8] sm:$0xff]  }
  0x39   : > { %1039 = vmatprep.mubr.bf16.mxu1 %v11202_v45  ;;  %10322 = vmatpush3.bf16.msra.mxu0 %v11302_v39  ;;  %v11306_v44 = vld [vmem:[%s14245_s3 + $0x28] sm:$0xff]  }
  0x3a   : > { %10344 = vmatpush3.bf16.msra.mxu1 %v11304_v41  ;;  %v11308_v45 = vld [vmem:[%s14245_s3 + $0xa8] sm:$0xff]   ;;  %10323 = vmatprep.subr.bf16.mxu0 %v11305_v42 }
  0x3b   : > { %10345 = vmatprep.subr.bf16.mxu1 %v11307_v43 }
  0x3d   : > { %10324 = vmatpush3.bf16.msra.mxu0 %v11306_v44 }
  0x3e   : > { %10346 = vmatpush3.bf16.msra.mxu1 %v11308_v45 }
  0x3f   : > { %904 = vmatmul.mubr.bf16.gmra.mrb[12].mxu0 %v11201_v46  ;;  %v11309_v46 = vld [vmem:[%s14245_s3 + $0x70] sm:$0xff]  }
  0x40   : > { %1040 = vmatmul.mubr.bf16.gmra.mrb[12].mxu1 %v11204_v47  ;;  %911 = vmatprep.mubr.bf16.mxu0 %v11205_v48  ;;  %v11311_v47 = vld [vmem:[%s14245_s3 + $0xf0] sm:$0xff]  }
  0x41   : > { %1047 = vmatprep.mubr.bf16.mxu1 %v11208_v49  ;;  %v11310_v48 = vld [vmem:[%s14245_s3 + $0x30] sm:$0xff]   ;;  %10325 = vmatprep.subr.bf16.mxu0 %v11309_v46  ;;  %v11318_v46 = vld [vmem:[%s14245_s3 + $0xb8] sm:$0xff]  }
  0x42   : > { %v11312_v49 = vld [vmem:[%s14245_s3 + $0xb0] sm:$0xff]   ;;  %10347 = vmatprep.subr.bf16.mxu1 %v11311_v47  ;;  %10326 = vmatpush3.bf16.msra.mxu0 %v11310_v48 }
  0x43   : > { %10348 = vmatpush3.bf16.msra.mxu1 %v11312_v49 }
  0x47   : > { %912 = vmatmul.mubr.bf16.gmra.mrb[16].mxu0 %v11207_v50  ;;  %v11314_v50 = vld [vmem:[%s14245_s3 + $0x78] sm:$0xff]  }
  0x48   : > { %1048 = vmatmul.mubr.bf16.gmra.mrb[16].mxu1 %v11210_v51  ;;  %919 = vmatprep.mubr.bf16.mxu0 %v11211_v52  ;;  %v11317_v51 = vld [vmem:[%s14245_s3 + $0xf8] sm:$0xff]  }
  0x49   : > { %1055 = vmatprep.mubr.bf16.mxu1 %v11214_v53  ;;  %v11315_v52 = vld [vmem:[%s14245_s3 + $0x38] sm:$0xff]   ;;  %10327 = vmatprep.subr.bf16.mxu0 %v11314_v50  ;;  %v12235_v53 = vld [vmem:[%s14244_s2] ss:$0 sm:$0xff] }
  0x4a   : > { %10349 = vmatprep.subr.bf16.mxu1 %v11317_v51  ;;  %10328 = vmatpush3.bf16.msra.mxu0 %v11315_v52 }
  0x4b   : > { %10350 = vmatpush3.bf16.msra.mxu1 %v11318_v46 }
  0x4f   : > { %920 = vmatmul.mubr.bf16.gmra.mrb[20].mxu0 %v11213_v54 }
  0x50   : > { %1056 = vmatmul.mubr.bf16.gmra.mrb[20].mxu1 %v11216_v55  ;;  %927 = vmatprep.mubr.bf16.mxu0 %v11217_v56 }
  0x51   : > { %1063 = vmatprep.mubr.bf16.mxu1 %v11220_v57 }
  0x57   : > { %928 = vmatmul.mubr.bf16.gmra.mrb[24].mxu0 %v11219_v58 }
  0x58   : > { %1064 = vmatmul.mubr.bf16.gmra.mrb[24].mxu1 %v11222_v59  ;;  %935 = vmatprep.mubr.bf16.mxu0 %v11223_v60 }
  0x59   : > { %1071 = vmatprep.mubr.bf16.mxu1 %v11226_v61 }
  0x5f   : > { %936 = vmatmul.mubr.bf16.gmra.mrb[28].mxu0 %v11225_v62 }
  0x60   : > { %1072 = vmatmul.mubr.bf16.gmra.mrb[28].mxu1 %v11228_v63  ;;  %943 = vmatprep.mubr.bf16.mxu0 %v11229_v0 }
  0x61   : > { %1079 = vmatprep.mubr.bf16.mxu1 %v11232_v1 }
  0x67   : > { %944 = vmatmul.mubr.bf16.gmra.mrb[32].mxu0 %v11231_v2 }
  0x68   : > { %1080 = vmatmul.mubr.bf16.gmra.mrb[32].mxu1 %v11234_v3  ;;  %951 = vmatprep.mubr.bf16.mxu0 %v11235_v4 }
  0x69   : > { %1087 = vmatprep.mubr.bf16.mxu1 %v11238_v5 }
  0x6f   : > { %952 = vmatmul.mubr.bf16.gmra.mrb[36].mxu0 %v11237_v6 }
  0x70   : > { %1088 = vmatmul.mubr.bf16.gmra.mrb[36].mxu1 %v11240_v7  ;;  %959 = vmatprep.mubr.bf16.mxu0 %v11241_v8 }
  0x71   : > { %1095 = vmatprep.mubr.bf16.mxu1 %v11244_v9 }
  0x77   : > { %960 = vmatmul.mubr.bf16.gmra.mrb[40].mxu0 %v11243_v10 }
  0x78   : > { %1096 = vmatmul.mubr.bf16.gmra.mrb[40].mxu1 %v11246_v11  ;;  %967 = vmatprep.mubr.bf16.mxu0 %v11247_v12 }
  0x79   : > { %1103 = vmatprep.mubr.bf16.mxu1 %v11250_v13 }
  0x7f   : > { %968 = vmatmul.mubr.bf16.gmra.mrb[44].mxu0 %v11249_v16 }
  0x80   : > { %1104 = vmatmul.mubr.bf16.gmra.mrb[44].mxu1 %v11252_v17  ;;  %975 = vmatprep.mubr.bf16.mxu0 %v9347_v18 }
  0x81   : > { %1111 = vmatprep.mubr.bf16.mxu1 %v9349_v19 }
  0x87   : > { %976 = vmatmul.mubr.bf16.gmra.mrb[48].mxu0 %v9346_v20 }
  0x88   : > { %1112 = vmatmul.mubr.bf16.gmra.mrb[48].mxu1 %v9348_v21 }
  0xfa   : > { %v10141_v54 = vpop.f32.mrb[0].mxu0 }
  0xfb   : > { %v10235_v55 = vpop.f32.mrb[0].mxu1  ;;  %v10142_v56 = vpop.f32.mrb[1].mxu0 }
  0xfc   : > { %v10143_v57 = vadd.f32 %v10142_v56, %v10141_v54  ;;  %v10236_v58 = vpop.f32.mrb[1].mxu1  ;;  %v10144_v59 = vpop.f32.mrb[2].mxu0 }
  0xfd   : > { %v10237_v60 = vadd.f32 %v10236_v58, %v10235_v55  ;;  %v10238_v61 = vpop.f32.mrb[2].mxu1  ;;  %v10145_v62 = vpop.f32.mrb[3].mxu0 }
  0xfe   : > { %v882_v63 = vadd.f32 %v10143_v57, %v12235_v53  ;;  %v10146_v0 = vadd.f32 %v10145_v62, %v10144_v59  ;;  %v10239_v1 = vpop.f32.mrb[3].mxu1  ;;  %v11319_v59 = vld [vmem:[%s14245_s3 + $0x40] sm:$0xff]  }
  0xff   : > { %v10240_v2 = vadd.f32 %v10239_v1, %v10238_v61  ;;  %10357 = vmatprep.subr.bf16.mxu0 %v11319_v59 }
 0x100   : > { %v1018_v3 = vadd.f32 %v10237_v60, %v882_v63  ;;  %v885_v4 = vadd.f32 %v10146_v0, %v12235_v53 }
 0x102   : > { %v1119_v5 = vmax.f32 %v1018_v3, 0.0  ;;  %v1021_v6 = vadd.f32 %v10240_v2, %v885_v4  ;;  %v10147_v7 = vpop.f32.mrb[4].mxu0 }
 0x103   : > { %v10241_v8 = vpop.f32.mrb[4].mxu1  ;;  %v10148_v9 = vpop.f32.mrb[5].mxu0 }
 0x104   : > { %v10076_v10 = vpack.c.bf16 %v1119_v5, %v1119_v5  ;;  %v1120_v11 = vmax.f32 %v1021_v6, 0.0  ;;  %v10149_v12 = vadd.f32 %v10148_v9, %v10147_v7  ;;  %v10242_v13 = vpop.f32.mrb[5].mxu1  ;;  %v10150_v14 = vpop.f32.mrb[6].mxu0 }
 0x105   : > { %v10243_v15 = vadd.f32 %v10242_v13, %v10241_v8  ;;  %v10244_v16 = vpop.f32.mrb[6].mxu1  ;;  %v10151_v17 = vpop.f32.mrb[7].mxu0 }
 0x106   : > { %1246 = vst.msk [vmem:[#allocation2] sm:$0xf] %vm1245_vm0, %v10076_v10  ;;  %v10077_v18 = vpack.c.bf16 %v1120_v11, %v1120_v11  ;;  %v890_v19 = vadd.f32 %v10149_v12, %v12235_v53  ;;  %v10152_v20 = vadd.f32 %v10151_v17, %v10150_v14  ;;  %v10245_v21 = vpop.f32.mrb[7].mxu1 }
 0x107   : > { %v10246_v22 = vadd.f32 %v10245_v21, %v10244_v16 }
 0x108   : > { %1247 = vst.msk [vmem:[#allocation2 + $0x4] sm:$0xf] %vm1245_vm0, %v10077_v18  ;;  %v1026_v23 = vadd.f32 %v10243_v15, %v890_v19  ;;  %v893_v24 = vadd.f32 %v10152_v20, %v12235_v53 }
 0x10a   : > { %v1121_v25 = vmax.f32 %v1026_v23, 0.0  ;;  %v1029_v26 = vadd.f32 %v10246_v22, %v893_v24  ;;  %v10153_v27 = vpop.f32.mrb[8].mxu0 }
 0x10b   : > { %v10247_v28 = vpop.f32.mrb[8].mxu1  ;;  %v10154_v29 = vpop.f32.mrb[9].mxu0 }
 0x10c   : > { %v10078_v30 = vpack.c.bf16 %v1121_v25, %v1121_v25  ;;  %v1122_v31 = vmax.f32 %v1029_v26, 0.0  ;;  %v10155_v32 = vadd.f32 %v10154_v29, %v10153_v27  ;;  %v10248_v33 = vpop.f32.mrb[9].mxu1  ;;  %v10156_v34 = vpop.f32.mrb[10].mxu0  ;;  %v11324_v26 = vld [vmem:[%s14245_s3 + $0xc0] sm:$0xff]  }
 0x10d   : > { %v10249_v35 = vadd.f32 %v10248_v33, %v10247_v28  ;;  %v10250_v36 = vpop.f32.mrb[10].mxu1  ;;  %v10157_v37 = vpop.f32.mrb[11].mxu0  ;;  %10379 = vmatprep.subr.bf16.mxu1 %v11324_v26 }
 0x10e   : > { %1248 = vst.msk [vmem:[#allocation2 + $0x8] sm:$0xf] %vm1245_vm0, %v10078_v30  ;;  %v10079_v38 = vpack.c.bf16 %v1122_v31, %v1122_v31  ;;  %v898_v39 = vadd.f32 %v10155_v32, %v12235_v53  ;;  %v10158_v40 = vadd.f32 %v10157_v37, %v10156_v34  ;;  %v10251_v41 = vpop.f32.mrb[11].mxu1 }
 0x10f   : > { %v10252_v42 = vadd.f32 %v10251_v41, %v10250_v36  ;;  %v11258_v43 = vld [vmem:[#allocation2] sm:$0x1f]  }
 0x110   : > { %1249 = vst.msk [vmem:[#allocation2 + $0xc] sm:$0xf] %vm1245_vm0, %v10079_v38  ;;  %v1034_v44 = vadd.f32 %v10249_v35, %v898_v39  ;;  %v901_v45 = vadd.f32 %v10158_v40, %v12235_v53  ;;  %v1287_v52 = vshll.u32 %v11258_v43, 16  ;;  %v1285_v19 = vshrl.u32 %v11258_v43, 16 }
 0x112   : > { %v1123_v47 = vmax.f32 %v1034_v44, 0.0  ;;  %v1037_v48 = vadd.f32 %v10252_v42, %v901_v45  ;;  %v10159_v49 = vpop.f32.mrb[12].mxu0  ;;  %v1289_v11 = vrot.slane %v1287_v52, 1 }
 0x113   : > { %v10160_v50 = vpop.f32.mrb[13].mxu0  ;;  %v10253_v51 = vpop.f32.mrb[12].mxu1 }
 0x114   : > { %v10080_v54 = vpack.c.bf16 %v1123_v47, %v1123_v47  ;;  %v1124_v55 = vmax.f32 %v1037_v48, 0.0  ;;  %v10161_v56 = vadd.f32 %v10160_v50, %v10159_v49  ;;  %v10162_v57 = vpop.f32.mrb[14].mxu0  ;;  %v10254_v58 = vpop.f32.mrb[13].mxu1  ;;  %v1290_v30 = vor.u32 %v1289_v11, %v1285_v19 }
 0x115   : > { %v10163_v60 = vpop.f32.mrb[15].mxu0  ;;  %v10255_v61 = vadd.f32 %v10254_v58, %v10253_v51  ;;  %v10256_v62 = vpop.f32.mrb[14].mxu1  ;;  %v11257_v63 = vld [vmem:[#allocation2 + $0x4] sm:$0x3e]  }
 0x116   : > { %1250 = vst.msk [vmem:[#allocation2 + $0x10] sm:$0xf] %vm1245_vm0, %v10080_v54  ;;  %v10081_v0 = vpack.c.bf16 %v1124_v55, %v1124_v55  ;;  %v906_v1 = vadd.f32 %v10161_v56, %v12235_v53  ;;  %v10164_v2 = vadd.f32 %v10163_v60, %v10162_v57  ;;  %v10257_v3 = vpop.f32.mrb[15].mxu1  ;;  %v1300_v5 = vshrl.u32 %v11257_v63, 16 }
 0x117   : > { %v10258_v4 = vadd.f32 %v10257_v3, %v10256_v62  ;;  %v1303_v6 = vshll.u32 %v11257_v63, 16  ;;  %v11261_v15 = vld [vmem:[#allocation2 + $0x8] sm:$0x7c]  }
 0x118   : > { %1251 = vst.msk [vmem:[#allocation2 + $0x14] sm:$0xf] %vm1245_vm0, %v10081_v0  ;;  %v909_v7 = vadd.f32 %v10164_v2, %v12235_v53  ;;  %v1042_v8 = vadd.f32 %v10255_v61, %v906_v1  ;;  %v1302_v9 = vrot.slane %v1300_v5, 1  ;;  %v12257_v25 = vld [vmem:[#allocation2 + $0x8] sm:$0x7c]   ;;  %v1316_v37 = vshrl.u32 %v11261_v15, 16 }
 0x119   : > { %v1305_v10 = vrot.slane %v1303_v6, 2  ;;  %v1319_v41 = vshll.u32 %v11261_v15, 16  ;;  %v1733_v48 = vshrl.u32 %v12257_v25, 16  ;;  %v1735_v49 = vshll.u32 %v12257_v25, 16 }
 0x11a   : > { %v1125_v12 = vmax.f32 %v1042_v8, 0.0  ;;  %v1045_v13 = vadd.f32 %v10258_v4, %v909_v7  ;;  %v10165_v14 = vpop.f32.mrb[16].mxu0  ;;  %v1318_v59 = vrot.slane %v1316_v37, 2 }
 0x11b   : > { %v10166_v16 = vpop.f32.mrb[17].mxu0  ;;  %v10259_v17 = vpop.f32.mrb[16].mxu1  ;;  %v1306_v18 = vor.u32 %v1305_v10, %v1302_v9  ;;  %v1321_v60 = vrot.slane %v1319_v41, 3  ;;  %v1737_v10 = vrot.slane %v1735_v49, 1 }
 0x11c   : > { %v10082_v20 = vpack.c.bf16 %v1125_v12, %v1125_v12  ;;  %v1126_v21 = vmax.f32 %v1045_v13, 0.0  ;;  %v10167_v22 = vadd.f32 %v10166_v16, %v10165_v14  ;;  %v10168_v23 = vpop.f32.mrb[18].mxu0  ;;  %v10260_v24 = vpop.f32.mrb[17].mxu1 }
 0x11d   : > { %v10169_v27 = vpop.f32.mrb[19].mxu0  ;;  %v10261_v28 = vadd.f32 %v10260_v24, %v10259_v17  ;;  %v10262_v29 = vpop.f32.mrb[18].mxu1  ;;  %1307 = vrot.lane.b32.xlu0 %v1306_v18, %s11930_s15  ;;  %v11259_v31 = vld [vmem:[#allocation2 + $0xc] sm:$0xf8]   ;;  %v1322_v13 = vor.u32 %v1321_v60, %v1318_v59  ;;  %v1738_v26 = vor.u32 %v1737_v10, %v1733_v48 }
 0x11e   : > { %1252 = vst.msk [vmem:[#allocation2 + $0x18] sm:$0xf] %vm1245_vm0, %v10082_v20  ;;  %v10083_v32 = vpack.c.bf16 %v1126_v21, %v1126_v21  ;;  %v914_v33 = vadd.f32 %v10167_v22, %v12235_v53  ;;  %v10170_v34 = vadd.f32 %v10169_v27, %v10168_v23  ;;  %v10263_v35 = vpop.f32.mrb[19].mxu1  ;;  %v11260_v36 = vld [vmem:[#allocation2 + $0xc] sm:$0xf8]   ;;  %v1332_v39 = vshrl.u32 %v11259_v31, 16 }
 0x11f   : > { %v10264_v38 = vadd.f32 %v10263_v35, %v10262_v29  ;;  %v1335_v40 = vshll.u32 %v11259_v31, 16  ;;  %v1748_v44 = vshrl.u32 %v11260_v36, 16  ;;  %v1751_v45 = vshll.u32 %v11260_v36, 16 }
 0x120   : > { %1253 = vst.msk [vmem:[#allocation2 + $0x1c] sm:$0xf] %vm1245_vm0, %v10083_v32  ;;  %v917_v42 = vadd.f32 %v10170_v34, %v12235_v53  ;;  %v1050_v43 = vadd.f32 %v10261_v28, %v914_v33  ;;  %v1334_v46 = vrot.slane %v1332_v39, 3 }
 0x121   : > { %1291 = vrot.lane.b32.xlu0 %v1290_v30, %s11930_s15  ;;  %v1337_v47 = vrot.slane %v1335_v40, 4  ;;  %v1750_v54 = vrot.slane %v1748_v44, 1  ;;  %v1753_v55 = vrot.slane %v1751_v45, 2 }
 0x122   : > { %v1127_v50 = vmax.f32 %v1050_v43, 0.0  ;;  %v1053_v51 = vadd.f32 %v10264_v38, %v917_v42  ;;  %v10171_v52 = vpop.f32.mrb[20].mxu0 }
 0x123   : > { %v10172_v56 = vpop.f32.mrb[21].mxu0  ;;  %v10265_v57 = vpop.f32.mrb[20].mxu1  ;;  %v1338_v58 = vor.u32 %v1337_v47, %v1334_v46  ;;  %v1754_v1 = vor.u32 %v1753_v55, %v1750_v54 }
 0x124   : > { %v10084_v61 = vpack.c.bf16 %v1127_v50, %v1127_v50  ;;  %v1128_v62 = vmax.f32 %v1053_v51, 0.0  ;;  %v10173_v63 = vadd.f32 %v10172_v56, %v10171_v52  ;;  %v10174_v0 = vpop.f32.mrb[22].mxu0  ;;  %v10266_v2 = vpop.f32.mrb[21].mxu1 }
 0x125   : > { %1339 = vrot.lane.b32.xlu1 %v1338_v58, %s11930_s15  ;;  %v10175_v3 = vpop.f32.mrb[23].mxu0  ;;  %v10267_v4 = vadd.f32 %v10266_v2, %v10265_v57  ;;  %v10268_v5 = vpop.f32.mrb[22].mxu1  ;;  %1755 = vrot.lane.b32.xlu0 %v1754_v1, %s11930_s15  ;;  %v11264_v11 = vld [vmem:[#allocation2 + $0x14] sm:$0x1f]  }
 0x126   : > { %1254 = vst.msk [vmem:[#allocation2 + $0x20] sm:$0xf] %vm1245_vm0, %v10084_v61  ;;  %v10085_v6 = vpack.c.bf16 %v1128_v62, %v1128_v62  ;;  %v922_v7 = vadd.f32 %v10173_v63, %v12235_v53  ;;  %v10176_v8 = vadd.f32 %v10175_v3, %v10174_v0  ;;  %v10269_v9 = vpop.f32.mrb[23].mxu1  ;;  %v1764_v17 = vshrl.u32 %v11264_v11, 16  ;;  %v11270_v22 = vld [vmem:[#allocation2 + $0x14] sm:$0x1f]  }
 0x127   : > { %v10270_v12 = vadd.f32 %v10269_v9, %v10268_v5  ;;  %v11263_v14 = vld [vmem:[#allocation2 + $0x18] sm:$0x3e]   ;;  %v1767_v18 = vshll.u32 %v11264_v11, 16  ;;  %v2202_v39 = vshrl.u32 %v11270_v22, 16  ;;  %v2204_v50 = vshll.u32 %v11270_v22, 16 }
 0x128   : > { %1255 = vst.msk [vmem:[#allocation2 + $0x24] sm:$0xf] %vm1245_vm0, %v10085_v6  ;;  %v925_v15 = vadd.f32 %v10176_v8, %v12235_v53  ;;  %v1058_v16 = vadd.f32 %v10267_v4, %v922_v7  ;;  %v11267_v19 = vld [vmem:[#allocation2 + $0x18] sm:$0x3e]   ;;  %v1780_v20 = vshrl.u32 %v11263_v14, 16  ;;  %v1783_v21 = vshll.u32 %v11263_v14, 16 }
 0x129   : > { %1323 = vrot.lane.b32.xlu1 %v1322_v13, %s11930_s15  ;;  %v1766_v27 = vrot.slane %v1764_v17, 6  ;;  %v1769_v31 = vrot.slane %v1767_v18, 7  ;;  %v2217_v32 = vshrl.u32 %v11267_v19, 16  ;;  %v2220_v33 = vshll.u32 %v11267_v19, 16 }
 0x12a   : > { %v1129_v23 = vmax.f32 %v1058_v16, 0.0  ;;  %v1061_v24 = vadd.f32 %v10270_v12, %v925_v15  ;;  %v10177_v25 = vpop.f32.mrb[24].mxu0  ;;  %v1782_v30 = vrot.slane %v1780_v20, 7  ;;  %v2206_v59 = vrot.slane %v2204_v50, 1 }
 0x12b   : > { %v10178_v28 = vpop.f32.mrb[25].mxu0  ;;  %v10271_v29 = vpop.f32.mrb[24].mxu1  ;;  %v2219_v44 = vrot.slane %v2217_v32, 1  ;;  %v2222_v45 = vrot.slane %v2220_v33, 2  ;;  %v1770_v54 = vor.u32 %v1769_v31, %v1766_v27 }
 0x12c   : > { %v10086_v34 = vpack.c.bf16 %v1129_v23, %v1129_v23  ;;  %v1130_v35 = vmax.f32 %v1061_v24, 0.0  ;;  %v10179_v36 = vadd.f32 %v10178_v28, %v10177_v25  ;;  %v10272_v37 = vpop.f32.mrb[25].mxu1  ;;  %v10180_v38 = vpop.f32.mrb[26].mxu0  ;;  %v1785_v43 = vor.u32 %v1783_v21, %v1782_v30 }
 0x12d   : > { %v10273_v40 = vadd.f32 %v10272_v37, %v10271_v29  ;;  %1739 = vrot.lane.b32.xlu1 %v1738_v26, %s11930_s15  ;;  %v10181_v41 = vpop.f32.mrb[27].mxu0  ;;  %v10274_v42 = vpop.f32.mrb[26].mxu1  ;;  %v11272_v51 = vld [vmem:[#allocation2 + $0x1c] sm:$0x7c]   ;;  %v2223_v55 = vor.u32 %v2222_v45, %v2219_v44  ;;  %v2207_v4 = vor.u32 %v2206_v59, %v2202_v39 }
 0x12e   : > { %1256 = vst.msk [vmem:[#allocation2 + $0x28] sm:$0xf] %vm1245_vm0, %v10086_v34  ;;  %v10087_v46 = vpack.c.bf16 %v1130_v35, %v1130_v35  ;;  %v930_v47 = vadd.f32 %v10179_v36, %v12235_v53  ;;  %v10182_v48 = vadd.f32 %v10181_v41, %v10180_v38  ;;  %v10275_v49 = vpop.f32.mrb[27].mxu1  ;;  %1786 = vrot.lane.b32.xlu0 %v1785_v43, %s11930_s15  ;;  %v2233_v60 = vshrl.u32 %v11272_v51, 16  ;;  %v11274_v6 = vld [vmem:[#allocation2 + $0x1c] sm:$0x7c]  }
 0x12f   : > { %v10276_v52 = vadd.f32 %v10275_v49, %v10274_v42  ;;  %v11271_v56 = vld [vmem:[#allocation2 + $0x20] sm:$0xf8]   ;;  %v2236_v0 = vshll.u32 %v11272_v51, 16  ;;  %v2657_v31 = vshrl.u32 %v11274_v6, 16  ;;  %v2659_v32 = vshll.u32 %v11274_v6, 16 }
 0x130   : > { %1257 = vst.msk [vmem:[#allocation2 + $0x2c] sm:$0xf] %vm1245_vm0, %v10087_v46  ;;  %v1066_v57 = vadd.f32 %v10273_v40, %v930_v47  ;;  %v933_v58 = vadd.f32 %v10182_v48, %v12235_v53  ;;  %v11273_v61 = vld [vmem:[#allocation2 + $0x20] sm:$0xf8]   ;;  %v2249_v62 = vshrl.u32 %v11271_v56, 16  ;;  %v2252_v63 = vshll.u32 %v11271_v56, 16 }
 0x131   : > { %1771 = vrot.lane.b32.xlu1 %v1770_v54, %s11930_s15  ;;  %v2235_v5 = vrot.slane %v2233_v60, 2  ;;  %v2238_v11 = vrot.slane %v2236_v0, 3  ;;  %v2672_v12 = vshrl.u32 %v11273_v61, 16  ;;  %v2675_v18 = vshll.u32 %v11273_v61, 16 }
 0x132   : > { %v1131_v1 = vmax.f32 %v1066_v57, 0.0  ;;  %v1069_v2 = vadd.f32 %v10276_v52, %v933_v58  ;;  %v10183_v3 = vpop.f32.mrb[28].mxu0  ;;  %2224 = vrot.lane.b32.xlu0 %v2223_v55, %s11930_s15  ;;  %v2251_v9 = vrot.slane %v2249_v62, 3  ;;  %v2254_v10 = vrot.slane %v2252_v63, 4 }
 0x133   : > { %v10184_v7 = vpop.f32.mrb[29].mxu0  ;;  %v10277_v8 = vpop.f32.mrb[28].mxu1  ;;  %v2239_v23 = vor.u32 %v2238_v11, %v2235_v5  ;;  %v2674_v24 = vrot.slane %v2672_v12, 1  ;;  %v2677_v29 = vrot.slane %v2675_v18, 2  ;;  %v2661_v38 = vrot.slane %v2659_v32, 1 }
 0x134   : > { %v10088_v13 = vpack.c.bf16 %v1131_v1, %v1131_v1  ;;  %v1132_v14 = vmax.f32 %v1069_v2, 0.0  ;;  %v10185_v15 = vadd.f32 %v10184_v7, %v10183_v3  ;;  %v10278_v16 = vpop.f32.mrb[29].mxu1  ;;  %v10186_v17 = vpop.f32.mrb[30].mxu0  ;;  %v2255_v20 = vor.u32 %v2254_v10, %v2251_v9 }
 0x135   : > { %v10279_v19 = vadd.f32 %v10278_v16, %v10277_v8  ;;  %2208 = vrot.lane.b32.xlu1 %v2207_v4, %s11930_s15  ;;  %v10187_v21 = vpop.f32.mrb[31].mxu0  ;;  %v10280_v22 = vpop.f32.mrb[30].mxu1  ;;  %v2678_v36 = vor.u32 %v2677_v29, %v2674_v24  ;;  %v2662_v47 = vor.u32 %v2661_v38, %v2657_v31 }
 0x136   : > { %1258 = vst.msk [vmem:[#allocation2 + $0x30] sm:$0xf] %vm1245_vm0, %v10088_v13  ;;  %v10089_v25 = vpack.c.bf16 %v1132_v14, %v1132_v14  ;;  %v938_v26 = vadd.f32 %v10185_v15, %v12235_v53  ;;  %v10188_v27 = vadd.f32 %v10187_v21, %v10186_v17  ;;  %v10281_v28 = vpop.f32.mrb[31].mxu1  ;;  %2256 = vrot.lane.b32.xlu0 %v2255_v20, %s11930_s15 }
 0x137   : > { %v10282_v30 = vadd.f32 %v10281_v28, %v10280_v22  ;;  %v11278_v33 = vld [vmem:[#allocation2 + $0x28] sm:$0x1f]  }
 0x138   : > { %1259 = vst.msk [vmem:[#allocation2 + $0x34] sm:$0xf] %vm1245_vm0, %v10089_v25  ;;  %v1074_v34 = vadd.f32 %v10279_v19, %v938_v26  ;;  %v941_v35 = vadd.f32 %v10188_v27, %v12235_v53  ;;  %v11280_v37 = vld [vmem:[#allocation2 + $0x28] sm:$0x1f]   ;;  %v2688_v39 = vshrl.u32 %v11278_v33, 16  ;;  %v2691_v40 = vshll.u32 %v11278_v33, 16 }
 0x139   : > { %2240 = vrot.lane.b32.xlu1 %v2239_v23, %s11930_s15  ;;  %v3130_v44 = vshll.u32 %v11280_v37, 16  ;;  %v3128_v50 = vshrl.u32 %v11280_v37, 16 }
 0x13a   : > { %v1133_v41 = vmax.f32 %v1074_v34, 0.0  ;;  %v10189_v42 = vpop.f32.mrb[32].mxu0  ;;  %v1077_v43 = vadd.f32 %v10282_v30, %v941_v35  ;;  %2679 = vrot.lane.b32.xlu0 %v2678_v36, %s11930_s15  ;;  %v2690_v48 = vrot.slane %v2688_v39, 6  ;;  %v2693_v49 = vrot.slane %v2691_v40, 7 }
 0x13b   : > { %v10190_v45 = vpop.f32.mrb[33].mxu0  ;;  %v10283_v46 = vpop.f32.mrb[32].mxu1  ;;  %v3132_v57 = vrot.slane %v3130_v44, 1 }
 0x13c   : > { %v10090_v51 = vpack.c.bf16 %v1133_v41, %v1133_v41  ;;  %v10191_v52 = vadd.f32 %v10190_v45, %v10189_v42  ;;  %v1134_v54 = vmax.f32 %v1077_v43, 0.0  ;;  %v10192_v55 = vpop.f32.mrb[34].mxu0  ;;  %v10284_v56 = vpop.f32.mrb[33].mxu1  ;;  %v2694_v61 = vor.u32 %v2693_v49, %v2690_v48 }
 0x13d   : > { %v10193_v58 = vpop.f32.mrb[35].mxu0  ;;  %v10285_v59 = vadd.f32 %v10284_v56, %v10283_v46  ;;  %v10286_v60 = vpop.f32.mrb[34].mxu1  ;;  %2663 = vrot.lane.b32.xlu1 %v2662_v47, %s11930_s15  ;;  %v11281_v62 = vld [vmem:[#allocation2 + $0x2c] sm:$0x3e]   ;;  %v3133_v10 = vor.u32 %v3132_v57, %v3128_v50 }
 0x13e   : > { %1260 = vst.msk [vmem:[#allocation2 + $0x38] sm:$0xf] %vm1245_vm0, %v10090_v51  ;;  %v946_v63 = vadd.f32 %v10191_v52, %v12235_v53  ;;  %v10091_v0 = vpack.c.bf16 %v1134_v54, %v1134_v54  ;;  %v10194_v1 = vadd.f32 %v10193_v58, %v10192_v55  ;;  %v10287_v2 = vpop.f32.mrb[35].mxu1  ;;  %v2704_v4 = vshrl.u32 %v11281_v62, 16  ;;  %v11283_v9 = vld [vmem:[#allocation2 + $0x2c] sm:$0x3e]  }
 0x13f   : > { %v10288_v3 = vadd.f32 %v10287_v2, %v10286_v60  ;;  %v2707_v5 = vshll.u32 %v11281_v62, 16  ;;  %v11282_v6 = vld [vmem:[#allocation2 + $0x30] sm:$0x7c]   ;;  %v3143_v18 = vshrl.u32 %v11283_v9, 16  ;;  %v3146_v19 = vshll.u32 %v11283_v9, 16 }
 0x140   : > { %1261 = vst.msk [vmem:[#allocation2 + $0x3c] sm:$0xf] %vm1245_vm0, %v10091_v0  ;;  %v949_v7 = vadd.f32 %v10194_v1, %v12235_v53  ;;  %v1082_v8 = vadd.f32 %v10285_v59, %v946_v63  ;;  %v2706_v11 = vrot.slane %v2704_v4, 7  ;;  %v3159_v12 = vshrl.u32 %v11282_v6, 16  ;;  %v11286_v14 = vld [vmem:[#allocation2 + $0x30] sm:$0x7c]  }
 0x141   : > { %2695 = vrot.lane.b32.xlu1 %v2694_v61, %s11930_s15  ;;  %v3162_v13 = vshll.u32 %v11282_v6, 16  ;;  %v3583_v25 = vshrl.u32 %v11286_v14, 16  ;;  %v3145_v30 = vrot.slane %v3143_v18, 1  ;;  %v3148_v34 = vrot.slane %v3146_v19, 2 }
 0x142   : > { %v1135_v15 = vmax.f32 %v1082_v8, 0.0  ;;  %v1085_v16 = vadd.f32 %v10288_v3, %v949_v7  ;;  %v10195_v17 = vpop.f32.mrb[36].mxu0  ;;  %v2709_v22 = vor.u32 %v2707_v5, %v2706_v11  ;;  %v3161_v23 = vrot.slane %v3159_v12, 2 }
 0x143   : > { %v10196_v20 = vpop.f32.mrb[37].mxu0  ;;  %v10289_v21 = vpop.f32.mrb[36].mxu1  ;;  %v3164_v24 = vrot.slane %v3162_v13, 3  ;;  %v3585_v35 = vshll.u32 %v11286_v14, 16  ;;  %v3149_v42 = vor.u32 %v3148_v34, %v3145_v30 }
 0x144   : > { %v10092_v26 = vpack.c.bf16 %v1135_v15, %v1135_v15  ;;  %v1136_v27 = vmax.f32 %v1085_v16, 0.0  ;;  %v10197_v28 = vadd.f32 %v10196_v20, %v10195_v17  ;;  %v10290_v29 = vpop.f32.mrb[37].mxu1  ;;  %v10198_v31 = vpop.f32.mrb[38].mxu0  ;;  %2710 = vrot.lane.b32.xlu0 %v2709_v22, %s11930_s15 }
 0x145   : > { %v10291_v32 = vadd.f32 %v10290_v29, %v10289_v21  ;;  %3134 = vrot.lane.b32.xlu1 %v3133_v10, %s11930_s15  ;;  %v3165_v33 = vor.u32 %v3164_v24, %v3161_v23  ;;  %v11287_v36 = vld [vmem:[#allocation2 + $0x34] sm:$0xf8]   ;;  %v10199_v40 = vpop.f32.mrb[39].mxu0  ;;  %v10292_v41 = vpop.f32.mrb[38].mxu1  ;;  %v3587_v43 = vrot.slane %v3585_v35, 1 }
 0x146   : > { %1262 = vst.msk [vmem:[#allocation2 + $0x40] sm:$0xf] %vm1245_vm0, %v10092_v26  ;;  %v10093_v37 = vpack.c.bf16 %v1136_v27, %v1136_v27  ;;  %v954_v38 = vadd.f32 %v10197_v28, %v12235_v53  ;;  %v11290_v39 = vld [vmem:[#allocation2 + $0x34] sm:$0xf8]   ;;  %v3175_v44 = vshrl.u32 %v11287_v36, 16  ;;  %v3178_v45 = vshll.u32 %v11287_v36, 16 }
 0x147   : > { %v10293_v46 = vpop.f32.mrb[39].mxu1  ;;  %v3598_v48 = vshrl.u32 %v11290_v39, 16  ;;  %v3601_v49 = vshll.u32 %v11290_v39, 16  ;;  %v10200_v50 = vadd.f32 %v10199_v40, %v10198_v31  ;;  %v3588_v51 = vor.u32 %v3587_v43, %v3583_v25 }
 0x148   : > { %1263 = vst.msk [vmem:[#allocation2 + $0x44] sm:$0xf] %vm1245_vm0, %v10093_v37  ;;  %v1090_v47 = vadd.f32 %v10291_v32, %v954_v38  ;;  %3150 = vrot.lane.b32.xlu0 %v3149_v42, %s11930_s15  ;;  %v3177_v52 = vrot.slane %v3175_v44, 3  ;;  %v3180_v54 = vrot.slane %v3178_v45, 4  ;;  %v10294_v55 = vadd.f32 %v10293_v46, %v10292_v41  ;;  %v11874_v46 = vld [vmem:[%s14244_s2] ss:$0 sm:$0xff] }
 0x149   : > { %3166 = vrot.lane.b32.xlu1 %v3165_v33, %s11930_s15  ;;  %v3600_v57 = vrot.slane %v3598_v48, 1  ;;  %v3603_v58 = vrot.slane %v3601_v49, 2  ;;  %v957_v59 = vadd.f32 %v10200_v50, %v12235_v53 }
 0x14a   : > { %v1137_v56 = vmax.f32 %v1090_v47, 0.0  ;;  %v10201_v60 = vpop.f32.mrb[40].mxu0  ;;  %v3181_v61 = vor.u32 %v3180_v54, %v3177_v52 }
 0x14b   : > { %v10202_v62 = vpop.f32.mrb[41].mxu0  ;;  %v10295_v63 = vpop.f32.mrb[40].mxu1  ;;  %v1093_v1 = vadd.f32 %v10294_v55, %v957_v59  ;;  %v3604_v5 = vor.u32 %v3603_v58, %v3600_v57 }
 0x14c   : > { %v10094_v0 = vpack.c.bf16 %v1137_v56, %v1137_v56  ;;  %v10203_v2 = vadd.f32 %v10202_v62, %v10201_v60  ;;  %v10204_v3 = vpop.f32.mrb[42].mxu0  ;;  %v10296_v4 = vpop.f32.mrb[41].mxu1  ;;  %3182 = vrot.lane.b32.xlu0 %v3181_v61, %s11930_s15 }
 0x14d   : > { %3589 = vrot.lane.b32.xlu1 %v3588_v51, %s11930_s15  ;;  %v11291_v6 = vld [vmem:[#allocation2 + $0x3c] sm:$0x1f]   ;;  %v10297_v7 = vadd.f32 %v10296_v4, %v10295_v63  ;;  %v1138_v24 = vmax.f32 %v1093_v1, 0.0  ;;  %v10298_v28 = vpop.f32.mrb[42].mxu1 }
 0x14e   : > { %1264 = vst.msk [vmem:[#allocation2 + $0x48] sm:$0xf] %vm1245_vm0, %v10094_v0  ;;  %v11294_v8 = vld [vmem:[#allocation2 + $0x3c] sm:$0x1f]   ;;  %v962_v9 = vadd.f32 %v10203_v2, %v12235_v53  ;;  %v3614_v10 = vshrl.u32 %v11291_v6, 16  ;;  %v3617_v11 = vshll.u32 %v11291_v6, 16 }
 0x14f   : > { %v11292_v12 = vld [vmem:[#allocation2 + $0x40] sm:$0x3e]   ;;  %v4054_v13 = vshrl.u32 %v11294_v8, 16  ;;  %v4056_v14 = vshll.u32 %v11294_v8, 16  ;;  %v10205_v53 = vpop.f32.mrb[43].mxu0  ;;  %v10095_v32 = vpack.c.bf16 %v1138_v24, %v1138_v24  ;;  %v10299_v34 = vpop.f32.mrb[43].mxu1 }
 0x150   : > { %v11297_v15 = vld [vmem:[#allocation2 + $0x40] sm:$0x3e]   ;;  %v1098_v16 = vadd.f32 %v10297_v7, %v962_v9  ;;  %3605 = vrot.lane.b32.xlu0 %v3604_v5, %s11930_s15  ;;  %v3616_v17 = vrot.slane %v3614_v10, 6  ;;  %v3619_v18 = vrot.slane %v3617_v11, 7  ;;  %v3630_v19 = vshrl.u32 %v11292_v12, 16 }
 0x151   : > { %v3633_v20 = vshll.u32 %v11292_v12, 16  ;;  %v4058_v21 = vrot.slane %v4056_v14, 1  ;;  %v4069_v22 = vshrl.u32 %v11297_v15, 16  ;;  %v4072_v23 = vshll.u32 %v11297_v15, 16  ;;  %1265 = vst.msk [vmem:[#allocation2 + $0x4c] sm:$0xf] %vm1245_vm0, %v10095_v32 }
 0x152   : > { %v3620_v25 = vor.u32 %v3619_v18, %v3616_v17  ;;  %v3632_v26 = vrot.slane %v3630_v19, 7  ;;  %v1139_v27 = vmax.f32 %v1098_v16, 0.0  ;;  %v10207_v33 = vpop.f32.mrb[44].mxu0  ;;  %v10206_v37 = vadd.f32 %v10205_v53, %v10204_v3 }
 0x153   : > { %v4059_v29 = vor.u32 %v4058_v21, %v4054_v13  ;;  %v4071_v30 = vrot.slane %v4069_v22, 1  ;;  %v4074_v31 = vrot.slane %v4072_v23, 2  ;;  %v10300_v39 = vadd.f32 %v10299_v34, %v10298_v28  ;;  %v10208_v42 = vpop.f32.mrb[45].mxu0  ;;  %v10301_v43 = vpop.f32.mrb[44].mxu1 }
 0x154   : > { %3621 = vrot.lane.b32.xlu1 %v3620_v25, %s11930_s15  ;;  %v3635_v35 = vor.u32 %v3633_v20, %v3632_v26  ;;  %v10096_v38 = vpack.c.bf16 %v1139_v27, %v1139_v27  ;;  %v965_v47 = vadd.f32 %v11874_v46, %v10206_v37  ;;  %v10209_v48 = vadd.f32 %v10208_v42, %v10207_v33  ;;  %v10302_v49 = vpop.f32.mrb[45].mxu1  ;;  %v10210_v50 = vpop.f32.mrb[46].mxu0 }
 0x155   : > { %v11299_v36 = vld [vmem:[#allocation2 + $0x44] sm:$0x7c]   ;;  %v4075_v40 = vor.u32 %v4074_v31, %v4071_v30  ;;  %v10303_v54 = vadd.f32 %v10302_v49, %v10301_v43  ;;  %v10211_v55 = vpop.f32.mrb[47].mxu0  ;;  %v10304_v56 = vpop.f32.mrb[46].mxu1 }
 0x156   : > { %v11300_v41 = vld [vmem:[#allocation2 + $0x44] sm:$0x7c]   ;;  %3636 = vrot.lane.b32.xlu0 %v3635_v35, %s11930_s15  ;;  %v4085_v44 = vshrl.u32 %v11299_v36, 16  ;;  %v4088_v45 = vshll.u32 %v11299_v36, 16  ;;  %1266 = vst.msk [vmem:[#allocation2 + $0x50] sm:$0xf] %vm1245_vm0, %v10096_v38  ;;  %v970_v59 = vadd.f32 %v11874_v46, %v10209_v48  ;;  %v1101_v60 = vadd.f32 %v10300_v39, %v965_v47 }
 0x157   : > { %v4508_v51 = vshrl.u32 %v11300_v41, 16  ;;  %v4510_v52 = vshll.u32 %v11300_v41, 16  ;;  %v10305_v61 = vpop.f32.mrb[47].mxu1  ;;  %v10212_v63 = vadd.f32 %v10211_v55, %v10210_v50 }
 0x158   : > { %4060 = vrot.lane.b32.xlu1 %v4059_v29, %s11930_s15  ;;  %v4087_v57 = vrot.slane %v4085_v44, 2  ;;  %v4090_v58 = vrot.slane %v4088_v45, 3  ;;  %v10306_v1 = vadd.f32 %v10305_v61, %v10304_v56  ;;  %v1140_v3 = vmax.f32 %v1101_v60, 0.0  ;;  %v11313_v14 = vld [vmem:[#allocation2 + $0x48] sm:$0xf8]  }
 0x159   : > { %v4512_v62 = vrot.slane %v4510_v52, 1  ;;  %v1106_v4 = vadd.f32 %v10303_v54, %v970_v59  ;;  %v973_v7 = vadd.f32 %v11874_v46, %v10212_v63  ;;  %v11316_v16 = vld [vmem:[#allocation2 + $0x48] sm:$0xf8]   ;;  %v4101_v20 = vshrl.u32 %v11313_v14, 16 }
 0x15a   : > { %v10213_v0 = vpop.f32.mrb[48].mxu0  ;;  %4076 = vrot.lane.b32.xlu0 %v4075_v40, %s11930_s15  ;;  %v4091_v2 = vor.u32 %v4090_v58, %v4087_v57  ;;  %v10097_v12 = vpack.c.bf16 %v1140_v3, %v1140_v3  ;;  %v4104_v21 = vshll.u32 %v11313_v14, 16  ;;  %v4523_v22 = vshrl.u32 %v11316_v16, 16 }
 0x15b   : > { %v10214_v5 = vpop.f32.mrb[49].mxu0  ;;  %v10307_v6 = vpop.f32.mrb[48].mxu1  ;;  %v4513_v11 = vor.u32 %v4512_v62, %v4508_v51  ;;  %v1141_v13 = vmax.f32 %v1106_v4, 0.0  ;;  %v1109_v18 = vadd.f32 %v10306_v1, %v973_v7  ;;  %v4526_v23 = vshll.u32 %v11316_v16, 16 }
 0x15c   : > { %v10215_v8 = vadd.f32 %v10214_v5, %v10213_v0  ;;  %v10308_v9 = vpop.f32.mrb[49].mxu1  ;;  %v10216_v10 = vpop.f32.mrb[50].mxu0  ;;  %4092 = vrot.lane.b32.xlu1 %v4091_v2, %s11930_s15  ;;  %1267 = vst.msk [vmem:[#allocation2 + $0x54] sm:$0xf] %vm1245_vm0, %v10097_v12  ;;  %v4103_v26 = vrot.slane %v4101_v20, 3  ;;  %v4106_v53 = vrot.slane %v4104_v21, 4 }
 0x15d   : > { %v10309_v15 = vadd.f32 %v10308_v9, %v10307_v6  ;;  %v10098_v19 = vpack.c.bf16 %v1141_v13, %v1141_v13  ;;  %v1142_v24 = vmax.f32 %v1109_v18, 0.0  ;;  %v4525_v27 = vrot.slane %v4523_v22, 1  ;;  %v10217_v32 = vpop.f32.mrb[51].mxu0  ;;  %v10310_v34 = vpop.f32.mrb[50].mxu1  ;;  %v11320_v12 = vld [vmem:[%s14245_s3] sm:$0xff]   ;;  %v11321_v13 = vld [vmem:[%s14245_s3 + $0x48] sm:$0xff]  }
 0x15e   : > { %v978_v17 = vadd.f32 %v11874_v46, %v10215_v8  ;;  %v4528_v28 = vrot.slane %v4526_v23, 2  ;;  %v4107_v31 = vor.u32 %v4106_v53, %v4103_v26  ;;  %v10311_v36 = vpop.f32.mrb[51].mxu1  ;;  %v11875_v8 = vld [vmem:[#allocation2 + $0x4] sm:$0x3e]   ;;  %v11878_v21 = vld [vmem:[#allocation2 + $0xc] sm:$0xf8]  }
 0x15f   : > { %1268 = vst.msk [vmem:[#allocation2 + $0x58] sm:$0xf] %vm1245_vm0, %v10098_v19  ;;  %v10099_v29 = vpack.c.bf16 %v1142_v24, %v1142_v24  ;;  %v1298_v9 = vrot.slane %v11875_v8, 1  ;;  %v11322_v19 = vld [vmem:[%s14245_s3 + $0x8] sm:$0xff]   ;;  %v1746_v22 = vrot.slane %v11878_v21, 1  ;;  %v11323_v23 = vld [vmem:[%s14245_s3 + $0x50] sm:$0xff]  }
 0x160   : > { %v1114_v25 = vadd.f32 %v10309_v15, %v978_v17  ;;  %4514 = vrot.lane.b32.xlu1 %v4513_v11, %s11930_s15  ;;  %4108 = vrot.lane.b32.xlu0 %v4107_v31, %s11930_s15  ;;  %v4529_v35 = vor.u32 %v4528_v28, %v4525_v27  ;;  %v11876_v15 = vld [vmem:[#allocation2] sm:$0x1f]   ;;  %v11877_v17 = vld [vmem:[#allocation2 + $0xc] sm:$0xf8]   ;;  %v11879_v26 = vld [vmem:[#allocation2 + $0x8] sm:$0x7c]  }
 0x161   : > { %1269 = vst.msk [vmem:[#allocation2 + $0x5c] sm:$0xf] %vm1245_vm0, %v10099_v29  ;;  %v1330_v18 = vrot.slane %v11877_v17, 3  ;;  %v1314_v53 = vrot.slane %v11879_v26, 2  ;;  %v11325_v27 = vld [vmem:[%s14245_s3 + $0x10] sm:$0xff]   ;;  %v11326_v28 = vld [vmem:[%s14245_s3 + $0x80] sm:$0xff]  }
 0x162   : > { %v1143_v30 = vmax.f32 %v1114_v25, 0.0  ;;  %v11329_v32 = vld [vmem:[%s14245_s3 + $0xc8] sm:$0xff]   ;;  %v11332_v36 = vld [vmem:[%s14245_s3 + $0x18] sm:$0xff]   ;;  %v11363_v17 = vld [vmem:[%s14245_s3 + $0x10] sm:$0xff]  }
 0x163   : > { %v11327_v37 = vld [vmem:[#allocation2 + $0x50] sm:$0x1f]   ;;  %v11884_v21 = vld [vmem:[#allocation2 + $0x20] sm:$0xf8]  }
 0x164   : > { %v10100_v33 = vpack.c.bf16 %v1143_v30, %v1143_v30  ;;  %v11333_v38 = vld [vmem:[#allocation2 + $0x50] sm:$0x1f]   ;;  %v4539_v39 = vshrl.u32 %v11327_v37, 16  ;;  %v4542_v40 = vshll.u32 %v11327_v37, 16  ;;  %4530 = vrot.lane.b32.xlu0 %v4529_v35, %s11930_s15  ;;  %v11328_v30 = vld [vmem:[%s14245_s3 + $0x58] sm:$0xff]   ;;  %v11330_v35 = vld [vmem:[%s14245_s3 + $0x88] sm:$0xff]  }
 0x165   : > { %v4978_v42 = vshrl.u32 %v11333_v38, 16  ;;  %v4980_v43 = vshll.u32 %v11333_v38, 16  ;;  %v11334_v37 = vld [vmem:[%s14245_s3 + $0x60] sm:$0xff]   ;;  %v11335_v38 = vld [vmem:[%s14245_s3 + $0xd0] sm:$0xff]  }
 0x166   : > { %1270 = vst.msk [vmem:[#allocation2 + $0x60] sm:$0xf] %vm1245_vm0, %v10100_v33  ;;  %v11331_v41 = vld [vmem:[#allocation2 + $0x54] sm:$0x3e]   ;;  %v4541_v45 = vrot.slane %v4539_v39, 6  ;;  %v4544_v46 = vrot.slane %v4542_v40, 7 }
 0x167   : > { %v11337_v44 = vld [vmem:[#allocation2 + $0x54] sm:$0x3e]   ;;  %v4555_v47 = vshrl.u32 %v11331_v41, 16  ;;  %v4558_v48 = vshll.u32 %v11331_v41, 16  ;;  %v4982_v49 = vrot.slane %v4980_v43, 1 }
 0x168   : > { %v4993_v50 = vshrl.u32 %v11337_v44, 16  ;;  %v4996_v51 = vshll.u32 %v11337_v44, 16  ;;  %v4545_v52 = vor.u32 %v4544_v46, %v4541_v45  ;;  %v11345_v55 = vld [vmem:[#allocation2 + $0x58] sm:$0x7c]   ;;  %v11336_v43 = vld [vmem:[%s14245_s3 + $0x90] sm:$0xff]   ;;  %v11338_v44 = vld [vmem:[%s14245_s3 + $0x20] sm:$0xff]  }
 0x169   : > { %v4557_v54 = vrot.slane %v4555_v47, 7  ;;  %v4983_v60 = vor.u32 %v4982_v49, %v4978_v42  ;;  %v5009_v61 = vshrl.u32 %v11345_v55, 16  ;;  %v5012_v62 = vshll.u32 %v11345_v55, 16  ;;  %v11880_v39 = vld [vmem:[#allocation2 + $0x18] sm:$0x3e]   ;;  %v11339_v46 = vld [vmem:[%s14245_s3 + $0x68] sm:$0xff]  }
 0x16a   : > { %v4995_v56 = vrot.slane %v4993_v50, 1  ;;  %v4998_v57 = vrot.slane %v4996_v51, 2  ;;  %4546 = vrot.lane.b32.xlu1 %v4545_v52, %s11930_s15  ;;  %v1778_v40 = vrot.slane %v11880_v39, 7  ;;  %v11340_v47 = vld [vmem:[%s14245_s3 + $0xd8] sm:$0xff]   ;;  %v11343_v50 = vld [vmem:[%s14245_s3 + $0x70] sm:$0xff]   ;;  %v11344_v51 = vld [vmem:[%s14245_s3 + $0xe0] sm:$0xff]  }
 0x16b   : > { %v4560_v59 = vor.u32 %v4558_v48, %v4557_v54  ;;  %v5011_v2 = vrot.slane %v5009_v61, 2  ;;  %v5014_v3 = vrot.slane %v5012_v62, 3  ;;  %v11341_v48 = vld [vmem:[%s14245_s3 + $0x28] sm:$0xff]   ;;  %v11342_v49 = vld [vmem:[%s14245_s3 + $0x98] sm:$0xff]   ;;  %v11346_v52 = vld [vmem:[%s14245_s3 + $0xa0] sm:$0xff]  }
 0x16c   : > { %v4999_v1 = vor.u32 %v4998_v57, %v4995_v56  ;;  %v11348_v54 = vld [vmem:[%s14245_s3 + $0x30] sm:$0xff]   ;;  %v11349_v55 = vld [vmem:[%s14245_s3 + $0x78] sm:$0xff]   ;;  %v11350_v56 = vld [vmem:[%s14245_s3 + $0xe8] sm:$0xff]  }
 0x16d   : > { %v11347_v58 = vld [vmem:[#allocation2 + $0x5c] sm:$0xf8]   ;;  %4561 = vrot.lane.b32.xlu0 %v4560_v59, %s11930_s15  ;;  %v5015_v6 = vor.u32 %v5014_v3, %v5011_v2  ;;  %v11352_v59 = vld [vmem:[%s14245_s3 + $0xa8] sm:$0xff]   ;;  %v11353_v62 = vld [vmem:[%s14245_s3 + $0xf0] sm:$0xff]  }
 0x16e   : > { %v5025_v63 = vshrl.u32 %v11347_v58, 16  ;;  %v5028_v0 = vshll.u32 %v11347_v58, 16  ;;  %4984 = vrot.lane.b32.xlu1 %v4983_v60, %s11930_s15  ;;  %v11351_v58 = vld [vmem:[%s14245_s3 + $0x38] sm:$0xff]   ;;  %v11881_v60 = vld [vmem:[#allocation2 + $0x8] sm:$0x7c]  }
 0x16f   : > { %v11357_v2 = vld [vmem:[%s14245_s3 + $0xf8] sm:$0xff]  }
 0x170   : > { %v5027_v4 = vrot.slane %v5025_v63, 3  ;;  %v5030_v5 = vrot.slane %v5028_v0, 4  ;;  %v11354_v63 = vld [vmem:[%s14245_s3 + $0x40] sm:$0xff]   ;;  %v11355_v0 = vld [vmem:[%s14245_s3 + $0xb0] sm:$0xff]   ;;  %v11381_v39 = vld [vmem:[%s14245_s3 + $0x78] sm:$0xff]  }
 0x171   : > { %5000 = vrot.lane.b32.xlu0 %v4999_v1, %s11930_s15  ;;  %v11356_v1 = vld [vmem:[%s14245_s3] sm:$0xff]  }
 0x172   : > { %v5031_v7 = vor.u32 %v5030_v5, %v5027_v4  ;;  %5016 = vrot.lane.b32.xlu1 %v5015_v6, %s11930_s15  ;;  %v11882_v4 = vld [vmem:[#allocation2 + $0x18] sm:$0x3e]   ;;  %v11358_v6 = vld [vmem:[%s14245_s3 + $0x48] sm:$0xff]  }
 0x173   : > { %v2215_v5 = vrot.slane %v11882_v4, 1  ;;  %v11397_v4 = vld [vmem:[%s14245_s3 + $0x58] sm:$0xff]  }
 0x175   : > { %5032 = vrot.lane.b32.xlu0 %v5031_v7, %s11930_s15 }
 0x18f   : > { %v1308_v10 = vpop.permute.xlu0 %1307 }
 0x190   : > { %v1347_v11 = vsel %vm1341_vm1, %v1298_v9, %v1308_v10  ;;  %v11883_v9 = vld [vmem:[#allocation2 + $0x14] sm:$0x1f]  }
 0x191   : > { %1652 = vmatprep.mubr.bf16.mxu0 %v1347_v11  ;;  %v1762_v10 = vrot.slane %v11883_v9, 6  ;;  %v11359_v11 = vld [vmem:[%s14245_s3 + $0xb8] sm:$0xff]  }
 0x193   : > { %v1292_v14 = vpop.permute.xlu0 %1291 }
 0x194   : > { %v1343_v16 = vsel %vm1341_vm1, %v11876_v15, %v1292_v14  ;;  %v11361_v15 = vld [vmem:[%s14245_s3 + $0x50] sm:$0xff]  }
 0x195   : > { %1653 = vmatmul.mubr.bf16.vlgmr.msra.gmra.mrb[52].mxu0 %v1343_v16  ;;  %v11362_v16 = vld [vmem:[%s14245_s3 + $0xc0] sm:$0xff]  }
 0x196   : > { %10358 = vmatpush3.bf16.msra.mxu0 %v11320_v12 }
 0x197   : > { %v1340_v20 = vpop.permute.xlu1 %1339  ;;  %10359 = vmatprep.subr.bf16.mxu0 %v11321_v13  ;;  %v1756_v24 = vpop.permute.xlu0 %1755  ;;  %v11360_v13 = vld [vmem:[%s14245_s3 + $0x8] sm:$0xff]  }
 0x198   : > { %v1355_v25 = vsel %vm1341_vm1, %v1330_v18, %v1340_v20  ;;  %v1792_v29 = vsel %vm1341_vm1, %v1746_v22, %v1756_v24  ;;  %v11364_v18 = vld [vmem:[%s14245_s3 + $0x80] sm:$0xff]   ;;  %v2247_v22 = vrot.slane %v11884_v21, 3  ;;  %v11409_v21 = vld [vmem:[%s14245_s3 + $0x70] sm:$0xff]  }
 0x199   : > { %1693 = vmatprep.mubr.bf16.mxu1 %v1355_v25  ;;  %v1875_v31 = vrot.slane %v1792_v29, 2  ;;  %v11367_v25 = vld [vmem:[%s14245_s3 + $0x18] sm:$0xff]   ;;  %v11371_v29 = vld [vmem:[%s14245_s3 + $0x20] sm:$0xff]  }
 0x19a   : > { %10360 = vmatpush3.bf16.msra.mxu0 %v11322_v19  ;;  %v11365_v19 = vld [vmem:[%s14245_s3 + $0x58] sm:$0xff]  }
 0x19b   : > { %v1324_v33 = vpop.permute.xlu1 %1323  ;;  %10361 = vmatprep.subr.bf16.mxu0 %v11323_v23  ;;  %2106 = vmatprep.mubr.bf16.mxu0 %v1875_v31  ;;  %v11366_v23 = vld [vmem:[%s14245_s3 + $0xc8] sm:$0xff]  }
 0x19c   : > { %v1351_v34 = vsel %vm1341_vm1, %v1314_v53, %v1324_v33  ;;  %v11368_v53 = vld [vmem:[%s14245_s3 + $0x88] sm:$0xff]  }
 0x19d   : > { %1694 = vmatmul.mubr.bf16.vlgmr.msra.gmra.mrb[52].mxu1 %v1351_v34  ;;  %v11373_v31 = vld [vmem:[%s14245_s3 + $0x68] sm:$0xff]   ;;  %v11376_v34 = vld [vmem:[%s14245_s3 + $0x98] sm:$0xff]  }
 0x19e   : > { %10362 = vmatpush3.bf16.msra.mxu0 %v11325_v27  ;;  %10380 = vmatpush3.bf16.msra.mxu1 %v11326_v28  ;;  %v11369_v27 = vld [vmem:[%s14245_s3 + $0x60] sm:$0xff]   ;;  %v11370_v28 = vld [vmem:[%s14245_s3 + $0xd0] sm:$0xff]   ;;  %v11375_v33 = vld [vmem:[%s14245_s3 + $0x28] sm:$0xff]  }
 0x19f   : > { %10363 = vmatprep.subr.bf16.mxu0 %v11328_v30  ;;  %10381 = vmatprep.subr.bf16.mxu1 %v11329_v32  ;;  %v1740_v57 = vpop.permute.xlu1 %1739  ;;  %v11372_v30 = vld [vmem:[%s14245_s3 + $0x90] sm:$0xff]   ;;  %v11374_v32 = vld [vmem:[%s14245_s3 + $0xd8] sm:$0xff]  }
 0x1a0   : > { %v1787_v41 = vpop.permute.xlu0 %1786  ;;  %v1789_v61 = vsel %vm1341_vm1, %v11881_v60, %v1740_v57 }
 0x1a1   : > { %v1798_v42 = vsel %vm1341_vm1, %v1778_v40, %v1787_v41  ;;  %v1874_v3 = vrot.slane %v1789_v61, 2  ;;  %v11382_v40 = vld [vmem:[%s14245_s3 + $0xe8] sm:$0xff]   ;;  %v11383_v41 = vld [vmem:[%s14245_s3 + $0x38] sm:$0xff]   ;;  %v11393_v61 = vld [vmem:[%s14245_s3 + $0x50] sm:$0xff]  }
 0x1a2   : > { %10382 = vmatpush3.bf16.msra.mxu1 %v11330_v35  ;;  %10364 = vmatpush3.bf16.msra.mxu0 %v11332_v36  ;;  %v1877_v45 = vrot.slane %v1798_v42, 2  ;;  %v11377_v35 = vld [vmem:[%s14245_s3 + $0x70] sm:$0xff]   ;;  %v11378_v36 = vld [vmem:[%s14245_s3 + $0xe0] sm:$0xff]   ;;  %v11384_v42 = vld [vmem:[%s14245_s3 + $0xa8] sm:$0xff]  }
 0x1a3   : > { %10365 = vmatprep.subr.bf16.mxu0 %v11334_v37  ;;  %10383 = vmatprep.subr.bf16.mxu1 %v11335_v38  ;;  %v1772_v8 = vpop.permute.xlu1 %1771  ;;  %v11379_v37 = vld [vmem:[%s14245_s3 + $0x30] sm:$0xff]   ;;  %v11380_v38 = vld [vmem:[%s14245_s3 + $0xa0] sm:$0xff]  }
 0x1a4   : > { %2147 = vmatprep.mubr.bf16.mxu1 %v1877_v45  ;;  %v2225_v7 = vpop.permute.xlu0 %2224  ;;  %v1795_v14 = vsel %vm1341_vm1, %v1762_v10, %v1772_v8  ;;  %v11398_v8 = vld [vmem:[%s14245_s3 + $0xc8] sm:$0xff]  }
 0x1a5   : > { %v2263_v12 = vsel %vm1341_vm1, %v2215_v5, %v2225_v7  ;;  %v1876_v20 = vrot.slane %v1795_v14, 2  ;;  %v11888_v5 = vld [vmem:[#allocation2 + $0x1c] sm:$0x7c]   ;;  %v11402_v14 = vld [vmem:[%s14245_s3 + $0xd0] sm:$0xff]  }
 0x1a6   : > { %10384 = vmatpush3.bf16.msra.mxu1 %v11336_v43  ;;  %10366 = vmatpush3.bf16.msra.mxu0 %v11338_v44  ;;  %v11885_v43 = vld [vmem:[#allocation2 + $0x20] sm:$0xf8]  }
 0x1a7   : > { %10367 = vmatprep.subr.bf16.mxu0 %v11339_v46  ;;  %10385 = vmatprep.subr.bf16.mxu1 %v11340_v47  ;;  %v2670_v44 = vrot.slane %v11885_v43, 1  ;;  %v11385_v46 = vld [vmem:[%s14245_s3 + $0xf0] sm:$0xff]   ;;  %v11386_v47 = vld [vmem:[%s14245_s3 + $0x40] sm:$0xff]   ;;  %v11423_v43 = vld [vmem:[%s14245_s3 + $0xb8] sm:$0xff]  }
 0x1a8   : > { %v2257_v24 = vpop.permute.xlu0 %2256 }
 0x1a9   : > { %v2271_v26 = vsel %vm1341_vm1, %v2247_v22, %v2257_v24  ;;  %v11410_v22 = vld [vmem:[%s14245_s3 + $0xe0] sm:$0xff]  }
 0x1aa   : > { %10368 = vmatpush3.bf16.msra.mxu0 %v11341_v48  ;;  %10386 = vmatpush3.bf16.msra.mxu1 %v11342_v49  ;;  %v11387_v48 = vld [vmem:[%s14245_s3 + $0xb0] sm:$0xff]   ;;  %v11388_v49 = vld [vmem:[%s14245_s3] sm:$0xff]  }
 0x1ab   : > { %10369 = vmatprep.subr.bf16.mxu0 %v11343_v50  ;;  %10387 = vmatprep.subr.bf16.mxu1 %v11344_v51  ;;  %v2209_v50 = vpop.permute.xlu1 %2208  ;;  %v11389_v51 = vld [vmem:[%s14245_s3 + $0xf8] sm:$0xff]   ;;  %v11412_v24 = vld [vmem:[%s14245_s3 + $0xa0] sm:$0xff]  }
 0x1ac   : > { %v2680_v45 = vpop.permute.xlu0 %2679 }
 0x1ae   : > { %10388 = vmatpush3.bf16.msra.mxu1 %v11346_v52  ;;  %10370 = vmatpush3.bf16.msra.mxu0 %v11348_v54  ;;  %v2716_v52 = vsel %vm1341_vm1, %v2670_v44, %v2680_v45  ;;  %v11390_v54 = vld [vmem:[%s14245_s3 + $0x48] sm:$0xff]  }
 0x1af   : > { %10371 = vmatprep.subr.bf16.mxu0 %v11349_v55  ;;  %10389 = vmatprep.subr.bf16.mxu1 %v11350_v56  ;;  %v11886_v55 = vld [vmem:[#allocation2 + $0x14] sm:$0x1f]   ;;  %v2799_v57 = vrot.slane %v2716_v52, 2  ;;  %v11424_v44 = vld [vmem:[%s14245_s3 + $0x8] sm:$0xff]  }
 0x1b0   : > { %v2259_v56 = vsel %vm1341_vm1, %v11886_v55, %v2209_v50  ;;  %v11427_v50 = vld [vmem:[%s14245_s3 + $0x10] sm:$0xff]  }
 0x1b1   : > { %v11892_v55 = vld [vmem:[#allocation2 + $0x34] sm:$0xf8]  }
 0x1b2   : > { %10372 = vmatpush3.bf16.msra.mxu0 %v11351_v58  ;;  %10390 = vmatpush3.bf16.msra.mxu1 %v11352_v59  ;;  %v11391_v58 = vld [vmem:[%s14245_s3 + $0xb8] sm:$0xff]   ;;  %v11392_v59 = vld [vmem:[%s14245_s3 + $0x8] sm:$0xff]  }
 0x1b3   : > { %10391 = vmatprep.subr.bf16.mxu1 %v11353_v62  ;;  %10401 = vmatprep.subr.bf16.mxu0 %v11354_v63  ;;  %v11394_v62 = vld [vmem:[%s14245_s3 + $0xc0] sm:$0xff]   ;;  %v11887_v63 = vld [vmem:[#allocation2 + $0x2c] sm:$0x3e]  }
 0x1b5   : > { %2107 = vmatmul.mubr.bf16.vlgmr.msra.gmra.mrb[56].mxu0 %v1874_v3  ;;  %v2241_v3 = vpop.permute.xlu1 %2240 }
 0x1b6   : > { %10392 = vmatpush3.bf16.msra.mxu1 %v11355_v0  ;;  %10402 = vmatpush3.bf16.msra.mxu0 %v11356_v1  ;;  %v2711_v60 = vpop.permute.xlu0 %2710  ;;  %v2702_v0 = vrot.slane %v11887_v63, 7  ;;  %v11395_v1 = vld [vmem:[%s14245_s3 + $0x10] sm:$0xff]  }
 0x1b7   : > { %2568 = vmatprep.mubr.bf16.mxu0 %v2263_v12  ;;  %10393 = vmatprep.subr.bf16.mxu1 %v11357_v2  ;;  %v11396_v2 = vld [vmem:[%s14245_s3 + $0x80] sm:$0xff]   ;;  %v11400_v12 = vld [vmem:[%s14245_s3 + $0x88] sm:$0xff]   ;;  %v11434_v63 = vld [vmem:[%s14245_s3 + $0xd0] sm:$0xff]  }
 0x1b8   : > { %10403 = vmatprep.subr.bf16.mxu0 %v11358_v6  ;;  %v2231_v6 = vrot.slane %v11888_v5, 2  ;;  %v2722_v7 = vsel %vm1341_vm1, %v2702_v0, %v2711_v60  ;;  %v11431_v60 = vld [vmem:[%s14245_s3 + $0x18] sm:$0xff]   ;;  %v11435_v0 = vld [vmem:[%s14245_s3 + $0x20] sm:$0xff]  }
 0x1b9   : > { %v2801_v10 = vrot.slane %v2722_v7, 2  ;;  %v11438_v5 = vld [vmem:[%s14245_s3 + $0xd8] sm:$0xff]  }
 0x1ba   : > { %10394 = vmatpush3.bf16.msra.mxu1 %v11359_v11  ;;  %10404 = vmatpush3.bf16.msra.mxu0 %v11360_v13  ;;  %v2267_v9 = vsel %vm1341_vm1, %v2231_v6, %v2241_v3  ;;  %v11399_v11 = vld [vmem:[%s14245_s3 + $0x18] sm:$0xff]   ;;  %v11401_v13 = vld [vmem:[%s14245_s3 + $0x60] sm:$0xff]   ;;  %v11439_v6 = vld [vmem:[%s14245_s3 + $0x28] sm:$0xff]  }
 0x1bb   : > { %10405 = vmatprep.subr.bf16.mxu0 %v11361_v15  ;;  %10423 = vmatprep.subr.bf16.mxu1 %v11362_v16  ;;  %v11403_v15 = vld [vmem:[%s14245_s3 + $0x20] sm:$0xff]   ;;  %v11404_v16 = vld [vmem:[%s14245_s3 + $0x90] sm:$0xff]   ;;  %v11440_v7 = vld [vmem:[%s14245_s3 + $0x98] sm:$0xff]  }
 0x1bd   : > { %2148 = vmatmul.mubr.bf16.vlgmr.msra.gmra.mrb[56].mxu1 %v1876_v20  ;;  %v11408_v20 = vld [vmem:[%s14245_s3 + $0x98] sm:$0xff]  }
 0x1be   : > { %10406 = vmatpush3.bf16.msra.mxu0 %v11363_v17  ;;  %10424 = vmatpush3.bf16.msra.mxu1 %v11364_v18  ;;  %v11405_v17 = vld [vmem:[%s14245_s3 + $0x68] sm:$0xff]   ;;  %v11406_v18 = vld [vmem:[%s14245_s3 + $0xd8] sm:$0xff]  }
 0x1bf   : > { %2609 = vmatprep.mubr.bf16.mxu1 %v2271_v26  ;;  %10407 = vmatprep.subr.bf16.mxu0 %v11365_v19  ;;  %v11407_v19 = vld [vmem:[%s14245_s3 + $0x28] sm:$0xff]  }
 0x1c0   : > { %10425 = vmatprep.subr.bf16.mxu1 %v11366_v23  ;;  %v11411_v23 = vld [vmem:[%s14245_s3 + $0x30] sm:$0xff]   ;;  %v11414_v26 = vld [vmem:[%s14245_s3 + $0xe8] sm:$0xff]  }
 0x1c2   : > { %10408 = vmatpush3.bf16.msra.mxu0 %v11367_v25  ;;  %10426 = vmatpush3.bf16.msra.mxu1 %v11368_v53  ;;  %v11413_v25 = vld [vmem:[%s14245_s3 + $0x78] sm:$0xff]   ;;  %v2664_v53 = vpop.permute.xlu1 %2663 }
 0x1c3   : > { %10409 = vmatprep.subr.bf16.mxu0 %v11369_v27  ;;  %10427 = vmatprep.subr.bf16.mxu1 %v11370_v28  ;;  %v11889_v27 = vld [vmem:[#allocation2 + $0x1c] sm:$0x7c]  }
 0x1c4   : > { %v2713_v28 = vsel %vm1341_vm1, %v11889_v27, %v2664_v53 }
 0x1c6   : > { %10410 = vmatpush3.bf16.msra.mxu0 %v11371_v29  ;;  %10428 = vmatpush3.bf16.msra.mxu1 %v11372_v30  ;;  %v11415_v29 = vld [vmem:[%s14245_s3 + $0x38] sm:$0xff]   ;;  %v11416_v30 = vld [vmem:[%s14245_s3 + $0xa8] sm:$0xff]   ;;  %v2696_v45 = vpop.permute.xlu1 %2695 }
 0x1c7   : > { %10411 = vmatprep.subr.bf16.mxu0 %v11373_v31  ;;  %10429 = vmatprep.subr.bf16.mxu1 %v11374_v32  ;;  %v11417_v31 = vld [vmem:[%s14245_s3 + $0xf0] sm:$0xff]   ;;  %v11890_v32 = vld [vmem:[#allocation2 + $0x28] sm:$0x1f]  }
 0x1ca   : > { %10412 = vmatpush3.bf16.msra.mxu0 %v11375_v33  ;;  %10430 = vmatpush3.bf16.msra.mxu1 %v11376_v34  ;;  %v2686_v33 = vrot.slane %v11890_v32, 6  ;;  %v11418_v34 = vld [vmem:[%s14245_s3 + $0x40] sm:$0xff]  }
 0x1cb   : > { %10413 = vmatprep.subr.bf16.mxu0 %v11377_v35  ;;  %10431 = vmatprep.subr.bf16.mxu1 %v11378_v36  ;;  %v2798_v35 = vrot.slane %v2713_v28, 2  ;;  %v11419_v36 = vld [vmem:[%s14245_s3 + $0xb0] sm:$0xff]  }
 0x1cc   : > { %v11451_v28 = vld [vmem:[%s14245_s3 + $0xb0] sm:$0xff]  }
 0x1ce   : > { %10414 = vmatpush3.bf16.msra.mxu0 %v11379_v37  ;;  %10432 = vmatpush3.bf16.msra.mxu1 %v11380_v38  ;;  %v11420_v37 = vld [vmem:[%s14245_s3] sm:$0xff]   ;;  %v11891_v38 = vld [vmem:[#allocation2 + $0x2c] sm:$0x3e]  }
 0x1cf   : > { %10415 = vmatprep.subr.bf16.mxu0 %v11381_v39  ;;  %10433 = vmatprep.subr.bf16.mxu1 %v11382_v40  ;;  %v3141_v39 = vrot.slane %v11891_v38, 1  ;;  %v11421_v40 = vld [vmem:[%s14245_s3 + $0xf8] sm:$0xff]   ;;  %v11458_v38 = vld [vmem:[%s14245_s3 + $0xc0] sm:$0xff]  }
 0x1d2   : > { %10416 = vmatpush3.bf16.msra.mxu0 %v11383_v41  ;;  %10434 = vmatpush3.bf16.msra.mxu1 %v11384_v42  ;;  %v11422_v41 = vld [vmem:[%s14245_s3 + $0x48] sm:$0xff]   ;;  %v3151_v42 = vpop.permute.xlu0 %3150 }
 0x1d3   : > { %10435 = vmatprep.subr.bf16.mxu1 %v11385_v46  ;;  %10445 = vmatprep.subr.bf16.mxu0 %v11386_v47  ;;  %v11425_v46 = vld [vmem:[%s14245_s3 + $0x50] sm:$0xff]   ;;  %v11426_v47 = vld [vmem:[%s14245_s3 + $0xc0] sm:$0xff]  }
 0x1d5   : > { %2569 = vmatmul.mubr.bf16.vlgmr.msra.gmra.mrb[60].mxu0 %v2259_v56  ;;  %v3173_v56 = vrot.slane %v11892_v55, 3 }
 0x1d6   : > { %10436 = vmatpush3.bf16.msra.mxu1 %v11387_v48  ;;  %10446 = vmatpush3.bf16.msra.mxu0 %v11388_v49  ;;  %v3189_v48 = vsel %vm1341_vm1, %v3141_v39, %v3151_v42  ;;  %v2719_v49 = vsel %vm1341_vm1, %v2686_v33, %v2696_v45  ;;  %v11896_v33 = vld [vmem:[#allocation2 + $0x28] sm:$0x1f]   ;;  %v11459_v39 = vld [vmem:[%s14245_s3 + $0x10] sm:$0xff]   ;;  %v11461_v42 = vld [vmem:[%s14245_s3 + $0x58] sm:$0xff]  }
 0x1d7   : > { %3030 = vmatprep.mubr.bf16.mxu0 %v2799_v57  ;;  %10437 = vmatprep.subr.bf16.mxu1 %v11389_v51  ;;  %v11428_v51 = vld [vmem:[%s14245_s3 + $0x80] sm:$0xff]   ;;  %v2800_v52 = vrot.slane %v2719_v49, 2  ;;  %v11429_v57 = vld [vmem:[%s14245_s3 + $0x58] sm:$0xff]  }
 0x1d8   : > { %10447 = vmatprep.subr.bf16.mxu0 %v11390_v54  ;;  %v3183_v54 = vpop.permute.xlu0 %3182  ;;  %v11463_v45 = vld [vmem:[%s14245_s3 + $0x18] sm:$0xff]  }
 0x1da   : > { %10438 = vmatpush3.bf16.msra.mxu1 %v11391_v58  ;;  %10448 = vmatpush3.bf16.msra.mxu0 %v11392_v59  ;;  %v11430_v58 = vld [vmem:[%s14245_s3 + $0xc8] sm:$0xff]   ;;  %v3197_v59 = vsel %vm1341_vm1, %v3173_v56, %v3183_v54  ;;  %v11467_v56 = vld [vmem:[%s14245_s3 + $0x20] sm:$0xff]  }
 0x1db   : > { %10449 = vmatprep.subr.bf16.mxu0 %v11393_v61  ;;  %10467 = vmatprep.subr.bf16.mxu1 %v11394_v62  ;;  %v11432_v61 = vld [vmem:[%s14245_s3 + $0x88] sm:$0xff]   ;;  %v11433_v62 = vld [vmem:[%s14245_s3 + $0x60] sm:$0xff]  }
 0x1dd   : > { %2610 = vmatmul.mubr.bf16.vlgmr.msra.gmra.mrb[60].mxu1 %v2267_v9  ;;  %v11894_v9 = vld [vmem:[#allocation2 + $0x40] sm:$0x3e]  }
 0x1de   : > { %10450 = vmatpush3.bf16.msra.mxu0 %v11395_v1  ;;  %10468 = vmatpush3.bf16.msra.mxu1 %v11396_v2  ;;  %v11436_v1 = vld [vmem:[%s14245_s3 + $0x90] sm:$0xff]  }
 0x1df   : > { %3071 = vmatprep.mubr.bf16.mxu1 %v2801_v10  ;;  %10451 = vmatprep.subr.bf16.mxu0 %v11397_v4  ;;  %v11893_v2 = vld [vmem:[#allocation2 + $0x34] sm:$0xf8]   ;;  %v11437_v4 = vld [vmem:[%s14245_s3 + $0x68] sm:$0xff]   ;;  %v3628_v10 = vrot.slane %v11894_v9, 7  ;;  %v11476_v9 = vld [vmem:[%s14245_s3 + $0xa0] sm:$0xff]  }
 0x1e0   : > { %10469 = vmatprep.subr.bf16.mxu1 %v11398_v8  ;;  %v3596_v3 = vrot.slane %v11893_v2, 1  ;;  %v11441_v8 = vld [vmem:[%s14245_s3 + $0x70] sm:$0xff]  }
 0x1e2   : > { %10452 = vmatpush3.bf16.msra.mxu0 %v11399_v11  ;;  %10470 = vmatpush3.bf16.msra.mxu1 %v11400_v12  ;;  %v11442_v11 = vld [vmem:[%s14245_s3 + $0xe0] sm:$0xff]   ;;  %v3606_v12 = vpop.permute.xlu0 %3605 }
 0x1e3   : > { %10453 = vmatprep.subr.bf16.mxu0 %v11401_v13  ;;  %10471 = vmatprep.subr.bf16.mxu1 %v11402_v14  ;;  %v11443_v13 = vld [vmem:[%s14245_s3 + $0x30] sm:$0xff]   ;;  %v11444_v14 = vld [vmem:[%s14245_s3 + $0xa0] sm:$0xff]  }
 0x1e6   : > { %10454 = vmatpush3.bf16.msra.mxu0 %v11403_v15  ;;  %10472 = vmatpush3.bf16.msra.mxu1 %v11404_v16  ;;  %v11445_v15 = vld [vmem:[%s14245_s3 + $0x78] sm:$0xff]   ;;  %v11446_v16 = vld [vmem:[%s14245_s3 + $0xe8] sm:$0xff]  }
 0x1e7   : > { %10455 = vmatprep.subr.bf16.mxu0 %v11405_v17  ;;  %10473 = vmatprep.subr.bf16.mxu1 %v11406_v18  ;;  %v3637_v17 = vpop.permute.xlu0 %3636  ;;  %v3642_v18 = vsel %vm1341_vm1, %v3596_v3, %v3606_v12  ;;  %v11479_v12 = vld [vmem:[%s14245_s3 + $0x38] sm:$0xff]  }
 0x1e8   : > { %v3725_v53 = vrot.slane %v3642_v18, 2  ;;  %v11484_v18 = vld [vmem:[%s14245_s3] sm:$0xff]  }
 0x1ea   : > { %10456 = vmatpush3.bf16.msra.mxu0 %v11407_v19  ;;  %10474 = vmatpush3.bf16.msra.mxu1 %v11408_v20  ;;  %v3648_v19 = vsel %vm1341_vm1, %v3628_v10, %v3637_v17  ;;  %v3135_v20 = vpop.permute.xlu1 %3134  ;;  %v11477_v10 = vld [vmem:[%s14245_s3 + $0x78] sm:$0xff]   ;;  %v11483_v17 = vld [vmem:[%s14245_s3 + $0xb0] sm:$0xff]  }
 0x1eb   : > { %10457 = vmatprep.subr.bf16.mxu0 %v11409_v21  ;;  %10475 = vmatprep.subr.bf16.mxu1 %v11410_v22  ;;  %v11447_v21 = vld [vmem:[%s14245_s3 + $0x38] sm:$0xff]   ;;  %v11895_v22 = vld [vmem:[#allocation2 + $0x30] sm:$0x7c]   ;;  %v3727_v27 = vrot.slane %v3648_v19, 2 }
 0x1ec   : > { %v11485_v19 = vld [vmem:[%s14245_s3 + $0xf8] sm:$0xff]  }
 0x1ee   : > { %10458 = vmatpush3.bf16.msra.mxu0 %v11411_v23  ;;  %10476 = vmatpush3.bf16.msra.mxu1 %v11412_v24  ;;  %v3157_v23 = vrot.slane %v11895_v22, 2  ;;  %v11448_v24 = vld [vmem:[%s14245_s3 + $0xa8] sm:$0xff]   ;;  %v3167_v32 = vpop.permute.xlu1 %3166  ;;  %v11487_v22 = vld [vmem:[%s14245_s3 + $0xb8] sm:$0xff]  }
 0x1ef   : > { %10459 = vmatprep.subr.bf16.mxu0 %v11413_v25  ;;  %10477 = vmatprep.subr.bf16.mxu1 %v11414_v26  ;;  %v11449_v25 = vld [vmem:[%s14245_s3 + $0xf0] sm:$0xff]   ;;  %v11450_v26 = vld [vmem:[%s14245_s3 + $0x40] sm:$0xff]  }
 0x1f2   : > { %10460 = vmatpush3.bf16.msra.mxu0 %v11415_v29  ;;  %10478 = vmatpush3.bf16.msra.mxu1 %v11416_v30  ;;  %v11452_v29 = vld [vmem:[%s14245_s3] sm:$0xff]   ;;  %v11453_v30 = vld [vmem:[%s14245_s3 + $0xf8] sm:$0xff]  }
 0x1f3   : > { %10479 = vmatprep.subr.bf16.mxu1 %v11417_v31  ;;  %10489 = vmatprep.subr.bf16.mxu0 %v11418_v34  ;;  %v11454_v31 = vld [vmem:[%s14245_s3 + $0x48] sm:$0xff]   ;;  %v3185_v34 = vsel %vm1341_vm1, %v11896_v33, %v3135_v20 }
 0x1f4   : > { %v11486_v20 = vld [vmem:[%s14245_s3 + $0x48] sm:$0xff]  }
 0x1f5   : > { %3031 = vmatmul.mubr.bf16.vlgmr.msra.gmra.mrb[64].mxu0 %v2798_v35  ;;  %v11455_v35 = vld [vmem:[%s14245_s3 + $0xb8] sm:$0xff]  }
 0x1f6   : > { %10480 = vmatpush3.bf16.msra.mxu1 %v11419_v36  ;;  %10490 = vmatpush3.bf16.msra.mxu0 %v11420_v37  ;;  %v11456_v36 = vld [vmem:[%s14245_s3 + $0x8] sm:$0xff]   ;;  %v11457_v37 = vld [vmem:[%s14245_s3 + $0x50] sm:$0xff]  }
 0x1f7   : > { %3494 = vmatprep.mubr.bf16.mxu0 %v3189_v48  ;;  %10481 = vmatprep.subr.bf16.mxu1 %v11421_v40  ;;  %v11460_v40 = vld [vmem:[%s14245_s3 + $0x80] sm:$0xff]  }
 0x1f8   : > { %10491 = vmatprep.subr.bf16.mxu0 %v11422_v41  ;;  %v3590_v41 = vpop.permute.xlu1 %3589  ;;  %v11897_v48 = vld [vmem:[#allocation2 + $0x3c] sm:$0x1f]  }
 0x1f9   : > { %v3612_v49 = vrot.slane %v11897_v48, 6  ;;  %v11505_v48 = vld [vmem:[%s14245_s3 + $0x70] sm:$0xff]  }
 0x1fa   : > { %10482 = vmatpush3.bf16.msra.mxu1 %v11423_v43  ;;  %10492 = vmatpush3.bf16.msra.mxu0 %v11424_v44  ;;  %v11462_v43 = vld [vmem:[%s14245_s3 + $0xc8] sm:$0xff]   ;;  %v3193_v44 = vsel %vm1341_vm1, %v3157_v23, %v3167_v32 }
 0x1fb   : > { %10493 = vmatprep.subr.bf16.mxu0 %v11425_v46  ;;  %10511 = vmatprep.subr.bf16.mxu1 %v11426_v47  ;;  %v11464_v46 = vld [vmem:[%s14245_s3 + $0x88] sm:$0xff]  }
 0x1fc   : > { %v3622_v47 = vpop.permute.xlu1 %3621  ;;  %v11488_v23 = vld [vmem:[%s14245_s3 + $0x8] sm:$0xff]  }
 0x1fd   : > { %3072 = vmatmul.mubr.bf16.vlgmr.msra.gmra.mrb[64].mxu1 %v2800_v52  ;;  %v11898_v52 = vld [vmem:[#allocation2 + $0x30] sm:$0x7c]   ;;  %v12779_v55 = vsel %vm1341_vm1, %v3612_v49, %v3622_v47  ;;  %v12878_v32 = vld [vmem:[#allocation2 + $0x44] sm:$0x7c]   ;;  %v11504_v47 = vld [vmem:[%s14245_s3 + $0x98] sm:$0xff]  }
 0x1fe   : > { %10494 = vmatpush3.bf16.msra.mxu0 %v11427_v50  ;;  %10512 = vmatpush3.bf16.msra.mxu1 %v11428_v51  ;;  %v11465_v50 = vld [vmem:[%s14245_s3 + $0x60] sm:$0xff]   ;;  %v11466_v51 = vld [vmem:[%s14245_s3 + $0xd0] sm:$0xff]   ;;  %v3639_v54 = vsel %vm1341_vm1, %v11898_v52, %v3590_v41  ;;  %v3726_v3 = vrot.slane %v12779_v55, 2  ;;  %v4083_v33 = vrot.slane %v12878_v32, 2  ;;  %v11509_v52 = vld [vmem:[%s14245_s3 + $0x78] sm:$0xff]  }
 0x1ff   : > { %3535 = vmatprep.mubr.bf16.mxu1 %v3197_v59  ;;  %10495 = vmatprep.subr.bf16.mxu0 %v11429_v57  ;;  %v12784_v57 = vld [vmem:[#allocation2 + $0x48] sm:$0xf8]   ;;  %v11468_v59 = vld [vmem:[%s14245_s3 + $0x90] sm:$0xff]   ;;  %v3724_v2 = vrot.slane %v3639_v54, 2  ;;  %v11506_v49 = vld [vmem:[%s14245_s3 + $0xe0] sm:$0xff]  }
 0x200   : > { %10513 = vmatprep.subr.bf16.mxu1 %v11430_v58  ;;  %v4521_v58 = vrot.slane %v12784_v57, 1  ;;  %v11498_v41 = vld [vmem:[%s14245_s3 + $0xd0] sm:$0xff]   ;;  %v11510_v54 = vld [vmem:[%s14245_s3 + $0xe8] sm:$0xff]   ;;  %v11511_v55 = vld [vmem:[%s14245_s3 + $0x38] sm:$0xff]  }
 0x201   : > { %v11513_v57 = vld [vmem:[%s14245_s3 + $0xf0] sm:$0xff]  }
 0x202   : > { %10496 = vmatpush3.bf16.msra.mxu0 %v11431_v60  ;;  %10514 = vmatpush3.bf16.msra.mxu1 %v11432_v61  ;;  %v11469_v60 = vld [vmem:[%s14245_s3 + $0x68] sm:$0xff]   ;;  %v11470_v61 = vld [vmem:[%s14245_s3 + $0xd8] sm:$0xff]  }
 0x203   : > { %10497 = vmatprep.subr.bf16.mxu0 %v11433_v62  ;;  %10515 = vmatprep.subr.bf16.mxu1 %v11434_v63  ;;  %v11900_v62 = vld [vmem:[#allocation2 + $0x40] sm:$0x3e]  }
 0x204   : > { %v4067_v63 = vrot.slane %v11900_v62, 1  ;;  %v11517_v62 = vld [vmem:[%s14245_s3 + $0xf8] sm:$0xff]  }
 0x206   : > { %10498 = vmatpush3.bf16.msra.mxu0 %v11435_v0  ;;  %10516 = vmatpush3.bf16.msra.mxu1 %v11436_v1  ;;  %v12796_v0 = vld [vmem:[#allocation2 + $0x48] sm:$0xf8]  }
 0x207   : > { %10499 = vmatprep.subr.bf16.mxu0 %v11437_v4  ;;  %10517 = vmatprep.subr.bf16.mxu1 %v11438_v5  ;;  %v4099_v1 = vrot.slane %v12796_v0, 3  ;;  %v11471_v4 = vld [vmem:[%s14245_s3 + $0x28] sm:$0xff]   ;;  %v11472_v5 = vld [vmem:[%s14245_s3 + $0x98] sm:$0xff]  }
 0x208   : > { %v11904_v0 = vld [vmem:[#allocation2 + $0x3c] sm:$0x1f]  }
 0x20a   : > { %10500 = vmatpush3.bf16.msra.mxu0 %v11439_v6  ;;  %10518 = vmatpush3.bf16.msra.mxu1 %v11440_v7  ;;  %v11473_v6 = vld [vmem:[%s14245_s3 + $0x70] sm:$0xff]   ;;  %v11474_v7 = vld [vmem:[%s14245_s3 + $0xe0] sm:$0xff]  }
 0x20b   : > { %10501 = vmatprep.subr.bf16.mxu0 %v11441_v8  ;;  %10519 = vmatprep.subr.bf16.mxu1 %v11442_v11  ;;  %v11475_v8 = vld [vmem:[%s14245_s3 + $0x30] sm:$0xff]   ;;  %v11478_v11 = vld [vmem:[%s14245_s3 + $0xe8] sm:$0xff]  }
 0x20e   : > { %10502 = vmatpush3.bf16.msra.mxu0 %v11443_v13  ;;  %10520 = vmatpush3.bf16.msra.mxu1 %v11444_v14  ;;  %v11480_v13 = vld [vmem:[%s14245_s3 + $0xa8] sm:$0xff]   ;;  %v11481_v14 = vld [vmem:[%s14245_s3 + $0xf0] sm:$0xff]  }
 0x20f   : > { %10503 = vmatprep.subr.bf16.mxu0 %v11445_v15  ;;  %10521 = vmatprep.subr.bf16.mxu1 %v11446_v16  ;;  %v11482_v15 = vld [vmem:[%s14245_s3 + $0x40] sm:$0xff]   ;;  %v4077_v16 = vpop.permute.xlu0 %4076 }
 0x212   : > { %10504 = vmatpush3.bf16.msra.mxu0 %v11447_v21  ;;  %10522 = vmatpush3.bf16.msra.mxu1 %v11448_v24  ;;  %v11489_v24 = vld [vmem:[%s14245_s3 + $0x50] sm:$0xff]  }
 0x213   : > { %10523 = vmatprep.subr.bf16.mxu1 %v11449_v25  ;;  %10533 = vmatprep.subr.bf16.mxu0 %v11450_v26  ;;  %v4109_v21 = vpop.permute.xlu0 %4108  ;;  %v11490_v25 = vld [vmem:[%s14245_s3 + $0xc0] sm:$0xff]   ;;  %v4115_v26 = vsel %vm1341_vm1, %v4067_v63, %v4077_v16  ;;  %v11518_v63 = vld [vmem:[%s14245_s3 + $0x48] sm:$0xff]  }
 0x214   : > { %v11528_v16 = vld [vmem:[%s14245_s3 + $0x88] sm:$0xff]  }
 0x215   : > { %3495 = vmatmul.mubr.bf16.vlgmr.msra.gmra.mrb[68].mxu0 %v3185_v34  ;;  %v12881_v34 = vld [vmem:[#allocation2 + $0x54] sm:$0x3e]  }
 0x216   : > { %10524 = vmatpush3.bf16.msra.mxu1 %v11451_v28  ;;  %10534 = vmatpush3.bf16.msra.mxu0 %v11452_v29  ;;  %v11493_v29 = vld [vmem:[%s14245_s3 + $0x58] sm:$0xff]  }
 0x217   : > { %3956 = vmatprep.mubr.bf16.mxu0 %v3725_v53  ;;  %10525 = vmatprep.subr.bf16.mxu1 %v11453_v30  ;;  %v11491_v53 = vld [vmem:[%s14245_s3 + $0x10] sm:$0xff]   ;;  %v4531_v28 = vpop.permute.xlu0 %4530 }
 0x218   : > { %10535 = vmatprep.subr.bf16.mxu0 %v11454_v31  ;;  %v12873_v30 = vsel %vm1341_vm1, %v4521_v58, %v4531_v28  ;;  %v11494_v31 = vld [vmem:[%s14245_s3 + $0xc8] sm:$0xff]   ;;  %v11514_v58 = vld [vmem:[%s14245_s3 + $0x40] sm:$0xff]  }
 0x21a   : > { %10526 = vmatpush3.bf16.msra.mxu1 %v11455_v35  ;;  %10536 = vmatpush3.bf16.msra.mxu0 %v11456_v36  ;;  %v4553_v35 = vrot.slane %v12881_v34, 7  ;;  %v4123_v36 = vsel %vm1341_vm1, %v4099_v1, %v4109_v21  ;;  %v11533_v21 = vld [vmem:[%s14245_s3 + $0x68] sm:$0xff]  }
 0x21b   : > { %10537 = vmatprep.subr.bf16.mxu0 %v11457_v37  ;;  %10555 = vmatprep.subr.bf16.mxu1 %v11458_v38  ;;  %v11495_v37 = vld [vmem:[%s14245_s3 + $0x18] sm:$0xff]   ;;  %v11496_v38 = vld [vmem:[%s14245_s3 + $0x88] sm:$0xff]  }
 0x21c   : > { %v11542_v34 = vld [vmem:[%s14245_s3 + $0xe8] sm:$0xff]  }
 0x21d   : > { %3536 = vmatmul.mubr.bf16.vlgmr.msra.gmra.mrb[68].mxu1 %v3193_v44  ;;  %v11501_v44 = vld [vmem:[%s14245_s3 + $0x68] sm:$0xff]  }
 0x21e   : > { %10538 = vmatpush3.bf16.msra.mxu0 %v11459_v39  ;;  %10556 = vmatpush3.bf16.msra.mxu1 %v11460_v40  ;;  %v11497_v39 = vld [vmem:[%s14245_s3 + $0x60] sm:$0xff]   ;;  %v4650_v40 = vrot.slane %v12873_v30, 2  ;;  %v11539_v30 = vld [vmem:[%s14245_s3 + $0x30] sm:$0xff]  }
 0x21f   : > { %3997 = vmatprep.mubr.bf16.mxu1 %v3727_v27  ;;  %10539 = vmatprep.subr.bf16.mxu0 %v11461_v42  ;;  %v11492_v27 = vld [vmem:[%s14245_s3 + $0x80] sm:$0xff]  }
 0x220   : > { %10557 = vmatprep.subr.bf16.mxu1 %v11462_v43  ;;  %v11499_v42 = vld [vmem:[%s14245_s3 + $0x20] sm:$0xff]   ;;  %v11500_v43 = vld [vmem:[%s14245_s3 + $0x90] sm:$0xff]  }
 0x222   : > { %10540 = vmatpush3.bf16.msra.mxu0 %v11463_v45  ;;  %10558 = vmatpush3.bf16.msra.mxu1 %v11464_v46  ;;  %v11502_v45 = vld [vmem:[%s14245_s3 + $0xd8] sm:$0xff]   ;;  %v11503_v46 = vld [vmem:[%s14245_s3 + $0x28] sm:$0xff]  }
 0x223   : > { %10541 = vmatprep.subr.bf16.mxu0 %v11465_v50  ;;  %10559 = vmatprep.subr.bf16.mxu1 %v11466_v51  ;;  %v11507_v50 = vld [vmem:[%s14245_s3 + $0x30] sm:$0xff]   ;;  %v11508_v51 = vld [vmem:[%s14245_s3 + $0xa0] sm:$0xff]  }
 0x226   : > { %10542 = vmatpush3.bf16.msra.mxu0 %v11467_v56  ;;  %10560 = vmatpush3.bf16.msra.mxu1 %v11468_v59  ;;  %v11512_v56 = vld [vmem:[%s14245_s3 + $0xa8] sm:$0xff]   ;;  %v11515_v59 = vld [vmem:[%s14245_s3 + $0xb0] sm:$0xff]  }
 0x227   : > { %10543 = vmatprep.subr.bf16.mxu0 %v11469_v60  ;;  %10561 = vmatprep.subr.bf16.mxu1 %v11470_v61  ;;  %v11516_v60 = vld [vmem:[%s14245_s3] sm:$0xff]   ;;  %v4061_v61 = vpop.permute.xlu1 %4060 }
 0x228   : > { %v4111_v1 = vsel %vm1341_vm1, %v11904_v0, %v4061_v61 }
 0x22a   : > { %10544 = vmatpush3.bf16.msra.mxu0 %v11471_v4  ;;  %10562 = vmatpush3.bf16.msra.mxu1 %v11472_v5  ;;  %v11521_v4 = vld [vmem:[%s14245_s3 + $0x50] sm:$0xff]   ;;  %v11522_v5 = vld [vmem:[%s14245_s3 + $0xc0] sm:$0xff]  }
 0x22b   : > { %10545 = vmatprep.subr.bf16.mxu0 %v11473_v6  ;;  %10563 = vmatprep.subr.bf16.mxu1 %v11474_v7  ;;  %v11523_v6 = vld [vmem:[%s14245_s3 + $0x10] sm:$0xff]   ;;  %v11524_v7 = vld [vmem:[%s14245_s3 + $0x80] sm:$0xff]  }
 0x22e   : > { %10546 = vmatpush3.bf16.msra.mxu0 %v11475_v8  ;;  %10564 = vmatpush3.bf16.msra.mxu1 %v11476_v9  ;;  %v4093_v8 = vpop.permute.xlu1 %4092  ;;  %v4562_v9 = vpop.permute.xlu0 %4561 }
 0x22f   : > { %10547 = vmatprep.subr.bf16.mxu0 %v11477_v10  ;;  %10565 = vmatprep.subr.bf16.mxu1 %v11478_v11  ;;  %v11525_v10 = vld [vmem:[%s14245_s3 + $0x58] sm:$0xff]   ;;  %v4573_v11 = vsel %vm1341_vm1, %v4553_v35, %v4562_v9 }
 0x232   : > { %10548 = vmatpush3.bf16.msra.mxu0 %v11479_v12  ;;  %10566 = vmatpush3.bf16.msra.mxu1 %v11480_v13  ;;  %v11526_v12 = vld [vmem:[%s14245_s3 + $0xc8] sm:$0xff]   ;;  %v4119_v13 = vsel %vm1341_vm1, %v4083_v33, %v4093_v8  ;;  %v11541_v33 = vld [vmem:[%s14245_s3 + $0x78] sm:$0xff]  }
 0x233   : > { %10567 = vmatprep.subr.bf16.mxu1 %v11481_v14  ;;  %10577 = vmatprep.subr.bf16.mxu0 %v11482_v15  ;;  %v4652_v14 = vrot.slane %v4573_v11, 2  ;;  %v11527_v15 = vld [vmem:[%s14245_s3 + $0x18] sm:$0xff]  }
 0x235   : > { %3957 = vmatmul.mubr.bf16.vlgmr.msra.gmra.mrb[72].mxu0 %v3724_v2  ;;  %v11519_v2 = vld [vmem:[%s14245_s3 + $0xb8] sm:$0xff]  }
 0x236   : > { %10568 = vmatpush3.bf16.msra.mxu1 %v11483_v17  ;;  %10578 = vmatpush3.bf16.msra.mxu0 %v11484_v18  ;;  %v11529_v17 = vld [vmem:[%s14245_s3 + $0x60] sm:$0xff]   ;;  %v11530_v18 = vld [vmem:[%s14245_s3 + $0xd0] sm:$0xff]  }
 0x237   : > { %4420 = vmatprep.mubr.bf16.mxu0 %v4115_v26  ;;  %10569 = vmatprep.subr.bf16.mxu1 %v11485_v19  ;;  %v11531_v19 = vld [vmem:[%s14245_s3 + $0x20] sm:$0xff]  }
 0x238   : > { %10579 = vmatprep.subr.bf16.mxu0 %v11486_v20  ;;  %v11532_v20 = vld [vmem:[%s14245_s3 + $0x90] sm:$0xff]   ;;  %v11538_v26 = vld [vmem:[%s14245_s3 + $0xe0] sm:$0xff]  }
 0x23a   : > { %10570 = vmatpush3.bf16.msra.mxu1 %v11487_v22  ;;  %10580 = vmatpush3.bf16.msra.mxu0 %v11488_v23  ;;  %v11534_v22 = vld [vmem:[%s14245_s3 + $0xd8] sm:$0xff]   ;;  %v11535_v23 = vld [vmem:[%s14245_s3 + $0x28] sm:$0xff]  }
 0x23b   : > { %10581 = vmatprep.subr.bf16.mxu0 %v11489_v24  ;;  %10599 = vmatprep.subr.bf16.mxu1 %v11490_v25  ;;  %v11536_v24 = vld [vmem:[%s14245_s3 + $0x98] sm:$0xff]   ;;  %v11537_v25 = vld [vmem:[%s14245_s3 + $0x70] sm:$0xff]  }
 0x23d   : > { %3998 = vmatmul.mubr.bf16.vlgmr.msra.gmra.mrb[72].mxu1 %v3726_v3  ;;  %v11520_v3 = vld [vmem:[%s14245_s3 + $0x8] sm:$0xff]  }
 0x23e   : > { %10582 = vmatpush3.bf16.msra.mxu0 %v11491_v53  ;;  %10600 = vmatpush3.bf16.msra.mxu1 %v11492_v27 }
 0x23f   : > { %4461 = vmatprep.mubr.bf16.mxu1 %v4123_v36  ;;  %10583 = vmatprep.subr.bf16.mxu0 %v11493_v29  ;;  %v4515_v36 = vpop.permute.xlu1 %4514 }
 0x240   : > { %10601 = vmatprep.subr.bf16.mxu1 %v11494_v31  ;;  %v11540_v31 = vld [vmem:[%s14245_s3 + $0xa0] sm:$0xff]  }
 0x242   : > { %10584 = vmatpush3.bf16.msra.mxu0 %v11495_v37  ;;  %10602 = vmatpush3.bf16.msra.mxu1 %v11496_v38  ;;  %v11543_v37 = vld [vmem:[%s14245_s3 + $0x38] sm:$0xff]   ;;  %v11544_v38 = vld [vmem:[%s14245_s3 + $0xa8] sm:$0xff]  }
 0x243   : > { %10585 = vmatprep.subr.bf16.mxu0 %v11497_v39  ;;  %10603 = vmatprep.subr.bf16.mxu1 %v11498_v41  ;;  %v13048_v39 = vld [vmem:[%s14246_s4] ss:$0 sm:$0xff] }
 0x244   : > { %v11546_v41 = vld [vmem:[%s14245_s3 + $0x40] sm:$0xff]  }
 0x246   : > { %10586 = vmatpush3.bf16.msra.mxu0 %v11499_v42  ;;  %10604 = vmatpush3.bf16.msra.mxu1 %v11500_v43  ;;  %v11905_v42 = vld [vmem:[#allocation2 + $0x44] sm:$0x7c]  }
 0x247   : > { %10587 = vmatprep.subr.bf16.mxu0 %v11501_v44  ;;  %10605 = vmatprep.subr.bf16.mxu1 %v11502_v45  ;;  %v4564_v43 = vsel %vm1341_vm1, %v11905_v42, %v4515_v36  ;;  %v11571_v42 = vld [vmem:[%s14245_s3 + $0xe0] sm:$0xff]  }
 0x24a   : > { %10588 = vmatpush3.bf16.msra.mxu0 %v11503_v46  ;;  %10606 = vmatpush3.bf16.msra.mxu1 %v11504_v47  ;;  %v11906_v46 = vld [vmem:[#allocation2 + $0x54] sm:$0x3e]  }
 0x24b   : > { %10589 = vmatprep.subr.bf16.mxu0 %v11505_v48  ;;  %10607 = vmatprep.subr.bf16.mxu1 %v11506_v49  ;;  %v4991_v47 = vrot.slane %v11906_v46, 1  ;;  %v5001_v48 = vpop.permute.xlu0 %5000  ;;  %v11572_v46 = vld [vmem:[%s14245_s3 + $0x30] sm:$0xff]  }
 0x24d   : > { %v5039_v0 = vsel %vm1341_vm1, %v4991_v47, %v5001_v48  ;;  %v11573_v47 = vld [vmem:[%s14245_s3 + $0xa0] sm:$0xff]  }
 0x24e   : > { %10590 = vmatpush3.bf16.msra.mxu0 %v11507_v50  ;;  %10608 = vmatpush3.bf16.msra.mxu1 %v11508_v51 }
 0x24f   : > { %10591 = vmatprep.subr.bf16.mxu0 %v11509_v52  ;;  %10609 = vmatprep.subr.bf16.mxu1 %v11510_v54  ;;  %v11547_v52 = vld [vmem:[%s14245_s3 + $0xb0] sm:$0xff]   ;;  %v11548_v54 = vld [vmem:[%s14245_s3] sm:$0xff]  }
 0x252   : > { %10592 = vmatpush3.bf16.msra.mxu0 %v11511_v55  ;;  %10610 = vmatpush3.bf16.msra.mxu1 %v11512_v56  ;;  %v4649_v55 = vrot.slane %v4564_v43, 2 }
 0x253   : > { %10611 = vmatprep.subr.bf16.mxu1 %v11513_v57  ;;  %10621 = vmatprep.subr.bf16.mxu0 %v11514_v58  ;;  %v11549_v57 = vld [vmem:[%s14245_s3 + $0xf8] sm:$0xff]   ;;  %v11907_v58 = vld [vmem:[#allocation2 + $0x50] sm:$0x1f]  }
 0x255   : > { %4421 = vmatmul.mubr.bf16.vlgmr.msra.gmra.mrb[76].mxu0 %v4111_v1 }
 0x256   : > { %10612 = vmatpush3.bf16.msra.mxu1 %v11515_v59  ;;  %10622 = vmatpush3.bf16.msra.mxu0 %v11516_v60  ;;  %v4537_v59 = vrot.slane %v11907_v58, 6 }
 0x257   : > { %4881 = vmatprep.mubr.bf16.mxu0 %v4650_v40  ;;  %10613 = vmatprep.subr.bf16.mxu1 %v11517_v62  ;;  %v11545_v40 = vld [vmem:[%s14245_s3 + $0xf0] sm:$0xff]  }
 0x258   : > { %10623 = vmatprep.subr.bf16.mxu0 %v11518_v63  ;;  %v11550_v63 = vld [vmem:[%s14245_s3 + $0x48] sm:$0xff]  }
 0x25a   : > { %10614 = vmatpush3.bf16.msra.mxu1 %v11519_v2  ;;  %10624 = vmatpush3.bf16.msra.mxu0 %v11520_v3  ;;  %v11551_v3 = vld [vmem:[%s14245_s3 + $0xb8] sm:$0xff]  }
 0x25b   : > { %10625 = vmatprep.subr.bf16.mxu0 %v11521_v4  ;;  %10643 = vmatprep.subr.bf16.mxu1 %v11522_v5  ;;  %v11552_v4 = vld [vmem:[%s14245_s3 + $0x8] sm:$0xff]   ;;  %v4547_v5 = vpop.permute.xlu1 %4546 }
 0x25c   : > { %v4570_v8 = vsel %vm1341_vm1, %v4537_v59, %v4547_v5 }
 0x25d   : > { %4462 = vmatmul.mubr.bf16.vlgmr.msra.gmra.mrb[76].mxu1 %v4119_v13 }
 0x25e   : > { %10626 = vmatpush3.bf16.msra.mxu0 %v11523_v6  ;;  %10644 = vmatpush3.bf16.msra.mxu1 %v11524_v7  ;;  %v11553_v6 = vld [vmem:[%s14245_s3 + $0x50] sm:$0xff]   ;;  %v11554_v7 = vld [vmem:[%s14245_s3 + $0xc0] sm:$0xff]  }
 0x25f   : > { %4922 = vmatprep.mubr.bf16.mxu1 %v4652_v14  ;;  %10627 = vmatprep.subr.bf16.mxu0 %v11525_v10  ;;  %v11555_v14 = vld [vmem:[%s14245_s3 + $0x10] sm:$0xff]   ;;  %v4985_v58 = vpop.permute.xlu1 %4984 }
 0x260   : > { %10645 = vmatprep.subr.bf16.mxu1 %v11526_v12  ;;  %v1716_v12 = vld [vmem:[#allocation3 + $0x4] sm:$0x1] }
 0x262   : > { %10628 = vmatpush3.bf16.msra.mxu0 %v11527_v15  ;;  %10646 = vmatpush3.bf16.msra.mxu1 %v11528_v16  ;;  %v11556_v15 = vld [vmem:[%s14245_s3 + $0x80] sm:$0xff]  }
 0x263   : > { %10629 = vmatprep.subr.bf16.mxu0 %v11529_v17  ;;  %10647 = vmatprep.subr.bf16.mxu1 %v11530_v18  ;;  %v11908_v16 = vld [vmem:[#allocation2 + $0x5c] sm:$0xf8]   ;;  %v4651_v18 = vrot.slane %v4570_v8, 2 }
 0x264   : > { %v5023_v17 = vrot.slane %v11908_v16, 3 }
 0x266   : > { %10630 = vmatpush3.bf16.msra.mxu0 %v11531_v19  ;;  %10648 = vmatpush3.bf16.msra.mxu1 %v11532_v20  ;;  %v5033_v19 = vpop.permute.xlu0 %5032  ;;  %v11557_v20 = vld [vmem:[%s14245_s3 + $0x58] sm:$0xff]  }
 0x267   : > { %10631 = vmatprep.subr.bf16.mxu0 %v11533_v21  ;;  %10649 = vmatprep.subr.bf16.mxu1 %v11534_v22  ;;  %v11558_v22 = vld [vmem:[%s14245_s3 + $0xc8] sm:$0xff]  }
 0x268   : > { %v10329_v53 = vpop.f32.mrb[52].mxu0 }
 0x269   : > { %v10330_v27 = vpop.f32.mrb[53].mxu0 }
 0x26a   : > { %v10331_v28 = vadd.f32 %v10330_v27, %v10329_v53  ;;  %10632 = vmatpush3.bf16.msra.mxu0 %v11535_v23  ;;  %10650 = vmatpush3.bf16.msra.mxu1 %v11536_v24  ;;  %v10332_v29 = vpop.f32.mrb[54].mxu0  ;;  %v5047_v23 = vsel %vm1341_vm1, %v5023_v17, %v5033_v19  ;;  %v11559_v24 = vld [vmem:[%s14245_s3 + $0x18] sm:$0xff]   ;;  %v11562_v53 = vld [vmem:[%s14245_s3 + $0xd0] sm:$0xff]   ;;  %v5017_v19 = vpop.permute.xlu1 %5016 }
 0x26b   : > { %v10333_v32 = vpop.f32.mrb[55].mxu0  ;;  %10633 = vmatprep.subr.bf16.mxu0 %v11537_v25  ;;  %10651 = vmatprep.subr.bf16.mxu1 %v11538_v26  ;;  %v11560_v25 = vld [vmem:[%s14245_s3 + $0x88] sm:$0xff]   ;;  %v11561_v26 = vld [vmem:[%s14245_s3 + $0x60] sm:$0xff]  }
 0x26c   : > { %v10334_v35 = vadd.f32 %v10333_v32, %v10332_v29  ;;  %v1655_v49 = vadd.f32 %v10331_v28, %v13048_v39  ;;  %v11563_v28 = vld [vmem:[%s14245_s3 + $0x20] sm:$0xff]   ;;  %v11564_v29 = vld [vmem:[%s14245_s3 + $0x90] sm:$0xff]   ;;  %v11566_v32 = vld [vmem:[%s14245_s3 + $0xd8] sm:$0xff]  }
 0x26e   : > { %10634 = vmatpush3.bf16.msra.mxu0 %v11539_v30  ;;  %10652 = vmatpush3.bf16.msra.mxu1 %v11540_v31  ;;  %v1658_v60 = vadd.f32 %v10334_v35, %v13048_v39  ;;  %v11565_v31 = vld [vmem:[%s14245_s3 + $0x68] sm:$0xff]   ;;  %v11568_v35 = vld [vmem:[%s14245_s3 + $0x98] sm:$0xff]  }
 0x26f   : > { %10635 = vmatprep.subr.bf16.mxu0 %v11541_v33  ;;  %10653 = vmatprep.subr.bf16.mxu1 %v11542_v34  ;;  %v11567_v34 = vld [vmem:[%s14245_s3 + $0x28] sm:$0xff]  }
 0x270   : > { %v10351_v44 = vpop.f32.mrb[52].mxu1 }
 0x271   : > { %v10352_v45 = vpop.f32.mrb[53].mxu1 }
 0x272   : > { %v10353_v50 = vadd.f32 %v10352_v45, %v10351_v44  ;;  %10636 = vmatpush3.bf16.msra.mxu0 %v11543_v37  ;;  %10654 = vmatpush3.bf16.msra.mxu1 %v11544_v38  ;;  %v10354_v51 = vpop.f32.mrb[54].mxu1  ;;  %v11570_v38 = vld [vmem:[%s14245_s3 + $0x70] sm:$0xff]  }
 0x273   : > { %v10355_v56 = vpop.f32.mrb[55].mxu1  ;;  %10655 = vmatprep.subr.bf16.mxu1 %v11545_v40  ;;  %10665 = vmatprep.subr.bf16.mxu0 %v11546_v41 }
 0x274   : > { %v1696_v61 = vadd.f32 %v10353_v50, %v1655_v49  ;;  %v10356_v62 = vadd.f32 %v10355_v56, %v10354_v51  ;;  %v11574_v49 = vld [vmem:[%s14245_s3 + $0x78] sm:$0xff]   ;;  %v11575_v50 = vld [vmem:[%s14245_s3 + $0xe8] sm:$0xff]   ;;  %v11593_v56 = vld [vmem:[%s14247_s5 + $0x40] sm:$0xff]  }
 0x275   : > { %4882 = vmatmul.mubr.bf16.vlgmr.msra.gmra.mrb[80].mxu0 %v4649_v55  ;;  %v11578_v55 = vld [vmem:[%s14245_s3 + $0xf0] sm:$0xff]  }
 0x276   : > { %v1702_v1 = vmax.f32 %v1696_v61, 0.0  ;;  %v1699_v2 = vadd.f32 %v10356_v62, %v1658_v60  ;;  %10656 = vmatpush3.bf16.msra.mxu1 %v11547_v52  ;;  %10666 = vmatpush3.bf16.msra.mxu0 %v11548_v54  ;;  %v11576_v52 = vld [vmem:[%s14245_s3 + $0x38] sm:$0xff]   ;;  %v11577_v54 = vld [vmem:[%s14245_s3 + $0xa8] sm:$0xff]  }
 0x277   : > { %5344 = vmatprep.mubr.bf16.mxu0 %v5039_v0  ;;  %10657 = vmatprep.subr.bf16.mxu1 %v11549_v57  ;;  %v11594_v0 = vld [vmem:[%s14247_s5] sm:$0xff]  }
 0x278   : > { %v10101_v9 = vpack.c.bf16 %v1702_v1, %v1702_v1  ;;  %v1703_v10 = vmax.f32 %v1699_v2, 0.0  ;;  %10667 = vmatprep.subr.bf16.mxu0 %v11550_v63  ;;  %v11579_v63 = vld [vmem:[%s14245_s3 + $0xb0] sm:$0xff]   ;;  %v11580_v2 = vld [vmem:[%s14245_s3 + $0xf8] sm:$0xff]  }
 0x27a   : > { %1712 = vst.msk [vmem:[#allocation3] sm:$0xf] %vm1245_vm0, %v10101_v9  ;;  %v10102_v13 = vpack.c.bf16 %v1703_v10, %v1703_v10  ;;  %10658 = vmatpush3.bf16.msra.mxu1 %v11551_v3  ;;  %10668 = vmatpush3.bf16.msra.mxu0 %v11552_v4  ;;  %v11595_v3 = vld [vmem:[%s14247_s5 + $0x48] sm:$0xff]   ;;  %v11909_v4 = vld [vmem:[#allocation2 + $0x50] sm:$0x1f]  }
 0x27b   : > { %10669 = vmatprep.subr.bf16.mxu0 %v11553_v6  ;;  %10687 = vmatprep.subr.bf16.mxu1 %v11554_v7  ;;  %v5035_v5 = vsel %vm1341_vm1, %v11909_v4, %v4985_v58 }
 0x27c   : > { %v1717_v21 = vsel %vm13087_vm4, %v10102_v13, %v1716_v12  ;;  %v11581_v12 = vld [vmem:[%s14245_s3 + $0xb8] sm:$0xff]   ;;  %v11596_v13 = vld [vmem:[%s14247_s5 + $0x8] sm:$0xff]  }
 0x27d   : > { %1718 = vst [vmem:[#allocation3 + $0x4] sm:$0x1] %v1717_v21  ;;  %4923 = vmatmul.mubr.bf16.vlgmr.msra.gmra.mrb[80].mxu1 %v4651_v18 }
 0x27e   : > { %10670 = vmatpush3.bf16.msra.mxu0 %v11555_v14  ;;  %10688 = vmatpush3.bf16.msra.mxu1 %v11556_v15  ;;  %v11597_v14 = vld [vmem:[%s14247_s5 + $0x50] sm:$0xff]   ;;  %v11910_v15 = vld [vmem:[#allocation2 + $0x58] sm:$0x7c]  }
 0x27f   : > { %5385 = vmatprep.mubr.bf16.mxu1 %v5047_v23  ;;  %10671 = vmatprep.subr.bf16.mxu0 %v11557_v20  ;;  %v5007_v16 = vrot.slane %v11910_v15, 2 }
 0x280   : > { %10689 = vmatprep.subr.bf16.mxu1 %v11558_v22  ;;  %v11598_v22 = vld [vmem:[%s14247_s5 + $0x10] sm:$0xff]  }
 0x281   : > { %v13119_v27 = vld [vmem:[#allocation3] sm:$0xf]  ;;  %v5043_v23 = vsel %vm1341_vm1, %v5007_v16, %v5017_v19  ;;  %v11931_v16 = vmov 0.0  }
 0x282   : > { %10672 = vmatpush3.bf16.msra.mxu0 %v11559_v24  ;;  %10690 = vmatpush3.bf16.msra.mxu1 %v11560_v25  ;;  %v9758_v30 = vcombine.low %v13119_v27, %v13119_v27 }
 0x283   : > { %10673 = vmatprep.subr.bf16.mxu0 %v11561_v26  ;;  %10691 = vmatprep.subr.bf16.mxu1 %v11562_v53 }
 0x284   : > { %v5424_v33 = vshll.u32 %v9758_v30, 16  ;;  %v5422_v36 = vshrl.u32 %v9758_v30, 16  ;;  %v11600_v30 = vld [vmem:[%s14247_s5 + $0x58] sm:$0xff]  }
 0x286   : > { %10674 = vmatpush3.bf16.msra.mxu0 %v11563_v28  ;;  %10692 = vmatpush3.bf16.msra.mxu1 %v11564_v29  ;;  %v5426_v37 = vrot.slane %v5424_v33, 1  ;;  %v2183_v29 = vld [vmem:[#allocation3 + $0x4] sm:$0xf]  ;;  %v11601_v33 = vld [vmem:[%s14247_s5 + $0x18] sm:$0xff]  }
 0x287   : > { %10675 = vmatprep.subr.bf16.mxu0 %v11565_v31  ;;  %10693 = vmatprep.subr.bf16.mxu1 %v11566_v32 }
 0x288   : > { %v10373_v40 = vpop.f32.mrb[56].mxu0  ;;  %v5427_v41 = vor.u32 %v5426_v37, %v5422_v36  ;;  %v11605_v36 = vld [vmem:[%s14247_s5 + $0x68] sm:$0xff]   ;;  %v11611_v37 = vld [vmem:[%s14247_s5 + $0xc0] sm:$0xff]  }
 0x289   : > { %v10374_v43 = vpop.f32.mrb[57].mxu0 }
 0x28a   : > { %v10375_v44 = vadd.f32 %v10374_v43, %v10373_v40  ;;  %v10376_v45 = vpop.f32.mrb[58].mxu0  ;;  %10676 = vmatpush3.bf16.msra.mxu0 %v11567_v34  ;;  %10694 = vmatpush3.bf16.msra.mxu1 %v11568_v35  ;;  %v11603_v34 = vld [vmem:[%s14247_s5 + $0x60] sm:$0xff]  }
 0x28b   : > { %5428 = vrot.lane.b32.xlu1 %v5427_v41, %s11930_s15  ;;  %v10377_v48 = vpop.f32.mrb[59].mxu0  ;;  %10677 = vmatprep.subr.bf16.mxu0 %v11570_v38  ;;  %v11604_v35 = vld [vmem:[%s14247_s5 + $0x20] sm:$0xff]   ;;  %v11606_v38 = vld [vmem:[%s14247_s5 + $0x28] sm:$0xff]   ;;  %v11607_v41 = vld [vmem:[%s14247_s5 + $0x70] sm:$0xff]  }
 0x28c   : > { %v10378_v51 = vadd.f32 %v10377_v48, %v10376_v45  ;;  %10695 = vmatprep.subr.bf16.mxu1 %v11571_v42  ;;  %v2109_v60 = vadd.f32 %v10375_v44, %v13048_v39  ;;  %v11613_v40 = vld [vmem:[%s14247_s5 + $0x80] sm:$0xff]   ;;  %v11608_v48 = vld [vmem:[%s14247_s5 + $0x30] sm:$0xff]  }
 0x28e   : > { %10678 = vmatpush3.bf16.msra.mxu0 %v11572_v46  ;;  %10696 = vmatpush3.bf16.msra.mxu1 %v11573_v47  ;;  %v2112_v6 = vadd.f32 %v10378_v51, %v13048_v39 }
 0x28f   : > { %10679 = vmatprep.subr.bf16.mxu0 %v11574_v49  ;;  %10697 = vmatprep.subr.bf16.mxu1 %v11575_v50 }
 0x290   : > { %v10395_v57 = vpop.f32.mrb[56].mxu1 }
 0x291   : > { %v10396_v59 = vpop.f32.mrb[57].mxu1 }
 0x292   : > { %v10397_v61 = vadd.f32 %v10396_v59, %v10395_v57  ;;  %v10398_v62 = vpop.f32.mrb[58].mxu1  ;;  %10680 = vmatpush3.bf16.msra.mxu0 %v11576_v52  ;;  %10698 = vmatpush3.bf16.msra.mxu1 %v11577_v54  ;;  %v11609_v52 = vld [vmem:[%s14247_s5 + $0x78] sm:$0xff]  }
 0x293   : > { %v10399_v1 = vpop.f32.mrb[59].mxu1  ;;  %10699 = vmatprep.subr.bf16.mxu1 %v11578_v55  ;;  %10709 = vmatprep.subr.bf16.mxu0 %v11593_v56 }
 0x294   : > { %v2150_v7 = vadd.f32 %v10397_v61, %v2109_v60  ;;  %v10400_v8 = vadd.f32 %v10399_v1, %v10398_v62  ;;  %v11610_v62 = vld [vmem:[%s14247_s5 + $0x38] sm:$0xff]   ;;  %v11616_v1 = vld [vmem:[%s14247_s5 + $0x88] sm:$0xff]  }
 0x295   : > { %5345 = vmatmul.mubr.bf16.vlgmr.msra.gmra.mrb[84].mxu0 %v5035_v5 }
 0x296   : > { %v2156_v9 = vmax.f32 %v2150_v7, 0.0  ;;  %v2153_v10 = vadd.f32 %v10400_v8, %v2112_v6  ;;  %10700 = vmatpush3.bf16.msra.mxu1 %v11579_v63  ;;  %10710 = vmatpush3.bf16.msra.mxu0 %v11594_v0  ;;  %v11615_v63 = vld [vmem:[%s14247_s5 + $0xc8] sm:$0xff]   ;;  %v11619_v8 = vld [vmem:[%s14247_s5 + $0x90] sm:$0xff]  }
 0x297   : > { %10701 = vmatprep.subr.bf16.mxu1 %v11580_v2  ;;  %10711 = vmatprep.subr.bf16.mxu0 %v11595_v3  ;;  %v11618_v2 = vld [vmem:[%s14247_s5 + $0xd0] sm:$0xff]  }
 0x298   : > { %v10103_v17 = vpack.c.bf16 %v2156_v9, %v2156_v9  ;;  %v2157_v18 = vmax.f32 %v2153_v10, 0.0 }
 0x29a   : > { %v2167_v20 = vshrl.u32 %v10103_v17, 16  ;;  %v10104_v21 = vpack.c.bf16 %v2157_v18, %v2157_v18  ;;  %10702 = vmatpush3.bf16.msra.mxu1 %v11581_v12  ;;  %10712 = vmatpush3.bf16.msra.mxu0 %v11596_v13  ;;  %v2170_v25 = vshll.u32 %v10103_v17, 16  ;;  %v11621_v13 = vld [vmem:[%s14247_s5 + $0xd8] sm:$0xff]  }
 0x29b   : > { %10713 = vmatprep.subr.bf16.mxu0 %v11597_v14  ;;  %10731 = vmatprep.subr.bf16.mxu1 %v11611_v37  ;;  %v11634_v37 = vld [vmem:[%s14247_s5 + $0xf0] sm:$0xff]  }
 0x29c   : > { %v2169_v24 = vrot.slane %v2167_v20, 7  ;;  %v2175_v28 = vshll.u32 %v10104_v21, 16 }
 0x29d   : > { %5386 = vmatmul.mubr.bf16.vlgmr.msra.gmra.mrb[84].mxu1 %v5043_v23 }
 0x29e   : > { %v2172_v26 = vor.u32 %v2170_v25, %v2169_v24  ;;  %v2173_v53 = vrot.slane %v2169_v24, 4  ;;  %10714 = vmatpush3.bf16.msra.mxu0 %v11598_v22  ;;  %10732 = vmatpush3.bf16.msra.mxu1 %v11613_v40  ;;  %v11636_v40 = vld [vmem:[%s14247_s5 + $0xb0] sm:$0xff]  }
 0x29f   : > { %10715 = vmatprep.subr.bf16.mxu0 %v11600_v30  ;;  %10733 = vmatprep.subr.bf16.mxu1 %v11615_v63  ;;  %v11623_v30 = vld [vmem:[%s14247_s5 + $0x98] sm:$0xff]  }
 0x2a0   : > { %v2184_v31 = vsel %vm2182_vm7, %v2172_v26, %v2183_v29  ;;  %v2177_v32 = vsel %vm2165_vm8, %v2173_v53, %v2175_v28  ;;  %v2640_v29 = vld [vmem:[#allocation3 + $0xc] sm:$0x3]  ;;  %vm3089_vm7 = vmor %vm2638_vm13, %vm3088_vm5  ;;  %vm3552_vm8 = vcmask 1041408   ;;  %vm3563_vm13 = vcmask 518144  }
 0x2a1   : > { %2185 = vst [vmem:[#allocation3 + $0x4] sm:$0xf] %v2184_v31  ;;  %2187 = vst.msk [vmem:[#allocation3 + $0x8] sm:$0x1] %vm14251_vm2, %v2177_v32 }
 0x2a2   : > { %10716 = vmatpush3.bf16.msra.mxu0 %v11601_v33  ;;  %10734 = vmatpush3.bf16.msra.mxu1 %v11616_v1  ;;  %v11626_v33 = vld [vmem:[%s14247_s5 + $0xe0] sm:$0xff]   ;;  %vm3554_vm3 = vmor %vm3552_vm8, %vm3553_vm9  ;;  %vm4014_vm8 = vsmask.f32 6416 }
 0x2a3   : > { %10717 = vmatprep.subr.bf16.mxu0 %v11603_v34  ;;  %10735 = vmatprep.subr.bf16.mxu1 %v11618_v2  ;;  %v11628_v34 = vld [vmem:[%s14247_s5 + $0xa0] sm:$0xff]  }
 0x2a6   : > { %10718 = vmatpush3.bf16.msra.mxu0 %v11604_v35  ;;  %10736 = vmatpush3.bf16.msra.mxu1 %v11619_v8  ;;  %v11631_v35 = vld [vmem:[%s14247_s5 + $0xe8] sm:$0xff]  }
 0x2a7   : > { %10719 = vmatprep.subr.bf16.mxu0 %v11605_v36  ;;  %10737 = vmatprep.subr.bf16.mxu1 %v11621_v13  ;;  %v11633_v36 = vld [vmem:[%s14247_s5 + $0xa8] sm:$0xff]  }
 0x2a8   : > { %v10417_v42 = vpop.f32.mrb[60].mxu0  ;;  %v13230_v44 = vld [vmem:[#allocation3 + $0x4] sm:$0x1e]   ;;  %v11583_v47 = vld [vmem:[#allocation3 + $0x4] ss:$0 sps:$4 sm:$0xff]  }
 0x2a9   : > { %v10418_v43 = vpop.f32.mrb[61].mxu0  ;;  %v5455_v50 = vshrl.u32 %v13230_v44, 16  ;;  %v5458_v51 = vshll.u32 %v13230_v44, 16  ;;  %v5442_v55 = vshll.u32 %v11583_v47, 16  ;;  %v13240_v56 = vld [vmem:[#allocation3 + $0x4] sm:$0x1e]  }
 0x2aa   : > { %v10419_v45 = vadd.f32 %v10418_v43, %v10417_v42  ;;  %v10420_v46 = vpop.f32.mrb[62].mxu0  ;;  %10720 = vmatpush3.bf16.msra.mxu0 %v11606_v38  ;;  %v5440_v59 = vshrl.u32 %v11583_v47, 16  ;;  %v5944_v61 = vshll.u32 %v13240_v56, 16  ;;  %v5942_v7 = vshrl.u32 %v13240_v56, 16  ;;  %10738 = vmatpush3.bf16.msra.mxu1 %v11623_v30  ;;  %v11637_v43 = vld [vmem:[%s14247_s5 + $0xf8] sm:$0xff]  }
 0x2ab   : > { %v10421_v49 = vpop.f32.mrb[63].mxu0  ;;  %10721 = vmatprep.subr.bf16.mxu0 %v11607_v41  ;;  %v5457_v57 = vrot.slane %v5455_v50, 1  ;;  %v5460_v58 = vrot.slane %v5458_v51, 2  ;;  %v5444_v60 = vrot.slane %v5442_v55, 1  ;;  %10739 = vmatprep.subr.bf16.mxu1 %v11626_v33  ;;  %v11638_v55 = vld [vmem:[%s14247_s5 + $0xb8] sm:$0xff]  }
 0x2ac   : > { %v10422_v54 = vadd.f32 %v10421_v49, %v10420_v46  ;;  %v5946_v5 = vrot.slane %v5944_v61, 1  ;;  %v2571_v9 = vadd.f32 %v10419_v45, %v13048_v39 }
 0x2ad   : > { %v5461_v0 = vor.u32 %v5460_v58, %v5457_v57  ;;  %v5445_v4 = vor.u32 %v5444_v60, %v5440_v59  ;;  %v11639_v58 = vld [vmem:[%s14247_s5 + $0x40] sm:$0xff]  }
 0x2ae   : > { %10722 = vmatpush3.bf16.msra.mxu0 %v11608_v48  ;;  %v5947_v15 = vor.u32 %v5946_v5, %v5942_v7  ;;  %v2574_v17 = vadd.f32 %v10422_v54, %v13048_v39  ;;  %10740 = vmatpush3.bf16.msra.mxu1 %v11628_v34 }
 0x2af   : > { %10723 = vmatprep.subr.bf16.mxu0 %v11609_v52  ;;  %5462 = vrot.lane.b32.xlu1 %v5461_v0, %s11930_s15 }
 0x2b0   : > { %v10439_v3 = vpop.f32.mrb[60].mxu1  ;;  %5446 = vrot.lane.b32.xlu0 %v5445_v4, %s11930_s15  ;;  %10741 = vmatprep.subr.bf16.mxu1 %v11631_v35 }
 0x2b1   : > { %v10440_v6 = vpop.f32.mrb[61].mxu1 }
 0x2b2   : > { %v10441_v10 = vadd.f32 %v10440_v6, %v10439_v3  ;;  %v10442_v12 = vpop.f32.mrb[62].mxu1  ;;  %10724 = vmatpush3.bf16.msra.mxu0 %v11610_v62  ;;  %10742 = vmatpush3.bf16.msra.mxu1 %v11633_v36 }
 0x2b3   : > { %v10443_v14 = vpop.f32.mrb[63].mxu1  ;;  %11052 = vmatprep.subr.bf16.mxu0 %v11931_v16  ;;  %5948 = vrot.lane.b32.xlu1 %v5947_v15, %s11930_s15 }
 0x2b4   : > { %v2612_v18 = vadd.f32 %v10441_v10, %v2571_v9  ;;  %v10444_v19 = vadd.f32 %v10443_v14, %v10442_v12  ;;  %10743 = vmatprep.subr.bf16.mxu1 %v11634_v37 }
 0x2b6   : > { %v2618_v20 = vmax.f32 %v2612_v18, 0.0  ;;  %v2615_v21 = vadd.f32 %v10444_v19, %v2574_v17  ;;  %10744 = vmatpush3.bf16.msra.mxu1 %v11636_v40 }
 0x2b7   : > { %10745 = vmatprep.subr.bf16.mxu1 %v11637_v43 }
 0x2b8   : > { %v10105_v22 = vpack.c.bf16 %v2618_v20, %v2618_v20  ;;  %v2619_v23 = vmax.f32 %v2615_v21, 0.0 }
 0x2ba   : > { %v2629_v24 = vrot.slane %v10105_v22, 7  ;;  %v10106_v25 = vpack.c.bf16 %v2619_v23, %v2619_v23  ;;  %10746 = vmatpush3.bf16.msra.mxu1 %v11638_v55 }
 0x2bb   : > { %10758 = vmatprep.subr.bf16.mxu1 %v11639_v58 }
 0x2bc   : > { %v2630_v26 = vrot.slane %v2629_v24, 4  ;;  %2636 = vst.msk [vmem:[#allocation3 + $0x8] sm:$0xe] %vm14250_vm11, %v2629_v24  ;;  %v2631_v53 = vrot.slane %v10106_v25, 7  ;;  %vm4489_vm11 = vsmask.f32 3328 }
 0x2be   : > { %v2632_v31 = vsel %vm2628_vm14, %v2630_v26, %v2631_v53  ;;  %vm3564_vm14 = vsmask.f32 2304 }
 0x2bf   : > { %v2641_v32 = vsel %vm13271_vm15, %v2632_v31, %v2640_v29  ;;  %vm13342_vm5 = vmand %vm3563_vm13, %vm3564_vm14 }
 0x2c0   : > { %2642 = vst [vmem:[#allocation3 + $0xc] sm:$0x3] %v2641_v32 }
 0x2c7   : > { %v13295_v38 = vld [vmem:[#allocation3 + $0x8] sm:$0x1e]   ;;  %v3109_v22 = vld [vmem:[#allocation3 + $0xc] sm:$0xe] }
 0x2c8   : > { %v10461_v41 = vpop.f32.mrb[64].mxu0  ;;  %v13300_v42 = vld [vmem:[#allocation3 + $0x8] sm:$0x1e]   ;;  %v5471_v46 = vshrl.u32 %v13295_v38, 16  ;;  %v5474_v47 = vshll.u32 %v13295_v38, 16 }
 0x2c9   : > { %v10462_v45 = vpop.f32.mrb[65].mxu0  ;;  %v5959_v50 = vshll.u32 %v13300_v42, 16  ;;  %v5957_v61 = vshrl.u32 %v13300_v42, 16  ;;  %v11589_v53 = vld [vmem:[#allocation3 + $0x8] sm:$0x1e]  }
 0x2ca   : > { %v10463_v48 = vadd.f32 %v10462_v45, %v10461_v41  ;;  %v10464_v49 = vpop.f32.mrb[66].mxu0  ;;  %v5473_v52 = vrot.slane %v5471_v46, 1  ;;  %v5476_v54 = vrot.slane %v5474_v47, 2  ;;  %v6508_v32 = vshll.u32 %v11589_v53, 16 }
 0x2cb   : > { %v10465_v51 = vpop.f32.mrb[67].mxu0  ;;  %v5961_v60 = vrot.slane %v5959_v50, 1 }
 0x2cc   : > { %v10466_v57 = vadd.f32 %v10465_v51, %v10464_v49  ;;  %v5477_v59 = vor.u32 %v5476_v54, %v5473_v52  ;;  %v3033_v1 = vadd.f32 %v10463_v48, %v13048_v39  ;;  %v6510_v49 = vrot.slane %v6508_v32, 1 }
 0x2cd   : > { %v5962_v0 = vor.u32 %v5961_v60, %v5957_v61  ;;  %v6506_v51 = vshrl.u32 %v11589_v53, 16 }
 0x2ce   : > { %5478 = vrot.lane.b32.xlu0 %v5477_v59, %s11930_s15  ;;  %v3036_v5 = vadd.f32 %v10466_v57, %v13048_v39 }
 0x2d0   : > { %v10483_v62 = vpop.f32.mrb[64].mxu1 }
 0x2d1   : > { %v10484_v63 = vpop.f32.mrb[65].mxu1 }
 0x2d2   : > { %v10485_v2 = vadd.f32 %v10484_v63, %v10483_v62  ;;  %v10486_v3 = vpop.f32.mrb[66].mxu1  ;;  %5963 = vrot.lane.b32.xlu0 %v5962_v0, %s11930_s15 }
 0x2d3   : > { %v10487_v4 = vpop.f32.mrb[67].mxu1 }
 0x2d4   : > { %v3074_v6 = vadd.f32 %v10485_v2, %v3033_v1  ;;  %v10488_v7 = vadd.f32 %v10487_v4, %v10486_v3  ;;  %v6511_v1 = vor.u32 %v6510_v49, %v6506_v51 }
 0x2d6   : > { %v3080_v8 = vmax.f32 %v3074_v6, 0.0  ;;  %v3077_v9 = vadd.f32 %v10488_v7, %v3036_v5 }
 0x2d8   : > { %v10107_v10 = vpack.c.bf16 %v3080_v8, %v3080_v8  ;;  %v3081_v12 = vmax.f32 %v3077_v9, 0.0 }
 0x2da   : > { %v3091_v13 = vshrl.u32 %v10107_v10, 16  ;;  %v3094_v14 = vshll.u32 %v10107_v10, 16  ;;  %v10108_v15 = vpack.c.bf16 %v3081_v12, %v3081_v12 }
 0x2dc   : > { %v3093_v17 = vrot.slane %v3091_v13, 6  ;;  %v3096_v18 = vrot.slane %v3094_v14, 7  ;;  %v3100_v19 = vshll.u32 %v10108_v15, 16 }
 0x2de   : > { %v3097_v21 = vor.u32 %v3096_v18, %v3093_v17  ;;  %v3102_v25 = vrot.slane %v3100_v19, 7 }
 0x2e0   : > { %v3098_v23 = vrot.slane %v3097_v21, 4  ;;  %v3110_v24 = vsel %vm13320_vm6, %v3097_v21, %v3109_v22 }
 0x2e1   : > { %3111 = vst [vmem:[#allocation3 + $0xc] sm:$0xe] %v3110_v24 }
 0x2e2   : > { %v3103_v26 = vsel %vm3089_vm7, %v3098_v23, %v3102_v25  ;;  %vm4033_vm7 = vsmask.f32 7946 }
 0x2e3   : > { %3113 = vst.msk [vmem:[#allocation3 + $0x10] sm:$0x3] %vm2637_vm12, %v3103_v26  ;;  %vm13358_vm9 = vmand %vm14252_vm10, %vm4033_vm7  ;;  %vm4478_vm7 = vcmask 1042432  }
 0x2e8   : > { %v10505_v29 = vpop.f32.mrb[68].mxu0  ;;  %v11587_v30 = vld [vmem:[#allocation3 + $0x8] sm:$0x3c]  }
 0x2e9   : > { %v10506_v31 = vpop.f32.mrb[69].mxu0  ;;  %v5972_v35 = vshrl.u32 %v11587_v30, 16  ;;  %v5975_v36 = vshll.u32 %v11587_v30, 16 }
 0x2ea   : > { %v10507_v33 = vadd.f32 %v10506_v31, %v10505_v29  ;;  %v10508_v34 = vpop.f32.mrb[70].mxu0  ;;  %v13328_v40 = vld [vmem:[#allocation3 + $0xc] sm:$0x3c]   ;;  %v3566_v31 = vld [vmem:[#allocation3 + $0x14] sm:$0x7] }
 0x2eb   : > { %v10509_v37 = vpop.f32.mrb[71].mxu0  ;;  %v5974_v43 = vrot.slane %v5972_v35, 1  ;;  %v5977_v45 = vrot.slane %v5975_v36, 2  ;;  %v11590_v46 = vld [vmem:[#allocation3 + $0xc] sm:$0x1e]   ;;  %v5993_v47 = vshrl.u32 %v13328_v40, 16 }
 0x2ec   : > { %v10510_v41 = vadd.f32 %v10509_v37, %v10508_v34  ;;  %v5996_v48 = vshll.u32 %v13328_v40, 16  ;;  %v6528_v52 = vshll.u32 %v11590_v46, 16  ;;  %v11591_v54 = vld [vmem:[#allocation3 + $0xc] sm:$0x3c]   ;;  %v3497_v62 = vadd.f32 %v10507_v33, %v13048_v39 }
 0x2ed   : > { %v5978_v50 = vor.u32 %v5977_v45, %v5974_v43  ;;  %v5995_v55 = vrot.slane %v5993_v47, 1  ;;  %v11592_v58 = vld [vmem:[#allocation3 + $0xc] sm:$0x3c]   ;;  %v6541_v60 = vshrl.u32 %v11591_v54, 16  ;;  %v6544_v61 = vshll.u32 %v11591_v54, 16 }
 0x2ee   : > { %v5998_v57 = vrot.slane %v5996_v48, 2  ;;  %v6530_v2 = vrot.slane %v6528_v52, 1  ;;  %v7052_v7 = vshll.u32 %v11592_v58, 16  ;;  %v6526_v9 = vshrl.u32 %v11590_v46, 16 }
 0x2ef   : > { %5979 = vrot.lane.b32.xlu1 %v5978_v50, %s11930_s15  ;;  %v6543_v5 = vrot.slane %v6541_v60, 1  ;;  %v6546_v6 = vrot.slane %v6544_v61, 2  ;;  %v3500_v10 = vadd.f32 %v10510_v41, %v13048_v39  ;;  %v7050_v23 = vshrl.u32 %v11592_v58, 16 }
 0x2f0   : > { %v10527_v59 = vpop.f32.mrb[68].mxu1  ;;  %v5999_v0 = vor.u32 %v5998_v57, %v5995_v55  ;;  %v6531_v14 = vor.u32 %v6530_v2, %v6526_v9  ;;  %v7054_v19 = vrot.slane %v7052_v7, 1 }
 0x2f1   : > { %v10528_v63 = vpop.f32.mrb[69].mxu1  ;;  %v6547_v18 = vor.u32 %v6546_v6, %v6543_v5 }
 0x2f2   : > { %v10529_v3 = vadd.f32 %v10528_v63, %v10527_v59  ;;  %v10530_v4 = vpop.f32.mrb[70].mxu1  ;;  %6000 = vrot.lane.b32.xlu0 %v5999_v0, %s11930_s15  ;;  %v7055_v26 = vor.u32 %v7054_v19, %v7050_v23 }
 0x2f3   : > { %v10531_v8 = vpop.f32.mrb[71].mxu1  ;;  %6512 = vrot.lane.b32.xlu1 %v6511_v1, %s11930_s15 }
 0x2f4   : > { %v3538_v12 = vadd.f32 %v10529_v3, %v3497_v62  ;;  %v10532_v13 = vadd.f32 %v10531_v8, %v10530_v4 }
 0x2f6   : > { %v3544_v15 = vmax.f32 %v3538_v12, 0.0  ;;  %v3541_v17 = vadd.f32 %v10532_v13, %v3500_v10  ;;  %6532 = vrot.lane.b32.xlu0 %v6531_v14, %s11930_s15 }
 0x2f7   : > { %6548 = vrot.lane.b32.xlu1 %v6547_v18, %s11930_s15 }
 0x2f8   : > { %v10109_v21 = vpack.c.bf16 %v3544_v15, %v3544_v15  ;;  %v3545_v22 = vmax.f32 %v3541_v17, 0.0  ;;  %v11612_v17 = vld [vmem:[#allocation3] sm:$0x1e]  }
 0x2fa   : > { %v3555_v24 = vrot.slane %v10109_v21, 6  ;;  %v10110_v25 = vpack.c.bf16 %v3545_v22, %v3545_v22 }
 0x2fb   : > { %7056 = vrot.lane.b32.xlu1 %v7055_v26, %s11930_s15  ;;  %v11614_v26 = vld [vmem:[%s14247_s5 + $0x100] sm:$0xff]  }
 0x2fc   : > { %v3556_v53 = vrot.slane %v3555_v24, 4  ;;  %3562 = vst.msk [vmem:[#allocation3 + $0x10] sm:$0xc] %vm14252_vm10, %v3555_v24  ;;  %v3557_v29 = vrot.slane %v10110_v25, 6  ;;  %v5435_v24 = vrot.slane %v11612_v17, 1  ;;  %vm13418_vm10 = vmand %vm1245_vm0, %vm4489_vm11 }
 0x2fd   : > { %v5429_v23 = vpop.permute.xlu1 %5428 }
 0x2fe   : > { %v3558_v32 = vsel %vm3554_vm3, %v3556_v53, %v3557_v29  ;;  %vm4015_vm3 = vmor %vm3564_vm14, %vm4014_vm8  ;;  %vm11932_vm14 = vmmov 0   ;;  %vm4479_vm8 = vcmask 1046532  }
 0x2ff   : > { %v3567_v33 = vsel %vm13342_vm5, %v3558_v32, %v3566_v31  ;;  %v5488_v31 = vsel %vm1341_vm1, %v13119_v27, %v5429_v23  ;;  %vm4480_vm2 = vmor %vm4478_vm7, %vm4479_vm8  ;;  %vm4939_vm8 = vsmask.f32 7440 }
 0x300   : > { %3568 = vst [vmem:[#allocation3 + $0x14] sm:$0x7] %v3567_v33  ;;  %v11617_v33 = vld [vmem:[%s14247_s5 + $0x108] sm:$0xff]  }
 0x307   : > { %v13349_v34 = vld [vmem:[#allocation3 + $0x10] sm:$0x3c]   ;;  %v4035_v15 = vld [vmem:[#allocation3 + $0x14] sm:$0xc] }
 0x308   : > { %v10549_v35 = vpop.f32.mrb[72].mxu0  ;;  %v11602_v36 = vld [vmem:[#allocation3 + $0x10] sm:$0x3c]   ;;  %v6557_v41 = vshrl.u32 %v13349_v34, 16  ;;  %v6560_v43 = vshll.u32 %v13349_v34, 16 }
 0x309   : > { %v10550_v37 = vpop.f32.mrb[73].mxu0  ;;  %v7067_v47 = vshll.u32 %v11602_v36, 16  ;;  %v7065_v55 = vshrl.u32 %v11602_v36, 16  ;;  %v11627_v29 = vld [vmem:[#allocation3 + $0x10] sm:$0x3c]  }
 0x30a   : > { %v10551_v45 = vadd.f32 %v10550_v37, %v10549_v35  ;;  %v10552_v46 = vpop.f32.mrb[74].mxu0  ;;  %v6559_v49 = vrot.slane %v6557_v41, 1  ;;  %v6562_v50 = vrot.slane %v6560_v43, 2  ;;  %v7620_v37 = vshll.u32 %v11627_v29, 16 }
 0x30b   : > { %v10553_v48 = vpop.f32.mrb[75].mxu0  ;;  %v7069_v54 = vrot.slane %v7067_v47, 1  ;;  %v11620_v47 = vld [vmem:[%s14247_s5 + $0x110] sm:$0xff]  }
 0x30c   : > { %v10554_v51 = vadd.f32 %v10553_v48, %v10552_v46  ;;  %v6563_v52 = vor.u32 %v6562_v50, %v6559_v49  ;;  %v3959_v60 = vadd.f32 %v10551_v45, %v13048_v39 }
 0x30d   : > { %v7070_v59 = vor.u32 %v7069_v54, %v7065_v55  ;;  %v13384_v54 = vld [vmem:[%s14246_s4] ss:$0 sm:$0xff] }
 0x30e   : > { %6564 = vrot.lane.b32.xlu0 %v6563_v52, %s11930_s15  ;;  %v3962_v0 = vadd.f32 %v10554_v51, %v13048_v39 }
 0x310   : > { %v10571_v57 = vpop.f32.mrb[72].mxu1 }
 0x311   : > { %v10572_v58 = vpop.f32.mrb[73].mxu1 }
 0x312   : > { %v10573_v61 = vadd.f32 %v10572_v58, %v10571_v57  ;;  %v10574_v62 = vpop.f32.mrb[74].mxu1  ;;  %7071 = vrot.lane.b32.xlu0 %v7070_v59, %s11930_s15  ;;  %v7622_v58 = vrot.slane %v7620_v37, 1 }
 0x313   : > { %v10575_v63 = vpop.f32.mrb[75].mxu1 }
 0x314   : > { %v4000_v1 = vadd.f32 %v10573_v61, %v3959_v60  ;;  %v10576_v2 = vadd.f32 %v10575_v63, %v10574_v62  ;;  %v11624_v60 = vld [vmem:[%s14247_s5 + $0x118] sm:$0xff]   ;;  %v7618_v61 = vshrl.u32 %v11627_v29, 16 }
 0x316   : > { %v4006_v3 = vmax.f32 %v4000_v1, 0.0  ;;  %v4003_v4 = vadd.f32 %v10576_v2, %v3962_v0 }
 0x318   : > { %v10111_v5 = vpack.c.bf16 %v4006_v3, %v4006_v3  ;;  %v4007_v6 = vmax.f32 %v4003_v4, 0.0 }
 0x31a   : > { %v4017_v7 = vshrl.u32 %v10111_v5, 16  ;;  %v4020_v8 = vshll.u32 %v10111_v5, 16  ;;  %v10112_v9 = vpack.c.bf16 %v4007_v6, %v4007_v6  ;;  %v11645_v6 = vld [vmem:[%s14247_s5 + $0xc0] sm:$0xff]  }
 0x31c   : > { %v4019_v10 = vrot.slane %v4017_v7, 5  ;;  %v4022_v12 = vrot.slane %v4020_v8, 6  ;;  %v4026_v13 = vshll.u32 %v10112_v9, 16  ;;  %v7623_v9 = vor.u32 %v7622_v58, %v7618_v61 }
 0x31d   : > { %v5469_v61 = vrot.slane %v13295_v38, 1  ;;  %v11641_v38 = vld [vmem:[%s14247_s5 + $0x48] sm:$0xff]  }
 0x31e   : > { %v4023_v39 = vor.u32 %v4022_v12, %v4019_v10  ;;  %v4028_v21 = vrot.slane %v4026_v13, 6  ;;  %v11629_v10 = vld [vmem:[#allocation3 + $0x8] sm:$0x3c]  }
 0x320   : > { %v4024_v18 = vrot.slane %v4023_v39, 4  ;;  %v4036_v19 = vsel %vm13358_vm9, %v4023_v39, %v4035_v15 }
 0x321   : > { %4037 = vst [vmem:[#allocation3 + $0x14] sm:$0xc] %v4036_v19 }
 0x322   : > { %v4029_v22 = vsel %vm4015_vm3, %v4024_v18, %v4028_v21  ;;  %v5447_v25 = vpop.permute.xlu0 %5446  ;;  %vm4487_vm3 = vcmask 519171  }
 0x323   : > { %4039 = vst.msk [vmem:[#allocation3 + $0x18] sm:$0x7] %vm3563_vm13, %v4029_v22  ;;  %v5492_v53 = vsel %vm1341_vm1, %v5435_v24, %v5447_v25 }
 0x324   : > { %5832 = vmatprep.mubr.bf16.mxu0 %v5492_v53  ;;  %v5485_v53 = vrot.slane %v11629_v10, 2 }
 0x325   : > { %5833 = vmatmul.mubr.bf16.vlgmr.msra.gmra.mrb[88].mxu0 %v5488_v31  ;;  %v11650_v31 = vld [vmem:[%s14247_s5 + $0xc8] sm:$0xff]  }
 0x326   : > { %11053 = vmatpush3.bf16.msra.mxu0 %v11614_v26  ;;  %11060 = vmatprep.mubr.msk.bf16.mxu0 %vm11932_vm14, %v11931_v16  ;;  %v11646_v26 = vld [vmem:[%s14247_s5 + $0x80] sm:$0xff]  }
 0x327   : > { %11054 = vmatprep.subr.bf16.mxu0 %v11931_v16 }
 0x328   : > { %v10593_v32 = vpop.f32.mrb[76].mxu0  ;;  %v11622_v35 = vld [vmem:[#allocation3 + $0x10] sm:$0x78]  }
 0x329   : > { %v10594_v36 = vpop.f32.mrb[77].mxu0  ;;  %v7080_v27 = vshrl.u32 %v11622_v35, 16  ;;  %v7083_v45 = vshll.u32 %v11622_v35, 16 }
 0x32a   : > { %v10595_v41 = vadd.f32 %v10594_v36, %v10593_v32  ;;  %v10596_v43 = vpop.f32.mrb[78].mxu0  ;;  %v11625_v48 = vld [vmem:[#allocation3 + $0x14] sm:$0x78]   ;;  %11055 = vmatpush3.bf16.msra.mxu0 %v11617_v33 }
 0x32b   : > { %v10597_v46 = vpop.f32.mrb[79].mxu0  ;;  %v7082_v50 = vrot.slane %v7080_v27, 1  ;;  %v7085_v51 = vrot.slane %v7083_v45, 2  ;;  %v11630_v52 = vld [vmem:[#allocation3 + $0x14] sm:$0x3c]   ;;  %11056 = vmatprep.subr.bf16.mxu0 %v11931_v16  ;;  %v7101_v55 = vshrl.u32 %v11625_v48, 16 }
 0x32c   : > { %v10598_v49 = vadd.f32 %v10597_v46, %v10596_v43  ;;  %v7104_v57 = vshll.u32 %v11625_v48, 16  ;;  %v7640_v62 = vshll.u32 %v11630_v52, 16  ;;  %v11632_v63 = vld [vmem:[#allocation3 + $0x14] sm:$0x78]   ;;  %v4423_v13 = vadd.f32 %v10595_v41, %v13384_v54  ;;  %v11651_v27 = vld [vmem:[%s14247_s5 + $0x88] sm:$0xff]   ;;  %v11655_v45 = vld [vmem:[%s14247_s5 + $0xd0] sm:$0xff]  }
 0x32d   : > { %v7086_v59 = vor.u32 %v7085_v51, %v7082_v50  ;;  %v7103_v0 = vrot.slane %v7101_v55, 1  ;;  %v7653_v3 = vshrl.u32 %v11632_v63, 16  ;;  %v7656_v4 = vshll.u32 %v11632_v63, 16  ;;  %v11635_v5 = vld [vmem:[#allocation3 + $0x14] sm:$0x78]   ;;  %v11656_v55 = vld [vmem:[%s14247_s5 + $0x90] sm:$0xff]  }
 0x32e   : > { %v7106_v1 = vrot.slane %v7104_v57, 2  ;;  %11057 = vmatpush3.bf16.msra.mxu0 %v11620_v47  ;;  %v7642_v12 = vrot.slane %v7640_v62, 1  ;;  %v7638_v21 = vshrl.u32 %v11630_v52, 16  ;;  %v8160_v22 = vshll.u32 %v11635_v5, 16  ;;  %v4491_v52 = vld [vmem:[#allocation3 + $0x1c] sm:$0xf] }
 0x32f   : > { %7087 = vrot.lane.b32.xlu1 %v7086_v59, %s11930_s15  ;;  %11058 = vmatprep.subr.bf16.mxu0 %v11931_v16  ;;  %v7655_v17 = vrot.slane %v7653_v3, 1  ;;  %v7658_v18 = vrot.slane %v7656_v4, 2  ;;  %v4426_v23 = vadd.f32 %v10598_v49, %v13384_v54  ;;  %v8158_v43 = vshrl.u32 %v11635_v5, 16  ;;  %v11659_v57 = vld [vmem:[%s14247_s5 + $0xd8] sm:$0xff]   ;;  %v11664_v5 = vld [vmem:[%s14247_s5 + $0xa0] sm:$0xff]   ;;  %v11865_v51 = vld [vmem:[%s14247_s5 + $0xf0] sm:$0xff]  }
 0x330   : > { %v10615_v2 = vpop.f32.mrb[76].mxu1  ;;  %v7107_v8 = vor.u32 %v7106_v1, %v7103_v0  ;;  %v7643_v29 = vor.u32 %v7642_v12, %v7638_v21  ;;  %v8162_v36 = vrot.slane %v8160_v22, 1  ;;  %v11660_v62 = vld [vmem:[%s14247_s5 + $0x98] sm:$0xff]   ;;  %v5453_v63 = vrot.slane %v13230_v44, 1  ;;  %v11640_v1 = vld [vmem:[%s14247_s5] sm:$0xff]  }
 0x331   : > { %v10616_v7 = vpop.f32.mrb[77].mxu1  ;;  %v7659_v35 = vor.u32 %v7658_v18, %v7655_v17  ;;  %v5950_v44 = vrot.slane %v13240_v56, 1  ;;  %v11643_v56 = vld [vmem:[%s14247_s5 + $0x50] sm:$0xff]   ;;  %v11668_v17 = vld [vmem:[%s14247_s5 + $0xa8] sm:$0xff]  }
 0x332   : > { %v10617_v39 = vadd.f32 %v10616_v7, %v10615_v2  ;;  %v10618_v15 = vpop.f32.mrb[78].mxu1  ;;  %7108 = vrot.lane.b32.xlu0 %v7107_v8, %s11930_s15  ;;  %11059 = vmatpush3.bf16.msra.mxu0 %v11624_v60  ;;  %v8163_v48 = vor.u32 %v8162_v36, %v8158_v43  ;;  %v5463_v60 = vpop.permute.xlu1 %5462  ;;  %v11663_v2 = vld [vmem:[%s14247_s5 + $0xe0] sm:$0xff]   ;;  %v11642_v7 = vld [vmem:[%s14247_s5 + $0x8] sm:$0xff]   ;;  %v11649_v43 = vld [vmem:[%s14247_s5 + $0x18] sm:$0xff]  }
 0x333   : > { %v10619_v19 = vpop.f32.mrb[79].mxu1  ;;  %7624 = vrot.lane.b32.xlu1 %v7623_v9, %s11930_s15  ;;  %10780 = vmatprep.subr.bf16.mxu0 %v11645_v6  ;;  %v5496_v4 = vsel %vm1341_vm1, %v5453_v63, %v5463_v60  ;;  %v11667_v8 = vld [vmem:[%s14247_s5 + $0xe8] sm:$0xff]  }
 0x334   : > { %v4464_v24 = vadd.f32 %v10617_v39, %v4423_v13  ;;  %v10620_v25 = vadd.f32 %v10619_v19, %v10618_v15  ;;  %v11644_v15 = vld [vmem:[%s14247_s5 + $0x10] sm:$0xff]  }
 0x335   : > { %11061 = vmatmul.mubr.msk.bf16.vlgmr.msra.gmra.mrb[92].mxu0 %vm1341_vm1, %v5485_v53  ;;  %v11669_v53 = vld [vmem:[%s14247_s5 + $0xf0] sm:$0xff]  }
 0x336   : > { %v4470_v32 = vmax.f32 %v4464_v24, 0.0  ;;  %v4467_v33 = vadd.f32 %v10620_v25, %v4426_v23  ;;  %7644 = vrot.lane.b32.xlu0 %v7643_v29, %s11930_s15  ;;  %10781 = vmatpush3.bf16.msra.mxu0 %v11646_v26  ;;  %v11648_v26 = vld [vmem:[%s14247_s5 + $0x58] sm:$0xff]   ;;  %v5949_v63 = vpop.permute.xlu1 %5948 }
 0x337   : > { %7660 = vrot.lane.b32.xlu1 %v7659_v35, %s11930_s15  ;;  %10782 = vmatprep.subr.bf16.mxu0 %v11650_v31 }
 0x338   : > { %v10113_v37 = vpack.c.bf16 %v4470_v32, %v4470_v32  ;;  %v4471_v41 = vmax.f32 %v4467_v33, 0.0 }
 0x33a   : > { %v4481_v46 = vrot.slane %v10113_v37, 5  ;;  %v10114_v47 = vpack.c.bf16 %v4471_v41, %v4471_v41  ;;  %10783 = vmatpush3.bf16.msra.mxu0 %v11651_v27  ;;  %v11672_v37 = vld [vmem:[%s14247_s5 + $0xb0] sm:$0xff]   ;;  %v11673_v27 = vld [vmem:[%s14247_s5 + $0xf8] sm:$0xff]  }
 0x33b   : > { %8164 = vrot.lane.b32.xlu1 %v8163_v48, %s11930_s15  ;;  %10784 = vmatprep.subr.bf16.mxu0 %v11655_v45 }
 0x33c   : > { %v4482_v49 = vrot.slane %v4481_v46, 4  ;;  %4488 = vst.msk [vmem:[#allocation3 + $0x18] sm:$0x8] %vm4487_vm3, %v4481_v46  ;;  %v4483_v50 = vrot.slane %v10114_v47, 5  ;;  %v11653_v46 = vld [vmem:[%s14247_s5 + $0x60] sm:$0xff]  }
 0x33e   : > { %v4484_v58 = vsel %vm4480_vm2, %v4482_v49, %v4483_v50  ;;  %10785 = vmatpush3.bf16.msra.mxu0 %v11656_v55  ;;  %v11676_v49 = vld [vmem:[%s14247_s5 + $0xb8] sm:$0xff]   ;;  %v11654_v55 = vld [vmem:[%s14247_s5 + $0x20] sm:$0xff]   ;;  %vm4958_vm2 = vsmask.f32 7950 }
 0x33f   : > { %v4492_v59 = vsel %vm13418_vm10, %v4484_v58, %v4491_v52  ;;  %10786 = vmatprep.subr.bf16.mxu0 %v11659_v57  ;;  %v11678_v57 = vld [vmem:[%s14247_s5 + $0x40] sm:$0xff]   ;;  %vm13519_vm7 = vmand %vm4487_vm3, %vm4958_vm2 }
 0x340   : > { %4493 = vst [vmem:[#allocation3 + $0x1c] sm:$0xf] %v4492_v59  ;;  %v5479_v0 = vpop.permute.xlu0 %5478  ;;  %vm4940_vm2 = vmor %vm4489_vm11, %vm4939_vm8  ;;  %vm14269_vm11 = vcmask 519169  }
 0x341   : > { %v5500_v3 = vsel %vm1341_vm1, %v5469_v61, %v5479_v0  ;;  %v11657_v61 = vld [vmem:[%s14247_s5 + $0x68] sm:$0xff]  }
 0x342   : > { %5872 = vmatprep.mubr.bf16.mxu1 %v5500_v3  ;;  %10787 = vmatpush3.bf16.msra.mxu0 %v11660_v62  ;;  %v11658_v3 = vld [vmem:[%s14247_s5 + $0x28] sm:$0xff]  }
 0x343   : > { %5873 = vmatmul.mubr.bf16.vlgmr.msra.gmra.mrb[88].mxu1 %v5496_v4  ;;  %10788 = vmatprep.subr.bf16.mxu0 %v11663_v2 }
 0x344   : > { %10759 = vmatpush3.bf16.msra.mxu1 %v11640_v1  ;;  %v5964_v6 = vpop.permute.xlu0 %5963 }
 0x345   : > { %v6008_v9 = vsel %vm1341_vm1, %v5950_v44, %v5964_v6  ;;  %10760 = vmatprep.subr.bf16.mxu1 %v11641_v38  ;;  %v5925_v38 = vld [vmem:[#allocation3 + $0x4] sm:$0xf] }
 0x346   : > { %v6102_v10 = vshll.u32 %v6008_v9, 16  ;;  %v6100_v13 = vshrl.u32 %v6008_v9, 16  ;;  %10789 = vmatpush3.bf16.msra.mxu0 %v11664_v5  ;;  %v11661_v5 = vld [vmem:[%s14247_s5 + $0x70] sm:$0xff]   ;;  %v6005_v6 = vsel %vm1341_vm1, %v5925_v38, %v5949_v63 }
 0x347   : > { %v13461_v12 = vld [vmem:[#allocation3 + $0x18] sm:$0x78]   ;;  %10790 = vmatprep.subr.bf16.mxu0 %v11667_v8  ;;  %v11662_v9 = vld [vmem:[%s14247_s5 + $0x30] sm:$0xff]  }
 0x348   : > { %v10637_v39 = vpop.f32.mrb[80].mxu0  ;;  %v6104_v18 = vrot.slane %v6102_v10, 1  ;;  %10761 = vmatpush3.bf16.msra.mxu1 %v11642_v7  ;;  %v7669_v21 = vshrl.u32 %v13461_v12, 16  ;;  %v7672_v22 = vshll.u32 %v13461_v12, 16  ;;  %v11652_v23 = vld [vmem:[#allocation3 + $0x18] sm:$0x78]  }
 0x349   : > { %v10638_v19 = vpop.f32.mrb[81].mxu0  ;;  %10762 = vmatprep.subr.bf16.mxu1 %v11643_v56  ;;  %v8175_v36 = vshll.u32 %v11652_v23, 16  ;;  %v8173_v47 = vshrl.u32 %v11652_v23, 16  ;;  %v6096_v56 = vshll.u32 %v6005_v6, 16  ;;  %v11666_v23 = vld [vmem:[%s14247_s5 + $0x38] sm:$0xff]  }
 0x34a   : > { %v10639_v24 = vadd.f32 %v10638_v19, %v10637_v39  ;;  %v10640_v25 = vpop.f32.mrb[82].mxu0  ;;  %v6105_v31 = vor.u32 %v6104_v18, %v6100_v13  ;;  %v7671_v32 = vrot.slane %v7669_v21, 1  ;;  %v7674_v33 = vrot.slane %v7672_v22, 2  ;;  %10791 = vmatpush3.bf16.msra.mxu0 %v11668_v17  ;;  %v4960_v22 = vld [vmem:[#allocation3 + $0x1c] sm:$0x8] }
 0x34b   : > { %v10641_v29 = vpop.f32.mrb[83].mxu0  ;;  %v8177_v45 = vrot.slane %v8175_v36, 1  ;;  %10792 = vmatprep.subr.bf16.mxu0 %v11669_v53  ;;  %v6094_v53 = vshrl.u32 %v6005_v6, 16 }
 0x34c   : > { %v10642_v35 = vadd.f32 %v10641_v29, %v10640_v25  ;;  %10763 = vmatpush3.bf16.msra.mxu1 %v11644_v15  ;;  %6380 = vmatprep.mubr.bf16.mxu1 %v6105_v31  ;;  %v7675_v41 = vor.u32 %v7674_v33, %v7671_v32  ;;  %v4884_v58 = vadd.f32 %v10639_v24, %v13384_v54  ;;  %v11665_v15 = vld [vmem:[%s14247_s5 + $0x78] sm:$0xff]   ;;  %v6098_v24 = vrot.slane %v6096_v56, 1  ;;  %v11671_v32 = vld [vmem:[#allocation3 + $0xc] sm:$0x1e]  }
 0x34d   : > { %10764 = vmatprep.subr.bf16.mxu1 %v11648_v26  ;;  %v8178_v52 = vor.u32 %v8177_v45, %v8173_v47  ;;  %v5965_v33 = vrot.slane %v13300_v42, 1  ;;  %v11675_v45 = vld [vmem:[#allocation3 + $0x8] sm:$0x3c]   ;;  %v5986_v47 = vrot.slane %v11671_v32, 1  ;;  %v11685_v42 = vld [vmem:[#allocation3 + $0x18] sm:$0x78]  }
 0x34e   : > { %7676 = vrot.lane.b32.xlu0 %v7675_v41, %s11930_s15  ;;  %10793 = vmatpush3.bf16.msra.mxu0 %v11672_v37  ;;  %v4887_v0 = vadd.f32 %v10642_v35, %v13384_v54  ;;  %v11670_v35 = vld [vmem:[%s14247_s5 + $0x100] sm:$0xff]   ;;  %v6099_v36 = vor.u32 %v6098_v24, %v6094_v53 }
 0x34f   : > { %10794 = vmatprep.subr.bf16.mxu0 %v11673_v27  ;;  %v11687_v32 = vld [vmem:[%s14247_s5 + $0xc0] sm:$0xff]  }
 0x350   : > { %v10659_v48 = vpop.f32.mrb[80].mxu1  ;;  %10765 = vmatpush3.bf16.msra.mxu1 %v11649_v43  ;;  %v6002_v43 = vrot.slane %v13328_v40, 2 }
 0x351   : > { %v10660_v50 = vpop.f32.mrb[81].mxu1  ;;  %10766 = vmatprep.subr.bf16.mxu1 %v11653_v46 }
 0x352   : > { %v10661_v59 = vadd.f32 %v10660_v50, %v10659_v48  ;;  %v10662_v60 = vpop.f32.mrb[82].mxu1  ;;  %8179 = vrot.lane.b32.xlu0 %v8178_v52, %s11930_s15  ;;  %10795 = vmatpush3.bf16.msra.mxu0 %v11676_v49  ;;  %v11674_v49 = vld [vmem:[%s14247_s5 + $0x108] sm:$0xff]   ;;  %v11681_v52 = vld [vmem:[#allocation3 + $0x1c] ss:$0 sps:$4 sm:$0xff]  }
 0x353   : > { %v10663_v62 = vpop.f32.mrb[83].mxu1  ;;  %10807 = vmatprep.subr.bf16.mxu0 %v11678_v57  ;;  %v6519_v57 = vrot.slane %v11675_v45, 1  ;;  %v8189_v63 = vshll.u32 %v11681_v52, 16 }
 0x354   : > { %v4925_v1 = vadd.f32 %v10661_v59, %v4884_v58  ;;  %v10664_v2 = vadd.f32 %v10663_v62, %v10662_v60  ;;  %10767 = vmatpush3.bf16.msra.mxu1 %v11654_v55  ;;  %v13546_v58 = vshll.u32 %v6002_v43, 16  ;;  %v8186_v62 = vshrl.u32 %v11681_v52, 16  ;;  %v11689_v52 = vld [vmem:[%s14247_s5 + $0x80] sm:$0xff]  }
 0x355   : > { %10768 = vmatprep.subr.bf16.mxu1 %v11657_v61  ;;  %v11677_v61 = vld [vmem:[%s14247_s5 + $0x110] sm:$0xff]  }
 0x356   : > { %v4931_v4 = vmax.f32 %v4925_v1, 0.0  ;;  %v4928_v44 = vadd.f32 %v10664_v2, %v4887_v0  ;;  %v8722_v0 = vshll.u32 %v11685_v42, 16 }
 0x358   : > { %v10115_v7 = vpack.c.bf16 %v4931_v4, %v4931_v4  ;;  %v4932_v8 = vmax.f32 %v4928_v44, 0.0  ;;  %10769 = vmatpush3.bf16.msra.mxu1 %v11658_v3 }
 0x359   : > { %10770 = vmatprep.subr.bf16.mxu1 %v11661_v5 }
 0x35a   : > { %v4942_v10 = vshll.u32 %v10115_v7, 16  ;;  %v4945_v13 = vshrl.u32 %v10115_v7, 16  ;;  %v10116_v39 = vpack.c.bf16 %v4932_v8, %v4932_v8  ;;  %v11679_v7 = vld [vmem:[%s14247_s5] sm:$0xff]   ;;  %v8188_v8 = vrot.slane %v8186_v62, 5  ;;  %v11690_v62 = vld [vmem:[%s14247_s5 + $0x10] sm:$0xff]  }
 0x35c   : > { %v4944_v18 = vrot.slane %v4942_v10, 5  ;;  %v4947_v19 = vrot.slane %v4945_v13, 4  ;;  %v4951_v21 = vshll.u32 %v10116_v39, 16  ;;  %10771 = vmatpush3.bf16.msra.mxu1 %v11662_v9  ;;  %v8191_v9 = vrot.slane %v8189_v63, 6 }
 0x35d   : > { %10772 = vmatprep.subr.bf16.mxu1 %v11665_v15  ;;  %v6123_v39 = vrot.slane %v13546_v58, 1 }
 0x35e   : > { %v4948_v25 = vor.u32 %v4947_v19, %v4944_v18  ;;  %v4961_v26 = vsel %vm13519_vm7, %v4944_v18, %v4960_v22  ;;  %v4953_v31 = vrot.slane %v4951_v21, 5  ;;  %v8192_v19 = vor.u32 %v8191_v9, %v8188_v8  ;;  %v11683_v21 = vld [vmem:[%s14247_s5 + $0x48] sm:$0xff]  }
 0x35f   : > { %4962 = vst [vmem:[#allocation3 + $0x1c] sm:$0x8] %v4961_v26  ;;  %v8724_v22 = vrot.slane %v8722_v0, 1 }
 0x360   : > { %v4949_v29 = vrot.slane %v4948_v25, 4  ;;  %10773 = vmatpush3.bf16.msra.mxu1 %v11666_v23  ;;  %v11682_v25 = vld [vmem:[%s14247_s5 + $0x118] sm:$0xff]   ;;  %8193 = vrot.lane.b32.xlu1 %v8192_v19, %s11930_s15  ;;  %v11700_v19 = vld [vmem:[%s14247_s5 + $0x20] sm:$0xff]  }
 0x361   : > { %v5980_v41 = vpop.permute.xlu1 %5979  ;;  %11064 = vmatprep.subr.bf16.mxu1 %v11931_v16 }
 0x362   : > { %v4954_v37 = vsel %vm4940_vm2, %v4949_v29, %v4953_v31  ;;  %v6011_v27 = vsel %vm1341_vm1, %v5965_v33, %v5980_v41  ;;  %v8720_v31 = vshrl.u32 %v11685_v42, 16 }
 0x363   : > { %4963 = vst.msk [vmem:[#allocation3 + $0x20] sm:$0xf] %vm1245_vm0, %v4954_v37  ;;  %v6108_v46 = vshll.u32 %v6011_v27, 16  ;;  %6381 = vmatmul.mubr.bf16.vlgmr.msra.gmra.mrb[92].mxu1 %v6099_v36  ;;  %v6106_v1 = vshrl.u32 %v6011_v27, 16  ;;  %v11684_v36 = vld [vmem:[%s14247_s5 + $0x8] sm:$0xff]  }
 0x364   : > { %11065 = vmatpush3.bf16.msra.mxu1 %v11670_v35  ;;  %v6001_v48 = vpop.permute.xlu0 %6000  ;;  %11072 = vmatprep.mubr.msk.bf16.mxu1 %vm11932_vm14, %v11931_v16  ;;  %v8725_v45 = vor.u32 %v8724_v22, %v8720_v31  ;;  %v11702_v22 = vld [vmem:[%s14247_s5 + $0x68] sm:$0xff]   ;;  %v11707_v31 = vld [vmem:[%s14247_s5 + $0xa0] sm:$0xff]  }
 0x365   : > { %v6014_v50 = vsel %vm1341_vm1, %v5986_v47, %v6001_v48  ;;  %11066 = vmatprep.subr.bf16.mxu1 %v11931_v16  ;;  %v6110_v59 = vrot.slane %v6108_v46, 1  ;;  %v6119_v46 = vshrl.u32 %v6002_v43, 16  ;;  %v11688_v47 = vld [vmem:[%s14247_s5 + $0x50] sm:$0xff]   ;;  %v11693_v43 = vld [vmem:[%s14247_s5 + $0xc8] sm:$0xff]  }
 0x366   : > { %v6114_v55 = vshll.u32 %v6014_v50, 16  ;;  %v6112_v2 = vshrl.u32 %v6014_v50, 16  ;;  %8726 = vrot.lane.b32.xlu1 %v8725_v45, %s11930_s15 }
 0x367   : > { %v6111_v15 = vor.u32 %v6110_v59, %v6106_v1  ;;  %v6124_v40 = vor.u32 %v6123_v39, %v6119_v46  ;;  %v11699_v39 = vld [vmem:[%s14247_s5 + $0x90] sm:$0xff]   ;;  %v11711_v46 = vld [vmem:[%s14247_s5 + $0xa8] sm:$0xff]  }
 0x368   : > { %v10681_v60 = vpop.f32.mrb[84].mxu0  ;;  %v6116_v3 = vrot.slane %v6114_v55, 1  ;;  %11067 = vmatpush3.bf16.msra.mxu1 %v11674_v49  ;;  %v6533_v4 = vpop.permute.xlu0 %6532 }
 0x369   : > { %v10682_v38 = vpop.f32.mrb[85].mxu0  ;;  %v6576_v5 = vsel %vm1341_vm1, %v6519_v57, %v6533_v4  ;;  %11068 = vmatprep.subr.bf16.mxu1 %v11931_v16  ;;  %v11695_v4 = vld [vmem:[%s14247_s5 + $0x88] sm:$0xff]  }
 0x36a   : > { %v10683_v44 = vadd.f32 %v10682_v38, %v10681_v60  ;;  %v10684_v6 = vpop.f32.mrb[86].mxu0  ;;  %v6117_v10 = vor.u32 %v6116_v3, %v6112_v2  ;;  %v13556_v13 = vld [vmem:[#allocation3 + $0x20] ss:$0 sps:$4 sm:$0xff]   ;;  %v6667_v24 = vrot.slane %v6576_v5, 1 }
 0x36b   : > { %v10685_v56 = vpop.f32.mrb[87].mxu0  ;;  %v11691_v23 = vld [vmem:[#allocation3 + $0x20] ss:$0 sps:$4 sm:$0xff]   ;;  %v8205_v26 = vshrl.u32 %v13556_v13, 16  ;;  %v8208_v53 = vshll.u32 %v13556_v13, 16 }
 0x36c   : > { %v10686_v18 = vadd.f32 %v10685_v56, %v10684_v6  ;;  %6420 = vmatprep.mubr.bf16.mxu0 %v6117_v10  ;;  %11069 = vmatpush3.bf16.msra.mxu1 %v11677_v61  ;;  %v11692_v29 = vld [vmem:[#allocation3 + $0x1c] sm:$0x78]   ;;  %v8751_v33 = vshrl.u32 %v11691_v23, 16  ;;  %v8754_v35 = vshll.u32 %v11691_v23, 16  ;;  %v5347_v57 = vadd.f32 %v10683_v44, %v13384_v54  ;;  %v11697_v6 = vld [vmem:[%s14247_s5 + $0xd0] sm:$0xff]   ;;  %v11703_v23 = vld [vmem:[%s14247_s5 + $0x98] sm:$0xff]  }
 0x36d   : > { %6421 = vmatmul.mubr.bf16.vlgmr.msra.gmra.mrb[96].mxu0 %v6111_v15  ;;  %v8207_v37 = vrot.slane %v8205_v26, 5  ;;  %v8210_v41 = vrot.slane %v8208_v53, 6  ;;  %11070 = vmatprep.subr.bf16.mxu1 %v11931_v16  ;;  %v8740_v55 = vshll.u32 %v11692_v29, 16  ;;  %v8738_v63 = vshrl.u32 %v11692_v29, 16  ;;  %v11698_v56 = vld [vmem:[%s14247_s5 + $0x60] sm:$0xff]   ;;  %v11706_v53 = vld [vmem:[%s14247_s5 + $0x70] sm:$0xff]  }
 0x36e   : > { %10808 = vmatpush3.bf16.msra.mxu0 %v11679_v7  ;;  %6926 = vmatprep.mubr.bf16.mxu0 %v6667_v24  ;;  %v8753_v42 = vrot.slane %v8751_v33, 5  ;;  %v8756_v48 = vrot.slane %v8754_v35, 6  ;;  %v5350_v60 = vadd.f32 %v10686_v18, %v13384_v54  ;;  %v11694_v54 = vld [vmem:[%s14247_s5 + $0x58] sm:$0xff]   ;;  %v5405_v10 = vld [vmem:[#allocation3 + $0x28] sm:$0x1]  ;;  %v11705_v24 = vld [vmem:[%s14247_s5 + $0xe0] sm:$0xff]  }
 0x36f   : > { %10809 = vmatprep.subr.bf16.mxu0 %v11683_v21  ;;  %v8211_v50 = vor.u32 %v8210_v41, %v8207_v37  ;;  %v8742_v0 = vrot.slane %v8740_v55, 1  ;;  %v11696_v7 = vld [vmem:[%s14247_s5 + $0x18] sm:$0xff]   ;;  %v6555_v26 = vrot.slane %v13349_v34, 1  ;;  %v11709_v35 = vld [vmem:[%s14247_s5 + $0xe8] sm:$0xff]  }
 0x370   : > { %v10703_v27 = vpop.f32.mrb[84].mxu1  ;;  %11071 = vmatpush3.bf16.msra.mxu1 %v11682_v25  ;;  %v8757_v3 = vor.u32 %v8756_v48, %v8753_v42  ;;  %v11701_v18 = vld [vmem:[%s14247_s5 + $0xd8] sm:$0xff]   ;;  %v11704_v25 = vld [vmem:[%s14247_s5 + $0x28] sm:$0xff]   ;;  %v6513_v48 = vpop.permute.xlu1 %6512 }
 0x371   : > { %v10704_v49 = vpop.f32.mrb[85].mxu1  ;;  %10829 = vmatprep.subr.bf16.mxu1 %v11687_v32  ;;  %8212 = vrot.lane.b32.xlu0 %v8211_v50, %s11930_s15  ;;  %v8743_v38 = vor.u32 %v8742_v0, %v8738_v63  ;;  %v11716_v63 = vld [vmem:[%s14247_s5 + $0x100] sm:$0xff]  }
 0x372   : > { %v10705_v58 = vadd.f32 %v10704_v49, %v10703_v27  ;;  %v10706_v59 = vpop.f32.mrb[86].mxu1  ;;  %10810 = vmatpush3.bf16.msra.mxu0 %v11684_v36  ;;  %8758 = vrot.lane.b32.xlu1 %v8757_v3, %s11930_s15  ;;  %v11708_v36 = vld [vmem:[%s14247_s5 + $0x30] sm:$0xff]   ;;  %v11710_v27 = vld [vmem:[%s14247_s5 + $0x78] sm:$0xff]  }
 0x373   : > { %v10707_v61 = vpop.f32.mrb[87].mxu1  ;;  %11073 = vmatmul.mubr.msk.bf16.vlgmr.msra.gmra.mrb[96].mxu1 %vm1341_vm1, %v6124_v40  ;;  %10811 = vmatprep.subr.bf16.mxu0 %v11688_v47  ;;  %v11911_v49 = vld [vmem:[#allocation3 + $0xc] sm:$0x3c]  }
 0x374   : > { %v5388_v1 = vadd.f32 %v10705_v58, %v5347_v57  ;;  %v10708_v2 = vadd.f32 %v10707_v61, %v10706_v59  ;;  %10830 = vmatpush3.bf16.msra.mxu1 %v11689_v52  ;;  %v7058_v50 = vrot.slane %v11911_v49, 1  ;;  %v11714_v52 = vld [vmem:[%s14247_s5 + $0xf0] sm:$0xff]   ;;  %v11713_v57 = vld [vmem:[%s14247_s5 + $0x38] sm:$0xff]  }
 0x375   : > { %10831 = vmatprep.subr.bf16.mxu1 %v11693_v43  ;;  %8744 = vrot.lane.b32.xlu0 %v8743_v38, %s11930_s15  ;;  %v11912_v59 = vld [vmem:[#allocation3 + $0x8] sm:$0x1e]   ;;  %v11720_v38 = vld [vmem:[%s14247_s5 + $0x40] sm:$0xff]  }
 0x376   : > { %v5394_v44 = vmax.f32 %v5388_v1, 0.0  ;;  %v5391_v5 = vadd.f32 %v10708_v2, %v5350_v60  ;;  %10812 = vmatpush3.bf16.msra.mxu0 %v11690_v62  ;;  %v6573_v40 = vsel %vm1341_vm1, %v11912_v59, %v6513_v48  ;;  %v11715_v43 = vld [vmem:[%s14247_s5 + $0xb0] sm:$0xff]   ;;  %v11717_v60 = vld [vmem:[%s14247_s5 + $0xf8] sm:$0xff]   ;;  %v6549_v1 = vpop.permute.xlu1 %6548 }
 0x377   : > { %10813 = vmatprep.subr.bf16.mxu0 %v11694_v54  ;;  %v6666_v0 = vrot.slane %v6573_v40, 1  ;;  %v11913_v2 = vld [vmem:[#allocation3 + $0xc] sm:$0x3c]   ;;  %v11718_v54 = vld [vmem:[%s14247_s5 + $0xb8] sm:$0xff]  }
 0x378   : > { %v10117_v8 = vpack.c.bf16 %v5394_v44, %v5394_v44  ;;  %v5395_v9 = vmax.f32 %v5391_v5, 0.0  ;;  %10832 = vmatpush3.bf16.msra.mxu1 %v11695_v4  ;;  %v6539_v3 = vrot.slane %v11913_v2, 1  ;;  %v11745_v49 = vld [vmem:[%s14247_s5 + $0x70] sm:$0xff]   ;;  %v11751_v2 = vld [vmem:[%s14247_s5 + $0x38] sm:$0xff]  }
 0x379   : > { %10833 = vmatprep.subr.bf16.mxu1 %v11697_v6  ;;  %v11719_v6 = vld [vmem:[%s14247_s5 + $0x108] sm:$0xff]  }
 0x37a   : > { %5404 = vst.msk [vmem:[#allocation3 + $0x24] sm:$0xf] %vm1245_vm0, %v10117_v8  ;;  %v10118_v15 = vpack.c.bf16 %v5395_v9, %v5395_v9  ;;  %10814 = vmatpush3.bf16.msra.mxu0 %v11696_v7  ;;  %v6579_v4 = vsel %vm1341_vm1, %v6539_v3, %v6549_v1  ;;  %v11721_v7 = vld [vmem:[%s14247_s5] sm:$0xff]   ;;  %v11723_v9 = vld [vmem:[%s14247_s5 + $0x48] sm:$0xff]   ;;  %vm14267_vm0 = vcmask 519170  }
 0x37b   : > { %10815 = vmatprep.subr.bf16.mxu0 %v11698_v56  ;;  %v6668_v8 = vrot.slane %v6579_v4, 1  ;;  %v11752_v1 = vld [vmem:[%s14247_s5 + $0xe8] sm:$0xff]   ;;  %v11914_v4 = vld [vmem:[#allocation3 + $0x10] sm:$0x3c]  }
 0x37c   : > { %v5406_v21 = vsel %vm13087_vm4, %v10118_v15, %v5405_v10  ;;  %10834 = vmatpush3.bf16.msra.mxu1 %v11699_v39  ;;  %v11722_v10 = vld [vmem:[%s14247_s5 + $0x110] sm:$0xff]   ;;  %v11724_v39 = vld [vmem:[%s14247_s5 + $0x8] sm:$0xff]  }
 0x37d   : > { %5407 = vst [vmem:[#allocation3 + $0x28] sm:$0x1] %v5406_v21  ;;  %10835 = vmatprep.subr.bf16.mxu1 %v11701_v18  ;;  %v11726_v15 = vld [vmem:[%s14247_s5 + $0x50] sm:$0xff]   ;;  %v11725_v18 = vld [vmem:[%s14247_s5 + $0x118] sm:$0xff]   ;;  %v11729_v21 = vld [vmem:[%s14247_s5 + $0xc0] sm:$0xff]  }
 0x37e   : > { %10816 = vmatpush3.bf16.msra.mxu0 %v11700_v19  ;;  %v11727_v19 = vld [vmem:[#allocation3 + $0x10] sm:$0x78]  }
 0x37f   : > { %10817 = vmatprep.subr.bf16.mxu0 %v11702_v22  ;;  %v11728_v22 = vld [vmem:[%s14247_s5 + $0x10] sm:$0xff]  }
 0x380   : > { %10836 = vmatpush3.bf16.msra.mxu1 %v11703_v23  ;;  %v6565_v29 = vpop.permute.xlu0 %6564  ;;  %v11731_v23 = vld [vmem:[%s14247_s5 + $0x58] sm:$0xff]  }
 0x381   : > { %v13642_v32 = vld [vmem:[#allocation3 + $0x24] ss:$0 sps:$4 sm:$0xff]   ;;  %v6582_v33 = vsel %vm1341_vm1, %v6555_v26, %v6565_v29  ;;  %10837 = vmatprep.subr.bf16.mxu1 %v11705_v24  ;;  %v11730_v24 = vld [vmem:[%s14247_s5 + $0x80] sm:$0xff]  }
 0x382   : > { %10818 = vmatpush3.bf16.msra.mxu0 %v11704_v25  ;;  %v6669_v34 = vrot.slane %v6582_v33, 1  ;;  %v8765_v37 = vshrl.u32 %v13642_v32, 16  ;;  %v8768_v41 = vshll.u32 %v13642_v32, 16  ;;  %v9853_v25 = vrot.slane %v11727_v19, 3  ;;  %v11733_v26 = vld [vmem:[%s14247_s5 + $0xc8] sm:$0xff]   ;;  %v11735_v29 = vld [vmem:[%s14247_s5 + $0x60] sm:$0xff]  }
 0x383   : > { %10819 = vmatprep.subr.bf16.mxu0 %v11706_v53  ;;  %v11732_v53 = vld [vmem:[%s14247_s5 + $0x18] sm:$0xff]   ;;  %v11737_v33 = vld [vmem:[%s14247_s5 + $0xd0] sm:$0xff]   ;;  %v11758_v19 = vld [vmem:[%s14247_s5 + $0x108] sm:$0xff]  }
 0x384   : > { %10838 = vmatpush3.bf16.msra.mxu1 %v11707_v31  ;;  %6966 = vmatprep.mubr.bf16.mxu1 %v6669_v34  ;;  %v7072_v45 = vpop.permute.xlu0 %7071  ;;  %v8767_v47 = vrot.slane %v8765_v37, 5  ;;  %v8770_v42 = vrot.slane %v8768_v41, 6  ;;  %v11734_v31 = vld [vmem:[%s14247_s5 + $0x88] sm:$0xff]   ;;  %v11736_v34 = vld [vmem:[%s14247_s5 + $0x20] sm:$0xff]   ;;  %v11739_v37 = vld [vmem:[%s14247_s5 + $0x90] sm:$0xff]   ;;  %v7057_v41 = vpop.permute.xlu1 %7056 }
 0x385   : > { %10839 = vmatprep.subr.bf16.mxu1 %v11709_v35  ;;  %v7116_v58 = vsel %vm1341_vm1, %v7058_v50, %v7072_v45  ;;  %v11738_v35 = vld [vmem:[#allocation3 + $0x14] sm:$0x3c]  }
 0x386   : > { %10820 = vmatpush3.bf16.msra.mxu0 %v11708_v36  ;;  %v8771_v55 = vor.u32 %v8770_v42, %v8767_v47  ;;  %v7209_v61 = vshrl.u32 %v7116_v58, 16  ;;  %v7212_v62 = vshll.u32 %v7116_v58, 16  ;;  %v11740_v36 = vld [vmem:[%s14247_s5 + $0x68] sm:$0xff]   ;;  %v11742_v45 = vld [vmem:[%s14247_s5 + $0xd8] sm:$0xff]   ;;  %v11747_v58 = vld [vmem:[%s14247_s5 + $0xe0] sm:$0xff]  }
 0x387   : > { %10821 = vmatprep.subr.bf16.mxu0 %v11710_v27  ;;  %v7094_v27 = vrot.slane %v11738_v35, 1  ;;  %v11741_v42 = vld [vmem:[%s14247_s5 + $0x28] sm:$0xff]  }
 0x388   : > { %10840 = vmatpush3.bf16.msra.mxu1 %v11711_v46  ;;  %8772 = vrot.lane.b32.xlu0 %v8771_v55, %s11930_s15  ;;  %v7211_v44 = vrot.slane %v7209_v61, 1  ;;  %v7214_v5 = vrot.slane %v7212_v62, 2  ;;  %v11680_v46 = vld [vmem:[#allocation3 + $0xc] sm:$0x1e]   ;;  %v11750_v62 = vld [vmem:[%s14247_s5 + $0x78] sm:$0xff]  }
 0x389   : > { %10841 = vmatprep.subr.bf16.mxu1 %v11714_v52  ;;  %v7113_v50 = vsel %vm1341_vm1, %v11680_v46, %v7057_v41  ;;  %v11764_v41 = vld [vmem:[%s14247_s5 + $0x48] sm:$0xff]  }
 0x38a   : > { %10822 = vmatpush3.bf16.msra.mxu0 %v11713_v57  ;;  %v7215_v56 = vor.u32 %v7214_v5, %v7211_v44  ;;  %v11744_v57 = vld [vmem:[%s14247_s5 + $0x98] sm:$0xff]   ;;  %v7205_v61 = vshll.u32 %v7113_v50, 16  ;;  %v7073_v44 = vrot.slane %v11914_v4, 1  ;;  %v11753_v5 = vld [vmem:[%s14247_s5 + $0xa8] sm:$0xff]  }
 0x38b   : > { %11076 = vmatprep.subr.bf16.mxu0 %v11931_v16  ;;  %v11781_v4 = vld [vmem:[%s14247_s5 + $0x28] sm:$0xff]  }
 0x38c   : > { %10842 = vmatpush3.bf16.msra.mxu1 %v11715_v43  ;;  %v11746_v43 = vld [vmem:[%s14247_s5 + $0x30] sm:$0xff]  }
 0x38d   : > { %6927 = vmatmul.mubr.bf16.vlgmr.msra.gmra.mrb[100].mxu0 %v6666_v0  ;;  %10843 = vmatprep.subr.bf16.mxu1 %v11717_v60  ;;  %v7202_v60 = vshrl.u32 %v7113_v50, 16  ;;  %v11748_v0 = vld [vmem:[%s14247_s5 + $0xa0] sm:$0xff]   ;;  %v11767_v50 = vld [vmem:[%s14247_s5 + $0x50] sm:$0xff]  }
 0x38e   : > { %11077 = vmatpush3.bf16.msra.mxu0 %v11716_v63  ;;  %11084 = vmatprep.mubr.msk.bf16.mxu0 %vm11932_vm14, %v11931_v16 }
 0x38f   : > { %11078 = vmatprep.subr.bf16.mxu0 %v11931_v16  ;;  %v7204_v3 = vrot.slane %v7202_v60, 1  ;;  %v11772_v60 = vld [vmem:[%s14247_s5 + $0x88] sm:$0xff]  }
 0x390   : > { %10844 = vmatpush3.bf16.msra.mxu1 %v11718_v54  ;;  %v7207_v54 = vrot.slane %v7205_v61, 2  ;;  %v11774_v61 = vld [vmem:[%s14247_s5 + $0xd0] sm:$0xff]  }
 0x391   : > { %10856 = vmatprep.subr.bf16.mxu1 %v11720_v38 }
 0x392   : > { %11079 = vmatpush3.bf16.msra.mxu0 %v11719_v6  ;;  %v11754_v6 = vld [vmem:[%s14247_s5 + $0xf0] sm:$0xff]  }
 0x393   : > { %6967 = vmatmul.mubr.bf16.vlgmr.msra.gmra.mrb[100].mxu1 %v6668_v8  ;;  %11080 = vmatprep.subr.bf16.mxu0 %v11931_v16  ;;  %v11755_v8 = vld [vmem:[%s14247_s5 + $0x100] sm:$0xff]  }
 0x394   : > { %10857 = vmatpush3.bf16.msra.mxu1 %v11721_v7  ;;  %7493 = vmatprep.mubr.bf16.mxu1 %v7215_v56  ;;  %v11756_v56 = vld [vmem:[%s14247_s5 + $0xb0] sm:$0xff]  }
 0x395   : > { %10858 = vmatprep.subr.bf16.mxu1 %v11723_v9  ;;  %v7208_v9 = vor.u32 %v7207_v54, %v7204_v3  ;;  %v11779_v3 = vld [vmem:[%s14247_s5 + $0x68] sm:$0xff]   ;;  %v11780_v54 = vld [vmem:[%s14247_s5 + $0x98] sm:$0xff]  }
 0x396   : > { %11081 = vmatpush3.bf16.msra.mxu0 %v11722_v10 }
 0x397   : > { %11082 = vmatprep.subr.bf16.mxu0 %v11931_v16 }
 0x398   : > { %10859 = vmatpush3.bf16.msra.mxu1 %v11724_v39 }
 0x399   : > { %10860 = vmatprep.subr.bf16.mxu1 %v11726_v15  ;;  %v11743_v15 = vld [vmem:[#allocation3 + $0x10] sm:$0x78]  }
 0x39a   : > { %11083 = vmatpush3.bf16.msra.mxu0 %v11725_v18  ;;  %v11757_v18 = vld [vmem:[%s14247_s5 + $0xf8] sm:$0xff]  }
 0x39b   : > { %10878 = vmatprep.subr.bf16.mxu0 %v11729_v21  ;;  %v11915_v21 = vld [vmem:[#allocation3 + $0x14] sm:$0x78]  }
 0x39c   : > { %10861 = vmatpush3.bf16.msra.mxu1 %v11728_v22  ;;  %v7110_v22 = vrot.slane %v11915_v21, 2 }
 0x39d   : > { %11085 = vmatmul.mubr.msk.bf16.vlgmr.msra.gmra.mrb[104].mxu0 %vm1341_vm1, %v9853_v25  ;;  %10862 = vmatprep.subr.bf16.mxu1 %v11731_v23 }
 0x39e   : > { %10879 = vmatpush3.bf16.msra.mxu0 %v11730_v24  ;;  %v11759_v24 = vld [vmem:[%s14247_s5 + $0xb8] sm:$0xff]   ;;  %v7231_v35 = vshrl.u32 %v7110_v22, 16 }
 0x39f   : > { %10880 = vmatprep.subr.bf16.mxu0 %v11733_v26 }
 0x3a0   : > { %10863 = vmatpush3.bf16.msra.mxu1 %v11732_v53  ;;  %v7631_v53 = vrot.slane %v11743_v15, 1  ;;  %v7233_v46 = vrot.slane %v7231_v35, 1  ;;  %v11918_v35 = vld [vmem:[#allocation3 + $0x14] sm:$0x78]  }
 0x3a1   : > { %10864 = vmatprep.subr.bf16.mxu1 %v11735_v29  ;;  %v7088_v38 = vpop.permute.xlu1 %7087  ;;  %v11761_v29 = vld [vmem:[%s14247_s5 + $0x40] sm:$0xff]  }
 0x3a2   : > { %10881 = vmatpush3.bf16.msra.mxu0 %v11734_v31  ;;  %v7119_v7 = vsel %vm1341_vm1, %v7073_v44, %v7088_v38  ;;  %v11760_v31 = vld [vmem:[%s14247_s5 + $0x110] sm:$0xff]   ;;  %v11782_v38 = vld [vmem:[%s14247_s5 + $0xe0] sm:$0xff]  }
 0x3a3   : > { %10882 = vmatprep.subr.bf16.mxu0 %v11737_v33  ;;  %v7216_v10 = vshrl.u32 %v7119_v7, 16  ;;  %v7219_v39 = vshll.u32 %v7119_v7, 16  ;;  %v11783_v44 = vld [vmem:[%s14247_s5 + $0x70] sm:$0xff]  }
 0x3a4   : > { %10865 = vmatpush3.bf16.msra.mxu1 %v11736_v34  ;;  %v7109_v47 = vpop.permute.xlu0 %7108  ;;  %v7234_v34 = vshll.u32 %v7110_v22, 16  ;;  %v11785_v7 = vld [vmem:[%s14247_s5 + $0x30] sm:$0xff]  }
 0x3a5   : > { %v7122_v48 = vsel %vm1341_vm1, %v7094_v27, %v7109_v47  ;;  %10866 = vmatprep.subr.bf16.mxu1 %v11740_v36  ;;  %v7218_v25 = vrot.slane %v7216_v10, 1  ;;  %v7221_v26 = vrot.slane %v7219_v39, 2  ;;  %v11762_v36 = vld [vmem:[%s14247_s5] sm:$0xff]   ;;  %v7625_v10 = vpop.permute.xlu1 %7624  ;;  %v11916_v39 = vld [vmem:[#allocation3 + $0x14] sm:$0x78]  }
 0x3a6   : > { %v7223_v52 = vshrl.u32 %v7122_v48, 16  ;;  %v7226_v55 = vshll.u32 %v7122_v48, 16  ;;  %10883 = vmatpush3.bf16.msra.mxu0 %v11739_v37  ;;  %v7236_v47 = vrot.slane %v7234_v34, 2  ;;  %v11765_v48 = vld [vmem:[%s14247_s5 + $0x8] sm:$0xff]   ;;  %v8166_v15 = vrot.slane %v11916_v39, 1 }
 0x3a7   : > { %10884 = vmatprep.subr.bf16.mxu0 %v11742_v45  ;;  %v7222_v37 = vor.u32 %v7221_v26, %v7218_v25  ;;  %v11763_v45 = vld [vmem:[%s14247_s5 + $0x118] sm:$0xff]   ;;  %v7651_v34 = vrot.slane %v11918_v35, 1 }
 0x3a8   : > { %v7225_v59 = vrot.slane %v7223_v52, 1  ;;  %v7228_v40 = vrot.slane %v7226_v55, 2  ;;  %10867 = vmatpush3.bf16.msra.mxu1 %v11741_v42  ;;  %v7645_v23 = vpop.permute.xlu0 %7644  ;;  %v11766_v42 = vld [vmem:[%s14247_s5 + $0xc0] sm:$0xff]   ;;  %v11917_v22 = vld [vmem:[#allocation3 + $0x10] sm:$0x3c]  }
 0x3a9   : > { %10868 = vmatprep.subr.bf16.mxu1 %v11745_v49  ;;  %v7686_v33 = vsel %vm1341_vm1, %v7631_v53, %v7645_v23  ;;  %v7667_v49 = vrot.slane %v13461_v12, 1  ;;  %v11768_v55 = vld [vmem:[%s14247_s5 + $0x80] sm:$0xff]   ;;  %v7683_v23 = vsel %vm1341_vm1, %v11917_v22, %v7625_v10  ;;  %v11793_v25 = vld [vmem:[%s14247_s5 + $0xf8] sm:$0xff]  }
 0x3aa   : > { %10885 = vmatpush3.bf16.msra.mxu0 %v11744_v57  ;;  %v7229_v63 = vor.u32 %v7228_v40, %v7225_v59  ;;  %v7777_v27 = vrot.slane %v7686_v33, 2  ;;  %v11770_v59 = vld [vmem:[%s14247_s5 + $0xc8] sm:$0xff]   ;;  %v11769_v40 = vld [vmem:[%s14247_s5 + $0x10] sm:$0xff]   ;;  %v7661_v33 = vpop.permute.xlu1 %7660  ;;  %v11819_v10 = vld [vmem:[%s14247_s5 + $0xd8] sm:$0xff]  }
 0x3ab   : > { %10886 = vmatprep.subr.bf16.mxu0 %v11747_v58  ;;  %v7237_v58 = vor.u32 %v7236_v47, %v7233_v46  ;;  %v11795_v46 = vld [vmem:[%s14247_s5 + $0x108] sm:$0xff]   ;;  %v11798_v47 = vld [vmem:[#allocation3 + $0x1c] sm:$0x78]   ;;  %v11749_v39 = vld [vmem:[#allocation3 + $0x14] sm:$0x3c]  }
 0x3ac   : > { %10869 = vmatpush3.bf16.msra.mxu1 %v11746_v43  ;;  %7533 = vmatprep.mubr.bf16.mxu0 %v7229_v63  ;;  %v11771_v43 = vld [vmem:[%s14247_s5 + $0x58] sm:$0xff]   ;;  %v11775_v63 = vld [vmem:[%s14247_s5 + $0x60] sm:$0xff]  }
 0x3ad   : > { %10870 = vmatprep.subr.bf16.mxu1 %v11750_v62  ;;  %v11773_v62 = vld [vmem:[%s14247_s5 + $0x18] sm:$0xff]   ;;  %v11823_v22 = vld [vmem:[%s14247_s5 + $0xe0] sm:$0xff]  }
 0x3ae   : > { %10887 = vmatpush3.bf16.msra.mxu0 %v11748_v0  ;;  %v11776_v0 = vld [vmem:[%s14247_s5 + $0x90] sm:$0xff]  }
 0x3af   : > { %10888 = vmatprep.subr.bf16.mxu0 %v11752_v1  ;;  %v11778_v1 = vld [vmem:[%s14247_s5 + $0xd8] sm:$0xff]  }
 0x3b0   : > { %10871 = vmatpush3.bf16.msra.mxu1 %v11751_v2  ;;  %v11777_v2 = vld [vmem:[%s14247_s5 + $0x20] sm:$0xff]  }
 0x3b1   : > { %11088 = vmatprep.subr.bf16.mxu1 %v11931_v16 }
 0x3b2   : > { %10889 = vmatpush3.bf16.msra.mxu0 %v11753_v5  ;;  %v11784_v5 = vld [vmem:[%s14247_s5 + $0xa0] sm:$0xff]  }
 0x3b3   : > { %7494 = vmatmul.mubr.bf16.vlgmr.msra.gmra.mrb[104].mxu1 %v7208_v9  ;;  %10890 = vmatprep.subr.bf16.mxu0 %v11754_v6  ;;  %v11786_v6 = vld [vmem:[%s14247_s5 + $0xe8] sm:$0xff]  }
 0x3b4   : > { %11089 = vmatpush3.bf16.msra.mxu1 %v11755_v8  ;;  %11096 = vmatprep.mubr.msk.bf16.mxu1 %vm11932_vm14, %v11931_v16  ;;  %v11787_v8 = vld [vmem:[%s14247_s5 + $0x78] sm:$0xff]  }
 0x3b5   : > { %11090 = vmatprep.subr.bf16.mxu1 %v11931_v16 }
 0x3b6   : > { %10891 = vmatpush3.bf16.msra.mxu0 %v11756_v56  ;;  %v11788_v56 = vld [vmem:[%s14247_s5 + $0xa8] sm:$0xff]  }
 0x3b7   : > { %10892 = vmatprep.subr.bf16.mxu0 %v11757_v18  ;;  %v11790_v18 = vld [vmem:[%s14247_s5 + $0xf0] sm:$0xff]  }
 0x3b8   : > { %11091 = vmatpush3.bf16.msra.mxu1 %v11758_v19  ;;  %v11789_v19 = vld [vmem:[%s14247_s5 + $0x38] sm:$0xff]  }
 0x3b9   : > { %11092 = vmatprep.subr.bf16.mxu1 %v11931_v16 }
 0x3ba   : > { %10893 = vmatpush3.bf16.msra.mxu0 %v11759_v24  ;;  %v11791_v24 = vld [vmem:[%s14247_s5 + $0xb0] sm:$0xff]  }
 0x3bb   : > { %10905 = vmatprep.subr.bf16.mxu0 %v11761_v29  ;;  %v11792_v29 = vld [vmem:[%s14247_s5 + $0x100] sm:$0xff]  }
 0x3bc   : > { %11093 = vmatpush3.bf16.msra.mxu1 %v11760_v31  ;;  %v7776_v31 = vrot.slane %v7683_v23, 2  ;;  %v11822_v23 = vld [vmem:[%s14247_s5 + $0x30] sm:$0xff]  }
 0x3bd   : > { %7534 = vmatmul.mubr.bf16.vlgmr.msra.gmra.mrb[108].mxu0 %v7222_v37  ;;  %11094 = vmatprep.subr.bf16.mxu1 %v11931_v16  ;;  %v11796_v37 = vld [vmem:[%s14247_s5 + $0x40] sm:$0xff]  }
 0x3be   : > { %10906 = vmatpush3.bf16.msra.mxu0 %v11762_v36  ;;  %8036 = vmatprep.mubr.bf16.mxu0 %v7777_v27  ;;  %v11794_v36 = vld [vmem:[%s14247_s5 + $0xb8] sm:$0xff]  }
 0x3bf   : > { %10907 = vmatprep.subr.bf16.mxu0 %v11764_v41  ;;  %v7689_v41 = vsel %vm1341_vm1, %v7651_v34, %v7661_v33  ;;  %v11827_v34 = vld [vmem:[%s14247_s5 + $0xe8] sm:$0xff]  }
 0x3c0   : > { %11095 = vmatpush3.bf16.msra.mxu1 %v11763_v45  ;;  %v7677_v52 = vpop.permute.xlu0 %7676 }
 0x3c1   : > { %v7692_v57 = vsel %vm1341_vm1, %v7667_v49, %v7677_v52  ;;  %10927 = vmatprep.subr.bf16.mxu1 %v11766_v42  ;;  %v11797_v42 = vld [vmem:[%s14247_s5] sm:$0xff]   ;;  %v11800_v49 = vld [vmem:[%s14247_s5 + $0x48] sm:$0xff]   ;;  %v11799_v52 = vld [vmem:[%s14247_s5 + $0x110] sm:$0xff]  }
 0x3c2   : > { %10908 = vmatpush3.bf16.msra.mxu0 %v11765_v48  ;;  %v7779_v12 = vrot.slane %v7692_v57, 2  ;;  %v7778_v48 = vrot.slane %v7689_v41, 2 }
 0x3c3   : > { %11097 = vmatmul.mubr.msk.bf16.vlgmr.msra.gmra.mrb[108].mxu1 %vm1341_vm1, %v7237_v58  ;;  %10909 = vmatprep.subr.bf16.mxu0 %v11767_v50  ;;  %v11801_v58 = vld [vmem:[%s14247_s5 + $0x8] sm:$0xff]  }
 0x3c4   : > { %10928 = vmatpush3.bf16.msra.mxu1 %v11768_v55  ;;  %8076 = vmatprep.mubr.bf16.mxu1 %v7779_v12  ;;  %v8180_v9 = vpop.permute.xlu0 %8179  ;;  %v8200_v55 = vrot.slane %v11798_v47, 1  ;;  %v11804_v12 = vld [vmem:[%s14247_s5 + $0x50] sm:$0xff]  }
 0x3c5   : > { %10929 = vmatprep.subr.bf16.mxu1 %v11770_v59  ;;  %v8220_v21 = vsel %vm1341_vm1, %v8166_v15, %v8180_v9  ;;  %v11816_v9 = vld [vmem:[%s14247_s5 + $0x90] sm:$0xff]   ;;  %v11818_v15 = vld [vmem:[%s14247_s5 + $0x28] sm:$0xff]  }
 0x3c6   : > { %10910 = vmatpush3.bf16.msra.mxu0 %v11769_v40  ;;  %v8313_v26 = vshrl.u32 %v8220_v21, 16  ;;  %v8316_v53 = vshll.u32 %v8220_v21, 16  ;;  %v11820_v21 = vld [vmem:[%s14247_s5 + $0x98] sm:$0xff]  }
 0x3c7   : > { %10911 = vmatprep.subr.bf16.mxu0 %v11771_v43 }
 0x3c8   : > { %10930 = vmatpush3.bf16.msra.mxu1 %v11772_v60  ;;  %v8315_v27 = vrot.slane %v8313_v26, 2  ;;  %v8318_v45 = vrot.slane %v8316_v53, 3  ;;  %v11803_v60 = vld [vmem:[%s14247_s5 + $0x118] sm:$0xff]  }
 0x3c9   : > { %10931 = vmatprep.subr.bf16.mxu1 %v11774_v61  ;;  %v11807_v61 = vld [vmem:[%s14247_s5 + $0xc0] sm:$0xff]   ;;  %v11825_v53 = vld [vmem:[%s14247_s5 + $0x78] sm:$0xff]  }
 0x3ca   : > { %10912 = vmatpush3.bf16.msra.mxu0 %v11773_v62  ;;  %v8319_v50 = vor.u32 %v8318_v45, %v8315_v27 }
 0x3cb   : > { %10913 = vmatprep.subr.bf16.mxu0 %v11775_v63 }
 0x3cc   : > { %10932 = vmatpush3.bf16.msra.mxu1 %v11776_v0  ;;  %v11806_v0 = vld [vmem:[%s14247_s5 + $0x10] sm:$0xff]  }
 0x3cd   : > { %10933 = vmatprep.subr.bf16.mxu1 %v11778_v1  ;;  %v11809_v1 = vld [vmem:[%s14247_s5 + $0x58] sm:$0xff]  }
 0x3ce   : > { %10914 = vmatpush3.bf16.msra.mxu0 %v11777_v2  ;;  %v11808_v2 = vld [vmem:[%s14247_s5 + $0x80] sm:$0xff]  }
 0x3cf   : > { %10915 = vmatprep.subr.bf16.mxu0 %v11779_v3 }
 0x3d0   : > { %10934 = vmatpush3.bf16.msra.mxu1 %v11780_v54  ;;  %v11805_v54 = vld [vmem:[#allocation3 + $0x1c] ss:$0 sps:$4 sm:$0xff]  }
 0x3d1   : > { %10935 = vmatprep.subr.bf16.mxu1 %v11782_v38  ;;  %v11811_v38 = vld [vmem:[%s14247_s5 + $0xc8] sm:$0xff]  }
 0x3d2   : > { %10916 = vmatpush3.bf16.msra.mxu0 %v11781_v4  ;;  %v11810_v4 = vld [vmem:[%s14247_s5 + $0x18] sm:$0xff]  }
 0x3d3   : > { %10917 = vmatprep.subr.bf16.mxu0 %v11783_v44  ;;  %v11813_v44 = vld [vmem:[%s14247_s5 + $0x60] sm:$0xff]  }
 0x3d4   : > { %10936 = vmatpush3.bf16.msra.mxu1 %v11784_v5  ;;  %v11812_v5 = vld [vmem:[%s14247_s5 + $0x88] sm:$0xff]  }
 0x3d5   : > { %10937 = vmatprep.subr.bf16.mxu1 %v11786_v6  ;;  %v11815_v6 = vld [vmem:[%s14247_s5 + $0xd0] sm:$0xff]  }
 0x3d6   : > { %10918 = vmatpush3.bf16.msra.mxu0 %v11785_v7  ;;  %v11814_v7 = vld [vmem:[%s14247_s5 + $0x20] sm:$0xff]  }
 0x3d7   : > { %10919 = vmatprep.subr.bf16.mxu0 %v11787_v8  ;;  %v11817_v8 = vld [vmem:[%s14247_s5 + $0x68] sm:$0xff]  }
 0x3d8   : > { %10938 = vmatpush3.bf16.msra.mxu1 %v11788_v56  ;;  %v8165_v56 = vpop.permute.xlu1 %8164 }
 0x3d9   : > { %10939 = vmatprep.subr.bf16.mxu1 %v11790_v18  ;;  %v11821_v18 = vld [vmem:[%s14247_s5 + $0x70] sm:$0xff]  }
 0x3da   : > { %10920 = vmatpush3.bf16.msra.mxu0 %v11789_v19  ;;  %v8217_v19 = vsel %vm1341_vm1, %v11749_v39, %v8165_v56  ;;  %v8763_v39 = vrot.slane %v13642_v32, 5  ;;  %v11842_v32 = vld [vmem:[%s14247_s5 + $0x50] sm:$0xff]  }
 0x3db   : > { %11100 = vmatprep.subr.bf16.mxu0 %v11931_v16 }
 0x3dc   : > { %10940 = vmatpush3.bf16.msra.mxu1 %v11791_v24  ;;  %v8306_v24 = vshrl.u32 %v8217_v19, 16  ;;  %v8194_v45 = vpop.permute.xlu1 %8193 }
 0x3dd   : > { %8037 = vmatmul.mubr.bf16.vlgmr.msra.gmra.mrb[112].mxu0 %v7776_v31  ;;  %10941 = vmatprep.subr.bf16.mxu1 %v11793_v25  ;;  %v8309_v25 = vshll.u32 %v8217_v19, 16  ;;  %v11824_v31 = vld [vmem:[%s14247_s5 + $0xa0] sm:$0xff]  }
 0x3de   : > { %11101 = vmatpush3.bf16.msra.mxu0 %v11792_v29  ;;  %11108 = vmatprep.mubr.msk.bf16.mxu0 %vm11932_vm14, %v11931_v16  ;;  %v8308_v41 = vrot.slane %v8306_v24, 2  ;;  %v11841_v19 = vld [vmem:[%s14247_s5 + $0xc0] sm:$0xff]  }
 0x3df   : > { %11102 = vmatprep.subr.bf16.mxu0 %v11931_v16  ;;  %v8311_v27 = vrot.slane %v8309_v25, 3  ;;  %v11845_v25 = vld [vmem:[%s14247_s5 + $0xc8] sm:$0xff]  }
 0x3e0   : > { %10942 = vmatpush3.bf16.msra.mxu1 %v11794_v36 }
 0x3e1   : > { %10954 = vmatprep.subr.bf16.mxu1 %v11796_v37  ;;  %v11826_v37 = vld [vmem:[%s14247_s5 + $0x38] sm:$0xff]  }
 0x3e2   : > { %11103 = vmatpush3.bf16.msra.mxu0 %v11795_v46  ;;  %v11919_v46 = vld [vmem:[#allocation3 + $0x18] sm:$0x78]  }
 0x3e3   : > { %8077 = vmatmul.mubr.bf16.vlgmr.msra.gmra.mrb[112].mxu1 %v7778_v48  ;;  %11104 = vmatprep.subr.bf16.mxu0 %v11931_v16  ;;  %v8213_v57 = vpop.permute.xlu0 %8212  ;;  %v8181_v47 = vrot.slane %v11919_v46, 1  ;;  %v11829_v48 = vld [vmem:[%s14247_s5 + $0xf0] sm:$0xff]  }
 0x3e4   : > { %10955 = vmatpush3.bf16.msra.mxu1 %v11797_v42  ;;  %8597 = vmatprep.mubr.bf16.mxu1 %v8319_v50  ;;  %v8226_v59 = vsel %vm1341_vm1, %v8200_v55, %v8213_v57  ;;  %v11828_v42 = vld [vmem:[%s14247_s5 + $0xa8] sm:$0xff]   ;;  %v11830_v50 = vld [vmem:[%s14247_s5 + $0x100] sm:$0xff]   ;;  %v11831_v55 = vld [vmem:[%s14247_s5 + $0xb0] sm:$0xff]  }
 0x3e5   : > { %10956 = vmatprep.subr.bf16.mxu1 %v11800_v49  ;;  %v8327_v40 = vshrl.u32 %v8226_v59, 16  ;;  %v8330_v43 = vshll.u32 %v8226_v59, 16  ;;  %v8223_v49 = vsel %vm1341_vm1, %v8181_v47, %v8194_v45  ;;  %v11802_v59 = vld [vmem:[#allocation3 + $0x1c] ss:$0 sps:$4 sm:$0xff]  }
 0x3e6   : > { %11105 = vmatpush3.bf16.msra.mxu0 %v11799_v52  ;;  %v8312_v52 = vor.u32 %v8311_v27, %v8308_v41  ;;  %v8320_v57 = vshrl.u32 %v8223_v49, 16  ;;  %v11850_v27 = vld [vmem:[%s14247_s5 + $0x60] sm:$0xff]  }
 0x3e7   : > { %11106 = vmatprep.subr.bf16.mxu0 %v11931_v16  ;;  %v8329_v62 = vrot.slane %v8327_v40, 2  ;;  %v8332_v63 = vrot.slane %v8330_v43, 3  ;;  %v11833_v40 = vld [vmem:[%s14247_s5 + $0x108] sm:$0xff]   ;;  %v8214_v43 = vrot.slane %v13556_v13, 6  ;;  %v11835_v13 = vld [vmem:[%s14247_s5 + $0x110] sm:$0xff]  }
 0x3e8   : > { %10957 = vmatpush3.bf16.msra.mxu1 %v11801_v58  ;;  %v8323_v58 = vshll.u32 %v8223_v49, 16  ;;  %v11853_v49 = vld [vmem:[%s14247_s5 + $0xd8] sm:$0xff]  }
 0x3e9   : > { %10958 = vmatprep.subr.bf16.mxu1 %v11804_v12  ;;  %v8333_v3 = vor.u32 %v8332_v63, %v8329_v62  ;;  %v11832_v12 = vld [vmem:[%s14247_s5 + $0xf8] sm:$0xff]   ;;  %v8322_v62 = vrot.slane %v8320_v57, 2 }
 0x3ea   : > { %11107 = vmatpush3.bf16.msra.mxu0 %v11803_v60  ;;  %v8745_v60 = vpop.permute.xlu0 %8744  ;;  %v8325_v63 = vrot.slane %v8323_v58, 3  ;;  %v11855_v57 = vld [vmem:[%s14247_s5 + $0x98] sm:$0xff]   ;;  %v11857_v58 = vld [vmem:[%s14247_s5 + $0xe0] sm:$0xff]  }
 0x3eb   : > { %10976 = vmatprep.subr.bf16.mxu0 %v11807_v61  ;;  %v11834_v61 = vld [vmem:[%s14247_s5 + $0xb8] sm:$0xff]  }
 0x3ec   : > { %10959 = vmatpush3.bf16.msra.mxu1 %v11806_v0  ;;  %v8731_v0 = vrot.slane %v11802_v59, 5 }
 0x3ed   : > { %11109 = vmatmul.mubr.msk.bf16.vlgmr.msra.gmra.mrb[116].mxu0 %vm1341_vm1, %v11805_v54  ;;  %10960 = vmatprep.subr.bf16.mxu1 %v11809_v1  ;;  %v11836_v1 = vld [vmem:[%s14247_s5 + $0x40] sm:$0xff]   ;;  %v8335_v54 = vshrl.u32 %v8214_v43, 16 }
 0x3ee   : > { %10977 = vmatpush3.bf16.msra.mxu0 %v11808_v2  ;;  %8637 = vmatprep.mubr.bf16.mxu0 %v8333_v3  ;;  %v8784_v2 = vsel %vm1341_vm1, %v8731_v0, %v8745_v60  ;;  %v11860_v0 = vld [vmem:[%s14247_s5 + $0x30] sm:$0xff]  }
 0x3ef   : > { %10978 = vmatprep.subr.bf16.mxu0 %v11811_v38  ;;  %v8338_v38 = vshll.u32 %v8214_v43, 16  ;;  %v11858_v43 = vld [vmem:[%s14247_s5 + $0x70] sm:$0xff]  }
 0x3f0   : > { %10961 = vmatpush3.bf16.msra.mxu1 %v11810_v4 }
 0x3f1   : > { %10962 = vmatprep.subr.bf16.mxu1 %v11813_v44  ;;  %v11837_v44 = vld [vmem:[%s14247_s5] sm:$0xff]  }
 0x3f2   : > { %10979 = vmatpush3.bf16.msra.mxu0 %v11812_v5  ;;  %v8326_v5 = vor.u32 %v8325_v63, %v8322_v62  ;;  %v11861_v62 = vld [vmem:[%s14247_s5 + $0xe8] sm:$0xff]  }
 0x3f3   : > { %10980 = vmatprep.subr.bf16.mxu0 %v11815_v6 }
 0x3f4   : > { %10963 = vmatpush3.bf16.msra.mxu1 %v11814_v7  ;;  %v11839_v7 = vld [vmem:[%s14247_s5 + $0x48] sm:$0xff]  }
 0x3f5   : > { %10964 = vmatprep.subr.bf16.mxu1 %v11817_v8  ;;  %v8875_v8 = vrot.slane %v8784_v2, 3  ;;  %v8727_v2 = vpop.permute.xlu1 %8726 }
 0x3f6   : > { %10981 = vmatpush3.bf16.msra.mxu0 %v11816_v9 }
 0x3f7   : > { %10982 = vmatprep.subr.bf16.mxu0 %v11819_v10  ;;  %v11838_v10 = vld [vmem:[%s14247_s5 + $0x118] sm:$0xff]  }
 0x3f8   : > { %10965 = vmatpush3.bf16.msra.mxu1 %v11818_v15  ;;  %v10725_v26 = vpop.f32.mrb[88].mxu0  ;;  %v8337_v15 = vrot.slane %v8335_v54, 2  ;;  %v11920_v54 = vld [vmem:[#allocation3 + $0x18] sm:$0x78]  }
 0x3f9   : > { %10966 = vmatprep.subr.bf16.mxu1 %v11821_v18  ;;  %v10726_v29 = vpop.f32.mrb[89].mxu0  ;;  %v8340_v18 = vrot.slane %v8338_v38, 3  ;;  %v8781_v38 = vsel %vm1341_vm1, %v11920_v54, %v8727_v2 }
 0x3fa   : > { %10983 = vmatpush3.bf16.msra.mxu0 %v11820_v21  ;;  %v14013_v33 = vadd.f32 %v10726_v29, %v10725_v26  ;;  %v10728_v35 = vpop.f32.mrb[90].mxu0  ;;  %v8773_v9 = vpop.permute.xlu0 %8772  ;;  %v11840_v21 = vld [vmem:[%s14247_s5 + $0x8] sm:$0xff]   ;;  %v11846_v29 = vld [vmem:[%s14247_s5 + $0x58] sm:$0xff]  }
 0x3fb   : > { %10984 = vmatprep.subr.bf16.mxu0 %v11823_v22  ;;  %v10729_v36 = vpop.f32.mrb[91].mxu0  ;;  %v8790_v22 = vsel %vm1341_vm1, %v8763_v39, %v8773_v9  ;;  %v8341_v24 = vor.u32 %v8340_v18, %v8337_v15  ;;  %v14098_v35 = vld [vmem:[%s14248_s6] ss:$0 sm:$0xff]  ;;  %v11870_v39 = vld [vmem:[%s14247_s5 + $0x108] sm:$0xff]   ;;  %v11871_v18 = vld [vmem:[%s14247_s5 + $0x110] sm:$0xff]  }
 0x3fc   : > { %10967 = vmatpush3.bf16.msra.mxu1 %v11822_v23  ;;  %v11843_v23 = vld [vmem:[%s14247_s5 + $0x80] sm:$0xff]   ;;  %v8877_v26 = vrot.slane %v8790_v22, 3  ;;  %v5835_v45 = vadd.f32 %v14013_v33, %v14098_v35 }
 0x3fd   : > { %10968 = vmatprep.subr.bf16.mxu1 %v11825_v53  ;;  %v11844_v53 = vld [vmem:[%s14247_s5 + $0x10] sm:$0xff]   ;;  %v11852_v33 = vld [vmem:[%s14247_s5 + $0x20] sm:$0xff]  }
 0x3fe   : > { %10985 = vmatpush3.bf16.msra.mxu0 %v11824_v31  ;;  %v11847_v31 = vld [vmem:[%s14247_s5 + $0x88] sm:$0xff]  }
 0x3ff   : > { %10986 = vmatprep.subr.bf16.mxu0 %v11827_v34  ;;  %v11849_v34 = vld [vmem:[%s14247_s5 + $0xd0] sm:$0xff]  }
 0x400   : > { %10969 = vmatpush3.bf16.msra.mxu1 %v11826_v37  ;;  %v11848_v37 = vld [vmem:[%s14247_s5 + $0x18] sm:$0xff]  }
 0x401   : > { %11112 = vmatprep.subr.bf16.mxu1 %v11931_v16 }
 0x402   : > { %10987 = vmatpush3.bf16.msra.mxu0 %v11828_v42  ;;  %v11851_v42 = vld [vmem:[%s14247_s5 + $0x90] sm:$0xff]  }
 0x403   : > { %8598 = vmatmul.mubr.bf16.vlgmr.msra.gmra.mrb[116].mxu1 %v8312_v52  ;;  %10988 = vmatprep.subr.bf16.mxu0 %v11829_v48  ;;  %v11854_v52 = vld [vmem:[%s14247_s5 + $0x68] sm:$0xff]  }
 0x404   : > { %11113 = vmatpush3.bf16.msra.mxu1 %v11830_v50  ;;  %11120 = vmatprep.mubr.msk.bf16.mxu1 %vm11932_vm14, %v11931_v16 }
 0x405   : > { %11114 = vmatprep.subr.bf16.mxu1 %v11931_v16 }
 0x406   : > { %10989 = vmatpush3.bf16.msra.mxu0 %v11831_v55 }
 0x407   : > { %10990 = vmatprep.subr.bf16.mxu0 %v11832_v12  ;;  %v11856_v12 = vld [vmem:[%s14247_s5 + $0x28] sm:$0xff]  }
 0x408   : > { %11115 = vmatpush3.bf16.msra.mxu1 %v11833_v40  ;;  %v14055_v3 = vpop.f32.mrb[92].mxu0  ;;  %v5922_v40 = vld [vmem:[%s14127_s8] sm:$0xf] }
 0x409   : > { %11116 = vmatprep.subr.bf16.mxu1 %v11931_v16  ;;  %v11062_v4 = vpop.f32.mrb[93].mxu0 }
 0x40a   : > { %10991 = vmatpush3.bf16.msra.mxu0 %v11834_v61  ;;  %v5917_v6 = vpop.f32.mrb[94].mxu0  ;;  %v11859_v61 = vld [vmem:[%s14247_s5 + $0xa0] sm:$0xff]   ;;  %v11866_v4 = vld [vmem:[%s14247_s5 + $0xb0] sm:$0xff]  }
 0x40b   : > { %11003 = vmatprep.subr.bf16.mxu0 %v11836_v1  ;;  %v11063_v56 = vpop.f32.mrb[95].mxu0  ;;  %v11862_v1 = vld [vmem:[%s14247_s5 + $0x78] sm:$0xff]   ;;  %v8874_v6 = vrot.slane %v8781_v38, 3 }
 0x40c   : > { %11117 = vmatpush3.bf16.msra.mxu1 %v11835_v13  ;;  %v11863_v13 = vld [vmem:[%s14247_s5 + $0xa8] sm:$0xff]   ;;  %v11869_v56 = vld [vmem:[%s14247_s5 + $0xb8] sm:$0xff]  }
 0x40d   : > { %8638 = vmatmul.mubr.bf16.vlgmr.msra.gmra.mrb[120].mxu0 %v8326_v5  ;;  %11118 = vmatprep.subr.bf16.mxu1 %v11931_v16  ;;  %v11867_v5 = vld [vmem:[%s14247_s5 + $0x100] sm:$0xff]  }
 0x40e   : > { %11004 = vmatpush3.bf16.msra.mxu0 %v11837_v44  ;;  %9134 = vmatprep.mubr.bf16.mxu0 %v8875_v8  ;;  %v11868_v44 = vld [vmem:[%s14247_s5 + $0xf8] sm:$0xff]   ;;  %v11921_v8 = vld [vmem:[#allocation3 + $0x20] ss:$0 sps:$4 sm:$0xff]  }
 0x40f   : > { %11005 = vmatprep.subr.bf16.mxu0 %v11839_v7  ;;  %v8759_v7 = vpop.permute.xlu1 %8758  ;;  %v8749_v9 = vrot.slane %v11921_v8, 5 }
 0x410   : > { %11119 = vmatpush3.bf16.msra.mxu1 %v11838_v10 }
 0x411   : > { %11025 = vmatprep.subr.bf16.mxu1 %v11841_v19  ;;  %v8787_v10 = vsel %vm1341_vm1, %v8749_v9, %v8759_v7  ;;  %v7024_v7 = vld [vmem:[%s14127_s8 + $0x8] sm:$0x7] }
 0x412   : > { %11006 = vmatpush3.bf16.msra.mxu0 %v11840_v21  ;;  %v8876_v15 = vrot.slane %v8787_v10, 3  ;;  %v11872_v21 = vld [vmem:[%s14247_s5 + $0x118] sm:$0xff]  }
 0x413   : > { %11121 = vmatmul.mubr.msk.bf16.vlgmr.msra.gmra.mrb[120].mxu1 %vm1341_vm1, %v8341_v24  ;;  %11007 = vmatprep.subr.bf16.mxu0 %v11842_v32  ;;  %v11873_v32 = vld [vmem:[#allocation3 + $0x24] sm:$0x1e]  }
 0x414   : > { %11026 = vmatpush3.bf16.msra.mxu1 %v11843_v23  ;;  %9174 = vmatprep.mubr.bf16.mxu1 %v8877_v26  ;;  %v10035_v26 = vrot.slane %v11873_v32, 9 }
 0x415   : > { %11027 = vmatprep.subr.bf16.mxu1 %v11845_v25 }
 0x416   : > { %11008 = vmatpush3.bf16.msra.mxu0 %v11844_v53  ;;  %v10747_v36 = vpop.f32.mrb[88].mxu1 }
 0x417   : > { %v10748_v41 = vpop.f32.mrb[89].mxu1  ;;  %11009 = vmatprep.subr.bf16.mxu0 %v11846_v29 }
 0x418   : > { %v10749_v46 = vadd.f32 %v10748_v41, %v10747_v36  ;;  %11028 = vmatpush3.bf16.msra.mxu1 %v11847_v31  ;;  %v10750_v47 = vpop.f32.mrb[90].mxu1 }
 0x419   : > { %v10751_v48 = vpop.f32.mrb[91].mxu1  ;;  %11029 = vmatprep.subr.bf16.mxu1 %v11849_v34 }
 0x41a   : > { %v5875_v50 = vadd.f32 %v10749_v46, %v5835_v45  ;;  %11010 = vmatpush3.bf16.msra.mxu0 %v11848_v37 }
 0x41b   : > { %11011 = vmatprep.subr.bf16.mxu0 %v11850_v27 }
 0x41c   : > { %v5915_v55 = vadd.f32 %v14055_v3, %v5875_v50  ;;  %11030 = vmatpush3.bf16.msra.mxu1 %v11851_v42  ;;  %v11864_v3 = vld [vmem:[%s14247_s5 + $0x38] sm:$0xff]  }
 0x41d   : > { %11031 = vmatprep.subr.bf16.mxu1 %v11853_v49 }
 0x41e   : > { %v5920_v59 = vmax.f32 %v5915_v55, 0.0  ;;  %11012 = vmatpush3.bf16.msra.mxu0 %v11852_v33 }
 0x41f   : > { %11013 = vmatprep.subr.bf16.mxu0 %v11854_v52 }
 0x420   : > { %v5921_v60 = vpack.c.bf16 %v5920_v59, %v5920_v59  ;;  %11032 = vmatpush3.bf16.msra.mxu1 %v11855_v57 }
 0x421   : > { %11033 = vmatprep.subr.bf16.mxu1 %v11857_v58 }
 0x422   : > { %v5923_v63 = vsel %vm13418_vm10, %v5921_v60, %v5922_v40  ;;  %11014 = vmatpush3.bf16.msra.mxu0 %v11856_v12 }
 0x423   : > { %5924 = vst [vmem:[%s14127_s8] sm:$0xf] %v5923_v63  ;;  %11015 = vmatprep.subr.bf16.mxu0 %v11858_v43 }
 0x424   : > { %11034 = vmatpush3.bf16.msra.mxu1 %v11859_v61 }
 0x425   : > { %11035 = vmatprep.subr.bf16.mxu1 %v11861_v62 }
 0x426   : > { %11016 = vmatpush3.bf16.msra.mxu0 %v11860_v0 }
 0x427   : > { %11017 = vmatprep.subr.bf16.mxu0 %v11862_v1 }
 0x428   : > { %11036 = vmatpush3.bf16.msra.mxu1 %v11863_v13 }
 0x429   : > { %11037 = vmatprep.subr.bf16.mxu1 %v11865_v51 }
 0x42a   : > { %11018 = vmatpush3.bf16.msra.mxu0 %v11864_v3  ;;  %v6484_v55 = vld [vmem:[%s14127_s8] sm:$0x8] }
 0x42b   : > { %11124 = vmatprep.subr.bf16.mxu0 %v11931_v16 }
 0x42c   : > { %11038 = vmatpush3.bf16.msra.mxu1 %v11866_v4 }
 0x42d   : > { %9135 = vmatmul.mubr.bf16.vlgmr.msra.gmra.mrb[124].mxu0 %v8874_v6  ;;  %11039 = vmatprep.subr.bf16.mxu1 %v11868_v44 }
 0x42e   : > { %11125 = vmatpush3.bf16.msra.mxu0 %v11867_v5  ;;  %11132 = vmatprep.mubr.msk.bf16.mxu0 %vm11932_vm14, %v11931_v16 }
 0x42f   : > { %11126 = vmatprep.subr.bf16.mxu0 %v11931_v16 }
 0x430   : > { %11040 = vmatpush3.bf16.msra.mxu1 %v11869_v56 }
 0x432   : > { %11127 = vmatpush3.bf16.msra.mxu0 %v11870_v39 }
 0x433   : > { %9175 = vmatmul.mubr.bf16.vlgmr.msra.gmra.mrb[124].mxu1 %v8876_v15  ;;  %11128 = vmatprep.subr.bf16.mxu0 %v11931_v16 }
 0x436   : > { %11129 = vmatpush3.bf16.msra.mxu0 %v11871_v18  ;;  %v10774_v19 = vpop.f32.mrb[92].mxu1 }
 0x437   : > { %v10775_v22 = vpop.f32.mrb[93].mxu1  ;;  %11130 = vmatprep.subr.bf16.mxu0 %v11931_v16 }
 0x438   : > { %v10776_v23 = vadd.f32 %v10775_v22, %v10774_v19  ;;  %v10777_v24 = vpop.f32.mrb[94].mxu1 }
 0x439   : > { %v10778_v25 = vpop.f32.mrb[95].mxu1 }
 0x43a   : > { %11131 = vmatpush3.bf16.msra.mxu0 %v11872_v21  ;;  %v6383_v31 = vadd.f32 %v10776_v23, %v14098_v35 }
 0x43d   : > { %11133 = vmatmul.mubr.msk.bf16.vlgmr.msra.gmra.mrb[128].mxu0 %vm1341_vm1, %v10035_v26  ;;  %vm14268_vm1 = vcmask 516096  }
 0x440   : > { %v10796_v53 = vpop.f32.mrb[96].mxu0 }
 0x441   : > { %v10797_v29 = vpop.f32.mrb[97].mxu0 }
 0x442   : > { %v10798_v34 = vadd.f32 %v10797_v29, %v10796_v53  ;;  %v10799_v36 = vpop.f32.mrb[98].mxu0 }
 0x443   : > { %v10800_v37 = vpop.f32.mrb[99].mxu0 }
 0x444   : > { %v6423_v41 = vadd.f32 %v10798_v34, %v6383_v31 }
 0x446   : > { %v6462_v27 = vpop.f32.mrb[96].mxu1 }
 0x447   : > { %v6463_v16 = vadd.f32 %v6462_v27, %v6423_v41  ;;  %v11074_v45 = vpop.f32.mrb[97].mxu1 }
 0x448   : > { %v6465_v46 = vpop.f32.mrb[98].mxu1 }
 0x449   : > { %v6468_v47 = vmax.f32 %v6463_v16, 0.0  ;;  %v11075_v42 = vpop.f32.mrb[99].mxu1 }
 0x44b   : > { %v10119_v48 = vpack.c.bf16 %v6468_v47, %v6468_v47 }
 0x44d   : > { %v6474_v49 = vshll.u32 %v10119_v48, 16  ;;  %v6477_v50 = vshrl.u32 %v10119_v48, 16 }
 0x44f   : > { %v6476_v33 = vrot.slane %v6474_v49, 5  ;;  %v6479_v52 = vrot.slane %v6477_v50, 4 }
 0x451   : > { %v6480_v57 = vor.u32 %v6479_v52, %v6476_v33  ;;  %v6485_v58 = vsel %vm13519_vm7, %v6476_v33, %v6484_v55 }
 0x452   : > { %6486 = vst [vmem:[%s14127_s8] sm:$0x8] %v6485_v58 }
 0x453   : > { %v6481_v59 = vrot.slane %v6480_v57, 4 }
 0x455   : > { %6487 = vst.msk [vmem:[%s14127_s8 + $0x4] sm:$0x7] %vm3563_vm13, %v6481_v59 }
 0x460   : > { %v10823_v12 = vpop.f32.mrb[100].mxu0 }
 0x461   : > { %v10824_v40 = vpop.f32.mrb[101].mxu0 }
 0x462   : > { %v10825_v43 = vadd.f32 %v10824_v40, %v10823_v12  ;;  %v10826_v60 = vpop.f32.mrb[102].mxu0 }
 0x463   : > { %v10827_v61 = vpop.f32.mrb[103].mxu0 }
 0x464   : > { %v6929_v0 = vadd.f32 %v10825_v43, %v14098_v35 }
 0x466   : > { %v10845_v62 = vpop.f32.mrb[100].mxu1 }
 0x467   : > { %v10846_v63 = vpop.f32.mrb[101].mxu1 }
 0x468   : > { %v10847_v1 = vadd.f32 %v10846_v63, %v10845_v62  ;;  %v10848_v13 = vpop.f32.mrb[102].mxu1 }
 0x469   : > { %v10849_v17 = vpop.f32.mrb[103].mxu1 }
 0x46a   : > { %v6969_v2 = vadd.f32 %v10847_v1, %v6929_v0  ;;  %v8134_v17 = vld [vmem:[%s14127_s8 + $0x10] sm:$0x3] }
 0x470   : > { %v7008_v51 = vpop.f32.mrb[104].mxu0 }
 0x471   : > { %v7009_v3 = vadd.f32 %v7008_v51, %v6969_v2  ;;  %v11086_v54 = vpop.f32.mrb[105].mxu0 }
 0x472   : > { %v7011_v38 = vpop.f32.mrb[106].mxu0 }
 0x473   : > { %v7014_v4 = vmax.f32 %v7009_v3, 0.0  ;;  %v11087_v44 = vpop.f32.mrb[107].mxu0 }
 0x475   : > { %v10120_v5 = vpack.c.bf16 %v7014_v4, %v7014_v4 }
 0x477   : > { %v7019_v6 = vrot.slane %v10120_v5, 5 }
 0x479   : > { %v7020_v8 = vrot.slane %v7019_v6, 4  ;;  %7023 = vst.msk [vmem:[%s14127_s8 + $0x4] sm:$0x8] %vm4487_vm3, %v7019_v6 }
 0x47b   : > { %v7025_v9 = vsel %vm13342_vm5, %v7020_v8, %v7024_v7 }
 0x47c   : > { %7026 = vst [vmem:[%s14127_s8 + $0x8] sm:$0x7] %v7025_v9 }
 0x483   : > { %v7597_v46 = vld [vmem:[%s14127_s8 + $0x8] sm:$0xc] }
 0x486   : > { %v10872_v56 = vpop.f32.mrb[104].mxu1 }
 0x487   : > { %v10873_v10 = vpop.f32.mrb[105].mxu1 }
 0x488   : > { %v10874_v39 = vadd.f32 %v10873_v10, %v10872_v56  ;;  %v10875_v15 = vpop.f32.mrb[106].mxu1 }
 0x489   : > { %v10876_v18 = vpop.f32.mrb[107].mxu1 }
 0x48a   : > { %v7496_v22 = vadd.f32 %v10874_v39, %v14098_v35 }
 0x490   : > { %v10894_v19 = vpop.f32.mrb[108].mxu0 }
 0x491   : > { %v10895_v21 = vpop.f32.mrb[109].mxu0 }
 0x492   : > { %v10896_v32 = vadd.f32 %v10895_v21, %v10894_v19  ;;  %v10897_v23 = vpop.f32.mrb[110].mxu0 }
 0x493   : > { %v10898_v24 = vpop.f32.mrb[111].mxu0 }
 0x494   : > { %v7536_v25 = vadd.f32 %v10896_v32, %v7496_v22 }
 0x496   : > { %v7575_v26 = vpop.f32.mrb[108].mxu1 }
 0x497   : > { %v7576_v30 = vadd.f32 %v7575_v26, %v7536_v25  ;;  %v11098_v53 = vpop.f32.mrb[109].mxu1 }
 0x498   : > { %v7578_v29 = vpop.f32.mrb[110].mxu1 }
 0x499   : > { %v7581_v31 = vmax.f32 %v7576_v30, 0.0  ;;  %v11099_v34 = vpop.f32.mrb[111].mxu1 }
 0x49b   : > { %v10121_v36 = vpack.c.bf16 %v7581_v31, %v7581_v31 }
 0x49d   : > { %v7587_v37 = vshrl.u32 %v10121_v36, 16  ;;  %v7590_v41 = vshll.u32 %v10121_v36, 16 }
 0x49f   : > { %v7589_v27 = vrot.slane %v7587_v37, 5  ;;  %v7592_v16 = vrot.slane %v7590_v41, 6 }
 0x4a1   : > { %v7593_v45 = vor.u32 %v7592_v16, %v7589_v27 }
 0x4a3   : > { %v7594_v47 = vrot.slane %v7593_v45, 4  ;;  %v7598_v42 = vsel %vm13358_vm9, %v7593_v45, %v7597_v46 }
 0x4a4   : > { %7599 = vst [vmem:[%s14127_s8 + $0x8] sm:$0xc] %v7598_v42 }
 0x4a5   : > { %7600 = vst.msk [vmem:[%s14127_s8 + $0xc] sm:$0x3] %vm2637_vm12, %v7594_v47 }
 0x4b0   : > { %v10921_v48 = vpop.f32.mrb[112].mxu0 }
 0x4b1   : > { %v10922_v49 = vpop.f32.mrb[113].mxu0 }
 0x4b2   : > { %v10923_v50 = vadd.f32 %v10922_v49, %v10921_v48  ;;  %v10924_v33 = vpop.f32.mrb[114].mxu0 }
 0x4b3   : > { %v10925_v52 = vpop.f32.mrb[115].mxu0 }
 0x4b4   : > { %v8039_v58 = vadd.f32 %v10923_v50, %v14098_v35 }
 0x4b6   : > { %v10943_v55 = vpop.f32.mrb[112].mxu1 }
 0x4b7   : > { %v10944_v57 = vpop.f32.mrb[113].mxu1 }
 0x4b8   : > { %v10945_v59 = vadd.f32 %v10944_v57, %v10943_v55  ;;  %v10946_v12 = vpop.f32.mrb[114].mxu1 }
 0x4b9   : > { %v10947_v40 = vpop.f32.mrb[115].mxu1 }
 0x4ba   : > { %v8079_v14 = vadd.f32 %v10945_v59, %v8039_v58  ;;  %v9232_v59 = vld [vmem:[%s14127_s8 + $0x18] sm:$0x1] }
 0x4c0   : > { %v8118_v43 = vpop.f32.mrb[116].mxu0 }
 0x4c1   : > { %v8119_v60 = vadd.f32 %v8118_v43, %v8079_v14  ;;  %v11110_v61 = vpop.f32.mrb[117].mxu0 }
 0x4c2   : > { %v8121_v62 = vpop.f32.mrb[118].mxu0 }
 0x4c3   : > { %v8124_v63 = vmax.f32 %v8119_v60, 0.0  ;;  %v11111_v0 = vpop.f32.mrb[119].mxu0 }
 0x4c5   : > { %v10122_v1 = vpack.c.bf16 %v8124_v63, %v8124_v63 }
 0x4c7   : > { %v8129_v13 = vrot.slane %v10122_v1, 6 }
 0x4c9   : > { %v8130_v2 = vrot.slane %v8129_v13, 4  ;;  %8133 = vst.msk [vmem:[%s14127_s8 + $0xc] sm:$0xc] %vm14267_vm0, %v8129_v13 }
 0x4cb   : > { %v8135_v51 = vsel %vm13271_vm15, %v8130_v2, %v8134_v17 }
 0x4cc   : > { %8136 = vst [vmem:[%s14127_s8 + $0x10] sm:$0x3] %v8135_v51 }
 0x4d3   : > { %v8701_v30 = vld [vmem:[%s14127_s8 + $0x10] sm:$0xe] }
 0x4d6   : > { %v10970_v3 = vpop.f32.mrb[116].mxu1 }
 0x4d7   : > { %v10971_v54 = vpop.f32.mrb[117].mxu1 }
 0x4d8   : > { %v10972_v38 = vadd.f32 %v10971_v54, %v10970_v3  ;;  %v10973_v4 = vpop.f32.mrb[118].mxu1 }
 0x4d9   : > { %v10974_v44 = vpop.f32.mrb[119].mxu1 }
 0x4da   : > { %v8600_v7 = vadd.f32 %v10972_v38, %v14098_v35 }
 0x4e0   : > { %v10992_v5 = vpop.f32.mrb[120].mxu0 }
 0x4e1   : > { %v10993_v6 = vpop.f32.mrb[121].mxu0 }
 0x4e2   : > { %v10994_v8 = vadd.f32 %v10993_v6, %v10992_v5  ;;  %v10995_v9 = vpop.f32.mrb[122].mxu0 }
 0x4e3   : > { %v10996_v56 = vpop.f32.mrb[123].mxu0 }
 0x4e4   : > { %v8640_v10 = vadd.f32 %v10994_v8, %v8600_v7 }
 0x4e6   : > { %v8679_v39 = vpop.f32.mrb[120].mxu1 }
 0x4e7   : > { %v8680_v28 = vadd.f32 %v8679_v39, %v8640_v10  ;;  %v11122_v15 = vpop.f32.mrb[121].mxu1 }
 0x4e8   : > { %v8682_v18 = vpop.f32.mrb[122].mxu1 }
 0x4e9   : > { %v8685_v19 = vmax.f32 %v8680_v28, 0.0  ;;  %v11123_v21 = vpop.f32.mrb[123].mxu1 }
 0x4eb   : > { %v10123_v22 = vpack.c.bf16 %v8685_v19, %v8685_v19 }
 0x4ed   : > { %v8691_v32 = vshrl.u32 %v10123_v22, 16  ;;  %v8694_v23 = vshll.u32 %v10123_v22, 16 }
 0x4ef   : > { %v8693_v24 = vrot.slane %v8691_v32, 6  ;;  %v8696_v25 = vrot.slane %v8694_v23, 7 }
 0x4f1   : > { %v8697_v26 = vor.u32 %v8696_v25, %v8693_v24 }
 0x4f3   : > { %v8698_v53 = vrot.slane %v8697_v26, 4  ;;  %v8702_v29 = vsel %vm13320_vm6, %v8697_v26, %v8701_v30 }
 0x4f4   : > { %8703 = vst [vmem:[%s14127_s8 + $0x10] sm:$0xe] %v8702_v29 }
 0x4f5   : > { %8704 = vst.msk [vmem:[%s14127_s8 + $0x14] sm:$0x1] %vm14268_vm1, %v8698_v53 }
 0x500   : > { %v11019_v31 = vpop.f32.mrb[124].mxu0 }
 0x501   : > { %v11020_v34 = vpop.f32.mrb[125].mxu0 }
 0x502   : > { %v11021_v36 = vadd.f32 %v11020_v34, %v11019_v31  ;;  %v11022_v37 = vpop.f32.mrb[126].mxu0 }
 0x503   : > { %v11023_v41 = vpop.f32.mrb[127].mxu0 }
 0x504   : > { %v9137_v45 = vadd.f32 %v11021_v36, %v14098_v35 }
 0x506   : > { %v11041_v27 = vpop.f32.mrb[124].mxu1 }
 0x507   : > { %v11042_v16 = vpop.f32.mrb[125].mxu1 }
 0x508   : > { %v11043_v46 = vadd.f32 %v11042_v16, %v11041_v27  ;;  %v11044_v47 = vpop.f32.mrb[126].mxu1 }
 0x509   : > { %v11045_v42 = vpop.f32.mrb[127].mxu1 }
 0x50a   : > { %v9177_v20 = vadd.f32 %v11043_v46, %v9137_v45 }
 0x510   : > { %v9216_v48 = vpop.f32.mrb[128].mxu0 }
 0x511   : > { %v9217_v49 = vadd.f32 %v9216_v48, %v9177_v20  ;;  %v11134_v50 = vpop.f32.mrb[129].mxu0 }
 0x512   : > { %v9219_v33 = vpop.f32.mrb[130].mxu0 }
 0x513   : > { %v9222_v52 = vmax.f32 %v9217_v49, 0.0  ;;  %v11135_v55 = vpop.f32.mrb[131].mxu0 }
 0x515   : > { %v10124_v57 = vpack.c.bf16 %v9222_v52, %v9222_v52 }
 0x517   : > { %v9227_v58 = vrot.slane %v10124_v57, 7 }
 0x519   : > { %v9228_v12 = vrot.slane %v9227_v58, 4  ;;  %9231 = vst.msk [vmem:[%s14127_s8 + $0x14] sm:$0xe] %vm14269_vm11, %v9227_v58 }
 0x51b   : > { %v9233_v35 = vsel %vm13087_vm4, %v9228_v12, %v9232_v59 }
 0x51c   : > { %9234 = vst [vmem:[%s14127_s8 + $0x18] sm:$0x1] %v9233_v35 }
 0x51d PF: > { %s17_s24 = sadd.s32 1, %s11928_s24  }
 0x51e   : > { %p14_p4 = scmp.ge.s32.totalorder %s17_s24, 4  }
 0x520   :  { %16 = sbr.rel (!%p14_p4) target bundleno = 1 (0x1), region = 78 }

</bundles_post_ra>
